<compile_context>
chip_gen: v7x
topology: tpu7x:2x2x1
jax: 0.10.0
libtpu: 0.0.40
codegen_flags: <defaults>
</compile_context>

<pallas_src>
import jax
import jax.numpy as jnp
from jax import lax
from jax.experimental import pallas as pl
from jax.experimental.pallas import tpu as pltpu

B_SUB = 8      # batch rows per block (sublane axis)
B_LANE = 128   # batch cols per block (lane axis)


def _viterbi_kernel(len_ref, feats_ref, trans_ref, out_ref, bp_ref):
    # len_ref  : VMEM (B_SUB, B_LANE) i32         sequence lengths
    # feats_ref: VMEM (S, T, B_SUB, B_LANE) f32   emission scores
    # trans_ref: SMEM (T, T) f32                  transition matrix (scalar reads)
    # out_ref  : VMEM (S, B_SUB, B_LANE) i32      decoded tag per position
    # bp_ref   : VMEM scratch (S, n_words, B_SUB, B_LANE) i32  bit-packed back-pointers
    S = feats_ref.shape[0]
    T = feats_ref.shape[1]
    n_words = bp_ref.shape[1]

    bits = max(1, (T - 1).bit_length())          # bits per back-pointer
    tags_per_word = 32 // bits
    tag_mask = jnp.int32((1 << bits) - 1)

    length = len_ref[...]                        # (B_SUB, B_LANE) i32
    length_m1 = length - 1
    zero_idx = jnp.zeros_like(length)

    # Hoist all T*T transition scalars out of the (unrolled) time loop: with
    # unroll the trace would otherwise re-emit S*T^2 SMEM reads.
    trans_v = tuple(tuple(trans_ref[i, j] for j in range(T)) for i in range(T))

    # t = 0 : partition[j] = feats[0, j] + trans[START_TAG = T-2, j]
    part0 = tuple(feats_ref[0, j] + trans_v[T - 2][j] for j in range(T))
    last0 = part0                                # captured partition (covers length == 1)

    def fwd_step(t, carry):
        part, last = carry
        m = t < length                           # prefix mask derived from lengths
        keep = t == length_m1
        new_part = []
        new_last = []
        packed = [None] * n_words
        for j in range(T):                       # current tag (unrolled)
            # max/argmax over predecessors on part[i] + trans[i, j] only;
            # emission added once after the reduction.
            best = part[0] + trans_v[0][j]
            bidx = zero_idx
            for i in range(1, T):                # previous tag (unrolled, pure VPU)
                cand = part[i] + trans_v[i][j]
                gt = cand > best                 # strict > -> first-occurrence argmax
                best = jnp.maximum(best, cand)
                bidx = jnp.where(gt, jnp.int32(i), bidx)
            best = best + feats_ref[t, j]        # emission added ONCE per j

            w, sh = divmod(j, tags_per_word)
            sh = sh * bits
            contrib = bidx if sh == 0 else (bidx << sh)
            packed[w] = contrib if packed[w] is None else (packed[w] | contrib)

            new_part.append(best)
            new_last.append(jnp.where(keep, best, last[j]))  # capture partition at t == length-1
        for w in range(n_words):
            # cur_bp.masked_fill_(~mask, 0) collapses to one select per packed plane
            bp_ref[t - 1, w] = jnp.where(m, packed[w], 0)
        return tuple(new_part), tuple(new_last)

    fwd_unroll = True if S <= 64 else 8
    part, last = lax.fori_loop(1, S, fwd_step, (part0, last0), unroll=fwd_unroll)

    # pointer = argmax_i(last_partition[i] + trans[i, STOP_TAG = T-1])
    best = last[0] + trans_v[0][T - 1]
    ptr0 = zero_idx
    for i in range(1, T):
        cand = last[i] + trans_v[i][T - 1]
        gt = cand > best
        best = jnp.maximum(best, cand)
        ptr0 = jnp.where(gt, jnp.int32(i), ptr0)

    out_ref[S - 1] = ptr0                        # decode_idx[-1] = pointer

    def back_step(k, ptr):
        idx = S - 2 - k
        if n_words == 1:
            word = bp_ref[idx, 0]
            sh = ptr * bits
        else:
            word = bp_ref[idx, 0]
            word_sel = ptr // tags_per_word
            for w in range(1, n_words):
                word = jnp.where(word_sel == w, bp_ref[idx, w], word)
            sh = (ptr % tags_per_word) * bits
        nxt = lax.shift_right_logical(word, sh) & tag_mask   # per-lane unpack
        # back_points.scatter_(1, last_position, pointer)
        nxt = jnp.where(idx == length_m1, ptr0, nxt)
        out_ref[idx] = nxt
        return nxt

    back_unroll = True if S <= 64 else 8
    lax.fori_loop(0, S - 1, back_step, ptr0, unroll=back_unroll)


def make_crf_trans(target_size):
    """Deterministic parameter init, identical to CRF.__init__."""
    T = target_size + 2
    trans = jnp.zeros((T, T), jnp.float32)
    trans = trans.at[:, T - 2].set(-10000.0)   # init_trans[:, START_TAG]
    trans = trans.at[T - 1, :].set(-10000.0)   # init_trans[STOP_TAG, :]
    return trans


def crf_forward(feats, mask, trans):
    """CRF.forward(feats, mask) -> (path_score=None, decode_idx (B, S) int32)."""
    B, S, T = feats.shape
    BB = B_SUB * B_LANE
    nb = -(-B // BB)           # on v7x, batches > 1024 give nb >= 2 -> megacore sharding
    Bp = nb * BB
    pad = Bp - B

    # (B, S, T) -> (nb, S, T, B_SUB, B_LANE): tags unrolled in-kernel, batch on (sublane, lane).
    # TODO(synk): for realistic S this pad+transpose (and the output transpose below) is a full
    # HBM pass outside the kernel; emit the emission projection directly in (S, T, B) layout
    # upstream (or fuse via allow_input_fusion) to remove it.
    f = jnp.transpose(feats.astype(jnp.float32), (1, 2, 0))              # (S, T, B)
    f = jnp.pad(f, ((0, 0), (0, 0), (0, pad)))
    f = f.reshape(S, T, nb, B_SUB, B_LANE).transpose(2, 0, 1, 3, 4)

    lengths = jnp.sum(mask.astype(jnp.int32), axis=1)                    # (B,)
    lens = jnp.pad(lengths, (0, pad)).reshape(nb, B_SUB, B_LANE)

    # Bit-packed back-pointer geometry (must match the kernel's derivation).
    bits = max(1, (T - 1).bit_length())
    tags_per_word = 32 // bits
    n_words = -(-T // tags_per_word)

    feats_block_bytes = S * T * B_SUB * B_LANE * 4
    spec_kwargs = {}
    if nb == 1 and feats_block_bytes > (8 << 20):
        # Single grid step: double-buffering buys nothing; halve the feats VMEM footprint.
        spec_kwargs["pipeline_mode"] = pl.Buffered(1)
    feats_spec = pl.BlockSpec((None, S, T, B_SUB, B_LANE),
                              lambda g: (g, 0, 0, 0, 0), **spec_kwargs)

    # Explicit VMEM budget (v5e's default scoped VMEM is only 16 MiB; v7x physical is 64 MiB).
    vmem_need = (2 * feats_block_bytes                      # feats (double-buffered)
                 + 2 * S * B_SUB * B_LANE * 4               # out (double-buffered)
                 + 2 * B_SUB * B_LANE * 4                   # lengths
                 + S * n_words * B_SUB * B_LANE * 4)        # packed bp scratch
    try:
        phys_vmem = pltpu.get_tpu_info().vmem_capacity_bytes
    except Exception:
        phys_vmem = 64 << 20                                # conservative (v7x)
    vmem_limit = int(min(phys_vmem - (4 << 20), max(32 << 20, vmem_need + (4 << 20))))

    decode = pl.pallas_call(
        _viterbi_kernel,
        out_shape=jax.ShapeDtypeStruct((nb, S, B_SUB, B_LANE), jnp.int32),
        grid_spec=pltpu.PrefetchScalarGridSpec(
            num_scalar_prefetch=0,
            grid=(nb,),
            in_specs=[
                pl.BlockSpec((None, B_SUB, B_LANE), lambda g: (g, 0, 0)),   # lengths
                feats_spec,                                                 # feats
                pl.BlockSpec(memory_space=pltpu.MemorySpace.SMEM),          # trans
            ],
            out_specs=pl.BlockSpec((None, S, B_SUB, B_LANE), lambda g: (g, 0, 0, 0)),
            scratch_shapes=[pltpu.VMEM((S, n_words, B_SUB, B_LANE), jnp.int32)],
        ),
        compiler_params=pltpu.CompilerParams(
            dimension_semantics=("parallel",),
            vmem_limit_bytes=vmem_limit,
        ),
    )(lens, f, trans.astype(jnp.float32))

    dec = decode.transpose(1, 0, 2, 3).reshape(S, Bp)[:, :B]             # (S, B)
    # TODO(synk): path_score is None in the PyTorch module's forward; nothing to compute.
    return None, jnp.transpose(dec, (1, 0))


def _viterbi_ref(feats, mask, trans):
    """Pure-JAX replica of CRF._viterbi_decode for verification."""
    B, S, T = feats.shape
    lengths = jnp.sum(mask.astype(jnp.int32), axis=1)
    scores = feats[:, :, None, :] + trans[None, None, :, :]      # [b, t, i, j]
    partition = scores[:, 0, T - 2, :]
    hist = [partition]
    bps = []
    for t in range(1, S):
        cur = scores[:, t] + partition[:, :, None]
        partition = jnp.max(cur, axis=1)
        bp = jnp.argmax(cur, axis=1).astype(jnp.int32)
        bp = jnp.where(mask[:, t:t + 1].astype(jnp.int32) != 0, bp, 0)
        hist.append(partition)
        bps.append(bp)
    hist = jnp.stack(hist, axis=1)                               # (B, S, T)
    last_part = jnp.take_along_axis(hist, (lengths - 1)[:, None, None], axis=1)[:, 0]
    last_vals = last_part[:, :, None] + trans[None]
    last_bp = jnp.argmax(last_vals, axis=1).astype(jnp.int32)
    pointer = last_bp[:, T - 1]
    bps.append(jnp.zeros((B, T), jnp.int32))
    back = jnp.stack(bps, axis=1)                                # (B, S, T)
    back = jnp.where(jnp.arange(S)[None, :, None] == (lengths - 1)[:, None, None],
                     pointer[:, None, None], back)
    decode = [None] * S
    decode[S - 1] = pointer
    ptr = pointer
    for idx in range(S - 2, -1, -1):
        ptr = jnp.take_along_axis(back[:, idx], ptr[:, None], axis=1)[:, 0]
        decode[idx] = ptr
    return jnp.stack(decode, axis=1).astype(jnp.int32)


if __name__ == "__main__":
    key = jax.random.PRNGKey(0)
    B, S, target_size = 2, 8, 6
    T = target_size + 2                                          # tag_size = 8

    trans = make_crf_trans(target_size)
    feats = jax.random.normal(key, (B, S, T), dtype=jnp.float32)
    lengths = jnp.array([S, 5], dtype=jnp.int32)                 # variable-length batch
    mask = (jnp.arange(S)[None, :] < lengths[:, None]).astype(jnp.int32)

    path_score, decode_idx = crf_forward(feats, mask, trans)
    decode_idx = jax.block_until_ready(decode_idx)

    ref = _viterbi_ref(feats, mask, trans)
    assert path_score is None
    assert decode_idx.shape == (B, S)
    assert bool(jnp.all(decode_idx == ref)), (decode_idx, ref)
    print("KERNEL_OK")
</pallas_src>

<mosaic_0001>
module attributes {stable_mosaic.version = 11 : i64} {
  func.func @_viterbi_kernel(%arg0: i32, %arg1: memref<1x8x128xi32, #tpu.memory_space<vmem>>, %arg2: memref<1x8x8x8x128xf32, #tpu.memory_space<vmem>>, %arg3: memref<8x8xf32, #tpu.memory_space<smem>>, %arg4: memref<1x8x8x128xi32, #tpu.memory_space<vmem>>, %arg5: memref<8x1x8x128xi32, #tpu.memory_space<vmem>>) attributes {dimension_semantics = [#tpu.dimension_semantics<parallel>], iteration_bounds = array<i64: 1>, scalar_prefetch = 0 : i64, scratch_operands = 1 : i64, tpu.core_type = #tpu.core_type<tc>, window_params = [{transform_indices = @transform_0, window_bounds = array<i64: 1, 8, 128>}, {transform_indices = @transform_1, window_bounds = array<i64: 1, 8, 8, 8, 128>}, {transform_indices = @transform_2, window_bounds = array<i64: 8, 8>}, {transform_indices = @transform_3, window_bounds = array<i64: 1, 8, 8, 128>}]} {
    %c0 = arith.constant 0 : index
    %c0_0 = arith.constant 0 : index
    %c0_1 = arith.constant 0 : index
    %0 = vector.load %arg1[%c0, %c0_0, %c0_1] : memref<1x8x128xi32, #tpu.memory_space<vmem>>, vector<1x8x128xi32>
    %1 = vector.shape_cast %0 : vector<1x8x128xi32> to vector<8x128xi32>
    %c1_i32 = arith.constant 1 : i32
    %2 = vector.broadcast %c1_i32 : i32 to vector<8x128xi32>
    %3 = arith.subi %1, %2 : vector<8x128xi32>
    %c0_i32 = arith.constant 0 : i32
    %4 = vector.broadcast %c0_i32 : i32 to vector<8x128xi32>
    %c0_2 = arith.constant 0 : index
    %c0_3 = arith.constant 0 : index
    %5 = memref.load %arg3[%c0_2, %c0_3] : memref<8x8xf32, #tpu.memory_space<smem>>
    %c0_4 = arith.constant 0 : index
    %c1 = arith.constant 1 : index
    %6 = memref.load %arg3[%c0_4, %c1] : memref<8x8xf32, #tpu.memory_space<smem>>
    %c0_5 = arith.constant 0 : index
    %c2 = arith.constant 2 : index
    %7 = memref.load %arg3[%c0_5, %c2] : memref<8x8xf32, #tpu.memory_space<smem>>
    %c0_6 = arith.constant 0 : index
    %c3 = arith.constant 3 : index
    %8 = memref.load %arg3[%c0_6, %c3] : memref<8x8xf32, #tpu.memory_space<smem>>
    %c0_7 = arith.constant 0 : index
    %c4 = arith.constant 4 : index
    %9 = memref.load %arg3[%c0_7, %c4] : memref<8x8xf32, #tpu.memory_space<smem>>
    %c0_8 = arith.constant 0 : index
    %c5 = arith.constant 5 : index
    %10 = memref.load %arg3[%c0_8, %c5] : memref<8x8xf32, #tpu.memory_space<smem>>
    %c0_9 = arith.constant 0 : index
    %c6 = arith.constant 6 : index
    %11 = memref.load %arg3[%c0_9, %c6] : memref<8x8xf32, #tpu.memory_space<smem>>
    %c0_10 = arith.constant 0 : index
    %c7 = arith.constant 7 : index
    %12 = memref.load %arg3[%c0_10, %c7] : memref<8x8xf32, #tpu.memory_space<smem>>
    %c1_11 = arith.constant 1 : index
    %c0_12 = arith.constant 0 : index
    %13 = memref.load %arg3[%c1_11, %c0_12] : memref<8x8xf32, #tpu.memory_space<smem>>
    %c1_13 = arith.constant 1 : index
    %c1_14 = arith.constant 1 : index
    %14 = memref.load %arg3[%c1_13, %c1_14] : memref<8x8xf32, #tpu.memory_space<smem>>
    %c1_15 = arith.constant 1 : index
    %c2_16 = arith.constant 2 : index
    %15 = memref.load %arg3[%c1_15, %c2_16] : memref<8x8xf32, #tpu.memory_space<smem>>
    %c1_17 = arith.constant 1 : index
    %c3_18 = arith.constant 3 : index
    %16 = memref.load %arg3[%c1_17, %c3_18] : memref<8x8xf32, #tpu.memory_space<smem>>
    %c1_19 = arith.constant 1 : index
    %c4_20 = arith.constant 4 : index
    %17 = memref.load %arg3[%c1_19, %c4_20] : memref<8x8xf32, #tpu.memory_space<smem>>
    %c1_21 = arith.constant 1 : index
    %c5_22 = arith.constant 5 : index
    %18 = memref.load %arg3[%c1_21, %c5_22] : memref<8x8xf32, #tpu.memory_space<smem>>
    %c1_23 = arith.constant 1 : index
    %c6_24 = arith.constant 6 : index
    %19 = memref.load %arg3[%c1_23, %c6_24] : memref<8x8xf32, #tpu.memory_space<smem>>
    %c1_25 = arith.constant 1 : index
    %c7_26 = arith.constant 7 : index
    %20 = memref.load %arg3[%c1_25, %c7_26] : memref<8x8xf32, #tpu.memory_space<smem>>
    %c2_27 = arith.constant 2 : index
    %c0_28 = arith.constant 0 : index
    %21 = memref.load %arg3[%c2_27, %c0_28] : memref<8x8xf32, #tpu.memory_space<smem>>
    %c2_29 = arith.constant 2 : index
    %c1_30 = arith.constant 1 : index
    %22 = memref.load %arg3[%c2_29, %c1_30] : memref<8x8xf32, #tpu.memory_space<smem>>
    %c2_31 = arith.constant 2 : index
    %c2_32 = arith.constant 2 : index
    %23 = memref.load %arg3[%c2_31, %c2_32] : memref<8x8xf32, #tpu.memory_space<smem>>
    %c2_33 = arith.constant 2 : index
    %c3_34 = arith.constant 3 : index
    %24 = memref.load %arg3[%c2_33, %c3_34] : memref<8x8xf32, #tpu.memory_space<smem>>
    %c2_35 = arith.constant 2 : index
    %c4_36 = arith.constant 4 : index
    %25 = memref.load %arg3[%c2_35, %c4_36] : memref<8x8xf32, #tpu.memory_space<smem>>
    %c2_37 = arith.constant 2 : index
    %c5_38 = arith.constant 5 : index
    %26 = memref.load %arg3[%c2_37, %c5_38] : memref<8x8xf32, #tpu.memory_space<smem>>
    %c2_39 = arith.constant 2 : index
    %c6_40 = arith.constant 6 : index
    %27 = memref.load %arg3[%c2_39, %c6_40] : memref<8x8xf32, #tpu.memory_space<smem>>
    %c2_41 = arith.constant 2 : index
    %c7_42 = arith.constant 7 : index
    %28 = memref.load %arg3[%c2_41, %c7_42] : memref<8x8xf32, #tpu.memory_space<smem>>
    %c3_43 = arith.constant 3 : index
    %c0_44 = arith.constant 0 : index
    %29 = memref.load %arg3[%c3_43, %c0_44] : memref<8x8xf32, #tpu.memory_space<smem>>
    %c3_45 = arith.constant 3 : index
    %c1_46 = arith.constant 1 : index
    %30 = memref.load %arg3[%c3_45, %c1_46] : memref<8x8xf32, #tpu.memory_space<smem>>
    %c3_47 = arith.constant 3 : index
    %c2_48 = arith.constant 2 : index
    %31 = memref.load %arg3[%c3_47, %c2_48] : memref<8x8xf32, #tpu.memory_space<smem>>
    %c3_49 = arith.constant 3 : index
    %c3_50 = arith.constant 3 : index
    %32 = memref.load %arg3[%c3_49, %c3_50] : memref<8x8xf32, #tpu.memory_space<smem>>
    %c3_51 = arith.constant 3 : index
    %c4_52 = arith.constant 4 : index
    %33 = memref.load %arg3[%c3_51, %c4_52] : memref<8x8xf32, #tpu.memory_space<smem>>
    %c3_53 = arith.constant 3 : index
    %c5_54 = arith.constant 5 : index
    %34 = memref.load %arg3[%c3_53, %c5_54] : memref<8x8xf32, #tpu.memory_space<smem>>
    %c3_55 = arith.constant 3 : index
    %c6_56 = arith.constant 6 : index
    %35 = memref.load %arg3[%c3_55, %c6_56] : memref<8x8xf32, #tpu.memory_space<smem>>
    %c3_57 = arith.constant 3 : index
    %c7_58 = arith.constant 7 : index
    %36 = memref.load %arg3[%c3_57, %c7_58] : memref<8x8xf32, #tpu.memory_space<smem>>
    %c4_59 = arith.constant 4 : index
    %c0_60 = arith.constant 0 : index
    %37 = memref.load %arg3[%c4_59, %c0_60] : memref<8x8xf32, #tpu.memory_space<smem>>
    %c4_61 = arith.constant 4 : index
    %c1_62 = arith.constant 1 : index
    %38 = memref.load %arg3[%c4_61, %c1_62] : memref<8x8xf32, #tpu.memory_space<smem>>
    %c4_63 = arith.constant 4 : index
    %c2_64 = arith.constant 2 : index
    %39 = memref.load %arg3[%c4_63, %c2_64] : memref<8x8xf32, #tpu.memory_space<smem>>
    %c4_65 = arith.constant 4 : index
    %c3_66 = arith.constant 3 : index
    %40 = memref.load %arg3[%c4_65, %c3_66] : memref<8x8xf32, #tpu.memory_space<smem>>
    %c4_67 = arith.constant 4 : index
    %c4_68 = arith.constant 4 : index
    %41 = memref.load %arg3[%c4_67, %c4_68] : memref<8x8xf32, #tpu.memory_space<smem>>
    %c4_69 = arith.constant 4 : index
    %c5_70 = arith.constant 5 : index
    %42 = memref.load %arg3[%c4_69, %c5_70] : memref<8x8xf32, #tpu.memory_space<smem>>
    %c4_71 = arith.constant 4 : index
    %c6_72 = arith.constant 6 : index
    %43 = memref.load %arg3[%c4_71, %c6_72] : memref<8x8xf32, #tpu.memory_space<smem>>
    %c4_73 = arith.constant 4 : index
    %c7_74 = arith.constant 7 : index
    %44 = memref.load %arg3[%c4_73, %c7_74] : memref<8x8xf32, #tpu.memory_space<smem>>
    %c5_75 = arith.constant 5 : index
    %c0_76 = arith.constant 0 : index
    %45 = memref.load %arg3[%c5_75, %c0_76] : memref<8x8xf32, #tpu.memory_space<smem>>
    %c5_77 = arith.constant 5 : index
    %c1_78 = arith.constant 1 : index
    %46 = memref.load %arg3[%c5_77, %c1_78] : memref<8x8xf32, #tpu.memory_space<smem>>
    %c5_79 = arith.constant 5 : index
    %c2_80 = arith.constant 2 : index
    %47 = memref.load %arg3[%c5_79, %c2_80] : memref<8x8xf32, #tpu.memory_space<smem>>
    %c5_81 = arith.constant 5 : index
    %c3_82 = arith.constant 3 : index
    %48 = memref.load %arg3[%c5_81, %c3_82] : memref<8x8xf32, #tpu.memory_space<smem>>
    %c5_83 = arith.constant 5 : index
    %c4_84 = arith.constant 4 : index
    %49 = memref.load %arg3[%c5_83, %c4_84] : memref<8x8xf32, #tpu.memory_space<smem>>
    %c5_85 = arith.constant 5 : index
    %c5_86 = arith.constant 5 : index
    %50 = memref.load %arg3[%c5_85, %c5_86] : memref<8x8xf32, #tpu.memory_space<smem>>
    %c5_87 = arith.constant 5 : index
    %c6_88 = arith.constant 6 : index
    %51 = memref.load %arg3[%c5_87, %c6_88] : memref<8x8xf32, #tpu.memory_space<smem>>
    %c5_89 = arith.constant 5 : index
    %c7_90 = arith.constant 7 : index
    %52 = memref.load %arg3[%c5_89, %c7_90] : memref<8x8xf32, #tpu.memory_space<smem>>
    %c6_91 = arith.constant 6 : index
    %c0_92 = arith.constant 0 : index
    %53 = memref.load %arg3[%c6_91, %c0_92] : memref<8x8xf32, #tpu.memory_space<smem>>
    %c6_93 = arith.constant 6 : index
    %c1_94 = arith.constant 1 : index
    %54 = memref.load %arg3[%c6_93, %c1_94] : memref<8x8xf32, #tpu.memory_space<smem>>
    %c6_95 = arith.constant 6 : index
    %c2_96 = arith.constant 2 : index
    %55 = memref.load %arg3[%c6_95, %c2_96] : memref<8x8xf32, #tpu.memory_space<smem>>
    %c6_97 = arith.constant 6 : index
    %c3_98 = arith.constant 3 : index
    %56 = memref.load %arg3[%c6_97, %c3_98] : memref<8x8xf32, #tpu.memory_space<smem>>
    %c6_99 = arith.constant 6 : index
    %c4_100 = arith.constant 4 : index
    %57 = memref.load %arg3[%c6_99, %c4_100] : memref<8x8xf32, #tpu.memory_space<smem>>
    %c6_101 = arith.constant 6 : index
    %c5_102 = arith.constant 5 : index
    %58 = memref.load %arg3[%c6_101, %c5_102] : memref<8x8xf32, #tpu.memory_space<smem>>
    %c6_103 = arith.constant 6 : index
    %c6_104 = arith.constant 6 : index
    %59 = memref.load %arg3[%c6_103, %c6_104] : memref<8x8xf32, #tpu.memory_space<smem>>
    %c6_105 = arith.constant 6 : index
    %c7_106 = arith.constant 7 : index
    %60 = memref.load %arg3[%c6_105, %c7_106] : memref<8x8xf32, #tpu.memory_space<smem>>
    %c7_107 = arith.constant 7 : index
    %c0_108 = arith.constant 0 : index
    %61 = memref.load %arg3[%c7_107, %c0_108] : memref<8x8xf32, #tpu.memory_space<smem>>
    %c7_109 = arith.constant 7 : index
    %c1_110 = arith.constant 1 : index
    %62 = memref.load %arg3[%c7_109, %c1_110] : memref<8x8xf32, #tpu.memory_space<smem>>
    %c7_111 = arith.constant 7 : index
    %c2_112 = arith.constant 2 : index
    %63 = memref.load %arg3[%c7_111, %c2_112] : memref<8x8xf32, #tpu.memory_space<smem>>
    %c7_113 = arith.constant 7 : index
    %c3_114 = arith.constant 3 : index
    %64 = memref.load %arg3[%c7_113, %c3_114] : memref<8x8xf32, #tpu.memory_space<smem>>
    %c7_115 = arith.constant 7 : index
    %c4_116 = arith.constant 4 : index
    %65 = memref.load %arg3[%c7_115, %c4_116] : memref<8x8xf32, #tpu.memory_space<smem>>
    %c7_117 = arith.constant 7 : index
    %c5_118 = arith.constant 5 : index
    %66 = memref.load %arg3[%c7_117, %c5_118] : memref<8x8xf32, #tpu.memory_space<smem>>
    %c7_119 = arith.constant 7 : index
    %c6_120 = arith.constant 6 : index
    %67 = memref.load %arg3[%c7_119, %c6_120] : memref<8x8xf32, #tpu.memory_space<smem>>
    %c7_121 = arith.constant 7 : index
    %c7_122 = arith.constant 7 : index
    %68 = memref.load %arg3[%c7_121, %c7_122] : memref<8x8xf32, #tpu.memory_space<smem>>
    %c0_123 = arith.constant 0 : index
    %c0_124 = arith.constant 0 : index
    %c0_125 = arith.constant 0 : index
    %c0_126 = arith.constant 0 : index
    %c0_127 = arith.constant 0 : index
    %69 = vector.load %arg2[%c0_123, %c0_124, %c0_125, %c0_126, %c0_127] : memref<1x8x8x8x128xf32, #tpu.memory_space<vmem>>, vector<1x1x1x8x128xf32>
    %70 = vector.shape_cast %69 : vector<1x1x1x8x128xf32> to vector<8x128xf32>
    %71 = vector.broadcast %53 : f32 to vector<8x128xf32>
    %72 = arith.addf %70, %71 : vector<8x128xf32>
    %c0_128 = arith.constant 0 : index
    %c0_129 = arith.constant 0 : index
    %c1_130 = arith.constant 1 : index
    %c0_131 = arith.constant 0 : index
    %c0_132 = arith.constant 0 : index
    %73 = vector.load %arg2[%c0_128, %c0_129, %c1_130, %c0_131, %c0_132] : memref<1x8x8x8x128xf32, #tpu.memory_space<vmem>>, vector<1x1x1x8x128xf32>
    %74 = vector.shape_cast %73 : vector<1x1x1x8x128xf32> to vector<8x128xf32>
    %75 = vector.broadcast %54 : f32 to vector<8x128xf32>
    %76 = arith.addf %74, %75 : vector<8x128xf32>
    %c0_133 = arith.constant 0 : index
    %c0_134 = arith.constant 0 : index
    %c2_135 = arith.constant 2 : index
    %c0_136 = arith.constant 0 : index
    %c0_137 = arith.constant 0 : index
    %77 = vector.load %arg2[%c0_133, %c0_134, %c2_135, %c0_136, %c0_137] : memref<1x8x8x8x128xf32, #tpu.memory_space<vmem>>, vector<1x1x1x8x128xf32>
    %78 = vector.shape_cast %77 : vector<1x1x1x8x128xf32> to vector<8x128xf32>
    %79 = vector.broadcast %55 : f32 to vector<8x128xf32>
    %80 = arith.addf %78, %79 : vector<8x128xf32>
    %c0_138 = arith.constant 0 : index
    %c0_139 = arith.constant 0 : index
    %c3_140 = arith.constant 3 : index
    %c0_141 = arith.constant 0 : index
    %c0_142 = arith.constant 0 : index
    %81 = vector.load %arg2[%c0_138, %c0_139, %c3_140, %c0_141, %c0_142] : memref<1x8x8x8x128xf32, #tpu.memory_space<vmem>>, vector<1x1x1x8x128xf32>
    %82 = vector.shape_cast %81 : vector<1x1x1x8x128xf32> to vector<8x128xf32>
    %83 = vector.broadcast %56 : f32 to vector<8x128xf32>
    %84 = arith.addf %82, %83 : vector<8x128xf32>
    %c0_143 = arith.constant 0 : index
    %c0_144 = arith.constant 0 : index
    %c4_145 = arith.constant 4 : index
    %c0_146 = arith.constant 0 : index
    %c0_147 = arith.constant 0 : index
    %85 = vector.load %arg2[%c0_143, %c0_144, %c4_145, %c0_146, %c0_147] : memref<1x8x8x8x128xf32, #tpu.memory_space<vmem>>, vector<1x1x1x8x128xf32>
    %86 = vector.shape_cast %85 : vector<1x1x1x8x128xf32> to vector<8x128xf32>
    %87 = vector.broadcast %57 : f32 to vector<8x128xf32>
    %88 = arith.addf %86, %87 : vector<8x128xf32>
    %c0_148 = arith.constant 0 : index
    %c0_149 = arith.constant 0 : index
    %c5_150 = arith.constant 5 : index
    %c0_151 = arith.constant 0 : index
    %c0_152 = arith.constant 0 : index
    %89 = vector.load %arg2[%c0_148, %c0_149, %c5_150, %c0_151, %c0_152] : memref<1x8x8x8x128xf32, #tpu.memory_space<vmem>>, vector<1x1x1x8x128xf32>
    %90 = vector.shape_cast %89 : vector<1x1x1x8x128xf32> to vector<8x128xf32>
    %91 = vector.broadcast %58 : f32 to vector<8x128xf32>
    %92 = arith.addf %90, %91 : vector<8x128xf32>
    %c0_153 = arith.constant 0 : index
    %c0_154 = arith.constant 0 : index
    %c6_155 = arith.constant 6 : index
    %c0_156 = arith.constant 0 : index
    %c0_157 = arith.constant 0 : index
    %93 = vector.load %arg2[%c0_153, %c0_154, %c6_155, %c0_156, %c0_157] : memref<1x8x8x8x128xf32, #tpu.memory_space<vmem>>, vector<1x1x1x8x128xf32>
    %94 = vector.shape_cast %93 : vector<1x1x1x8x128xf32> to vector<8x128xf32>
    %95 = vector.broadcast %59 : f32 to vector<8x128xf32>
    %96 = arith.addf %94, %95 : vector<8x128xf32>
    %c0_158 = arith.constant 0 : index
    %c0_159 = arith.constant 0 : index
    %c7_160 = arith.constant 7 : index
    %c0_161 = arith.constant 0 : index
    %c0_162 = arith.constant 0 : index
    %97 = vector.load %arg2[%c0_158, %c0_159, %c7_160, %c0_161, %c0_162] : memref<1x8x8x8x128xf32, #tpu.memory_space<vmem>>, vector<1x1x1x8x128xf32>
    %98 = vector.shape_cast %97 : vector<1x1x1x8x128xf32> to vector<8x128xf32>
    %99 = vector.broadcast %60 : f32 to vector<8x128xf32>
    %100 = arith.addf %98, %99 : vector<8x128xf32>
    %c1_i32_163 = arith.constant 1 : i32
    %101 = vector.broadcast %c1_i32_163 : i32 to vector<8x128xi32>
    %102 = arith.cmpi slt, %101, %1 : vector<8x128xi32>
    %103 = vector.broadcast %c1_i32_163 : i32 to vector<8x128xi32>
    %104 = arith.cmpi eq, %103, %3 : vector<8x128xi32>
    %105 = vector.broadcast %5 : f32 to vector<8x128xf32>
    %106 = arith.addf %72, %105 : vector<8x128xf32>
    %107 = vector.broadcast %13 : f32 to vector<8x128xf32>
    %108 = arith.addf %76, %107 : vector<8x128xf32>
    %109 = arith.cmpf ogt, %108, %106 : vector<8x128xf32>
    %110 = arith.maximumf %106, %108 : vector<8x128xf32>
    %c1_i32_164 = arith.constant 1 : i32
    %111 = vector.broadcast %c1_i32_164 : i32 to vector<8x128xi32>
    %112 = arith.select %109, %111, %4 : vector<8x128xi1>, vector<8x128xi32>
    %113 = vector.broadcast %21 : f32 to vector<8x128xf32>
    %114 = arith.addf %80, %113 : vector<8x128xf32>
    %115 = arith.cmpf ogt, %114, %110 : vector<8x128xf32>
    %116 = arith.maximumf %110, %114 : vector<8x128xf32>
    %c2_i32 = arith.constant 2 : i32
    %117 = vector.broadcast %c2_i32 : i32 to vector<8x128xi32>
    %118 = arith.select %115, %117, %112 : vector<8x128xi1>, vector<8x128xi32>
    %119 = vector.broadcast %29 : f32 to vector<8x128xf32>
    %120 = arith.addf %84, %119 : vector<8x128xf32>
    %121 = arith.cmpf ogt, %120, %116 : vector<8x128xf32>
    %122 = arith.maximumf %116, %120 : vector<8x128xf32>
    %c3_i32 = arith.constant 3 : i32
    %123 = vector.broadcast %c3_i32 : i32 to vector<8x128xi32>
    %124 = arith.select %121, %123, %118 : vector<8x128xi1>, vector<8x128xi32>
    %125 = vector.broadcast %37 : f32 to vector<8x128xf32>
    %126 = arith.addf %88, %125 : vector<8x128xf32>
    %127 = arith.cmpf ogt, %126, %122 : vector<8x128xf32>
    %128 = arith.maximumf %122, %126 : vector<8x128xf32>
    %c4_i32 = arith.constant 4 : i32
    %129 = vector.broadcast %c4_i32 : i32 to vector<8x128xi32>
    %130 = arith.select %127, %129, %124 : vector<8x128xi1>, vector<8x128xi32>
    %131 = vector.broadcast %45 : f32 to vector<8x128xf32>
    %132 = arith.addf %92, %131 : vector<8x128xf32>
    %133 = arith.cmpf ogt, %132, %128 : vector<8x128xf32>
    %134 = arith.maximumf %128, %132 : vector<8x128xf32>
    %c5_i32 = arith.constant 5 : i32
    %135 = vector.broadcast %c5_i32 : i32 to vector<8x128xi32>
    %136 = arith.select %133, %135, %130 : vector<8x128xi1>, vector<8x128xi32>
    %137 = vector.broadcast %53 : f32 to vector<8x128xf32>
    %138 = arith.addf %96, %137 : vector<8x128xf32>
    %139 = arith.cmpf ogt, %138, %134 : vector<8x128xf32>
    %140 = arith.maximumf %134, %138 : vector<8x128xf32>
    %c6_i32 = arith.constant 6 : i32
    %141 = vector.broadcast %c6_i32 : i32 to vector<8x128xi32>
    %142 = arith.select %139, %141, %136 : vector<8x128xi1>, vector<8x128xi32>
    %143 = vector.broadcast %61 : f32 to vector<8x128xf32>
    %144 = arith.addf %100, %143 : vector<8x128xf32>
    %145 = arith.cmpf ogt, %144, %140 : vector<8x128xf32>
    %146 = arith.maximumf %140, %144 : vector<8x128xf32>
    %c7_i32 = arith.constant 7 : i32
    %147 = vector.broadcast %c7_i32 : i32 to vector<8x128xi32>
    %148 = arith.select %145, %147, %142 : vector<8x128xi1>, vector<8x128xi32>
    %c0_165 = arith.constant 0 : index
    %149 = arith.index_cast %c1_i32_163 : i32 to index
    %c0_166 = arith.constant 0 : index
    %c0_167 = arith.constant 0 : index
    %c0_168 = arith.constant 0 : index
    %150 = vector.load %arg2[%c0_165, %149, %c0_166, %c0_167, %c0_168] : memref<1x8x8x8x128xf32, #tpu.memory_space<vmem>>, vector<1x1x1x8x128xf32>
    %151 = vector.shape_cast %150 : vector<1x1x1x8x128xf32> to vector<8x128xf32>
    %152 = arith.addf %146, %151 : vector<8x128xf32>
    %153 = arith.select %104, %152, %72 : vector<8x128xi1>, vector<8x128xf32>
    %154 = vector.broadcast %6 : f32 to vector<8x128xf32>
    %155 = arith.addf %72, %154 : vector<8x128xf32>
    %156 = vector.broadcast %14 : f32 to vector<8x128xf32>
    %157 = arith.addf %76, %156 : vector<8x128xf32>
    %158 = arith.cmpf ogt, %157, %155 : vector<8x128xf32>
    %159 = arith.maximumf %155, %157 : vector<8x128xf32>
    %c1_i32_169 = arith.constant 1 : i32
    %160 = vector.broadcast %c1_i32_169 : i32 to vector<8x128xi32>
    %161 = arith.select %158, %160, %4 : vector<8x128xi1>, vector<8x128xi32>
    %162 = vector.broadcast %22 : f32 to vector<8x128xf32>
    %163 = arith.addf %80, %162 : vector<8x128xf32>
    %164 = arith.cmpf ogt, %163, %159 : vector<8x128xf32>
    %165 = arith.maximumf %159, %163 : vector<8x128xf32>
    %c2_i32_170 = arith.constant 2 : i32
    %166 = vector.broadcast %c2_i32_170 : i32 to vector<8x128xi32>
    %167 = arith.select %164, %166, %161 : vector<8x128xi1>, vector<8x128xi32>
    %168 = vector.broadcast %30 : f32 to vector<8x128xf32>
    %169 = arith.addf %84, %168 : vector<8x128xf32>
    %170 = arith.cmpf ogt, %169, %165 : vector<8x128xf32>
    %171 = arith.maximumf %165, %169 : vector<8x128xf32>
    %c3_i32_171 = arith.constant 3 : i32
    %172 = vector.broadcast %c3_i32_171 : i32 to vector<8x128xi32>
    %173 = arith.select %170, %172, %167 : vector<8x128xi1>, vector<8x128xi32>
    %174 = vector.broadcast %38 : f32 to vector<8x128xf32>
    %175 = arith.addf %88, %174 : vector<8x128xf32>
    %176 = arith.cmpf ogt, %175, %171 : vector<8x128xf32>
    %177 = arith.maximumf %171, %175 : vector<8x128xf32>
    %c4_i32_172 = arith.constant 4 : i32
    %178 = vector.broadcast %c4_i32_172 : i32 to vector<8x128xi32>
    %179 = arith.select %176, %178, %173 : vector<8x128xi1>, vector<8x128xi32>
    %180 = vector.broadcast %46 : f32 to vector<8x128xf32>
    %181 = arith.addf %92, %180 : vector<8x128xf32>
    %182 = arith.cmpf ogt, %181, %177 : vector<8x128xf32>
    %183 = arith.maximumf %177, %181 : vector<8x128xf32>
    %c5_i32_173 = arith.constant 5 : i32
    %184 = vector.broadcast %c5_i32_173 : i32 to vector<8x128xi32>
    %185 = arith.select %182, %184, %179 : vector<8x128xi1>, vector<8x128xi32>
    %186 = vector.broadcast %54 : f32 to vector<8x128xf32>
    %187 = arith.addf %96, %186 : vector<8x128xf32>
    %188 = arith.cmpf ogt, %187, %183 : vector<8x128xf32>
    %189 = arith.maximumf %183, %187 : vector<8x128xf32>
    %c6_i32_174 = arith.constant 6 : i32
    %190 = vector.broadcast %c6_i32_174 : i32 to vector<8x128xi32>
    %191 = arith.select %188, %190, %185 : vector<8x128xi1>, vector<8x128xi32>
    %192 = vector.broadcast %62 : f32 to vector<8x128xf32>
    %193 = arith.addf %100, %192 : vector<8x128xf32>
    %194 = arith.cmpf ogt, %193, %189 : vector<8x128xf32>
    %195 = arith.maximumf %189, %193 : vector<8x128xf32>
    %c7_i32_175 = arith.constant 7 : i32
    %196 = vector.broadcast %c7_i32_175 : i32 to vector<8x128xi32>
    %197 = arith.select %194, %196, %191 : vector<8x128xi1>, vector<8x128xi32>
    %c0_176 = arith.constant 0 : index
    %198 = arith.index_cast %c1_i32_163 : i32 to index
    %c1_177 = arith.constant 1 : index
    %c0_178 = arith.constant 0 : index
    %c0_179 = arith.constant 0 : index
    %199 = vector.load %arg2[%c0_176, %198, %c1_177, %c0_178, %c0_179] : memref<1x8x8x8x128xf32, #tpu.memory_space<vmem>>, vector<1x1x1x8x128xf32>
    %200 = vector.shape_cast %199 : vector<1x1x1x8x128xf32> to vector<8x128xf32>
    %201 = arith.addf %195, %200 : vector<8x128xf32>
    %c3_i32_180 = arith.constant 3 : i32
    %202 = vector.broadcast %c3_i32_180 : i32 to vector<8x128xi32>
    %203 = arith.shli %197, %202 : vector<8x128xi32>
    %204 = arith.ori %148, %203 : vector<8x128xi32>
    %205 = arith.select %104, %201, %76 : vector<8x128xi1>, vector<8x128xf32>
    %206 = vector.broadcast %7 : f32 to vector<8x128xf32>
    %207 = arith.addf %72, %206 : vector<8x128xf32>
    %208 = vector.broadcast %15 : f32 to vector<8x128xf32>
    %209 = arith.addf %76, %208 : vector<8x128xf32>
    %210 = arith.cmpf ogt, %209, %207 : vector<8x128xf32>
    %211 = arith.maximumf %207, %209 : vector<8x128xf32>
    %c1_i32_181 = arith.constant 1 : i32
    %212 = vector.broadcast %c1_i32_181 : i32 to vector<8x128xi32>
    %213 = arith.select %210, %212, %4 : vector<8x128xi1>, vector<8x128xi32>
    %214 = vector.broadcast %23 : f32 to vector<8x128xf32>
    %215 = arith.addf %80, %214 : vector<8x128xf32>
    %216 = arith.cmpf ogt, %215, %211 : vector<8x128xf32>
    %217 = arith.maximumf %211, %215 : vector<8x128xf32>
    %c2_i32_182 = arith.constant 2 : i32
    %218 = vector.broadcast %c2_i32_182 : i32 to vector<8x128xi32>
    %219 = arith.select %216, %218, %213 : vector<8x128xi1>, vector<8x128xi32>
    %220 = vector.broadcast %31 : f32 to vector<8x128xf32>
    %221 = arith.addf %84, %220 : vector<8x128xf32>
    %222 = arith.cmpf ogt, %221, %217 : vector<8x128xf32>
    %223 = arith.maximumf %217, %221 : vector<8x128xf32>
    %c3_i32_183 = arith.constant 3 : i32
    %224 = vector.broadcast %c3_i32_183 : i32 to vector<8x128xi32>
    %225 = arith.select %222, %224, %219 : vector<8x128xi1>, vector<8x128xi32>
    %226 = vector.broadcast %39 : f32 to vector<8x128xf32>
    %227 = arith.addf %88, %226 : vector<8x128xf32>
    %228 = arith.cmpf ogt, %227, %223 : vector<8x128xf32>
    %229 = arith.maximumf %223, %227 : vector<8x128xf32>
    %c4_i32_184 = arith.constant 4 : i32
    %230 = vector.broadcast %c4_i32_184 : i32 to vector<8x128xi32>
    %231 = arith.select %228, %230, %225 : vector<8x128xi1>, vector<8x128xi32>
    %232 = vector.broadcast %47 : f32 to vector<8x128xf32>
    %233 = arith.addf %92, %232 : vector<8x128xf32>
    %234 = arith.cmpf ogt, %233, %229 : vector<8x128xf32>
    %235 = arith.maximumf %229, %233 : vector<8x128xf32>
    %c5_i32_185 = arith.constant 5 : i32
    %236 = vector.broadcast %c5_i32_185 : i32 to vector<8x128xi32>
    %237 = arith.select %234, %236, %231 : vector<8x128xi1>, vector<8x128xi32>
    %238 = vector.broadcast %55 : f32 to vector<8x128xf32>
    %239 = arith.addf %96, %238 : vector<8x128xf32>
    %240 = arith.cmpf ogt, %239, %235 : vector<8x128xf32>
    %241 = arith.maximumf %235, %239 : vector<8x128xf32>
    %c6_i32_186 = arith.constant 6 : i32
    %242 = vector.broadcast %c6_i32_186 : i32 to vector<8x128xi32>
    %243 = arith.select %240, %242, %237 : vector<8x128xi1>, vector<8x128xi32>
    %244 = vector.broadcast %63 : f32 to vector<8x128xf32>
    %245 = arith.addf %100, %244 : vector<8x128xf32>
    %246 = arith.cmpf ogt, %245, %241 : vector<8x128xf32>
    %247 = arith.maximumf %241, %245 : vector<8x128xf32>
    %c7_i32_187 = arith.constant 7 : i32
    %248 = vector.broadcast %c7_i32_187 : i32 to vector<8x128xi32>
    %249 = arith.select %246, %248, %243 : vector<8x128xi1>, vector<8x128xi32>
    %c0_188 = arith.constant 0 : index
    %250 = arith.index_cast %c1_i32_163 : i32 to index
    %c2_189 = arith.constant 2 : index
    %c0_190 = arith.constant 0 : index
    %c0_191 = arith.constant 0 : index
    %251 = vector.load %arg2[%c0_188, %250, %c2_189, %c0_190, %c0_191] : memref<1x8x8x8x128xf32, #tpu.memory_space<vmem>>, vector<1x1x1x8x128xf32>
    %252 = vector.shape_cast %251 : vector<1x1x1x8x128xf32> to vector<8x128xf32>
    %253 = arith.addf %247, %252 : vector<8x128xf32>
    %c6_i32_192 = arith.constant 6 : i32
    %254 = vector.broadcast %c6_i32_192 : i32 to vector<8x128xi32>
    %255 = arith.shli %249, %254 : vector<8x128xi32>
    %256 = arith.ori %204, %255 : vector<8x128xi32>
    %257 = arith.select %104, %253, %80 : vector<8x128xi1>, vector<8x128xf32>
    %258 = vector.broadcast %8 : f32 to vector<8x128xf32>
    %259 = arith.addf %72, %258 : vector<8x128xf32>
    %260 = vector.broadcast %16 : f32 to vector<8x128xf32>
    %261 = arith.addf %76, %260 : vector<8x128xf32>
    %262 = arith.cmpf ogt, %261, %259 : vector<8x128xf32>
    %263 = arith.maximumf %259, %261 : vector<8x128xf32>
    %c1_i32_193 = arith.constant 1 : i32
    %264 = vector.broadcast %c1_i32_193 : i32 to vector<8x128xi32>
    %265 = arith.select %262, %264, %4 : vector<8x128xi1>, vector<8x128xi32>
    %266 = vector.broadcast %24 : f32 to vector<8x128xf32>
    %267 = arith.addf %80, %266 : vector<8x128xf32>
    %268 = arith.cmpf ogt, %267, %263 : vector<8x128xf32>
    %269 = arith.maximumf %263, %267 : vector<8x128xf32>
    %c2_i32_194 = arith.constant 2 : i32
    %270 = vector.broadcast %c2_i32_194 : i32 to vector<8x128xi32>
    %271 = arith.select %268, %270, %265 : vector<8x128xi1>, vector<8x128xi32>
    %272 = vector.broadcast %32 : f32 to vector<8x128xf32>
    %273 = arith.addf %84, %272 : vector<8x128xf32>
    %274 = arith.cmpf ogt, %273, %269 : vector<8x128xf32>
    %275 = arith.maximumf %269, %273 : vector<8x128xf32>
    %c3_i32_195 = arith.constant 3 : i32
    %276 = vector.broadcast %c3_i32_195 : i32 to vector<8x128xi32>
    %277 = arith.select %274, %276, %271 : vector<8x128xi1>, vector<8x128xi32>
    %278 = vector.broadcast %40 : f32 to vector<8x128xf32>
    %279 = arith.addf %88, %278 : vector<8x128xf32>
    %280 = arith.cmpf ogt, %279, %275 : vector<8x128xf32>
    %281 = arith.maximumf %275, %279 : vector<8x128xf32>
    %c4_i32_196 = arith.constant 4 : i32
    %282 = vector.broadcast %c4_i32_196 : i32 to vector<8x128xi32>
    %283 = arith.select %280, %282, %277 : vector<8x128xi1>, vector<8x128xi32>
    %284 = vector.broadcast %48 : f32 to vector<8x128xf32>
    %285 = arith.addf %92, %284 : vector<8x128xf32>
    %286 = arith.cmpf ogt, %285, %281 : vector<8x128xf32>
    %287 = arith.maximumf %281, %285 : vector<8x128xf32>
    %c5_i32_197 = arith.constant 5 : i32
    %288 = vector.broadcast %c5_i32_197 : i32 to vector<8x128xi32>
    %289 = arith.select %286, %288, %283 : vector<8x128xi1>, vector<8x128xi32>
    %290 = vector.broadcast %56 : f32 to vector<8x128xf32>
    %291 = arith.addf %96, %290 : vector<8x128xf32>
    %292 = arith.cmpf ogt, %291, %287 : vector<8x128xf32>
    %293 = arith.maximumf %287, %291 : vector<8x128xf32>
    %c6_i32_198 = arith.constant 6 : i32
    %294 = vector.broadcast %c6_i32_198 : i32 to vector<8x128xi32>
    %295 = arith.select %292, %294, %289 : vector<8x128xi1>, vector<8x128xi32>
    %296 = vector.broadcast %64 : f32 to vector<8x128xf32>
    %297 = arith.addf %100, %296 : vector<8x128xf32>
    %298 = arith.cmpf ogt, %297, %293 : vector<8x128xf32>
    %299 = arith.maximumf %293, %297 : vector<8x128xf32>
    %c7_i32_199 = arith.constant 7 : i32
    %300 = vector.broadcast %c7_i32_199 : i32 to vector<8x128xi32>
    %301 = arith.select %298, %300, %295 : vector<8x128xi1>, vector<8x128xi32>
    %c0_200 = arith.constant 0 : index
    %302 = arith.index_cast %c1_i32_163 : i32 to index
    %c3_201 = arith.constant 3 : index
    %c0_202 = arith.constant 0 : index
    %c0_203 = arith.constant 0 : index
    %303 = vector.load %arg2[%c0_200, %302, %c3_201, %c0_202, %c0_203] : memref<1x8x8x8x128xf32, #tpu.memory_space<vmem>>, vector<1x1x1x8x128xf32>
    %304 = vector.shape_cast %303 : vector<1x1x1x8x128xf32> to vector<8x128xf32>
    %305 = arith.addf %299, %304 : vector<8x128xf32>
    %c9_i32 = arith.constant 9 : i32
    %306 = vector.broadcast %c9_i32 : i32 to vector<8x128xi32>
    %307 = arith.shli %301, %306 : vector<8x128xi32>
    %308 = arith.ori %256, %307 : vector<8x128xi32>
    %309 = arith.select %104, %305, %84 : vector<8x128xi1>, vector<8x128xf32>
    %310 = vector.broadcast %9 : f32 to vector<8x128xf32>
    %311 = arith.addf %72, %310 : vector<8x128xf32>
    %312 = vector.broadcast %17 : f32 to vector<8x128xf32>
    %313 = arith.addf %76, %312 : vector<8x128xf32>
    %314 = arith.cmpf ogt, %313, %311 : vector<8x128xf32>
    %315 = arith.maximumf %311, %313 : vector<8x128xf32>
    %c1_i32_204 = arith.constant 1 : i32
    %316 = vector.broadcast %c1_i32_204 : i32 to vector<8x128xi32>
    %317 = arith.select %314, %316, %4 : vector<8x128xi1>, vector<8x128xi32>
    %318 = vector.broadcast %25 : f32 to vector<8x128xf32>
    %319 = arith.addf %80, %318 : vector<8x128xf32>
    %320 = arith.cmpf ogt, %319, %315 : vector<8x128xf32>
    %321 = arith.maximumf %315, %319 : vector<8x128xf32>
    %c2_i32_205 = arith.constant 2 : i32
    %322 = vector.broadcast %c2_i32_205 : i32 to vector<8x128xi32>
    %323 = arith.select %320, %322, %317 : vector<8x128xi1>, vector<8x128xi32>
    %324 = vector.broadcast %33 : f32 to vector<8x128xf32>
    %325 = arith.addf %84, %324 : vector<8x128xf32>
    %326 = arith.cmpf ogt, %325, %321 : vector<8x128xf32>
    %327 = arith.maximumf %321, %325 : vector<8x128xf32>
    %c3_i32_206 = arith.constant 3 : i32
    %328 = vector.broadcast %c3_i32_206 : i32 to vector<8x128xi32>
    %329 = arith.select %326, %328, %323 : vector<8x128xi1>, vector<8x128xi32>
    %330 = vector.broadcast %41 : f32 to vector<8x128xf32>
    %331 = arith.addf %88, %330 : vector<8x128xf32>
    %332 = arith.cmpf ogt, %331, %327 : vector<8x128xf32>
    %333 = arith.maximumf %327, %331 : vector<8x128xf32>
    %c4_i32_207 = arith.constant 4 : i32
    %334 = vector.broadcast %c4_i32_207 : i32 to vector<8x128xi32>
    %335 = arith.select %332, %334, %329 : vector<8x128xi1>, vector<8x128xi32>
    %336 = vector.broadcast %49 : f32 to vector<8x128xf32>
    %337 = arith.addf %92, %336 : vector<8x128xf32>
    %338 = arith.cmpf ogt, %337, %333 : vector<8x128xf32>
    %339 = arith.maximumf %333, %337 : vector<8x128xf32>
    %c5_i32_208 = arith.constant 5 : i32
    %340 = vector.broadcast %c5_i32_208 : i32 to vector<8x128xi32>
    %341 = arith.select %338, %340, %335 : vector<8x128xi1>, vector<8x128xi32>
    %342 = vector.broadcast %57 : f32 to vector<8x128xf32>
    %343 = arith.addf %96, %342 : vector<8x128xf32>
    %344 = arith.cmpf ogt, %343, %339 : vector<8x128xf32>
    %345 = arith.maximumf %339, %343 : vector<8x128xf32>
    %c6_i32_209 = arith.constant 6 : i32
    %346 = vector.broadcast %c6_i32_209 : i32 to vector<8x128xi32>
    %347 = arith.select %344, %346, %341 : vector<8x128xi1>, vector<8x128xi32>
    %348 = vector.broadcast %65 : f32 to vector<8x128xf32>
    %349 = arith.addf %100, %348 : vector<8x128xf32>
    %350 = arith.cmpf ogt, %349, %345 : vector<8x128xf32>
    %351 = arith.maximumf %345, %349 : vector<8x128xf32>
    %c7_i32_210 = arith.constant 7 : i32
    %352 = vector.broadcast %c7_i32_210 : i32 to vector<8x128xi32>
    %353 = arith.select %350, %352, %347 : vector<8x128xi1>, vector<8x128xi32>
    %c0_211 = arith.constant 0 : index
    %354 = arith.index_cast %c1_i32_163 : i32 to index
    %c4_212 = arith.constant 4 : index
    %c0_213 = arith.constant 0 : index
    %c0_214 = arith.constant 0 : index
    %355 = vector.load %arg2[%c0_211, %354, %c4_212, %c0_213, %c0_214] : memref<1x8x8x8x128xf32, #tpu.memory_space<vmem>>, vector<1x1x1x8x128xf32>
    %356 = vector.shape_cast %355 : vector<1x1x1x8x128xf32> to vector<8x128xf32>
    %357 = arith.addf %351, %356 : vector<8x128xf32>
    %c12_i32 = arith.constant 12 : i32
    %358 = vector.broadcast %c12_i32 : i32 to vector<8x128xi32>
    %359 = arith.shli %353, %358 : vector<8x128xi32>
    %360 = arith.ori %308, %359 : vector<8x128xi32>
    %361 = arith.select %104, %357, %88 : vector<8x128xi1>, vector<8x128xf32>
    %362 = vector.broadcast %10 : f32 to vector<8x128xf32>
    %363 = arith.addf %72, %362 : vector<8x128xf32>
    %364 = vector.broadcast %18 : f32 to vector<8x128xf32>
    %365 = arith.addf %76, %364 : vector<8x128xf32>
    %366 = arith.cmpf ogt, %365, %363 : vector<8x128xf32>
    %367 = arith.maximumf %363, %365 : vector<8x128xf32>
    %c1_i32_215 = arith.constant 1 : i32
    %368 = vector.broadcast %c1_i32_215 : i32 to vector<8x128xi32>
    %369 = arith.select %366, %368, %4 : vector<8x128xi1>, vector<8x128xi32>
    %370 = vector.broadcast %26 : f32 to vector<8x128xf32>
    %371 = arith.addf %80, %370 : vector<8x128xf32>
    %372 = arith.cmpf ogt, %371, %367 : vector<8x128xf32>
    %373 = arith.maximumf %367, %371 : vector<8x128xf32>
    %c2_i32_216 = arith.constant 2 : i32
    %374 = vector.broadcast %c2_i32_216 : i32 to vector<8x128xi32>
    %375 = arith.select %372, %374, %369 : vector<8x128xi1>, vector<8x128xi32>
    %376 = vector.broadcast %34 : f32 to vector<8x128xf32>
    %377 = arith.addf %84, %376 : vector<8x128xf32>
    %378 = arith.cmpf ogt, %377, %373 : vector<8x128xf32>
    %379 = arith.maximumf %373, %377 : vector<8x128xf32>
    %c3_i32_217 = arith.constant 3 : i32
    %380 = vector.broadcast %c3_i32_217 : i32 to vector<8x128xi32>
    %381 = arith.select %378, %380, %375 : vector<8x128xi1>, vector<8x128xi32>
    %382 = vector.broadcast %42 : f32 to vector<8x128xf32>
    %383 = arith.addf %88, %382 : vector<8x128xf32>
    %384 = arith.cmpf ogt, %383, %379 : vector<8x128xf32>
    %385 = arith.maximumf %379, %383 : vector<8x128xf32>
    %c4_i32_218 = arith.constant 4 : i32
    %386 = vector.broadcast %c4_i32_218 : i32 to vector<8x128xi32>
    %387 = arith.select %384, %386, %381 : vector<8x128xi1>, vector<8x128xi32>
    %388 = vector.broadcast %50 : f32 to vector<8x128xf32>
    %389 = arith.addf %92, %388 : vector<8x128xf32>
    %390 = arith.cmpf ogt, %389, %385 : vector<8x128xf32>
    %391 = arith.maximumf %385, %389 : vector<8x128xf32>
    %c5_i32_219 = arith.constant 5 : i32
    %392 = vector.broadcast %c5_i32_219 : i32 to vector<8x128xi32>
    %393 = arith.select %390, %392, %387 : vector<8x128xi1>, vector<8x128xi32>
    %394 = vector.broadcast %58 : f32 to vector<8x128xf32>
    %395 = arith.addf %96, %394 : vector<8x128xf32>
    %396 = arith.cmpf ogt, %395, %391 : vector<8x128xf32>
    %397 = arith.maximumf %391, %395 : vector<8x128xf32>
    %c6_i32_220 = arith.constant 6 : i32
    %398 = vector.broadcast %c6_i32_220 : i32 to vector<8x128xi32>
    %399 = arith.select %396, %398, %393 : vector<8x128xi1>, vector<8x128xi32>
    %400 = vector.broadcast %66 : f32 to vector<8x128xf32>
    %401 = arith.addf %100, %400 : vector<8x128xf32>
    %402 = arith.cmpf ogt, %401, %397 : vector<8x128xf32>
    %403 = arith.maximumf %397, %401 : vector<8x128xf32>
    %c7_i32_221 = arith.constant 7 : i32
    %404 = vector.broadcast %c7_i32_221 : i32 to vector<8x128xi32>
    %405 = arith.select %402, %404, %399 : vector<8x128xi1>, vector<8x128xi32>
    %c0_222 = arith.constant 0 : index
    %406 = arith.index_cast %c1_i32_163 : i32 to index
    %c5_223 = arith.constant 5 : index
    %c0_224 = arith.constant 0 : index
    %c0_225 = arith.constant 0 : index
    %407 = vector.load %arg2[%c0_222, %406, %c5_223, %c0_224, %c0_225] : memref<1x8x8x8x128xf32, #tpu.memory_space<vmem>>, vector<1x1x1x8x128xf32>
    %408 = vector.shape_cast %407 : vector<1x1x1x8x128xf32> to vector<8x128xf32>
    %409 = arith.addf %403, %408 : vector<8x128xf32>
    %c15_i32 = arith.constant 15 : i32
    %410 = vector.broadcast %c15_i32 : i32 to vector<8x128xi32>
    %411 = arith.shli %405, %410 : vector<8x128xi32>
    %412 = arith.ori %360, %411 : vector<8x128xi32>
    %413 = arith.select %104, %409, %92 : vector<8x128xi1>, vector<8x128xf32>
    %414 = vector.broadcast %11 : f32 to vector<8x128xf32>
    %415 = arith.addf %72, %414 : vector<8x128xf32>
    %416 = vector.broadcast %19 : f32 to vector<8x128xf32>
    %417 = arith.addf %76, %416 : vector<8x128xf32>
    %418 = arith.cmpf ogt, %417, %415 : vector<8x128xf32>
    %419 = arith.maximumf %415, %417 : vector<8x128xf32>
    %c1_i32_226 = arith.constant 1 : i32
    %420 = vector.broadcast %c1_i32_226 : i32 to vector<8x128xi32>
    %421 = arith.select %418, %420, %4 : vector<8x128xi1>, vector<8x128xi32>
    %422 = vector.broadcast %27 : f32 to vector<8x128xf32>
    %423 = arith.addf %80, %422 : vector<8x128xf32>
    %424 = arith.cmpf ogt, %423, %419 : vector<8x128xf32>
    %425 = arith.maximumf %419, %423 : vector<8x128xf32>
    %c2_i32_227 = arith.constant 2 : i32
    %426 = vector.broadcast %c2_i32_227 : i32 to vector<8x128xi32>
    %427 = arith.select %424, %426, %421 : vector<8x128xi1>, vector<8x128xi32>
    %428 = vector.broadcast %35 : f32 to vector<8x128xf32>
    %429 = arith.addf %84, %428 : vector<8x128xf32>
    %430 = arith.cmpf ogt, %429, %425 : vector<8x128xf32>
    %431 = arith.maximumf %425, %429 : vector<8x128xf32>
    %c3_i32_228 = arith.constant 3 : i32
    %432 = vector.broadcast %c3_i32_228 : i32 to vector<8x128xi32>
    %433 = arith.select %430, %432, %427 : vector<8x128xi1>, vector<8x128xi32>
    %434 = vector.broadcast %43 : f32 to vector<8x128xf32>
    %435 = arith.addf %88, %434 : vector<8x128xf32>
    %436 = arith.cmpf ogt, %435, %431 : vector<8x128xf32>
    %437 = arith.maximumf %431, %435 : vector<8x128xf32>
    %c4_i32_229 = arith.constant 4 : i32
    %438 = vector.broadcast %c4_i32_229 : i32 to vector<8x128xi32>
    %439 = arith.select %436, %438, %433 : vector<8x128xi1>, vector<8x128xi32>
    %440 = vector.broadcast %51 : f32 to vector<8x128xf32>
    %441 = arith.addf %92, %440 : vector<8x128xf32>
    %442 = arith.cmpf ogt, %441, %437 : vector<8x128xf32>
    %443 = arith.maximumf %437, %441 : vector<8x128xf32>
    %c5_i32_230 = arith.constant 5 : i32
    %444 = vector.broadcast %c5_i32_230 : i32 to vector<8x128xi32>
    %445 = arith.select %442, %444, %439 : vector<8x128xi1>, vector<8x128xi32>
    %446 = vector.broadcast %59 : f32 to vector<8x128xf32>
    %447 = arith.addf %96, %446 : vector<8x128xf32>
    %448 = arith.cmpf ogt, %447, %443 : vector<8x128xf32>
    %449 = arith.maximumf %443, %447 : vector<8x128xf32>
    %c6_i32_231 = arith.constant 6 : i32
    %450 = vector.broadcast %c6_i32_231 : i32 to vector<8x128xi32>
    %451 = arith.select %448, %450, %445 : vector<8x128xi1>, vector<8x128xi32>
    %452 = vector.broadcast %67 : f32 to vector<8x128xf32>
    %453 = arith.addf %100, %452 : vector<8x128xf32>
    %454 = arith.cmpf ogt, %453, %449 : vector<8x128xf32>
    %455 = arith.maximumf %449, %453 : vector<8x128xf32>
    %c7_i32_232 = arith.constant 7 : i32
    %456 = vector.broadcast %c7_i32_232 : i32 to vector<8x128xi32>
    %457 = arith.select %454, %456, %451 : vector<8x128xi1>, vector<8x128xi32>
    %c0_233 = arith.constant 0 : index
    %458 = arith.index_cast %c1_i32_163 : i32 to index
    %c6_234 = arith.constant 6 : index
    %c0_235 = arith.constant 0 : index
    %c0_236 = arith.constant 0 : index
    %459 = vector.load %arg2[%c0_233, %458, %c6_234, %c0_235, %c0_236] : memref<1x8x8x8x128xf32, #tpu.memory_space<vmem>>, vector<1x1x1x8x128xf32>
    %460 = vector.shape_cast %459 : vector<1x1x1x8x128xf32> to vector<8x128xf32>
    %461 = arith.addf %455, %460 : vector<8x128xf32>
    %c18_i32 = arith.constant 18 : i32
    %462 = vector.broadcast %c18_i32 : i32 to vector<8x128xi32>
    %463 = arith.shli %457, %462 : vector<8x128xi32>
    %464 = arith.ori %412, %463 : vector<8x128xi32>
    %465 = arith.select %104, %461, %96 : vector<8x128xi1>, vector<8x128xf32>
    %466 = vector.broadcast %12 : f32 to vector<8x128xf32>
    %467 = arith.addf %72, %466 : vector<8x128xf32>
    %468 = vector.broadcast %20 : f32 to vector<8x128xf32>
    %469 = arith.addf %76, %468 : vector<8x128xf32>
    %470 = arith.cmpf ogt, %469, %467 : vector<8x128xf32>
    %471 = arith.maximumf %467, %469 : vector<8x128xf32>
    %c1_i32_237 = arith.constant 1 : i32
    %472 = vector.broadcast %c1_i32_237 : i32 to vector<8x128xi32>
    %473 = arith.select %470, %472, %4 : vector<8x128xi1>, vector<8x128xi32>
    %474 = vector.broadcast %28 : f32 to vector<8x128xf32>
    %475 = arith.addf %80, %474 : vector<8x128xf32>
    %476 = arith.cmpf ogt, %475, %471 : vector<8x128xf32>
    %477 = arith.maximumf %471, %475 : vector<8x128xf32>
    %c2_i32_238 = arith.constant 2 : i32
    %478 = vector.broadcast %c2_i32_238 : i32 to vector<8x128xi32>
    %479 = arith.select %476, %478, %473 : vector<8x128xi1>, vector<8x128xi32>
    %480 = vector.broadcast %36 : f32 to vector<8x128xf32>
    %481 = arith.addf %84, %480 : vector<8x128xf32>
    %482 = arith.cmpf ogt, %481, %477 : vector<8x128xf32>
    %483 = arith.maximumf %477, %481 : vector<8x128xf32>
    %c3_i32_239 = arith.constant 3 : i32
    %484 = vector.broadcast %c3_i32_239 : i32 to vector<8x128xi32>
    %485 = arith.select %482, %484, %479 : vector<8x128xi1>, vector<8x128xi32>
    %486 = vector.broadcast %44 : f32 to vector<8x128xf32>
    %487 = arith.addf %88, %486 : vector<8x128xf32>
    %488 = arith.cmpf ogt, %487, %483 : vector<8x128xf32>
    %489 = arith.maximumf %483, %487 : vector<8x128xf32>
    %c4_i32_240 = arith.constant 4 : i32
    %490 = vector.broadcast %c4_i32_240 : i32 to vector<8x128xi32>
    %491 = arith.select %488, %490, %485 : vector<8x128xi1>, vector<8x128xi32>
    %492 = vector.broadcast %52 : f32 to vector<8x128xf32>
    %493 = arith.addf %92, %492 : vector<8x128xf32>
    %494 = arith.cmpf ogt, %493, %489 : vector<8x128xf32>
    %495 = arith.maximumf %489, %493 : vector<8x128xf32>
    %c5_i32_241 = arith.constant 5 : i32
    %496 = vector.broadcast %c5_i32_241 : i32 to vector<8x128xi32>
    %497 = arith.select %494, %496, %491 : vector<8x128xi1>, vector<8x128xi32>
    %498 = vector.broadcast %60 : f32 to vector<8x128xf32>
    %499 = arith.addf %96, %498 : vector<8x128xf32>
    %500 = arith.cmpf ogt, %499, %495 : vector<8x128xf32>
    %501 = arith.maximumf %495, %499 : vector<8x128xf32>
    %c6_i32_242 = arith.constant 6 : i32
    %502 = vector.broadcast %c6_i32_242 : i32 to vector<8x128xi32>
    %503 = arith.select %500, %502, %497 : vector<8x128xi1>, vector<8x128xi32>
    %504 = vector.broadcast %68 : f32 to vector<8x128xf32>
    %505 = arith.addf %100, %504 : vector<8x128xf32>
    %506 = arith.cmpf ogt, %505, %501 : vector<8x128xf32>
    %507 = arith.maximumf %501, %505 : vector<8x128xf32>
    %c7_i32_243 = arith.constant 7 : i32
    %508 = vector.broadcast %c7_i32_243 : i32 to vector<8x128xi32>
    %509 = arith.select %506, %508, %503 : vector<8x128xi1>, vector<8x128xi32>
    %c0_244 = arith.constant 0 : index
    %510 = arith.index_cast %c1_i32_163 : i32 to index
    %c7_245 = arith.constant 7 : index
    %c0_246 = arith.constant 0 : index
    %c0_247 = arith.constant 0 : index
    %511 = vector.load %arg2[%c0_244, %510, %c7_245, %c0_246, %c0_247] : memref<1x8x8x8x128xf32, #tpu.memory_space<vmem>>, vector<1x1x1x8x128xf32>
    %512 = vector.shape_cast %511 : vector<1x1x1x8x128xf32> to vector<8x128xf32>
    %513 = arith.addf %507, %512 : vector<8x128xf32>
    %c21_i32 = arith.constant 21 : i32
    %514 = vector.broadcast %c21_i32 : i32 to vector<8x128xi32>
    %515 = arith.shli %509, %514 : vector<8x128xi32>
    %516 = arith.ori %464, %515 : vector<8x128xi32>
    %517 = arith.select %104, %513, %100 : vector<8x128xi1>, vector<8x128xf32>
    %c0_i32_248 = arith.constant 0 : i32
    %518 = vector.broadcast %c0_i32_248 : i32 to vector<8x128xi32>
    %519 = arith.select %102, %516, %518 : vector<8x128xi1>, vector<8x128xi32>
    %c1_i32_249 = arith.constant 1 : i32
    %520 = arith.subi %c1_i32_163, %c1_i32_249 : i32
    %521 = arith.index_cast %520 : i32 to index
    %c0_250 = arith.constant 0 : index
    %c0_251 = arith.constant 0 : index
    %c0_252 = arith.constant 0 : index
    %522 = vector.load %arg5[%521, %c0_250, %c0_251, %c0_252] : memref<8x1x8x128xi32, #tpu.memory_space<vmem>>, vector<1x1x8x128xi32>
    %523 = vector.shape_cast %522 : vector<1x1x8x128xi32> to vector<8x128xi32>
    %524 = vector.shape_cast %519 : vector<8x128xi32> to vector<1x1x8x128xi32>
    tpu.vector_store %arg5[%521, %c0_250, %c0_251, %c0_252], %524 {strides = array<i32>} : memref<8x1x8x128xi32, #tpu.memory_space<vmem>>, vector<1x1x8x128xi32>,
    %c2_i32_253 = arith.constant 2 : i32
    %525 = vector.broadcast %c2_i32_253 : i32 to vector<8x128xi32>
    %526 = arith.cmpi slt, %525, %1 : vector<8x128xi32>
    %527 = vector.broadcast %c2_i32_253 : i32 to vector<8x128xi32>
    %528 = arith.cmpi eq, %527, %3 : vector<8x128xi32>
    %529 = vector.broadcast %5 : f32 to vector<8x128xf32>
    %530 = arith.addf %152, %529 : vector<8x128xf32>
    %531 = vector.broadcast %13 : f32 to vector<8x128xf32>
    %532 = arith.addf %201, %531 : vector<8x128xf32>
    %533 = arith.cmpf ogt, %532, %530 : vector<8x128xf32>
    %534 = arith.maximumf %530, %532 : vector<8x128xf32>
    %c1_i32_254 = arith.constant 1 : i32
    %535 = vector.broadcast %c1_i32_254 : i32 to vector<8x128xi32>
    %536 = arith.select %533, %535, %4 : vector<8x128xi1>, vector<8x128xi32>
    %537 = vector.broadcast %21 : f32 to vector<8x128xf32>
    %538 = arith.addf %253, %537 : vector<8x128xf32>
    %539 = arith.cmpf ogt, %538, %534 : vector<8x128xf32>
    %540 = arith.maximumf %534, %538 : vector<8x128xf32>
    %c2_i32_255 = arith.constant 2 : i32
    %541 = vector.broadcast %c2_i32_255 : i32 to vector<8x128xi32>
    %542 = arith.select %539, %541, %536 : vector<8x128xi1>, vector<8x128xi32>
    %543 = vector.broadcast %29 : f32 to vector<8x128xf32>
    %544 = arith.addf %305, %543 : vector<8x128xf32>
    %545 = arith.cmpf ogt, %544, %540 : vector<8x128xf32>
    %546 = arith.maximumf %540, %544 : vector<8x128xf32>
    %c3_i32_256 = arith.constant 3 : i32
    %547 = vector.broadcast %c3_i32_256 : i32 to vector<8x128xi32>
    %548 = arith.select %545, %547, %542 : vector<8x128xi1>, vector<8x128xi32>
    %549 = vector.broadcast %37 : f32 to vector<8x128xf32>
    %550 = arith.addf %357, %549 : vector<8x128xf32>
    %551 = arith.cmpf ogt, %550, %546 : vector<8x128xf32>
    %552 = arith.maximumf %546, %550 : vector<8x128xf32>
    %c4_i32_257 = arith.constant 4 : i32
    %553 = vector.broadcast %c4_i32_257 : i32 to vector<8x128xi32>
    %554 = arith.select %551, %553, %548 : vector<8x128xi1>, vector<8x128xi32>
    %555 = vector.broadcast %45 : f32 to vector<8x128xf32>
    %556 = arith.addf %409, %555 : vector<8x128xf32>
    %557 = arith.cmpf ogt, %556, %552 : vector<8x128xf32>
    %558 = arith.maximumf %552, %556 : vector<8x128xf32>
    %c5_i32_258 = arith.constant 5 : i32
    %559 = vector.broadcast %c5_i32_258 : i32 to vector<8x128xi32>
    %560 = arith.select %557, %559, %554 : vector<8x128xi1>, vector<8x128xi32>
    %561 = vector.broadcast %53 : f32 to vector<8x128xf32>
    %562 = arith.addf %461, %561 : vector<8x128xf32>
    %563 = arith.cmpf ogt, %562, %558 : vector<8x128xf32>
    %564 = arith.maximumf %558, %562 : vector<8x128xf32>
    %c6_i32_259 = arith.constant 6 : i32
    %565 = vector.broadcast %c6_i32_259 : i32 to vector<8x128xi32>
    %566 = arith.select %563, %565, %560 : vector<8x128xi1>, vector<8x128xi32>
    %567 = vector.broadcast %61 : f32 to vector<8x128xf32>
    %568 = arith.addf %513, %567 : vector<8x128xf32>
    %569 = arith.cmpf ogt, %568, %564 : vector<8x128xf32>
    %570 = arith.maximumf %564, %568 : vector<8x128xf32>
    %c7_i32_260 = arith.constant 7 : i32
    %571 = vector.broadcast %c7_i32_260 : i32 to vector<8x128xi32>
    %572 = arith.select %569, %571, %566 : vector<8x128xi1>, vector<8x128xi32>
    %c0_261 = arith.constant 0 : index
    %573 = arith.index_cast %c2_i32_253 : i32 to index
    %c0_262 = arith.constant 0 : index
    %c0_263 = arith.constant 0 : index
    %c0_264 = arith.constant 0 : index
    %574 = vector.load %arg2[%c0_261, %573, %c0_262, %c0_263, %c0_264] : memref<1x8x8x8x128xf32, #tpu.memory_space<vmem>>, vector<1x1x1x8x128xf32>
    %575 = vector.shape_cast %574 : vector<1x1x1x8x128xf32> to vector<8x128xf32>
    %576 = arith.addf %570, %575 : vector<8x128xf32>
    %577 = arith.select %528, %576, %153 : vector<8x128xi1>, vector<8x128xf32>
    %578 = vector.broadcast %6 : f32 to vector<8x128xf32>
    %579 = arith.addf %152, %578 : vector<8x128xf32>
    %580 = vector.broadcast %14 : f32 to vector<8x128xf32>
    %581 = arith.addf %201, %580 : vector<8x128xf32>
    %582 = arith.cmpf ogt, %581, %579 : vector<8x128xf32>
    %583 = arith.maximumf %579, %581 : vector<8x128xf32>
    %c1_i32_265 = arith.constant 1 : i32
    %584 = vector.broadcast %c1_i32_265 : i32 to vector<8x128xi32>
    %585 = arith.select %582, %584, %4 : vector<8x128xi1>, vector<8x128xi32>
    %586 = vector.broadcast %22 : f32 to vector<8x128xf32>
    %587 = arith.addf %253, %586 : vector<8x128xf32>
    %588 = arith.cmpf ogt, %587, %583 : vector<8x128xf32>
    %589 = arith.maximumf %583, %587 : vector<8x128xf32>
    %c2_i32_266 = arith.constant 2 : i32
    %590 = vector.broadcast %c2_i32_266 : i32 to vector<8x128xi32>
    %591 = arith.select %588, %590, %585 : vector<8x128xi1>, vector<8x128xi32>
    %592 = vector.broadcast %30 : f32 to vector<8x128xf32>
    %593 = arith.addf %305, %592 : vector<8x128xf32>
    %594 = arith.cmpf ogt, %593, %589 : vector<8x128xf32>
    %595 = arith.maximumf %589, %593 : vector<8x128xf32>
    %c3_i32_267 = arith.constant 3 : i32
    %596 = vector.broadcast %c3_i32_267 : i32 to vector<8x128xi32>
    %597 = arith.select %594, %596, %591 : vector<8x128xi1>, vector<8x128xi32>
    %598 = vector.broadcast %38 : f32 to vector<8x128xf32>
    %599 = arith.addf %357, %598 : vector<8x128xf32>
    %600 = arith.cmpf ogt, %599, %595 : vector<8x128xf32>
    %601 = arith.maximumf %595, %599 : vector<8x128xf32>
    %c4_i32_268 = arith.constant 4 : i32
    %602 = vector.broadcast %c4_i32_268 : i32 to vector<8x128xi32>
    %603 = arith.select %600, %602, %597 : vector<8x128xi1>, vector<8x128xi32>
    %604 = vector.broadcast %46 : f32 to vector<8x128xf32>
    %605 = arith.addf %409, %604 : vector<8x128xf32>
    %606 = arith.cmpf ogt, %605, %601 : vector<8x128xf32>
    %607 = arith.maximumf %601, %605 : vector<8x128xf32>
    %c5_i32_269 = arith.constant 5 : i32
    %608 = vector.broadcast %c5_i32_269 : i32 to vector<8x128xi32>
    %609 = arith.select %606, %608, %603 : vector<8x128xi1>, vector<8x128xi32>
    %610 = vector.broadcast %54 : f32 to vector<8x128xf32>
    %611 = arith.addf %461, %610 : vector<8x128xf32>
    %612 = arith.cmpf ogt, %611, %607 : vector<8x128xf32>
    %613 = arith.maximumf %607, %611 : vector<8x128xf32>
    %c6_i32_270 = arith.constant 6 : i32
    %614 = vector.broadcast %c6_i32_270 : i32 to vector<8x128xi32>
    %615 = arith.select %612, %614, %609 : vector<8x128xi1>, vector<8x128xi32>
    %616 = vector.broadcast %62 : f32 to vector<8x128xf32>
    %617 = arith.addf %513, %616 : vector<8x128xf32>
    %618 = arith.cmpf ogt, %617, %613 : vector<8x128xf32>
    %619 = arith.maximumf %613, %617 : vector<8x128xf32>
    %c7_i32_271 = arith.constant 7 : i32
    %620 = vector.broadcast %c7_i32_271 : i32 to vector<8x128xi32>
    %621 = arith.select %618, %620, %615 : vector<8x128xi1>, vector<8x128xi32>
    %c0_272 = arith.constant 0 : index
    %622 = arith.index_cast %c2_i32_253 : i32 to index
    %c1_273 = arith.constant 1 : index
    %c0_274 = arith.constant 0 : index
    %c0_275 = arith.constant 0 : index
    %623 = vector.load %arg2[%c0_272, %622, %c1_273, %c0_274, %c0_275] : memref<1x8x8x8x128xf32, #tpu.memory_space<vmem>>, vector<1x1x1x8x128xf32>
    %624 = vector.shape_cast %623 : vector<1x1x1x8x128xf32> to vector<8x128xf32>
    %625 = arith.addf %619, %624 : vector<8x128xf32>
    %c3_i32_276 = arith.constant 3 : i32
    %626 = vector.broadcast %c3_i32_276 : i32 to vector<8x128xi32>
    %627 = arith.shli %621, %626 : vector<8x128xi32>
    %628 = arith.ori %572, %627 : vector<8x128xi32>
    %629 = arith.select %528, %625, %205 : vector<8x128xi1>, vector<8x128xf32>
    %630 = vector.broadcast %7 : f32 to vector<8x128xf32>
    %631 = arith.addf %152, %630 : vector<8x128xf32>
    %632 = vector.broadcast %15 : f32 to vector<8x128xf32>
    %633 = arith.addf %201, %632 : vector<8x128xf32>
    %634 = arith.cmpf ogt, %633, %631 : vector<8x128xf32>
    %635 = arith.maximumf %631, %633 : vector<8x128xf32>
    %c1_i32_277 = arith.constant 1 : i32
    %636 = vector.broadcast %c1_i32_277 : i32 to vector<8x128xi32>
    %637 = arith.select %634, %636, %4 : vector<8x128xi1>, vector<8x128xi32>
    %638 = vector.broadcast %23 : f32 to vector<8x128xf32>
    %639 = arith.addf %253, %638 : vector<8x128xf32>
    %640 = arith.cmpf ogt, %639, %635 : vector<8x128xf32>
    %641 = arith.maximumf %635, %639 : vector<8x128xf32>
    %c2_i32_278 = arith.constant 2 : i32
    %642 = vector.broadcast %c2_i32_278 : i32 to vector<8x128xi32>
    %643 = arith.select %640, %642, %637 : vector<8x128xi1>, vector<8x128xi32>
    %644 = vector.broadcast %31 : f32 to vector<8x128xf32>
    %645 = arith.addf %305, %644 : vector<8x128xf32>
    %646 = arith.cmpf ogt, %645, %641 : vector<8x128xf32>
    %647 = arith.maximumf %641, %645 : vector<8x128xf32>
    %c3_i32_279 = arith.constant 3 : i32
    %648 = vector.broadcast %c3_i32_279 : i32 to vector<8x128xi32>
    %649 = arith.select %646, %648, %643 : vector<8x128xi1>, vector<8x128xi32>
    %650 = vector.broadcast %39 : f32 to vector<8x128xf32>
    %651 = arith.addf %357, %650 : vector<8x128xf32>
    %652 = arith.cmpf ogt, %651, %647 : vector<8x128xf32>
    %653 = arith.maximumf %647, %651 : vector<8x128xf32>
    %c4_i32_280 = arith.constant 4 : i32
    %654 = vector.broadcast %c4_i32_280 : i32 to vector<8x128xi32>
    %655 = arith.select %652, %654, %649 : vector<8x128xi1>, vector<8x128xi32>
    %656 = vector.broadcast %47 : f32 to vector<8x128xf32>
    %657 = arith.addf %409, %656 : vector<8x128xf32>
    %658 = arith.cmpf ogt, %657, %653 : vector<8x128xf32>
    %659 = arith.maximumf %653, %657 : vector<8x128xf32>
    %c5_i32_281 = arith.constant 5 : i32
    %660 = vector.broadcast %c5_i32_281 : i32 to vector<8x128xi32>
    %661 = arith.select %658, %660, %655 : vector<8x128xi1>, vector<8x128xi32>
    %662 = vector.broadcast %55 : f32 to vector<8x128xf32>
    %663 = arith.addf %461, %662 : vector<8x128xf32>
    %664 = arith.cmpf ogt, %663, %659 : vector<8x128xf32>
    %665 = arith.maximumf %659, %663 : vector<8x128xf32>
    %c6_i32_282 = arith.constant 6 : i32
    %666 = vector.broadcast %c6_i32_282 : i32 to vector<8x128xi32>
    %667 = arith.select %664, %666, %661 : vector<8x128xi1>, vector<8x128xi32>
    %668 = vector.broadcast %63 : f32 to vector<8x128xf32>
    %669 = arith.addf %513, %668 : vector<8x128xf32>
    %670 = arith.cmpf ogt, %669, %665 : vector<8x128xf32>
    %671 = arith.maximumf %665, %669 : vector<8x128xf32>
    %c7_i32_283 = arith.constant 7 : i32
    %672 = vector.broadcast %c7_i32_283 : i32 to vector<8x128xi32>
    %673 = arith.select %670, %672, %667 : vector<8x128xi1>, vector<8x128xi32>
    %c0_284 = arith.constant 0 : index
    %674 = arith.index_cast %c2_i32_253 : i32 to index
    %c2_285 = arith.constant 2 : index
    %c0_286 = arith.constant 0 : index
    %c0_287 = arith.constant 0 : index
    %675 = vector.load %arg2[%c0_284, %674, %c2_285, %c0_286, %c0_287] : memref<1x8x8x8x128xf32, #tpu.memory_space<vmem>>, vector<1x1x1x8x128xf32>
    %676 = vector.shape_cast %675 : vector<1x1x1x8x128xf32> to vector<8x128xf32>
    %677 = arith.addf %671, %676 : vector<8x128xf32>
    %c6_i32_288 = arith.constant 6 : i32
    %678 = vector.broadcast %c6_i32_288 : i32 to vector<8x128xi32>
    %679 = arith.shli %673, %678 : vector<8x128xi32>
    %680 = arith.ori %628, %679 : vector<8x128xi32>
    %681 = arith.select %528, %677, %257 : vector<8x128xi1>, vector<8x128xf32>
    %682 = vector.broadcast %8 : f32 to vector<8x128xf32>
    %683 = arith.addf %152, %682 : vector<8x128xf32>
    %684 = vector.broadcast %16 : f32 to vector<8x128xf32>
    %685 = arith.addf %201, %684 : vector<8x128xf32>
    %686 = arith.cmpf ogt, %685, %683 : vector<8x128xf32>
    %687 = arith.maximumf %683, %685 : vector<8x128xf32>
    %c1_i32_289 = arith.constant 1 : i32
    %688 = vector.broadcast %c1_i32_289 : i32 to vector<8x128xi32>
    %689 = arith.select %686, %688, %4 : vector<8x128xi1>, vector<8x128xi32>
    %690 = vector.broadcast %24 : f32 to vector<8x128xf32>
    %691 = arith.addf %253, %690 : vector<8x128xf32>
    %692 = arith.cmpf ogt, %691, %687 : vector<8x128xf32>
    %693 = arith.maximumf %687, %691 : vector<8x128xf32>
    %c2_i32_290 = arith.constant 2 : i32
    %694 = vector.broadcast %c2_i32_290 : i32 to vector<8x128xi32>
    %695 = arith.select %692, %694, %689 : vector<8x128xi1>, vector<8x128xi32>
    %696 = vector.broadcast %32 : f32 to vector<8x128xf32>
    %697 = arith.addf %305, %696 : vector<8x128xf32>
    %698 = arith.cmpf ogt, %697, %693 : vector<8x128xf32>
    %699 = arith.maximumf %693, %697 : vector<8x128xf32>
    %c3_i32_291 = arith.constant 3 : i32
    %700 = vector.broadcast %c3_i32_291 : i32 to vector<8x128xi32>
    %701 = arith.select %698, %700, %695 : vector<8x128xi1>, vector<8x128xi32>
    %702 = vector.broadcast %40 : f32 to vector<8x128xf32>
    %703 = arith.addf %357, %702 : vector<8x128xf32>
    %704 = arith.cmpf ogt, %703, %699 : vector<8x128xf32>
    %705 = arith.maximumf %699, %703 : vector<8x128xf32>
    %c4_i32_292 = arith.constant 4 : i32
    %706 = vector.broadcast %c4_i32_292 : i32 to vector<8x128xi32>
    %707 = arith.select %704, %706, %701 : vector<8x128xi1>, vector<8x128xi32>
    %708 = vector.broadcast %48 : f32 to vector<8x128xf32>
    %709 = arith.addf %409, %708 : vector<8x128xf32>
    %710 = arith.cmpf ogt, %709, %705 : vector<8x128xf32>
    %711 = arith.maximumf %705, %709 : vector<8x128xf32>
    %c5_i32_293 = arith.constant 5 : i32
    %712 = vector.broadcast %c5_i32_293 : i32 to vector<8x128xi32>
    %713 = arith.select %710, %712, %707 : vector<8x128xi1>, vector<8x128xi32>
    %714 = vector.broadcast %56 : f32 to vector<8x128xf32>
    %715 = arith.addf %461, %714 : vector<8x128xf32>
    %716 = arith.cmpf ogt, %715, %711 : vector<8x128xf32>
    %717 = arith.maximumf %711, %715 : vector<8x128xf32>
    %c6_i32_294 = arith.constant 6 : i32
    %718 = vector.broadcast %c6_i32_294 : i32 to vector<8x128xi32>
    %719 = arith.select %716, %718, %713 : vector<8x128xi1>, vector<8x128xi32>
    %720 = vector.broadcast %64 : f32 to vector<8x128xf32>
    %721 = arith.addf %513, %720 : vector<8x128xf32>
    %722 = arith.cmpf ogt, %721, %717 : vector<8x128xf32>
    %723 = arith.maximumf %717, %721 : vector<8x128xf32>
    %c7_i32_295 = arith.constant 7 : i32
    %724 = vector.broadcast %c7_i32_295 : i32 to vector<8x128xi32>
    %725 = arith.select %722, %724, %719 : vector<8x128xi1>, vector<8x128xi32>
    %c0_296 = arith.constant 0 : index
    %726 = arith.index_cast %c2_i32_253 : i32 to index
    %c3_297 = arith.constant 3 : index
    %c0_298 = arith.constant 0 : index
    %c0_299 = arith.constant 0 : index
    %727 = vector.load %arg2[%c0_296, %726, %c3_297, %c0_298, %c0_299] : memref<1x8x8x8x128xf32, #tpu.memory_space<vmem>>, vector<1x1x1x8x128xf32>
    %728 = vector.shape_cast %727 : vector<1x1x1x8x128xf32> to vector<8x128xf32>
    %729 = arith.addf %723, %728 : vector<8x128xf32>
    %c9_i32_300 = arith.constant 9 : i32
    %730 = vector.broadcast %c9_i32_300 : i32 to vector<8x128xi32>
    %731 = arith.shli %725, %730 : vector<8x128xi32>
    %732 = arith.ori %680, %731 : vector<8x128xi32>
    %733 = arith.select %528, %729, %309 : vector<8x128xi1>, vector<8x128xf32>
    %734 = vector.broadcast %9 : f32 to vector<8x128xf32>
    %735 = arith.addf %152, %734 : vector<8x128xf32>
    %736 = vector.broadcast %17 : f32 to vector<8x128xf32>
    %737 = arith.addf %201, %736 : vector<8x128xf32>
    %738 = arith.cmpf ogt, %737, %735 : vector<8x128xf32>
    %739 = arith.maximumf %735, %737 : vector<8x128xf32>
    %c1_i32_301 = arith.constant 1 : i32
    %740 = vector.broadcast %c1_i32_301 : i32 to vector<8x128xi32>
    %741 = arith.select %738, %740, %4 : vector<8x128xi1>, vector<8x128xi32>
    %742 = vector.broadcast %25 : f32 to vector<8x128xf32>
    %743 = arith.addf %253, %742 : vector<8x128xf32>
    %744 = arith.cmpf ogt, %743, %739 : vector<8x128xf32>
    %745 = arith.maximumf %739, %743 : vector<8x128xf32>
    %c2_i32_302 = arith.constant 2 : i32
    %746 = vector.broadcast %c2_i32_302 : i32 to vector<8x128xi32>
    %747 = arith.select %744, %746, %741 : vector<8x128xi1>, vector<8x128xi32>
    %748 = vector.broadcast %33 : f32 to vector<8x128xf32>
    %749 = arith.addf %305, %748 : vector<8x128xf32>
    %750 = arith.cmpf ogt, %749, %745 : vector<8x128xf32>
    %751 = arith.maximumf %745, %749 : vector<8x128xf32>
    %c3_i32_303 = arith.constant 3 : i32
    %752 = vector.broadcast %c3_i32_303 : i32 to vector<8x128xi32>
    %753 = arith.select %750, %752, %747 : vector<8x128xi1>, vector<8x128xi32>
    %754 = vector.broadcast %41 : f32 to vector<8x128xf32>
    %755 = arith.addf %357, %754 : vector<8x128xf32>
    %756 = arith.cmpf ogt, %755, %751 : vector<8x128xf32>
    %757 = arith.maximumf %751, %755 : vector<8x128xf32>
    %c4_i32_304 = arith.constant 4 : i32
    %758 = vector.broadcast %c4_i32_304 : i32 to vector<8x128xi32>
    %759 = arith.select %756, %758, %753 : vector<8x128xi1>, vector<8x128xi32>
    %760 = vector.broadcast %49 : f32 to vector<8x128xf32>
    %761 = arith.addf %409, %760 : vector<8x128xf32>
    %762 = arith.cmpf ogt, %761, %757 : vector<8x128xf32>
    %763 = arith.maximumf %757, %761 : vector<8x128xf32>
    %c5_i32_305 = arith.constant 5 : i32
    %764 = vector.broadcast %c5_i32_305 : i32 to vector<8x128xi32>
    %765 = arith.select %762, %764, %759 : vector<8x128xi1>, vector<8x128xi32>
    %766 = vector.broadcast %57 : f32 to vector<8x128xf32>
    %767 = arith.addf %461, %766 : vector<8x128xf32>
    %768 = arith.cmpf ogt, %767, %763 : vector<8x128xf32>
    %769 = arith.maximumf %763, %767 : vector<8x128xf32>
    %c6_i32_306 = arith.constant 6 : i32
    %770 = vector.broadcast %c6_i32_306 : i32 to vector<8x128xi32>
    %771 = arith.select %768, %770, %765 : vector<8x128xi1>, vector<8x128xi32>
    %772 = vector.broadcast %65 : f32 to vector<8x128xf32>
    %773 = arith.addf %513, %772 : vector<8x128xf32>
    %774 = arith.cmpf ogt, %773, %769 : vector<8x128xf32>
    %775 = arith.maximumf %769, %773 : vector<8x128xf32>
    %c7_i32_307 = arith.constant 7 : i32
    %776 = vector.broadcast %c7_i32_307 : i32 to vector<8x128xi32>
    %777 = arith.select %774, %776, %771 : vector<8x128xi1>, vector<8x128xi32>
    %c0_308 = arith.constant 0 : index
    %778 = arith.index_cast %c2_i32_253 : i32 to index
    %c4_309 = arith.constant 4 : index
    %c0_310 = arith.constant 0 : index
    %c0_311 = arith.constant 0 : index
    %779 = vector.load %arg2[%c0_308, %778, %c4_309, %c0_310, %c0_311] : memref<1x8x8x8x128xf32, #tpu.memory_space<vmem>>, vector<1x1x1x8x128xf32>
    %780 = vector.shape_cast %779 : vector<1x1x1x8x128xf32> to vector<8x128xf32>
    %781 = arith.addf %775, %780 : vector<8x128xf32>
    %c12_i32_312 = arith.constant 12 : i32
    %782 = vector.broadcast %c12_i32_312 : i32 to vector<8x128xi32>
    %783 = arith.shli %777, %782 : vector<8x128xi32>
    %784 = arith.ori %732, %783 : vector<8x128xi32>
    %785 = arith.select %528, %781, %361 : vector<8x128xi1>, vector<8x128xf32>
    %786 = vector.broadcast %10 : f32 to vector<8x128xf32>
    %787 = arith.addf %152, %786 : vector<8x128xf32>
    %788 = vector.broadcast %18 : f32 to vector<8x128xf32>
    %789 = arith.addf %201, %788 : vector<8x128xf32>
    %790 = arith.cmpf ogt, %789, %787 : vector<8x128xf32>
    %791 = arith.maximumf %787, %789 : vector<8x128xf32>
    %c1_i32_313 = arith.constant 1 : i32
    %792 = vector.broadcast %c1_i32_313 : i32 to vector<8x128xi32>
    %793 = arith.select %790, %792, %4 : vector<8x128xi1>, vector<8x128xi32>
    %794 = vector.broadcast %26 : f32 to vector<8x128xf32>
    %795 = arith.addf %253, %794 : vector<8x128xf32>
    %796 = arith.cmpf ogt, %795, %791 : vector<8x128xf32>
    %797 = arith.maximumf %791, %795 : vector<8x128xf32>
    %c2_i32_314 = arith.constant 2 : i32
    %798 = vector.broadcast %c2_i32_314 : i32 to vector<8x128xi32>
    %799 = arith.select %796, %798, %793 : vector<8x128xi1>, vector<8x128xi32>
    %800 = vector.broadcast %34 : f32 to vector<8x128xf32>
    %801 = arith.addf %305, %800 : vector<8x128xf32>
    %802 = arith.cmpf ogt, %801, %797 : vector<8x128xf32>
    %803 = arith.maximumf %797, %801 : vector<8x128xf32>
    %c3_i32_315 = arith.constant 3 : i32
    %804 = vector.broadcast %c3_i32_315 : i32 to vector<8x128xi32>
    %805 = arith.select %802, %804, %799 : vector<8x128xi1>, vector<8x128xi32>
    %806 = vector.broadcast %42 : f32 to vector<8x128xf32>
    %807 = arith.addf %357, %806 : vector<8x128xf32>
    %808 = arith.cmpf ogt, %807, %803 : vector<8x128xf32>
    %809 = arith.maximumf %803, %807 : vector<8x128xf32>
    %c4_i32_316 = arith.constant 4 : i32
    %810 = vector.broadcast %c4_i32_316 : i32 to vector<8x128xi32>
    %811 = arith.select %808, %810, %805 : vector<8x128xi1>, vector<8x128xi32>
    %812 = vector.broadcast %50 : f32 to vector<8x128xf32>
    %813 = arith.addf %409, %812 : vector<8x128xf32>
    %814 = arith.cmpf ogt, %813, %809 : vector<8x128xf32>
    %815 = arith.maximumf %809, %813 : vector<8x128xf32>
    %c5_i32_317 = arith.constant 5 : i32
    %816 = vector.broadcast %c5_i32_317 : i32 to vector<8x128xi32>
    %817 = arith.select %814, %816, %811 : vector<8x128xi1>, vector<8x128xi32>
    %818 = vector.broadcast %58 : f32 to vector<8x128xf32>
    %819 = arith.addf %461, %818 : vector<8x128xf32>
    %820 = arith.cmpf ogt, %819, %815 : vector<8x128xf32>
    %821 = arith.maximumf %815, %819 : vector<8x128xf32>
    %c6_i32_318 = arith.constant 6 : i32
    %822 = vector.broadcast %c6_i32_318 : i32 to vector<8x128xi32>
    %823 = arith.select %820, %822, %817 : vector<8x128xi1>, vector<8x128xi32>
    %824 = vector.broadcast %66 : f32 to vector<8x128xf32>
    %825 = arith.addf %513, %824 : vector<8x128xf32>
    %826 = arith.cmpf ogt, %825, %821 : vector<8x128xf32>
    %827 = arith.maximumf %821, %825 : vector<8x128xf32>
    %c7_i32_319 = arith.constant 7 : i32
    %828 = vector.broadcast %c7_i32_319 : i32 to vector<8x128xi32>
    %829 = arith.select %826, %828, %823 : vector<8x128xi1>, vector<8x128xi32>
    %c0_320 = arith.constant 0 : index
    %830 = arith.index_cast %c2_i32_253 : i32 to index
    %c5_321 = arith.constant 5 : index
    %c0_322 = arith.constant 0 : index
    %c0_323 = arith.constant 0 : index
    %831 = vector.load %arg2[%c0_320, %830, %c5_321, %c0_322, %c0_323] : memref<1x8x8x8x128xf32, #tpu.memory_space<vmem>>, vector<1x1x1x8x128xf32>
    %832 = vector.shape_cast %831 : vector<1x1x1x8x128xf32> to vector<8x128xf32>
    %833 = arith.addf %827, %832 : vector<8x128xf32>
    %c15_i32_324 = arith.constant 15 : i32
    %834 = vector.broadcast %c15_i32_324 : i32 to vector<8x128xi32>
    %835 = arith.shli %829, %834 : vector<8x128xi32>
    %836 = arith.ori %784, %835 : vector<8x128xi32>
    %837 = arith.select %528, %833, %413 : vector<8x128xi1>, vector<8x128xf32>
    %838 = vector.broadcast %11 : f32 to vector<8x128xf32>
    %839 = arith.addf %152, %838 : vector<8x128xf32>
    %840 = vector.broadcast %19 : f32 to vector<8x128xf32>
    %841 = arith.addf %201, %840 : vector<8x128xf32>
    %842 = arith.cmpf ogt, %841, %839 : vector<8x128xf32>
    %843 = arith.maximumf %839, %841 : vector<8x128xf32>
    %c1_i32_325 = arith.constant 1 : i32
    %844 = vector.broadcast %c1_i32_325 : i32 to vector<8x128xi32>
    %845 = arith.select %842, %844, %4 : vector<8x128xi1>, vector<8x128xi32>
    %846 = vector.broadcast %27 : f32 to vector<8x128xf32>
    %847 = arith.addf %253, %846 : vector<8x128xf32>
    %848 = arith.cmpf ogt, %847, %843 : vector<8x128xf32>
    %849 = arith.maximumf %843, %847 : vector<8x128xf32>
    %c2_i32_326 = arith.constant 2 : i32
    %850 = vector.broadcast %c2_i32_326 : i32 to vector<8x128xi32>
    %851 = arith.select %848, %850, %845 : vector<8x128xi1>, vector<8x128xi32>
    %852 = vector.broadcast %35 : f32 to vector<8x128xf32>
    %853 = arith.addf %305, %852 : vector<8x128xf32>
    %854 = arith.cmpf ogt, %853, %849 : vector<8x128xf32>
    %855 = arith.maximumf %849, %853 : vector<8x128xf32>
    %c3_i32_327 = arith.constant 3 : i32
    %856 = vector.broadcast %c3_i32_327 : i32 to vector<8x128xi32>
    %857 = arith.select %854, %856, %851 : vector<8x128xi1>, vector<8x128xi32>
    %858 = vector.broadcast %43 : f32 to vector<8x128xf32>
    %859 = arith.addf %357, %858 : vector<8x128xf32>
    %860 = arith.cmpf ogt, %859, %855 : vector<8x128xf32>
    %861 = arith.maximumf %855, %859 : vector<8x128xf32>
    %c4_i32_328 = arith.constant 4 : i32
    %862 = vector.broadcast %c4_i32_328 : i32 to vector<8x128xi32>
    %863 = arith.select %860, %862, %857 : vector<8x128xi1>, vector<8x128xi32>
    %864 = vector.broadcast %51 : f32 to vector<8x128xf32>
    %865 = arith.addf %409, %864 : vector<8x128xf32>
    %866 = arith.cmpf ogt, %865, %861 : vector<8x128xf32>
    %867 = arith.maximumf %861, %865 : vector<8x128xf32>
    %c5_i32_329 = arith.constant 5 : i32
    %868 = vector.broadcast %c5_i32_329 : i32 to vector<8x128xi32>
    %869 = arith.select %866, %868, %863 : vector<8x128xi1>, vector<8x128xi32>
    %870 = vector.broadcast %59 : f32 to vector<8x128xf32>
    %871 = arith.addf %461, %870 : vector<8x128xf32>
    %872 = arith.cmpf ogt, %871, %867 : vector<8x128xf32>
    %873 = arith.maximumf %867, %871 : vector<8x128xf32>
    %c6_i32_330 = arith.constant 6 : i32
    %874 = vector.broadcast %c6_i32_330 : i32 to vector<8x128xi32>
    %875 = arith.select %872, %874, %869 : vector<8x128xi1>, vector<8x128xi32>
    %876 = vector.broadcast %67 : f32 to vector<8x128xf32>
    %877 = arith.addf %513, %876 : vector<8x128xf32>
    %878 = arith.cmpf ogt, %877, %873 : vector<8x128xf32>
    %879 = arith.maximumf %873, %877 : vector<8x128xf32>
    %c7_i32_331 = arith.constant 7 : i32
    %880 = vector.broadcast %c7_i32_331 : i32 to vector<8x128xi32>
    %881 = arith.select %878, %880, %875 : vector<8x128xi1>, vector<8x128xi32>
    %c0_332 = arith.constant 0 : index
    %882 = arith.index_cast %c2_i32_253 : i32 to index
    %c6_333 = arith.constant 6 : index
    %c0_334 = arith.constant 0 : index
    %c0_335 = arith.constant 0 : index
    %883 = vector.load %arg2[%c0_332, %882, %c6_333, %c0_334, %c0_335] : memref<1x8x8x8x128xf32, #tpu.memory_space<vmem>>, vector<1x1x1x8x128xf32>
    %884 = vector.shape_cast %883 : vector<1x1x1x8x128xf32> to vector<8x128xf32>
    %885 = arith.addf %879, %884 : vector<8x128xf32>
    %c18_i32_336 = arith.constant 18 : i32
    %886 = vector.broadcast %c18_i32_336 : i32 to vector<8x128xi32>
    %887 = arith.shli %881, %886 : vector<8x128xi32>
    %888 = arith.ori %836, %887 : vector<8x128xi32>
    %889 = arith.select %528, %885, %465 : vector<8x128xi1>, vector<8x128xf32>
    %890 = vector.broadcast %12 : f32 to vector<8x128xf32>
    %891 = arith.addf %152, %890 : vector<8x128xf32>
    %892 = vector.broadcast %20 : f32 to vector<8x128xf32>
    %893 = arith.addf %201, %892 : vector<8x128xf32>
    %894 = arith.cmpf ogt, %893, %891 : vector<8x128xf32>
    %895 = arith.maximumf %891, %893 : vector<8x128xf32>
    %c1_i32_337 = arith.constant 1 : i32
    %896 = vector.broadcast %c1_i32_337 : i32 to vector<8x128xi32>
    %897 = arith.select %894, %896, %4 : vector<8x128xi1>, vector<8x128xi32>
    %898 = vector.broadcast %28 : f32 to vector<8x128xf32>
    %899 = arith.addf %253, %898 : vector<8x128xf32>
    %900 = arith.cmpf ogt, %899, %895 : vector<8x128xf32>
    %901 = arith.maximumf %895, %899 : vector<8x128xf32>
    %c2_i32_338 = arith.constant 2 : i32
    %902 = vector.broadcast %c2_i32_338 : i32 to vector<8x128xi32>
    %903 = arith.select %900, %902, %897 : vector<8x128xi1>, vector<8x128xi32>
    %904 = vector.broadcast %36 : f32 to vector<8x128xf32>
    %905 = arith.addf %305, %904 : vector<8x128xf32>
    %906 = arith.cmpf ogt, %905, %901 : vector<8x128xf32>
    %907 = arith.maximumf %901, %905 : vector<8x128xf32>
    %c3_i32_339 = arith.constant 3 : i32
    %908 = vector.broadcast %c3_i32_339 : i32 to vector<8x128xi32>
    %909 = arith.select %906, %908, %903 : vector<8x128xi1>, vector<8x128xi32>
    %910 = vector.broadcast %44 : f32 to vector<8x128xf32>
    %911 = arith.addf %357, %910 : vector<8x128xf32>
    %912 = arith.cmpf ogt, %911, %907 : vector<8x128xf32>
    %913 = arith.maximumf %907, %911 : vector<8x128xf32>
    %c4_i32_340 = arith.constant 4 : i32
    %914 = vector.broadcast %c4_i32_340 : i32 to vector<8x128xi32>
    %915 = arith.select %912, %914, %909 : vector<8x128xi1>, vector<8x128xi32>
    %916 = vector.broadcast %52 : f32 to vector<8x128xf32>
    %917 = arith.addf %409, %916 : vector<8x128xf32>
    %918 = arith.cmpf ogt, %917, %913 : vector<8x128xf32>
    %919 = arith.maximumf %913, %917 : vector<8x128xf32>
    %c5_i32_341 = arith.constant 5 : i32
    %920 = vector.broadcast %c5_i32_341 : i32 to vector<8x128xi32>
    %921 = arith.select %918, %920, %915 : vector<8x128xi1>, vector<8x128xi32>
    %922 = vector.broadcast %60 : f32 to vector<8x128xf32>
    %923 = arith.addf %461, %922 : vector<8x128xf32>
    %924 = arith.cmpf ogt, %923, %919 : vector<8x128xf32>
    %925 = arith.maximumf %919, %923 : vector<8x128xf32>
    %c6_i32_342 = arith.constant 6 : i32
    %926 = vector.broadcast %c6_i32_342 : i32 to vector<8x128xi32>
    %927 = arith.select %924, %926, %921 : vector<8x128xi1>, vector<8x128xi32>
    %928 = vector.broadcast %68 : f32 to vector<8x128xf32>
    %929 = arith.addf %513, %928 : vector<8x128xf32>
    %930 = arith.cmpf ogt, %929, %925 : vector<8x128xf32>
    %931 = arith.maximumf %925, %929 : vector<8x128xf32>
    %c7_i32_343 = arith.constant 7 : i32
    %932 = vector.broadcast %c7_i32_343 : i32 to vector<8x128xi32>
    %933 = arith.select %930, %932, %927 : vector<8x128xi1>, vector<8x128xi32>
    %c0_344 = arith.constant 0 : index
    %934 = arith.index_cast %c2_i32_253 : i32 to index
    %c7_345 = arith.constant 7 : index
    %c0_346 = arith.constant 0 : index
    %c0_347 = arith.constant 0 : index
    %935 = vector.load %arg2[%c0_344, %934, %c7_345, %c0_346, %c0_347] : memref<1x8x8x8x128xf32, #tpu.memory_space<vmem>>, vector<1x1x1x8x128xf32>
    %936 = vector.shape_cast %935 : vector<1x1x1x8x128xf32> to vector<8x128xf32>
    %937 = arith.addf %931, %936 : vector<8x128xf32>
    %c21_i32_348 = arith.constant 21 : i32
    %938 = vector.broadcast %c21_i32_348 : i32 to vector<8x128xi32>
    %939 = arith.shli %933, %938 : vector<8x128xi32>
    %940 = arith.ori %888, %939 : vector<8x128xi32>
    %941 = arith.select %528, %937, %517 : vector<8x128xi1>, vector<8x128xf32>
    %c0_i32_349 = arith.constant 0 : i32
    %942 = vector.broadcast %c0_i32_349 : i32 to vector<8x128xi32>
    %943 = arith.select %526, %940, %942 : vector<8x128xi1>, vector<8x128xi32>
    %c1_i32_350 = arith.constant 1 : i32
    %944 = arith.subi %c2_i32_253, %c1_i32_350 : i32
    %945 = arith.index_cast %944 : i32 to index
    %c0_351 = arith.constant 0 : index
    %c0_352 = arith.constant 0 : index
    %c0_353 = arith.constant 0 : index
    %946 = vector.load %arg5[%945, %c0_351, %c0_352, %c0_353] : memref<8x1x8x128xi32, #tpu.memory_space<vmem>>, vector<1x1x8x128xi32>
    %947 = vector.shape_cast %946 : vector<1x1x8x128xi32> to vector<8x128xi32>
    %948 = vector.shape_cast %943 : vector<8x128xi32> to vector<1x1x8x128xi32>
    tpu.vector_store %arg5[%945, %c0_351, %c0_352, %c0_353], %948 {strides = array<i32>} : memref<8x1x8x128xi32, #tpu.memory_space<vmem>>, vector<1x1x8x128xi32>,
    %c3_i32_354 = arith.constant 3 : i32
    %949 = vector.broadcast %c3_i32_354 : i32 to vector<8x128xi32>
    %950 = arith.cmpi slt, %949, %1 : vector<8x128xi32>
    %951 = vector.broadcast %c3_i32_354 : i32 to vector<8x128xi32>
    %952 = arith.cmpi eq, %951, %3 : vector<8x128xi32>
    %953 = vector.broadcast %5 : f32 to vector<8x128xf32>
    %954 = arith.addf %576, %953 : vector<8x128xf32>
    %955 = vector.broadcast %13 : f32 to vector<8x128xf32>
    %956 = arith.addf %625, %955 : vector<8x128xf32>
    %957 = arith.cmpf ogt, %956, %954 : vector<8x128xf32>
    %958 = arith.maximumf %954, %956 : vector<8x128xf32>
    %c1_i32_355 = arith.constant 1 : i32
    %959 = vector.broadcast %c1_i32_355 : i32 to vector<8x128xi32>
    %960 = arith.select %957, %959, %4 : vector<8x128xi1>, vector<8x128xi32>
    %961 = vector.broadcast %21 : f32 to vector<8x128xf32>
    %962 = arith.addf %677, %961 : vector<8x128xf32>
    %963 = arith.cmpf ogt, %962, %958 : vector<8x128xf32>
    %964 = arith.maximumf %958, %962 : vector<8x128xf32>
    %c2_i32_356 = arith.constant 2 : i32
    %965 = vector.broadcast %c2_i32_356 : i32 to vector<8x128xi32>
    %966 = arith.select %963, %965, %960 : vector<8x128xi1>, vector<8x128xi32>
    %967 = vector.broadcast %29 : f32 to vector<8x128xf32>
    %968 = arith.addf %729, %967 : vector<8x128xf32>
    %969 = arith.cmpf ogt, %968, %964 : vector<8x128xf32>
    %970 = arith.maximumf %964, %968 : vector<8x128xf32>
    %c3_i32_357 = arith.constant 3 : i32
    %971 = vector.broadcast %c3_i32_357 : i32 to vector<8x128xi32>
    %972 = arith.select %969, %971, %966 : vector<8x128xi1>, vector<8x128xi32>
    %973 = vector.broadcast %37 : f32 to vector<8x128xf32>
    %974 = arith.addf %781, %973 : vector<8x128xf32>
    %975 = arith.cmpf ogt, %974, %970 : vector<8x128xf32>
    %976 = arith.maximumf %970, %974 : vector<8x128xf32>
    %c4_i32_358 = arith.constant 4 : i32
    %977 = vector.broadcast %c4_i32_358 : i32 to vector<8x128xi32>
    %978 = arith.select %975, %977, %972 : vector<8x128xi1>, vector<8x128xi32>
    %979 = vector.broadcast %45 : f32 to vector<8x128xf32>
    %980 = arith.addf %833, %979 : vector<8x128xf32>
    %981 = arith.cmpf ogt, %980, %976 : vector<8x128xf32>
    %982 = arith.maximumf %976, %980 : vector<8x128xf32>
    %c5_i32_359 = arith.constant 5 : i32
    %983 = vector.broadcast %c5_i32_359 : i32 to vector<8x128xi32>
    %984 = arith.select %981, %983, %978 : vector<8x128xi1>, vector<8x128xi32>
    %985 = vector.broadcast %53 : f32 to vector<8x128xf32>
    %986 = arith.addf %885, %985 : vector<8x128xf32>
    %987 = arith.cmpf ogt, %986, %982 : vector<8x128xf32>
    %988 = arith.maximumf %982, %986 : vector<8x128xf32>
    %c6_i32_360 = arith.constant 6 : i32
    %989 = vector.broadcast %c6_i32_360 : i32 to vector<8x128xi32>
    %990 = arith.select %987, %989, %984 : vector<8x128xi1>, vector<8x128xi32>
    %991 = vector.broadcast %61 : f32 to vector<8x128xf32>
    %992 = arith.addf %937, %991 : vector<8x128xf32>
    %993 = arith.cmpf ogt, %992, %988 : vector<8x128xf32>
    %994 = arith.maximumf %988, %992 : vector<8x128xf32>
    %c7_i32_361 = arith.constant 7 : i32
    %995 = vector.broadcast %c7_i32_361 : i32 to vector<8x128xi32>
    %996 = arith.select %993, %995, %990 : vector<8x128xi1>, vector<8x128xi32>
    %c0_362 = arith.constant 0 : index
    %997 = arith.index_cast %c3_i32_354 : i32 to index
    %c0_363 = arith.constant 0 : index
    %c0_364 = arith.constant 0 : index
    %c0_365 = arith.constant 0 : index
    %998 = vector.load %arg2[%c0_362, %997, %c0_363, %c0_364, %c0_365] : memref<1x8x8x8x128xf32, #tpu.memory_space<vmem>>, vector<1x1x1x8x128xf32>
    %999 = vector.shape_cast %998 : vector<1x1x1x8x128xf32> to vector<8x128xf32>
    %1000 = arith.addf %994, %999 : vector<8x128xf32>
    %1001 = arith.select %952, %1000, %577 : vector<8x128xi1>, vector<8x128xf32>
    %1002 = vector.broadcast %6 : f32 to vector<8x128xf32>
    %1003 = arith.addf %576, %1002 : vector<8x128xf32>
    %1004 = vector.broadcast %14 : f32 to vector<8x128xf32>
    %1005 = arith.addf %625, %1004 : vector<8x128xf32>
    %1006 = arith.cmpf ogt, %1005, %1003 : vector<8x128xf32>
    %1007 = arith.maximumf %1003, %1005 : vector<8x128xf32>
    %c1_i32_366 = arith.constant 1 : i32
    %1008 = vector.broadcast %c1_i32_366 : i32 to vector<8x128xi32>
    %1009 = arith.select %1006, %1008, %4 : vector<8x128xi1>, vector<8x128xi32>
    %1010 = vector.broadcast %22 : f32 to vector<8x128xf32>
    %1011 = arith.addf %677, %1010 : vector<8x128xf32>
    %1012 = arith.cmpf ogt, %1011, %1007 : vector<8x128xf32>
    %1013 = arith.maximumf %1007, %1011 : vector<8x128xf32>
    %c2_i32_367 = arith.constant 2 : i32
    %1014 = vector.broadcast %c2_i32_367 : i32 to vector<8x128xi32>
    %1015 = arith.select %1012, %1014, %1009 : vector<8x128xi1>, vector<8x128xi32>
    %1016 = vector.broadcast %30 : f32 to vector<8x128xf32>
    %1017 = arith.addf %729, %1016 : vector<8x128xf32>
    %1018 = arith.cmpf ogt, %1017, %1013 : vector<8x128xf32>
    %1019 = arith.maximumf %1013, %1017 : vector<8x128xf32>
    %c3_i32_368 = arith.constant 3 : i32
    %1020 = vector.broadcast %c3_i32_368 : i32 to vector<8x128xi32>
    %1021 = arith.select %1018, %1020, %1015 : vector<8x128xi1>, vector<8x128xi32>
    %1022 = vector.broadcast %38 : f32 to vector<8x128xf32>
    %1023 = arith.addf %781, %1022 : vector<8x128xf32>
    %1024 = arith.cmpf ogt, %1023, %1019 : vector<8x128xf32>
    %1025 = arith.maximumf %1019, %1023 : vector<8x128xf32>
    %c4_i32_369 = arith.constant 4 : i32
    %1026 = vector.broadcast %c4_i32_369 : i32 to vector<8x128xi32>
    %1027 = arith.select %1024, %1026, %1021 : vector<8x128xi1>, vector<8x128xi32>
    %1028 = vector.broadcast %46 : f32 to vector<8x128xf32>
    %1029 = arith.addf %833, %1028 : vector<8x128xf32>
    %1030 = arith.cmpf ogt, %1029, %1025 : vector<8x128xf32>
    %1031 = arith.maximumf %1025, %1029 : vector<8x128xf32>
    %c5_i32_370 = arith.constant 5 : i32
    %1032 = vector.broadcast %c5_i32_370 : i32 to vector<8x128xi32>
    %1033 = arith.select %1030, %1032, %1027 : vector<8x128xi1>, vector<8x128xi32>
    %1034 = vector.broadcast %54 : f32 to vector<8x128xf32>
    %1035 = arith.addf %885, %1034 : vector<8x128xf32>
    %1036 = arith.cmpf ogt, %1035, %1031 : vector<8x128xf32>
    %1037 = arith.maximumf %1031, %1035 : vector<8x128xf32>
    %c6_i32_371 = arith.constant 6 : i32
    %1038 = vector.broadcast %c6_i32_371 : i32 to vector<8x128xi32>
    %1039 = arith.select %1036, %1038, %1033 : vector<8x128xi1>, vector<8x128xi32>
    %1040 = vector.broadcast %62 : f32 to vector<8x128xf32>
    %1041 = arith.addf %937, %1040 : vector<8x128xf32>
    %1042 = arith.cmpf ogt, %1041, %1037 : vector<8x128xf32>
    %1043 = arith.maximumf %1037, %1041 : vector<8x128xf32>
    %c7_i32_372 = arith.constant 7 : i32
    %1044 = vector.broadcast %c7_i32_372 : i32 to vector<8x128xi32>
    %1045 = arith.select %1042, %1044, %1039 : vector<8x128xi1>, vector<8x128xi32>
    %c0_373 = arith.constant 0 : index
    %1046 = arith.index_cast %c3_i32_354 : i32 to index
    %c1_374 = arith.constant 1 : index
    %c0_375 = arith.constant 0 : index
    %c0_376 = arith.constant 0 : index
    %1047 = vector.load %arg2[%c0_373, %1046, %c1_374, %c0_375, %c0_376] : memref<1x8x8x8x128xf32, #tpu.memory_space<vmem>>, vector<1x1x1x8x128xf32>
    %1048 = vector.shape_cast %1047 : vector<1x1x1x8x128xf32> to vector<8x128xf32>
    %1049 = arith.addf %1043, %1048 : vector<8x128xf32>
    %c3_i32_377 = arith.constant 3 : i32
    %1050 = vector.broadcast %c3_i32_377 : i32 to vector<8x128xi32>
    %1051 = arith.shli %1045, %1050 : vector<8x128xi32>
    %1052 = arith.ori %996, %1051 : vector<8x128xi32>
    %1053 = arith.select %952, %1049, %629 : vector<8x128xi1>, vector<8x128xf32>
    %1054 = vector.broadcast %7 : f32 to vector<8x128xf32>
    %1055 = arith.addf %576, %1054 : vector<8x128xf32>
    %1056 = vector.broadcast %15 : f32 to vector<8x128xf32>
    %1057 = arith.addf %625, %1056 : vector<8x128xf32>
    %1058 = arith.cmpf ogt, %1057, %1055 : vector<8x128xf32>
    %1059 = arith.maximumf %1055, %1057 : vector<8x128xf32>
    %c1_i32_378 = arith.constant 1 : i32
    %1060 = vector.broadcast %c1_i32_378 : i32 to vector<8x128xi32>
    %1061 = arith.select %1058, %1060, %4 : vector<8x128xi1>, vector<8x128xi32>
    %1062 = vector.broadcast %23 : f32 to vector<8x128xf32>
    %1063 = arith.addf %677, %1062 : vector<8x128xf32>
    %1064 = arith.cmpf ogt, %1063, %1059 : vector<8x128xf32>
    %1065 = arith.maximumf %1059, %1063 : vector<8x128xf32>
    %c2_i32_379 = arith.constant 2 : i32
    %1066 = vector.broadcast %c2_i32_379 : i32 to vector<8x128xi32>
    %1067 = arith.select %1064, %1066, %1061 : vector<8x128xi1>, vector<8x128xi32>
    %1068 = vector.broadcast %31 : f32 to vector<8x128xf32>
    %1069 = arith.addf %729, %1068 : vector<8x128xf32>
    %1070 = arith.cmpf ogt, %1069, %1065 : vector<8x128xf32>
    %1071 = arith.maximumf %1065, %1069 : vector<8x128xf32>
    %c3_i32_380 = arith.constant 3 : i32
    %1072 = vector.broadcast %c3_i32_380 : i32 to vector<8x128xi32>
    %1073 = arith.select %1070, %1072, %1067 : vector<8x128xi1>, vector<8x128xi32>
    %1074 = vector.broadcast %39 : f32 to vector<8x128xf32>
    %1075 = arith.addf %781, %1074 : vector<8x128xf32>
    %1076 = arith.cmpf ogt, %1075, %1071 : vector<8x128xf32>
    %1077 = arith.maximumf %1071, %1075 : vector<8x128xf32>
    %c4_i32_381 = arith.constant 4 : i32
    %1078 = vector.broadcast %c4_i32_381 : i32 to vector<8x128xi32>
    %1079 = arith.select %1076, %1078, %1073 : vector<8x128xi1>, vector<8x128xi32>
    %1080 = vector.broadcast %47 : f32 to vector<8x128xf32>
    %1081 = arith.addf %833, %1080 : vector<8x128xf32>
    %1082 = arith.cmpf ogt, %1081, %1077 : vector<8x128xf32>
    %1083 = arith.maximumf %1077, %1081 : vector<8x128xf32>
    %c5_i32_382 = arith.constant 5 : i32
    %1084 = vector.broadcast %c5_i32_382 : i32 to vector<8x128xi32>
    %1085 = arith.select %1082, %1084, %1079 : vector<8x128xi1>, vector<8x128xi32>
    %1086 = vector.broadcast %55 : f32 to vector<8x128xf32>
    %1087 = arith.addf %885, %1086 : vector<8x128xf32>
    %1088 = arith.cmpf ogt, %1087, %1083 : vector<8x128xf32>
    %1089 = arith.maximumf %1083, %1087 : vector<8x128xf32>
    %c6_i32_383 = arith.constant 6 : i32
    %1090 = vector.broadcast %c6_i32_383 : i32 to vector<8x128xi32>
    %1091 = arith.select %1088, %1090, %1085 : vector<8x128xi1>, vector<8x128xi32>
    %1092 = vector.broadcast %63 : f32 to vector<8x128xf32>
    %1093 = arith.addf %937, %1092 : vector<8x128xf32>
    %1094 = arith.cmpf ogt, %1093, %1089 : vector<8x128xf32>
    %1095 = arith.maximumf %1089, %1093 : vector<8x128xf32>
    %c7_i32_384 = arith.constant 7 : i32
    %1096 = vector.broadcast %c7_i32_384 : i32 to vector<8x128xi32>
    %1097 = arith.select %1094, %1096, %1091 : vector<8x128xi1>, vector<8x128xi32>
    %c0_385 = arith.constant 0 : index
    %1098 = arith.index_cast %c3_i32_354 : i32 to index
    %c2_386 = arith.constant 2 : index
    %c0_387 = arith.constant 0 : index
    %c0_388 = arith.constant 0 : index
    %1099 = vector.load %arg2[%c0_385, %1098, %c2_386, %c0_387, %c0_388] : memref<1x8x8x8x128xf32, #tpu.memory_space<vmem>>, vector<1x1x1x8x128xf32>
    %1100 = vector.shape_cast %1099 : vector<1x1x1x8x128xf32> to vector<8x128xf32>
    %1101 = arith.addf %1095, %1100 : vector<8x128xf32>
    %c6_i32_389 = arith.constant 6 : i32
    %1102 = vector.broadcast %c6_i32_389 : i32 to vector<8x128xi32>
    %1103 = arith.shli %1097, %1102 : vector<8x128xi32>
    %1104 = arith.ori %1052, %1103 : vector<8x128xi32>
    %1105 = arith.select %952, %1101, %681 : vector<8x128xi1>, vector<8x128xf32>
    %1106 = vector.broadcast %8 : f32 to vector<8x128xf32>
    %1107 = arith.addf %576, %1106 : vector<8x128xf32>
    %1108 = vector.broadcast %16 : f32 to vector<8x128xf32>
    %1109 = arith.addf %625, %1108 : vector<8x128xf32>
    %1110 = arith.cmpf ogt, %1109, %1107 : vector<8x128xf32>
    %1111 = arith.maximumf %1107, %1109 : vector<8x128xf32>
    %c1_i32_390 = arith.constant 1 : i32
    %1112 = vector.broadcast %c1_i32_390 : i32 to vector<8x128xi32>
    %1113 = arith.select %1110, %1112, %4 : vector<8x128xi1>, vector<8x128xi32>
    %1114 = vector.broadcast %24 : f32 to vector<8x128xf32>
    %1115 = arith.addf %677, %1114 : vector<8x128xf32>
    %1116 = arith.cmpf ogt, %1115, %1111 : vector<8x128xf32>
    %1117 = arith.maximumf %1111, %1115 : vector<8x128xf32>
    %c2_i32_391 = arith.constant 2 : i32
    %1118 = vector.broadcast %c2_i32_391 : i32 to vector<8x128xi32>
    %1119 = arith.select %1116, %1118, %1113 : vector<8x128xi1>, vector<8x128xi32>
    %1120 = vector.broadcast %32 : f32 to vector<8x128xf32>
    %1121 = arith.addf %729, %1120 : vector<8x128xf32>
    %1122 = arith.cmpf ogt, %1121, %1117 : vector<8x128xf32>
    %1123 = arith.maximumf %1117, %1121 : vector<8x128xf32>
    %c3_i32_392 = arith.constant 3 : i32
    %1124 = vector.broadcast %c3_i32_392 : i32 to vector<8x128xi32>
    %1125 = arith.select %1122, %1124, %1119 : vector<8x128xi1>, vector<8x128xi32>
    %1126 = vector.broadcast %40 : f32 to vector<8x128xf32>
    %1127 = arith.addf %781, %1126 : vector<8x128xf32>
    %1128 = arith.cmpf ogt, %1127, %1123 : vector<8x128xf32>
    %1129 = arith.maximumf %1123, %1127 : vector<8x128xf32>
    %c4_i32_393 = arith.constant 4 : i32
    %1130 = vector.broadcast %c4_i32_393 : i32 to vector<8x128xi32>
    %1131 = arith.select %1128, %1130, %1125 : vector<8x128xi1>, vector<8x128xi32>
    %1132 = vector.broadcast %48 : f32 to vector<8x128xf32>
    %1133 = arith.addf %833, %1132 : vector<8x128xf32>
    %1134 = arith.cmpf ogt, %1133, %1129 : vector<8x128xf32>
    %1135 = arith.maximumf %1129, %1133 : vector<8x128xf32>
    %c5_i32_394 = arith.constant 5 : i32
    %1136 = vector.broadcast %c5_i32_394 : i32 to vector<8x128xi32>
    %1137 = arith.select %1134, %1136, %1131 : vector<8x128xi1>, vector<8x128xi32>
    %1138 = vector.broadcast %56 : f32 to vector<8x128xf32>
    %1139 = arith.addf %885, %1138 : vector<8x128xf32>
    %1140 = arith.cmpf ogt, %1139, %1135 : vector<8x128xf32>
    %1141 = arith.maximumf %1135, %1139 : vector<8x128xf32>
    %c6_i32_395 = arith.constant 6 : i32
    %1142 = vector.broadcast %c6_i32_395 : i32 to vector<8x128xi32>
    %1143 = arith.select %1140, %1142, %1137 : vector<8x128xi1>, vector<8x128xi32>
    %1144 = vector.broadcast %64 : f32 to vector<8x128xf32>
    %1145 = arith.addf %937, %1144 : vector<8x128xf32>
    %1146 = arith.cmpf ogt, %1145, %1141 : vector<8x128xf32>
    %1147 = arith.maximumf %1141, %1145 : vector<8x128xf32>
    %c7_i32_396 = arith.constant 7 : i32
    %1148 = vector.broadcast %c7_i32_396 : i32 to vector<8x128xi32>
    %1149 = arith.select %1146, %1148, %1143 : vector<8x128xi1>, vector<8x128xi32>
    %c0_397 = arith.constant 0 : index
    %1150 = arith.index_cast %c3_i32_354 : i32 to index
    %c3_398 = arith.constant 3 : index
    %c0_399 = arith.constant 0 : index
    %c0_400 = arith.constant 0 : index
    %1151 = vector.load %arg2[%c0_397, %1150, %c3_398, %c0_399, %c0_400] : memref<1x8x8x8x128xf32, #tpu.memory_space<vmem>>, vector<1x1x1x8x128xf32>
    %1152 = vector.shape_cast %1151 : vector<1x1x1x8x128xf32> to vector<8x128xf32>
    %1153 = arith.addf %1147, %1152 : vector<8x128xf32>
    %c9_i32_401 = arith.constant 9 : i32
    %1154 = vector.broadcast %c9_i32_401 : i32 to vector<8x128xi32>
    %1155 = arith.shli %1149, %1154 : vector<8x128xi32>
    %1156 = arith.ori %1104, %1155 : vector<8x128xi32>
    %1157 = arith.select %952, %1153, %733 : vector<8x128xi1>, vector<8x128xf32>
    %1158 = vector.broadcast %9 : f32 to vector<8x128xf32>
    %1159 = arith.addf %576, %1158 : vector<8x128xf32>
    %1160 = vector.broadcast %17 : f32 to vector<8x128xf32>
    %1161 = arith.addf %625, %1160 : vector<8x128xf32>
    %1162 = arith.cmpf ogt, %1161, %1159 : vector<8x128xf32>
    %1163 = arith.maximumf %1159, %1161 : vector<8x128xf32>
    %c1_i32_402 = arith.constant 1 : i32
    %1164 = vector.broadcast %c1_i32_402 : i32 to vector<8x128xi32>
    %1165 = arith.select %1162, %1164, %4 : vector<8x128xi1>, vector<8x128xi32>
    %1166 = vector.broadcast %25 : f32 to vector<8x128xf32>
    %1167 = arith.addf %677, %1166 : vector<8x128xf32>
    %1168 = arith.cmpf ogt, %1167, %1163 : vector<8x128xf32>
    %1169 = arith.maximumf %1163, %1167 : vector<8x128xf32>
    %c2_i32_403 = arith.constant 2 : i32
    %1170 = vector.broadcast %c2_i32_403 : i32 to vector<8x128xi32>
    %1171 = arith.select %1168, %1170, %1165 : vector<8x128xi1>, vector<8x128xi32>
    %1172 = vector.broadcast %33 : f32 to vector<8x128xf32>
    %1173 = arith.addf %729, %1172 : vector<8x128xf32>
    %1174 = arith.cmpf ogt, %1173, %1169 : vector<8x128xf32>
    %1175 = arith.maximumf %1169, %1173 : vector<8x128xf32>
    %c3_i32_404 = arith.constant 3 : i32
    %1176 = vector.broadcast %c3_i32_404 : i32 to vector<8x128xi32>
    %1177 = arith.select %1174, %1176, %1171 : vector<8x128xi1>, vector<8x128xi32>
    %1178 = vector.broadcast %41 : f32 to vector<8x128xf32>
    %1179 = arith.addf %781, %1178 : vector<8x128xf32>
    %1180 = arith.cmpf ogt, %1179, %1175 : vector<8x128xf32>
    %1181 = arith.maximumf %1175, %1179 : vector<8x128xf32>
    %c4_i32_405 = arith.constant 4 : i32
    %1182 = vector.broadcast %c4_i32_405 : i32 to vector<8x128xi32>
    %1183 = arith.select %1180, %1182, %1177 : vector<8x128xi1>, vector<8x128xi32>
    %1184 = vector.broadcast %49 : f32 to vector<8x128xf32>
    %1185 = arith.addf %833, %1184 : vector<8x128xf32>
    %1186 = arith.cmpf ogt, %1185, %1181 : vector<8x128xf32>
    %1187 = arith.maximumf %1181, %1185 : vector<8x128xf32>
    %c5_i32_406 = arith.constant 5 : i32
    %1188 = vector.broadcast %c5_i32_406 : i32 to vector<8x128xi32>
    %1189 = arith.select %1186, %1188, %1183 : vector<8x128xi1>, vector<8x128xi32>
    %1190 = vector.broadcast %57 : f32 to vector<8x128xf32>
    %1191 = arith.addf %885, %1190 : vector<8x128xf32>
    %1192 = arith.cmpf ogt, %1191, %1187 : vector<8x128xf32>
    %1193 = arith.maximumf %1187, %1191 : vector<8x128xf32>
    %c6_i32_407 = arith.constant 6 : i32
    %1194 = vector.broadcast %c6_i32_407 : i32 to vector<8x128xi32>
    %1195 = arith.select %1192, %1194, %1189 : vector<8x128xi1>, vector<8x128xi32>
    %1196 = vector.broadcast %65 : f32 to vector<8x128xf32>
    %1197 = arith.addf %937, %1196 : vector<8x128xf32>
    %1198 = arith.cmpf ogt, %1197, %1193 : vector<8x128xf32>
    %1199 = arith.maximumf %1193, %1197 : vector<8x128xf32>
    %c7_i32_408 = arith.constant 7 : i32
    %1200 = vector.broadcast %c7_i32_408 : i32 to vector<8x128xi32>
    %1201 = arith.select %1198, %1200, %1195 : vector<8x128xi1>, vector<8x128xi32>
    %c0_409 = arith.constant 0 : index
    %1202 = arith.index_cast %c3_i32_354 : i32 to index
    %c4_410 = arith.constant 4 : index
    %c0_411 = arith.constant 0 : index
    %c0_412 = arith.constant 0 : index
    %1203 = vector.load %arg2[%c0_409, %1202, %c4_410, %c0_411, %c0_412] : memref<1x8x8x8x128xf32, #tpu.memory_space<vmem>>, vector<1x1x1x8x128xf32>
    %1204 = vector.shape_cast %1203 : vector<1x1x1x8x128xf32> to vector<8x128xf32>
    %1205 = arith.addf %1199, %1204 : vector<8x128xf32>
    %c12_i32_413 = arith.constant 12 : i32
    %1206 = vector.broadcast %c12_i32_413 : i32 to vector<8x128xi32>
    %1207 = arith.shli %1201, %1206 : vector<8x128xi32>
    %1208 = arith.ori %1156, %1207 : vector<8x128xi32>
    %1209 = arith.select %952, %1205, %785 : vector<8x128xi1>, vector<8x128xf32>
    %1210 = vector.broadcast %10 : f32 to vector<8x128xf32>
    %1211 = arith.addf %576, %1210 : vector<8x128xf32>
    %1212 = vector.broadcast %18 : f32 to vector<8x128xf32>
    %1213 = arith.addf %625, %1212 : vector<8x128xf32>
    %1214 = arith.cmpf ogt, %1213, %1211 : vector<8x128xf32>
    %1215 = arith.maximumf %1211, %1213 : vector<8x128xf32>
    %c1_i32_414 = arith.constant 1 : i32
    %1216 = vector.broadcast %c1_i32_414 : i32 to vector<8x128xi32>
    %1217 = arith.select %1214, %1216, %4 : vector<8x128xi1>, vector<8x128xi32>
    %1218 = vector.broadcast %26 : f32 to vector<8x128xf32>
    %1219 = arith.addf %677, %1218 : vector<8x128xf32>
    %1220 = arith.cmpf ogt, %1219, %1215 : vector<8x128xf32>
    %1221 = arith.maximumf %1215, %1219 : vector<8x128xf32>
    %c2_i32_415 = arith.constant 2 : i32
    %1222 = vector.broadcast %c2_i32_415 : i32 to vector<8x128xi32>
    %1223 = arith.select %1220, %1222, %1217 : vector<8x128xi1>, vector<8x128xi32>
    %1224 = vector.broadcast %34 : f32 to vector<8x128xf32>
    %1225 = arith.addf %729, %1224 : vector<8x128xf32>
    %1226 = arith.cmpf ogt, %1225, %1221 : vector<8x128xf32>
    %1227 = arith.maximumf %1221, %1225 : vector<8x128xf32>
    %c3_i32_416 = arith.constant 3 : i32
    %1228 = vector.broadcast %c3_i32_416 : i32 to vector<8x128xi32>
    %1229 = arith.select %1226, %1228, %1223 : vector<8x128xi1>, vector<8x128xi32>
    %1230 = vector.broadcast %42 : f32 to vector<8x128xf32>
    %1231 = arith.addf %781, %1230 : vector<8x128xf32>
    %1232 = arith.cmpf ogt, %1231, %1227 : vector<8x128xf32>
    %1233 = arith.maximumf %1227, %1231 : vector<8x128xf32>
    %c4_i32_417 = arith.constant 4 : i32
    %1234 = vector.broadcast %c4_i32_417 : i32 to vector<8x128xi32>
    %1235 = arith.select %1232, %1234, %1229 : vector<8x128xi1>, vector<8x128xi32>
    %1236 = vector.broadcast %50 : f32 to vector<8x128xf32>
    %1237 = arith.addf %833, %1236 : vector<8x128xf32>
    %1238 = arith.cmpf ogt, %1237, %1233 : vector<8x128xf32>
    %1239 = arith.maximumf %1233, %1237 : vector<8x128xf32>
    %c5_i32_418 = arith.constant 5 : i32
    %1240 = vector.broadcast %c5_i32_418 : i32 to vector<8x128xi32>
    %1241 = arith.select %1238, %1240, %1235 : vector<8x128xi1>, vector<8x128xi32>
    %1242 = vector.broadcast %58 : f32 to vector<8x128xf32>
    %1243 = arith.addf %885, %1242 : vector<8x128xf32>
    %1244 = arith.cmpf ogt, %1243, %1239 : vector<8x128xf32>
    %1245 = arith.maximumf %1239, %1243 : vector<8x128xf32>
    %c6_i32_419 = arith.constant 6 : i32
    %1246 = vector.broadcast %c6_i32_419 : i32 to vector<8x128xi32>
    %1247 = arith.select %1244, %1246, %1241 : vector<8x128xi1>, vector<8x128xi32>
    %1248 = vector.broadcast %66 : f32 to vector<8x128xf32>
    %1249 = arith.addf %937, %1248 : vector<8x128xf32>
    %1250 = arith.cmpf ogt, %1249, %1245 : vector<8x128xf32>
    %1251 = arith.maximumf %1245, %1249 : vector<8x128xf32>
    %c7_i32_420 = arith.constant 7 : i32
    %1252 = vector.broadcast %c7_i32_420 : i32 to vector<8x128xi32>
    %1253 = arith.select %1250, %1252, %1247 : vector<8x128xi1>, vector<8x128xi32>
    %c0_421 = arith.constant 0 : index
    %1254 = arith.index_cast %c3_i32_354 : i32 to index
    %c5_422 = arith.constant 5 : index
    %c0_423 = arith.constant 0 : index
    %c0_424 = arith.constant 0 : index
    %1255 = vector.load %arg2[%c0_421, %1254, %c5_422, %c0_423, %c0_424] : memref<1x8x8x8x128xf32, #tpu.memory_space<vmem>>, vector<1x1x1x8x128xf32>
    %1256 = vector.shape_cast %1255 : vector<1x1x1x8x128xf32> to vector<8x128xf32>
    %1257 = arith.addf %1251, %1256 : vector<8x128xf32>
    %c15_i32_425 = arith.constant 15 : i32
    %1258 = vector.broadcast %c15_i32_425 : i32 to vector<8x128xi32>
    %1259 = arith.shli %1253, %1258 : vector<8x128xi32>
    %1260 = arith.ori %1208, %1259 : vector<8x128xi32>
    %1261 = arith.select %952, %1257, %837 : vector<8x128xi1>, vector<8x128xf32>
    %1262 = vector.broadcast %11 : f32 to vector<8x128xf32>
    %1263 = arith.addf %576, %1262 : vector<8x128xf32>
    %1264 = vector.broadcast %19 : f32 to vector<8x128xf32>
    %1265 = arith.addf %625, %1264 : vector<8x128xf32>
    %1266 = arith.cmpf ogt, %1265, %1263 : vector<8x128xf32>
    %1267 = arith.maximumf %1263, %1265 : vector<8x128xf32>
    %c1_i32_426 = arith.constant 1 : i32
    %1268 = vector.broadcast %c1_i32_426 : i32 to vector<8x128xi32>
    %1269 = arith.select %1266, %1268, %4 : vector<8x128xi1>, vector<8x128xi32>
    %1270 = vector.broadcast %27 : f32 to vector<8x128xf32>
    %1271 = arith.addf %677, %1270 : vector<8x128xf32>
    %1272 = arith.cmpf ogt, %1271, %1267 : vector<8x128xf32>
    %1273 = arith.maximumf %1267, %1271 : vector<8x128xf32>
    %c2_i32_427 = arith.constant 2 : i32
    %1274 = vector.broadcast %c2_i32_427 : i32 to vector<8x128xi32>
    %1275 = arith.select %1272, %1274, %1269 : vector<8x128xi1>, vector<8x128xi32>
    %1276 = vector.broadcast %35 : f32 to vector<8x128xf32>
    %1277 = arith.addf %729, %1276 : vector<8x128xf32>
    %1278 = arith.cmpf ogt, %1277, %1273 : vector<8x128xf32>
    %1279 = arith.maximumf %1273, %1277 : vector<8x128xf32>
    %c3_i32_428 = arith.constant 3 : i32
    %1280 = vector.broadcast %c3_i32_428 : i32 to vector<8x128xi32>
    %1281 = arith.select %1278, %1280, %1275 : vector<8x128xi1>, vector<8x128xi32>
    %1282 = vector.broadcast %43 : f32 to vector<8x128xf32>
    %1283 = arith.addf %781, %1282 : vector<8x128xf32>
    %1284 = arith.cmpf ogt, %1283, %1279 : vector<8x128xf32>
    %1285 = arith.maximumf %1279, %1283 : vector<8x128xf32>
    %c4_i32_429 = arith.constant 4 : i32
    %1286 = vector.broadcast %c4_i32_429 : i32 to vector<8x128xi32>
    %1287 = arith.select %1284, %1286, %1281 : vector<8x128xi1>, vector<8x128xi32>
    %1288 = vector.broadcast %51 : f32 to vector<8x128xf32>
    %1289 = arith.addf %833, %1288 : vector<8x128xf32>
    %1290 = arith.cmpf ogt, %1289, %1285 : vector<8x128xf32>
    %1291 = arith.maximumf %1285, %1289 : vector<8x128xf32>
    %c5_i32_430 = arith.constant 5 : i32
    %1292 = vector.broadcast %c5_i32_430 : i32 to vector<8x128xi32>
    %1293 = arith.select %1290, %1292, %1287 : vector<8x128xi1>, vector<8x128xi32>
    %1294 = vector.broadcast %59 : f32 to vector<8x128xf32>
    %1295 = arith.addf %885, %1294 : vector<8x128xf32>
    %1296 = arith.cmpf ogt, %1295, %1291 : vector<8x128xf32>
    %1297 = arith.maximumf %1291, %1295 : vector<8x128xf32>
    %c6_i32_431 = arith.constant 6 : i32
    %1298 = vector.broadcast %c6_i32_431 : i32 to vector<8x128xi32>
    %1299 = arith.select %1296, %1298, %1293 : vector<8x128xi1>, vector<8x128xi32>
    %1300 = vector.broadcast %67 : f32 to vector<8x128xf32>
    %1301 = arith.addf %937, %1300 : vector<8x128xf32>
    %1302 = arith.cmpf ogt, %1301, %1297 : vector<8x128xf32>
    %1303 = arith.maximumf %1297, %1301 : vector<8x128xf32>
    %c7_i32_432 = arith.constant 7 : i32
    %1304 = vector.broadcast %c7_i32_432 : i32 to vector<8x128xi32>
    %1305 = arith.select %1302, %1304, %1299 : vector<8x128xi1>, vector<8x128xi32>
    %c0_433 = arith.constant 0 : index
    %1306 = arith.index_cast %c3_i32_354 : i32 to index
    %c6_434 = arith.constant 6 : index
    %c0_435 = arith.constant 0 : index
    %c0_436 = arith.constant 0 : index
    %1307 = vector.load %arg2[%c0_433, %1306, %c6_434, %c0_435, %c0_436] : memref<1x8x8x8x128xf32, #tpu.memory_space<vmem>>, vector<1x1x1x8x128xf32>
    %1308 = vector.shape_cast %1307 : vector<1x1x1x8x128xf32> to vector<8x128xf32>
    %1309 = arith.addf %1303, %1308 : vector<8x128xf32>
    %c18_i32_437 = arith.constant 18 : i32
    %1310 = vector.broadcast %c18_i32_437 : i32 to vector<8x128xi32>
    %1311 = arith.shli %1305, %1310 : vector<8x128xi32>
    %1312 = arith.ori %1260, %1311 : vector<8x128xi32>
    %1313 = arith.select %952, %1309, %889 : vector<8x128xi1>, vector<8x128xf32>
    %1314 = vector.broadcast %12 : f32 to vector<8x128xf32>
    %1315 = arith.addf %576, %1314 : vector<8x128xf32>
    %1316 = vector.broadcast %20 : f32 to vector<8x128xf32>
    %1317 = arith.addf %625, %1316 : vector<8x128xf32>
    %1318 = arith.cmpf ogt, %1317, %1315 : vector<8x128xf32>
    %1319 = arith.maximumf %1315, %1317 : vector<8x128xf32>
    %c1_i32_438 = arith.constant 1 : i32
    %1320 = vector.broadcast %c1_i32_438 : i32 to vector<8x128xi32>
    %1321 = arith.select %1318, %1320, %4 : vector<8x128xi1>, vector<8x128xi32>
    %1322 = vector.broadcast %28 : f32 to vector<8x128xf32>
    %1323 = arith.addf %677, %1322 : vector<8x128xf32>
    %1324 = arith.cmpf ogt, %1323, %1319 : vector<8x128xf32>
    %1325 = arith.maximumf %1319, %1323 : vector<8x128xf32>
    %c2_i32_439 = arith.constant 2 : i32
    %1326 = vector.broadcast %c2_i32_439 : i32 to vector<8x128xi32>
    %1327 = arith.select %1324, %1326, %1321 : vector<8x128xi1>, vector<8x128xi32>
    %1328 = vector.broadcast %36 : f32 to vector<8x128xf32>
    %1329 = arith.addf %729, %1328 : vector<8x128xf32>
    %1330 = arith.cmpf ogt, %1329, %1325 : vector<8x128xf32>
    %1331 = arith.maximumf %1325, %1329 : vector<8x128xf32>
    %c3_i32_440 = arith.constant 3 : i32
    %1332 = vector.broadcast %c3_i32_440 : i32 to vector<8x128xi32>
    %1333 = arith.select %1330, %1332, %1327 : vector<8x128xi1>, vector<8x128xi32>
    %1334 = vector.broadcast %44 : f32 to vector<8x128xf32>
    %1335 = arith.addf %781, %1334 : vector<8x128xf32>
    %1336 = arith.cmpf ogt, %1335, %1331 : vector<8x128xf32>
    %1337 = arith.maximumf %1331, %1335 : vector<8x128xf32>
    %c4_i32_441 = arith.constant 4 : i32
    %1338 = vector.broadcast %c4_i32_441 : i32 to vector<8x128xi32>
    %1339 = arith.select %1336, %1338, %1333 : vector<8x128xi1>, vector<8x128xi32>
    %1340 = vector.broadcast %52 : f32 to vector<8x128xf32>
    %1341 = arith.addf %833, %1340 : vector<8x128xf32>
    %1342 = arith.cmpf ogt, %1341, %1337 : vector<8x128xf32>
    %1343 = arith.maximumf %1337, %1341 : vector<8x128xf32>
    %c5_i32_442 = arith.constant 5 : i32
    %1344 = vector.broadcast %c5_i32_442 : i32 to vector<8x128xi32>
    %1345 = arith.select %1342, %1344, %1339 : vector<8x128xi1>, vector<8x128xi32>
    %1346 = vector.broadcast %60 : f32 to vector<8x128xf32>
    %1347 = arith.addf %885, %1346 : vector<8x128xf32>
    %1348 = arith.cmpf ogt, %1347, %1343 : vector<8x128xf32>
    %1349 = arith.maximumf %1343, %1347 : vector<8x128xf32>
    %c6_i32_443 = arith.constant 6 : i32
    %1350 = vector.broadcast %c6_i32_443 : i32 to vector<8x128xi32>
    %1351 = arith.select %1348, %1350, %1345 : vector<8x128xi1>, vector<8x128xi32>
    %1352 = vector.broadcast %68 : f32 to vector<8x128xf32>
    %1353 = arith.addf %937, %1352 : vector<8x128xf32>
    %1354 = arith.cmpf ogt, %1353, %1349 : vector<8x128xf32>
    %1355 = arith.maximumf %1349, %1353 : vector<8x128xf32>
    %c7_i32_444 = arith.constant 7 : i32
    %1356 = vector.broadcast %c7_i32_444 : i32 to vector<8x128xi32>
    %1357 = arith.select %1354, %1356, %1351 : vector<8x128xi1>, vector<8x128xi32>
    %c0_445 = arith.constant 0 : index
    %1358 = arith.index_cast %c3_i32_354 : i32 to index
    %c7_446 = arith.constant 7 : index
    %c0_447 = arith.constant 0 : index
    %c0_448 = arith.constant 0 : index
    %1359 = vector.load %arg2[%c0_445, %1358, %c7_446, %c0_447, %c0_448] : memref<1x8x8x8x128xf32, #tpu.memory_space<vmem>>, vector<1x1x1x8x128xf32>
    %1360 = vector.shape_cast %1359 : vector<1x1x1x8x128xf32> to vector<8x128xf32>
    %1361 = arith.addf %1355, %1360 : vector<8x128xf32>
    %c21_i32_449 = arith.constant 21 : i32
    %1362 = vector.broadcast %c21_i32_449 : i32 to vector<8x128xi32>
    %1363 = arith.shli %1357, %1362 : vector<8x128xi32>
    %1364 = arith.ori %1312, %1363 : vector<8x128xi32>
    %1365 = arith.select %952, %1361, %941 : vector<8x128xi1>, vector<8x128xf32>
    %c0_i32_450 = arith.constant 0 : i32
    %1366 = vector.broadcast %c0_i32_450 : i32 to vector<8x128xi32>
    %1367 = arith.select %950, %1364, %1366 : vector<8x128xi1>, vector<8x128xi32>
    %c1_i32_451 = arith.constant 1 : i32
    %1368 = arith.subi %c3_i32_354, %c1_i32_451 : i32
    %1369 = arith.index_cast %1368 : i32 to index
    %c0_452 = arith.constant 0 : index
    %c0_453 = arith.constant 0 : index
    %c0_454 = arith.constant 0 : index
    %1370 = vector.load %arg5[%1369, %c0_452, %c0_453, %c0_454] : memref<8x1x8x128xi32, #tpu.memory_space<vmem>>, vector<1x1x8x128xi32>
    %1371 = vector.shape_cast %1370 : vector<1x1x8x128xi32> to vector<8x128xi32>
    %1372 = vector.shape_cast %1367 : vector<8x128xi32> to vector<1x1x8x128xi32>
    tpu.vector_store %arg5[%1369, %c0_452, %c0_453, %c0_454], %1372 {strides = array<i32>} : memref<8x1x8x128xi32, #tpu.memory_space<vmem>>, vector<1x1x8x128xi32>,
    %c4_i32_455 = arith.constant 4 : i32
    %1373 = vector.broadcast %c4_i32_455 : i32 to vector<8x128xi32>
    %1374 = arith.cmpi slt, %1373, %1 : vector<8x128xi32>
    %1375 = vector.broadcast %c4_i32_455 : i32 to vector<8x128xi32>
    %1376 = arith.cmpi eq, %1375, %3 : vector<8x128xi32>
    %1377 = vector.broadcast %5 : f32 to vector<8x128xf32>
    %1378 = arith.addf %1000, %1377 : vector<8x128xf32>
    %1379 = vector.broadcast %13 : f32 to vector<8x128xf32>
    %1380 = arith.addf %1049, %1379 : vector<8x128xf32>
    %1381 = arith.cmpf ogt, %1380, %1378 : vector<8x128xf32>
    %1382 = arith.maximumf %1378, %1380 : vector<8x128xf32>
    %c1_i32_456 = arith.constant 1 : i32
    %1383 = vector.broadcast %c1_i32_456 : i32 to vector<8x128xi32>
    %1384 = arith.select %1381, %1383, %4 : vector<8x128xi1>, vector<8x128xi32>
    %1385 = vector.broadcast %21 : f32 to vector<8x128xf32>
    %1386 = arith.addf %1101, %1385 : vector<8x128xf32>
    %1387 = arith.cmpf ogt, %1386, %1382 : vector<8x128xf32>
    %1388 = arith.maximumf %1382, %1386 : vector<8x128xf32>
    %c2_i32_457 = arith.constant 2 : i32
    %1389 = vector.broadcast %c2_i32_457 : i32 to vector<8x128xi32>
    %1390 = arith.select %1387, %1389, %1384 : vector<8x128xi1>, vector<8x128xi32>
    %1391 = vector.broadcast %29 : f32 to vector<8x128xf32>
    %1392 = arith.addf %1153, %1391 : vector<8x128xf32>
    %1393 = arith.cmpf ogt, %1392, %1388 : vector<8x128xf32>
    %1394 = arith.maximumf %1388, %1392 : vector<8x128xf32>
    %c3_i32_458 = arith.constant 3 : i32
    %1395 = vector.broadcast %c3_i32_458 : i32 to vector<8x128xi32>
    %1396 = arith.select %1393, %1395, %1390 : vector<8x128xi1>, vector<8x128xi32>
    %1397 = vector.broadcast %37 : f32 to vector<8x128xf32>
    %1398 = arith.addf %1205, %1397 : vector<8x128xf32>
    %1399 = arith.cmpf ogt, %1398, %1394 : vector<8x128xf32>
    %1400 = arith.maximumf %1394, %1398 : vector<8x128xf32>
    %c4_i32_459 = arith.constant 4 : i32
    %1401 = vector.broadcast %c4_i32_459 : i32 to vector<8x128xi32>
    %1402 = arith.select %1399, %1401, %1396 : vector<8x128xi1>, vector<8x128xi32>
    %1403 = vector.broadcast %45 : f32 to vector<8x128xf32>
    %1404 = arith.addf %1257, %1403 : vector<8x128xf32>
    %1405 = arith.cmpf ogt, %1404, %1400 : vector<8x128xf32>
    %1406 = arith.maximumf %1400, %1404 : vector<8x128xf32>
    %c5_i32_460 = arith.constant 5 : i32
    %1407 = vector.broadcast %c5_i32_460 : i32 to vector<8x128xi32>
    %1408 = arith.select %1405, %1407, %1402 : vector<8x128xi1>, vector<8x128xi32>
    %1409 = vector.broadcast %53 : f32 to vector<8x128xf32>
    %1410 = arith.addf %1309, %1409 : vector<8x128xf32>
    %1411 = arith.cmpf ogt, %1410, %1406 : vector<8x128xf32>
    %1412 = arith.maximumf %1406, %1410 : vector<8x128xf32>
    %c6_i32_461 = arith.constant 6 : i32
    %1413 = vector.broadcast %c6_i32_461 : i32 to vector<8x128xi32>
    %1414 = arith.select %1411, %1413, %1408 : vector<8x128xi1>, vector<8x128xi32>
    %1415 = vector.broadcast %61 : f32 to vector<8x128xf32>
    %1416 = arith.addf %1361, %1415 : vector<8x128xf32>
    %1417 = arith.cmpf ogt, %1416, %1412 : vector<8x128xf32>
    %1418 = arith.maximumf %1412, %1416 : vector<8x128xf32>
    %c7_i32_462 = arith.constant 7 : i32
    %1419 = vector.broadcast %c7_i32_462 : i32 to vector<8x128xi32>
    %1420 = arith.select %1417, %1419, %1414 : vector<8x128xi1>, vector<8x128xi32>
    %c0_463 = arith.constant 0 : index
    %1421 = arith.index_cast %c4_i32_455 : i32 to index
    %c0_464 = arith.constant 0 : index
    %c0_465 = arith.constant 0 : index
    %c0_466 = arith.constant 0 : index
    %1422 = vector.load %arg2[%c0_463, %1421, %c0_464, %c0_465, %c0_466] : memref<1x8x8x8x128xf32, #tpu.memory_space<vmem>>, vector<1x1x1x8x128xf32>
    %1423 = vector.shape_cast %1422 : vector<1x1x1x8x128xf32> to vector<8x128xf32>
    %1424 = arith.addf %1418, %1423 : vector<8x128xf32>
    %1425 = arith.select %1376, %1424, %1001 : vector<8x128xi1>, vector<8x128xf32>
    %1426 = vector.broadcast %6 : f32 to vector<8x128xf32>
    %1427 = arith.addf %1000, %1426 : vector<8x128xf32>
    %1428 = vector.broadcast %14 : f32 to vector<8x128xf32>
    %1429 = arith.addf %1049, %1428 : vector<8x128xf32>
    %1430 = arith.cmpf ogt, %1429, %1427 : vector<8x128xf32>
    %1431 = arith.maximumf %1427, %1429 : vector<8x128xf32>
    %c1_i32_467 = arith.constant 1 : i32
    %1432 = vector.broadcast %c1_i32_467 : i32 to vector<8x128xi32>
    %1433 = arith.select %1430, %1432, %4 : vector<8x128xi1>, vector<8x128xi32>
    %1434 = vector.broadcast %22 : f32 to vector<8x128xf32>
    %1435 = arith.addf %1101, %1434 : vector<8x128xf32>
    %1436 = arith.cmpf ogt, %1435, %1431 : vector<8x128xf32>
    %1437 = arith.maximumf %1431, %1435 : vector<8x128xf32>
    %c2_i32_468 = arith.constant 2 : i32
    %1438 = vector.broadcast %c2_i32_468 : i32 to vector<8x128xi32>
    %1439 = arith.select %1436, %1438, %1433 : vector<8x128xi1>, vector<8x128xi32>
    %1440 = vector.broadcast %30 : f32 to vector<8x128xf32>
    %1441 = arith.addf %1153, %1440 : vector<8x128xf32>
    %1442 = arith.cmpf ogt, %1441, %1437 : vector<8x128xf32>
    %1443 = arith.maximumf %1437, %1441 : vector<8x128xf32>
    %c3_i32_469 = arith.constant 3 : i32
    %1444 = vector.broadcast %c3_i32_469 : i32 to vector<8x128xi32>
    %1445 = arith.select %1442, %1444, %1439 : vector<8x128xi1>, vector<8x128xi32>
    %1446 = vector.broadcast %38 : f32 to vector<8x128xf32>
    %1447 = arith.addf %1205, %1446 : vector<8x128xf32>
    %1448 = arith.cmpf ogt, %1447, %1443 : vector<8x128xf32>
    %1449 = arith.maximumf %1443, %1447 : vector<8x128xf32>
    %c4_i32_470 = arith.constant 4 : i32
    %1450 = vector.broadcast %c4_i32_470 : i32 to vector<8x128xi32>
    %1451 = arith.select %1448, %1450, %1445 : vector<8x128xi1>, vector<8x128xi32>
    %1452 = vector.broadcast %46 : f32 to vector<8x128xf32>
    %1453 = arith.addf %1257, %1452 : vector<8x128xf32>
    %1454 = arith.cmpf ogt, %1453, %1449 : vector<8x128xf32>
    %1455 = arith.maximumf %1449, %1453 : vector<8x128xf32>
    %c5_i32_471 = arith.constant 5 : i32
    %1456 = vector.broadcast %c5_i32_471 : i32 to vector<8x128xi32>
    %1457 = arith.select %1454, %1456, %1451 : vector<8x128xi1>, vector<8x128xi32>
    %1458 = vector.broadcast %54 : f32 to vector<8x128xf32>
    %1459 = arith.addf %1309, %1458 : vector<8x128xf32>
    %1460 = arith.cmpf ogt, %1459, %1455 : vector<8x128xf32>
    %1461 = arith.maximumf %1455, %1459 : vector<8x128xf32>
    %c6_i32_472 = arith.constant 6 : i32
    %1462 = vector.broadcast %c6_i32_472 : i32 to vector<8x128xi32>
    %1463 = arith.select %1460, %1462, %1457 : vector<8x128xi1>, vector<8x128xi32>
    %1464 = vector.broadcast %62 : f32 to vector<8x128xf32>
    %1465 = arith.addf %1361, %1464 : vector<8x128xf32>
    %1466 = arith.cmpf ogt, %1465, %1461 : vector<8x128xf32>
    %1467 = arith.maximumf %1461, %1465 : vector<8x128xf32>
    %c7_i32_473 = arith.constant 7 : i32
    %1468 = vector.broadcast %c7_i32_473 : i32 to vector<8x128xi32>
    %1469 = arith.select %1466, %1468, %1463 : vector<8x128xi1>, vector<8x128xi32>
    %c0_474 = arith.constant 0 : index
    %1470 = arith.index_cast %c4_i32_455 : i32 to index
    %c1_475 = arith.constant 1 : index
    %c0_476 = arith.constant 0 : index
    %c0_477 = arith.constant 0 : index
    %1471 = vector.load %arg2[%c0_474, %1470, %c1_475, %c0_476, %c0_477] : memref<1x8x8x8x128xf32, #tpu.memory_space<vmem>>, vector<1x1x1x8x128xf32>
    %1472 = vector.shape_cast %1471 : vector<1x1x1x8x128xf32> to vector<8x128xf32>
    %1473 = arith.addf %1467, %1472 : vector<8x128xf32>
    %c3_i32_478 = arith.constant 3 : i32
    %1474 = vector.broadcast %c3_i32_478 : i32 to vector<8x128xi32>
    %1475 = arith.shli %1469, %1474 : vector<8x128xi32>
    %1476 = arith.ori %1420, %1475 : vector<8x128xi32>
    %1477 = arith.select %1376, %1473, %1053 : vector<8x128xi1>, vector<8x128xf32>
    %1478 = vector.broadcast %7 : f32 to vector<8x128xf32>
    %1479 = arith.addf %1000, %1478 : vector<8x128xf32>
    %1480 = vector.broadcast %15 : f32 to vector<8x128xf32>
    %1481 = arith.addf %1049, %1480 : vector<8x128xf32>
    %1482 = arith.cmpf ogt, %1481, %1479 : vector<8x128xf32>
    %1483 = arith.maximumf %1479, %1481 : vector<8x128xf32>
    %c1_i32_479 = arith.constant 1 : i32
    %1484 = vector.broadcast %c1_i32_479 : i32 to vector<8x128xi32>
    %1485 = arith.select %1482, %1484, %4 : vector<8x128xi1>, vector<8x128xi32>
    %1486 = vector.broadcast %23 : f32 to vector<8x128xf32>
    %1487 = arith.addf %1101, %1486 : vector<8x128xf32>
    %1488 = arith.cmpf ogt, %1487, %1483 : vector<8x128xf32>
    %1489 = arith.maximumf %1483, %1487 : vector<8x128xf32>
    %c2_i32_480 = arith.constant 2 : i32
    %1490 = vector.broadcast %c2_i32_480 : i32 to vector<8x128xi32>
    %1491 = arith.select %1488, %1490, %1485 : vector<8x128xi1>, vector<8x128xi32>
    %1492 = vector.broadcast %31 : f32 to vector<8x128xf32>
    %1493 = arith.addf %1153, %1492 : vector<8x128xf32>
    %1494 = arith.cmpf ogt, %1493, %1489 : vector<8x128xf32>
    %1495 = arith.maximumf %1489, %1493 : vector<8x128xf32>
    %c3_i32_481 = arith.constant 3 : i32
    %1496 = vector.broadcast %c3_i32_481 : i32 to vector<8x128xi32>
    %1497 = arith.select %1494, %1496, %1491 : vector<8x128xi1>, vector<8x128xi32>
    %1498 = vector.broadcast %39 : f32 to vector<8x128xf32>
    %1499 = arith.addf %1205, %1498 : vector<8x128xf32>
    %1500 = arith.cmpf ogt, %1499, %1495 : vector<8x128xf32>
    %1501 = arith.maximumf %1495, %1499 : vector<8x128xf32>
    %c4_i32_482 = arith.constant 4 : i32
    %1502 = vector.broadcast %c4_i32_482 : i32 to vector<8x128xi32>
    %1503 = arith.select %1500, %1502, %1497 : vector<8x128xi1>, vector<8x128xi32>
    %1504 = vector.broadcast %47 : f32 to vector<8x128xf32>
    %1505 = arith.addf %1257, %1504 : vector<8x128xf32>
    %1506 = arith.cmpf ogt, %1505, %1501 : vector<8x128xf32>
    %1507 = arith.maximumf %1501, %1505 : vector<8x128xf32>
    %c5_i32_483 = arith.constant 5 : i32
    %1508 = vector.broadcast %c5_i32_483 : i32 to vector<8x128xi32>
    %1509 = arith.select %1506, %1508, %1503 : vector<8x128xi1>, vector<8x128xi32>
    %1510 = vector.broadcast %55 : f32 to vector<8x128xf32>
    %1511 = arith.addf %1309, %1510 : vector<8x128xf32>
    %1512 = arith.cmpf ogt, %1511, %1507 : vector<8x128xf32>
    %1513 = arith.maximumf %1507, %1511 : vector<8x128xf32>
    %c6_i32_484 = arith.constant 6 : i32
    %1514 = vector.broadcast %c6_i32_484 : i32 to vector<8x128xi32>
    %1515 = arith.select %1512, %1514, %1509 : vector<8x128xi1>, vector<8x128xi32>
    %1516 = vector.broadcast %63 : f32 to vector<8x128xf32>
    %1517 = arith.addf %1361, %1516 : vector<8x128xf32>
    %1518 = arith.cmpf ogt, %1517, %1513 : vector<8x128xf32>
    %1519 = arith.maximumf %1513, %1517 : vector<8x128xf32>
    %c7_i32_485 = arith.constant 7 : i32
    %1520 = vector.broadcast %c7_i32_485 : i32 to vector<8x128xi32>
    %1521 = arith.select %1518, %1520, %1515 : vector<8x128xi1>, vector<8x128xi32>
    %c0_486 = arith.constant 0 : index
    %1522 = arith.index_cast %c4_i32_455 : i32 to index
    %c2_487 = arith.constant 2 : index
    %c0_488 = arith.constant 0 : index
    %c0_489 = arith.constant 0 : index
    %1523 = vector.load %arg2[%c0_486, %1522, %c2_487, %c0_488, %c0_489] : memref<1x8x8x8x128xf32, #tpu.memory_space<vmem>>, vector<1x1x1x8x128xf32>
    %1524 = vector.shape_cast %1523 : vector<1x1x1x8x128xf32> to vector<8x128xf32>
    %1525 = arith.addf %1519, %1524 : vector<8x128xf32>
    %c6_i32_490 = arith.constant 6 : i32
    %1526 = vector.broadcast %c6_i32_490 : i32 to vector<8x128xi32>
    %1527 = arith.shli %1521, %1526 : vector<8x128xi32>
    %1528 = arith.ori %1476, %1527 : vector<8x128xi32>
    %1529 = arith.select %1376, %1525, %1105 : vector<8x128xi1>, vector<8x128xf32>
    %1530 = vector.broadcast %8 : f32 to vector<8x128xf32>
    %1531 = arith.addf %1000, %1530 : vector<8x128xf32>
    %1532 = vector.broadcast %16 : f32 to vector<8x128xf32>
    %1533 = arith.addf %1049, %1532 : vector<8x128xf32>
    %1534 = arith.cmpf ogt, %1533, %1531 : vector<8x128xf32>
    %1535 = arith.maximumf %1531, %1533 : vector<8x128xf32>
    %c1_i32_491 = arith.constant 1 : i32
    %1536 = vector.broadcast %c1_i32_491 : i32 to vector<8x128xi32>
    %1537 = arith.select %1534, %1536, %4 : vector<8x128xi1>, vector<8x128xi32>
    %1538 = vector.broadcast %24 : f32 to vector<8x128xf32>
    %1539 = arith.addf %1101, %1538 : vector<8x128xf32>
    %1540 = arith.cmpf ogt, %1539, %1535 : vector<8x128xf32>
    %1541 = arith.maximumf %1535, %1539 : vector<8x128xf32>
    %c2_i32_492 = arith.constant 2 : i32
    %1542 = vector.broadcast %c2_i32_492 : i32 to vector<8x128xi32>
    %1543 = arith.select %1540, %1542, %1537 : vector<8x128xi1>, vector<8x128xi32>
    %1544 = vector.broadcast %32 : f32 to vector<8x128xf32>
    %1545 = arith.addf %1153, %1544 : vector<8x128xf32>
    %1546 = arith.cmpf ogt, %1545, %1541 : vector<8x128xf32>
    %1547 = arith.maximumf %1541, %1545 : vector<8x128xf32>
    %c3_i32_493 = arith.constant 3 : i32
    %1548 = vector.broadcast %c3_i32_493 : i32 to vector<8x128xi32>
    %1549 = arith.select %1546, %1548, %1543 : vector<8x128xi1>, vector<8x128xi32>
    %1550 = vector.broadcast %40 : f32 to vector<8x128xf32>
    %1551 = arith.addf %1205, %1550 : vector<8x128xf32>
    %1552 = arith.cmpf ogt, %1551, %1547 : vector<8x128xf32>
    %1553 = arith.maximumf %1547, %1551 : vector<8x128xf32>
    %c4_i32_494 = arith.constant 4 : i32
    %1554 = vector.broadcast %c4_i32_494 : i32 to vector<8x128xi32>
    %1555 = arith.select %1552, %1554, %1549 : vector<8x128xi1>, vector<8x128xi32>
    %1556 = vector.broadcast %48 : f32 to vector<8x128xf32>
    %1557 = arith.addf %1257, %1556 : vector<8x128xf32>
    %1558 = arith.cmpf ogt, %1557, %1553 : vector<8x128xf32>
    %1559 = arith.maximumf %1553, %1557 : vector<8x128xf32>
    %c5_i32_495 = arith.constant 5 : i32
    %1560 = vector.broadcast %c5_i32_495 : i32 to vector<8x128xi32>
    %1561 = arith.select %1558, %1560, %1555 : vector<8x128xi1>, vector<8x128xi32>
    %1562 = vector.broadcast %56 : f32 to vector<8x128xf32>
    %1563 = arith.addf %1309, %1562 : vector<8x128xf32>
    %1564 = arith.cmpf ogt, %1563, %1559 : vector<8x128xf32>
    %1565 = arith.maximumf %1559, %1563 : vector<8x128xf32>
    %c6_i32_496 = arith.constant 6 : i32
    %1566 = vector.broadcast %c6_i32_496 : i32 to vector<8x128xi32>
    %1567 = arith.select %1564, %1566, %1561 : vector<8x128xi1>, vector<8x128xi32>
    %1568 = vector.broadcast %64 : f32 to vector<8x128xf32>
    %1569 = arith.addf %1361, %1568 : vector<8x128xf32>
    %1570 = arith.cmpf ogt, %1569, %1565 : vector<8x128xf32>
    %1571 = arith.maximumf %1565, %1569 : vector<8x128xf32>
    %c7_i32_497 = arith.constant 7 : i32
    %1572 = vector.broadcast %c7_i32_497 : i32 to vector<8x128xi32>
    %1573 = arith.select %1570, %1572, %1567 : vector<8x128xi1>, vector<8x128xi32>
    %c0_498 = arith.constant 0 : index
    %1574 = arith.index_cast %c4_i32_455 : i32 to index
    %c3_499 = arith.constant 3 : index
    %c0_500 = arith.constant 0 : index
    %c0_501 = arith.constant 0 : index
    %1575 = vector.load %arg2[%c0_498, %1574, %c3_499, %c0_500, %c0_501] : memref<1x8x8x8x128xf32, #tpu.memory_space<vmem>>, vector<1x1x1x8x128xf32>
    %1576 = vector.shape_cast %1575 : vector<1x1x1x8x128xf32> to vector<8x128xf32>
    %1577 = arith.addf %1571, %1576 : vector<8x128xf32>
    %c9_i32_502 = arith.constant 9 : i32
    %1578 = vector.broadcast %c9_i32_502 : i32 to vector<8x128xi32>
    %1579 = arith.shli %1573, %1578 : vector<8x128xi32>
    %1580 = arith.ori %1528, %1579 : vector<8x128xi32>
    %1581 = arith.select %1376, %1577, %1157 : vector<8x128xi1>, vector<8x128xf32>
    %1582 = vector.broadcast %9 : f32 to vector<8x128xf32>
    %1583 = arith.addf %1000, %1582 : vector<8x128xf32>
    %1584 = vector.broadcast %17 : f32 to vector<8x128xf32>
    %1585 = arith.addf %1049, %1584 : vector<8x128xf32>
    %1586 = arith.cmpf ogt, %1585, %1583 : vector<8x128xf32>
    %1587 = arith.maximumf %1583, %1585 : vector<8x128xf32>
    %c1_i32_503 = arith.constant 1 : i32
    %1588 = vector.broadcast %c1_i32_503 : i32 to vector<8x128xi32>
    %1589 = arith.select %1586, %1588, %4 : vector<8x128xi1>, vector<8x128xi32>
    %1590 = vector.broadcast %25 : f32 to vector<8x128xf32>
    %1591 = arith.addf %1101, %1590 : vector<8x128xf32>
    %1592 = arith.cmpf ogt, %1591, %1587 : vector<8x128xf32>
    %1593 = arith.maximumf %1587, %1591 : vector<8x128xf32>
    %c2_i32_504 = arith.constant 2 : i32
    %1594 = vector.broadcast %c2_i32_504 : i32 to vector<8x128xi32>
    %1595 = arith.select %1592, %1594, %1589 : vector<8x128xi1>, vector<8x128xi32>
    %1596 = vector.broadcast %33 : f32 to vector<8x128xf32>
    %1597 = arith.addf %1153, %1596 : vector<8x128xf32>
    %1598 = arith.cmpf ogt, %1597, %1593 : vector<8x128xf32>
    %1599 = arith.maximumf %1593, %1597 : vector<8x128xf32>
    %c3_i32_505 = arith.constant 3 : i32
    %1600 = vector.broadcast %c3_i32_505 : i32 to vector<8x128xi32>
    %1601 = arith.select %1598, %1600, %1595 : vector<8x128xi1>, vector<8x128xi32>
    %1602 = vector.broadcast %41 : f32 to vector<8x128xf32>
    %1603 = arith.addf %1205, %1602 : vector<8x128xf32>
    %1604 = arith.cmpf ogt, %1603, %1599 : vector<8x128xf32>
    %1605 = arith.maximumf %1599, %1603 : vector<8x128xf32>
    %c4_i32_506 = arith.constant 4 : i32
    %1606 = vector.broadcast %c4_i32_506 : i32 to vector<8x128xi32>
    %1607 = arith.select %1604, %1606, %1601 : vector<8x128xi1>, vector<8x128xi32>
    %1608 = vector.broadcast %49 : f32 to vector<8x128xf32>
    %1609 = arith.addf %1257, %1608 : vector<8x128xf32>
    %1610 = arith.cmpf ogt, %1609, %1605 : vector<8x128xf32>
    %1611 = arith.maximumf %1605, %1609 : vector<8x128xf32>
    %c5_i32_507 = arith.constant 5 : i32
    %1612 = vector.broadcast %c5_i32_507 : i32 to vector<8x128xi32>
    %1613 = arith.select %1610, %1612, %1607 : vector<8x128xi1>, vector<8x128xi32>
    %1614 = vector.broadcast %57 : f32 to vector<8x128xf32>
    %1615 = arith.addf %1309, %1614 : vector<8x128xf32>
    %1616 = arith.cmpf ogt, %1615, %1611 : vector<8x128xf32>
    %1617 = arith.maximumf %1611, %1615 : vector<8x128xf32>
    %c6_i32_508 = arith.constant 6 : i32
    %1618 = vector.broadcast %c6_i32_508 : i32 to vector<8x128xi32>
    %1619 = arith.select %1616, %1618, %1613 : vector<8x128xi1>, vector<8x128xi32>
    %1620 = vector.broadcast %65 : f32 to vector<8x128xf32>
    %1621 = arith.addf %1361, %1620 : vector<8x128xf32>
    %1622 = arith.cmpf ogt, %1621, %1617 : vector<8x128xf32>
    %1623 = arith.maximumf %1617, %1621 : vector<8x128xf32>
    %c7_i32_509 = arith.constant 7 : i32
    %1624 = vector.broadcast %c7_i32_509 : i32 to vector<8x128xi32>
    %1625 = arith.select %1622, %1624, %1619 : vector<8x128xi1>, vector<8x128xi32>
    %c0_510 = arith.constant 0 : index
    %1626 = arith.index_cast %c4_i32_455 : i32 to index
    %c4_511 = arith.constant 4 : index
    %c0_512 = arith.constant 0 : index
    %c0_513 = arith.constant 0 : index
    %1627 = vector.load %arg2[%c0_510, %1626, %c4_511, %c0_512, %c0_513] : memref<1x8x8x8x128xf32, #tpu.memory_space<vmem>>, vector<1x1x1x8x128xf32>
    %1628 = vector.shape_cast %1627 : vector<1x1x1x8x128xf32> to vector<8x128xf32>
    %1629 = arith.addf %1623, %1628 : vector<8x128xf32>
    %c12_i32_514 = arith.constant 12 : i32
    %1630 = vector.broadcast %c12_i32_514 : i32 to vector<8x128xi32>
    %1631 = arith.shli %1625, %1630 : vector<8x128xi32>
    %1632 = arith.ori %1580, %1631 : vector<8x128xi32>
    %1633 = arith.select %1376, %1629, %1209 : vector<8x128xi1>, vector<8x128xf32>
    %1634 = vector.broadcast %10 : f32 to vector<8x128xf32>
    %1635 = arith.addf %1000, %1634 : vector<8x128xf32>
    %1636 = vector.broadcast %18 : f32 to vector<8x128xf32>
    %1637 = arith.addf %1049, %1636 : vector<8x128xf32>
    %1638 = arith.cmpf ogt, %1637, %1635 : vector<8x128xf32>
    %1639 = arith.maximumf %1635, %1637 : vector<8x128xf32>
    %c1_i32_515 = arith.constant 1 : i32
    %1640 = vector.broadcast %c1_i32_515 : i32 to vector<8x128xi32>
    %1641 = arith.select %1638, %1640, %4 : vector<8x128xi1>, vector<8x128xi32>
    %1642 = vector.broadcast %26 : f32 to vector<8x128xf32>
    %1643 = arith.addf %1101, %1642 : vector<8x128xf32>
    %1644 = arith.cmpf ogt, %1643, %1639 : vector<8x128xf32>
    %1645 = arith.maximumf %1639, %1643 : vector<8x128xf32>
    %c2_i32_516 = arith.constant 2 : i32
    %1646 = vector.broadcast %c2_i32_516 : i32 to vector<8x128xi32>
    %1647 = arith.select %1644, %1646, %1641 : vector<8x128xi1>, vector<8x128xi32>
    %1648 = vector.broadcast %34 : f32 to vector<8x128xf32>
    %1649 = arith.addf %1153, %1648 : vector<8x128xf32>
    %1650 = arith.cmpf ogt, %1649, %1645 : vector<8x128xf32>
    %1651 = arith.maximumf %1645, %1649 : vector<8x128xf32>
    %c3_i32_517 = arith.constant 3 : i32
    %1652 = vector.broadcast %c3_i32_517 : i32 to vector<8x128xi32>
    %1653 = arith.select %1650, %1652, %1647 : vector<8x128xi1>, vector<8x128xi32>
    %1654 = vector.broadcast %42 : f32 to vector<8x128xf32>
    %1655 = arith.addf %1205, %1654 : vector<8x128xf32>
    %1656 = arith.cmpf ogt, %1655, %1651 : vector<8x128xf32>
    %1657 = arith.maximumf %1651, %1655 : vector<8x128xf32>
    %c4_i32_518 = arith.constant 4 : i32
    %1658 = vector.broadcast %c4_i32_518 : i32 to vector<8x128xi32>
    %1659 = arith.select %1656, %1658, %1653 : vector<8x128xi1>, vector<8x128xi32>
    %1660 = vector.broadcast %50 : f32 to vector<8x128xf32>
    %1661 = arith.addf %1257, %1660 : vector<8x128xf32>
    %1662 = arith.cmpf ogt, %1661, %1657 : vector<8x128xf32>
    %1663 = arith.maximumf %1657, %1661 : vector<8x128xf32>
    %c5_i32_519 = arith.constant 5 : i32
    %1664 = vector.broadcast %c5_i32_519 : i32 to vector<8x128xi32>
    %1665 = arith.select %1662, %1664, %1659 : vector<8x128xi1>, vector<8x128xi32>
    %1666 = vector.broadcast %58 : f32 to vector<8x128xf32>
    %1667 = arith.addf %1309, %1666 : vector<8x128xf32>
    %1668 = arith.cmpf ogt, %1667, %1663 : vector<8x128xf32>
    %1669 = arith.maximumf %1663, %1667 : vector<8x128xf32>
    %c6_i32_520 = arith.constant 6 : i32
    %1670 = vector.broadcast %c6_i32_520 : i32 to vector<8x128xi32>
    %1671 = arith.select %1668, %1670, %1665 : vector<8x128xi1>, vector<8x128xi32>
    %1672 = vector.broadcast %66 : f32 to vector<8x128xf32>
    %1673 = arith.addf %1361, %1672 : vector<8x128xf32>
    %1674 = arith.cmpf ogt, %1673, %1669 : vector<8x128xf32>
    %1675 = arith.maximumf %1669, %1673 : vector<8x128xf32>
    %c7_i32_521 = arith.constant 7 : i32
    %1676 = vector.broadcast %c7_i32_521 : i32 to vector<8x128xi32>
    %1677 = arith.select %1674, %1676, %1671 : vector<8x128xi1>, vector<8x128xi32>
    %c0_522 = arith.constant 0 : index
    %1678 = arith.index_cast %c4_i32_455 : i32 to index
    %c5_523 = arith.constant 5 : index
    %c0_524 = arith.constant 0 : index
    %c0_525 = arith.constant 0 : index
    %1679 = vector.load %arg2[%c0_522, %1678, %c5_523, %c0_524, %c0_525] : memref<1x8x8x8x128xf32, #tpu.memory_space<vmem>>, vector<1x1x1x8x128xf32>
    %1680 = vector.shape_cast %1679 : vector<1x1x1x8x128xf32> to vector<8x128xf32>
    %1681 = arith.addf %1675, %1680 : vector<8x128xf32>
    %c15_i32_526 = arith.constant 15 : i32
    %1682 = vector.broadcast %c15_i32_526 : i32 to vector<8x128xi32>
    %1683 = arith.shli %1677, %1682 : vector<8x128xi32>
    %1684 = arith.ori %1632, %1683 : vector<8x128xi32>
    %1685 = arith.select %1376, %1681, %1261 : vector<8x128xi1>, vector<8x128xf32>
    %1686 = vector.broadcast %11 : f32 to vector<8x128xf32>
    %1687 = arith.addf %1000, %1686 : vector<8x128xf32>
    %1688 = vector.broadcast %19 : f32 to vector<8x128xf32>
    %1689 = arith.addf %1049, %1688 : vector<8x128xf32>
    %1690 = arith.cmpf ogt, %1689, %1687 : vector<8x128xf32>
    %1691 = arith.maximumf %1687, %1689 : vector<8x128xf32>
    %c1_i32_527 = arith.constant 1 : i32
    %1692 = vector.broadcast %c1_i32_527 : i32 to vector<8x128xi32>
    %1693 = arith.select %1690, %1692, %4 : vector<8x128xi1>, vector<8x128xi32>
    %1694 = vector.broadcast %27 : f32 to vector<8x128xf32>
    %1695 = arith.addf %1101, %1694 : vector<8x128xf32>
    %1696 = arith.cmpf ogt, %1695, %1691 : vector<8x128xf32>
    %1697 = arith.maximumf %1691, %1695 : vector<8x128xf32>
    %c2_i32_528 = arith.constant 2 : i32
    %1698 = vector.broadcast %c2_i32_528 : i32 to vector<8x128xi32>
    %1699 = arith.select %1696, %1698, %1693 : vector<8x128xi1>, vector<8x128xi32>
    %1700 = vector.broadcast %35 : f32 to vector<8x128xf32>
    %1701 = arith.addf %1153, %1700 : vector<8x128xf32>
    %1702 = arith.cmpf ogt, %1701, %1697 : vector<8x128xf32>
    %1703 = arith.maximumf %1697, %1701 : vector<8x128xf32>
    %c3_i32_529 = arith.constant 3 : i32
    %1704 = vector.broadcast %c3_i32_529 : i32 to vector<8x128xi32>
    %1705 = arith.select %1702, %1704, %1699 : vector<8x128xi1>, vector<8x128xi32>
    %1706 = vector.broadcast %43 : f32 to vector<8x128xf32>
    %1707 = arith.addf %1205, %1706 : vector<8x128xf32>
    %1708 = arith.cmpf ogt, %1707, %1703 : vector<8x128xf32>
    %1709 = arith.maximumf %1703, %1707 : vector<8x128xf32>
    %c4_i32_530 = arith.constant 4 : i32
    %1710 = vector.broadcast %c4_i32_530 : i32 to vector<8x128xi32>
    %1711 = arith.select %1708, %1710, %1705 : vector<8x128xi1>, vector<8x128xi32>
    %1712 = vector.broadcast %51 : f32 to vector<8x128xf32>
    %1713 = arith.addf %1257, %1712 : vector<8x128xf32>
    %1714 = arith.cmpf ogt, %1713, %1709 : vector<8x128xf32>
    %1715 = arith.maximumf %1709, %1713 : vector<8x128xf32>
    %c5_i32_531 = arith.constant 5 : i32
    %1716 = vector.broadcast %c5_i32_531 : i32 to vector<8x128xi32>
    %1717 = arith.select %1714, %1716, %1711 : vector<8x128xi1>, vector<8x128xi32>
    %1718 = vector.broadcast %59 : f32 to vector<8x128xf32>
    %1719 = arith.addf %1309, %1718 : vector<8x128xf32>
    %1720 = arith.cmpf ogt, %1719, %1715 : vector<8x128xf32>
    %1721 = arith.maximumf %1715, %1719 : vector<8x128xf32>
    %c6_i32_532 = arith.constant 6 : i32
    %1722 = vector.broadcast %c6_i32_532 : i32 to vector<8x128xi32>
    %1723 = arith.select %1720, %1722, %1717 : vector<8x128xi1>, vector<8x128xi32>
    %1724 = vector.broadcast %67 : f32 to vector<8x128xf32>
    %1725 = arith.addf %1361, %1724 : vector<8x128xf32>
    %1726 = arith.cmpf ogt, %1725, %1721 : vector<8x128xf32>
    %1727 = arith.maximumf %1721, %1725 : vector<8x128xf32>
    %c7_i32_533 = arith.constant 7 : i32
    %1728 = vector.broadcast %c7_i32_533 : i32 to vector<8x128xi32>
    %1729 = arith.select %1726, %1728, %1723 : vector<8x128xi1>, vector<8x128xi32>
    %c0_534 = arith.constant 0 : index
    %1730 = arith.index_cast %c4_i32_455 : i32 to index
    %c6_535 = arith.constant 6 : index
    %c0_536 = arith.constant 0 : index
    %c0_537 = arith.constant 0 : index
    %1731 = vector.load %arg2[%c0_534, %1730, %c6_535, %c0_536, %c0_537] : memref<1x8x8x8x128xf32, #tpu.memory_space<vmem>>, vector<1x1x1x8x128xf32>
    %1732 = vector.shape_cast %1731 : vector<1x1x1x8x128xf32> to vector<8x128xf32>
    %1733 = arith.addf %1727, %1732 : vector<8x128xf32>
    %c18_i32_538 = arith.constant 18 : i32
    %1734 = vector.broadcast %c18_i32_538 : i32 to vector<8x128xi32>
    %1735 = arith.shli %1729, %1734 : vector<8x128xi32>
    %1736 = arith.ori %1684, %1735 : vector<8x128xi32>
    %1737 = arith.select %1376, %1733, %1313 : vector<8x128xi1>, vector<8x128xf32>
    %1738 = vector.broadcast %12 : f32 to vector<8x128xf32>
    %1739 = arith.addf %1000, %1738 : vector<8x128xf32>
    %1740 = vector.broadcast %20 : f32 to vector<8x128xf32>
    %1741 = arith.addf %1049, %1740 : vector<8x128xf32>
    %1742 = arith.cmpf ogt, %1741, %1739 : vector<8x128xf32>
    %1743 = arith.maximumf %1739, %1741 : vector<8x128xf32>
    %c1_i32_539 = arith.constant 1 : i32
    %1744 = vector.broadcast %c1_i32_539 : i32 to vector<8x128xi32>
    %1745 = arith.select %1742, %1744, %4 : vector<8x128xi1>, vector<8x128xi32>
    %1746 = vector.broadcast %28 : f32 to vector<8x128xf32>
    %1747 = arith.addf %1101, %1746 : vector<8x128xf32>
    %1748 = arith.cmpf ogt, %1747, %1743 : vector<8x128xf32>
    %1749 = arith.maximumf %1743, %1747 : vector<8x128xf32>
    %c2_i32_540 = arith.constant 2 : i32
    %1750 = vector.broadcast %c2_i32_540 : i32 to vector<8x128xi32>
    %1751 = arith.select %1748, %1750, %1745 : vector<8x128xi1>, vector<8x128xi32>
    %1752 = vector.broadcast %36 : f32 to vector<8x128xf32>
    %1753 = arith.addf %1153, %1752 : vector<8x128xf32>
    %1754 = arith.cmpf ogt, %1753, %1749 : vector<8x128xf32>
    %1755 = arith.maximumf %1749, %1753 : vector<8x128xf32>
    %c3_i32_541 = arith.constant 3 : i32
    %1756 = vector.broadcast %c3_i32_541 : i32 to vector<8x128xi32>
    %1757 = arith.select %1754, %1756, %1751 : vector<8x128xi1>, vector<8x128xi32>
    %1758 = vector.broadcast %44 : f32 to vector<8x128xf32>
    %1759 = arith.addf %1205, %1758 : vector<8x128xf32>
    %1760 = arith.cmpf ogt, %1759, %1755 : vector<8x128xf32>
    %1761 = arith.maximumf %1755, %1759 : vector<8x128xf32>
    %c4_i32_542 = arith.constant 4 : i32
    %1762 = vector.broadcast %c4_i32_542 : i32 to vector<8x128xi32>
    %1763 = arith.select %1760, %1762, %1757 : vector<8x128xi1>, vector<8x128xi32>
    %1764 = vector.broadcast %52 : f32 to vector<8x128xf32>
    %1765 = arith.addf %1257, %1764 : vector<8x128xf32>
    %1766 = arith.cmpf ogt, %1765, %1761 : vector<8x128xf32>
    %1767 = arith.maximumf %1761, %1765 : vector<8x128xf32>
    %c5_i32_543 = arith.constant 5 : i32
    %1768 = vector.broadcast %c5_i32_543 : i32 to vector<8x128xi32>
    %1769 = arith.select %1766, %1768, %1763 : vector<8x128xi1>, vector<8x128xi32>
    %1770 = vector.broadcast %60 : f32 to vector<8x128xf32>
    %1771 = arith.addf %1309, %1770 : vector<8x128xf32>
    %1772 = arith.cmpf ogt, %1771, %1767 : vector<8x128xf32>
    %1773 = arith.maximumf %1767, %1771 : vector<8x128xf32>
    %c6_i32_544 = arith.constant 6 : i32
    %1774 = vector.broadcast %c6_i32_544 : i32 to vector<8x128xi32>
    %1775 = arith.select %1772, %1774, %1769 : vector<8x128xi1>, vector<8x128xi32>
    %1776 = vector.broadcast %68 : f32 to vector<8x128xf32>
    %1777 = arith.addf %1361, %1776 : vector<8x128xf32>
    %1778 = arith.cmpf ogt, %1777, %1773 : vector<8x128xf32>
    %1779 = arith.maximumf %1773, %1777 : vector<8x128xf32>
    %c7_i32_545 = arith.constant 7 : i32
    %1780 = vector.broadcast %c7_i32_545 : i32 to vector<8x128xi32>
    %1781 = arith.select %1778, %1780, %1775 : vector<8x128xi1>, vector<8x128xi32>
    %c0_546 = arith.constant 0 : index
    %1782 = arith.index_cast %c4_i32_455 : i32 to index
    %c7_547 = arith.constant 7 : index
    %c0_548 = arith.constant 0 : index
    %c0_549 = arith.constant 0 : index
    %1783 = vector.load %arg2[%c0_546, %1782, %c7_547, %c0_548, %c0_549] : memref<1x8x8x8x128xf32, #tpu.memory_space<vmem>>, vector<1x1x1x8x128xf32>
    %1784 = vector.shape_cast %1783 : vector<1x1x1x8x128xf32> to vector<8x128xf32>
    %1785 = arith.addf %1779, %1784 : vector<8x128xf32>
    %c21_i32_550 = arith.constant 21 : i32
    %1786 = vector.broadcast %c21_i32_550 : i32 to vector<8x128xi32>
    %1787 = arith.shli %1781, %1786 : vector<8x128xi32>
    %1788 = arith.ori %1736, %1787 : vector<8x128xi32>
    %1789 = arith.select %1376, %1785, %1365 : vector<8x128xi1>, vector<8x128xf32>
    %c0_i32_551 = arith.constant 0 : i32
    %1790 = vector.broadcast %c0_i32_551 : i32 to vector<8x128xi32>
    %1791 = arith.select %1374, %1788, %1790 : vector<8x128xi1>, vector<8x128xi32>
    %c1_i32_552 = arith.constant 1 : i32
    %1792 = arith.subi %c4_i32_455, %c1_i32_552 : i32
    %1793 = arith.index_cast %1792 : i32 to index
    %c0_553 = arith.constant 0 : index
    %c0_554 = arith.constant 0 : index
    %c0_555 = arith.constant 0 : index
    %1794 = vector.load %arg5[%1793, %c0_553, %c0_554, %c0_555] : memref<8x1x8x128xi32, #tpu.memory_space<vmem>>, vector<1x1x8x128xi32>
    %1795 = vector.shape_cast %1794 : vector<1x1x8x128xi32> to vector<8x128xi32>
    %1796 = vector.shape_cast %1791 : vector<8x128xi32> to vector<1x1x8x128xi32>
    tpu.vector_store %arg5[%1793, %c0_553, %c0_554, %c0_555], %1796 {strides = array<i32>} : memref<8x1x8x128xi32, #tpu.memory_space<vmem>>, vector<1x1x8x128xi32>,
    %c5_i32_556 = arith.constant 5 : i32
    %1797 = vector.broadcast %c5_i32_556 : i32 to vector<8x128xi32>
    %1798 = arith.cmpi slt, %1797, %1 : vector<8x128xi32>
    %1799 = vector.broadcast %c5_i32_556 : i32 to vector<8x128xi32>
    %1800 = arith.cmpi eq, %1799, %3 : vector<8x128xi32>
    %1801 = vector.broadcast %5 : f32 to vector<8x128xf32>
    %1802 = arith.addf %1424, %1801 : vector<8x128xf32>
    %1803 = vector.broadcast %13 : f32 to vector<8x128xf32>
    %1804 = arith.addf %1473, %1803 : vector<8x128xf32>
    %1805 = arith.cmpf ogt, %1804, %1802 : vector<8x128xf32>
    %1806 = arith.maximumf %1802, %1804 : vector<8x128xf32>
    %c1_i32_557 = arith.constant 1 : i32
    %1807 = vector.broadcast %c1_i32_557 : i32 to vector<8x128xi32>
    %1808 = arith.select %1805, %1807, %4 : vector<8x128xi1>, vector<8x128xi32>
    %1809 = vector.broadcast %21 : f32 to vector<8x128xf32>
    %1810 = arith.addf %1525, %1809 : vector<8x128xf32>
    %1811 = arith.cmpf ogt, %1810, %1806 : vector<8x128xf32>
    %1812 = arith.maximumf %1806, %1810 : vector<8x128xf32>
    %c2_i32_558 = arith.constant 2 : i32
    %1813 = vector.broadcast %c2_i32_558 : i32 to vector<8x128xi32>
    %1814 = arith.select %1811, %1813, %1808 : vector<8x128xi1>, vector<8x128xi32>
    %1815 = vector.broadcast %29 : f32 to vector<8x128xf32>
    %1816 = arith.addf %1577, %1815 : vector<8x128xf32>
    %1817 = arith.cmpf ogt, %1816, %1812 : vector<8x128xf32>
    %1818 = arith.maximumf %1812, %1816 : vector<8x128xf32>
    %c3_i32_559 = arith.constant 3 : i32
    %1819 = vector.broadcast %c3_i32_559 : i32 to vector<8x128xi32>
    %1820 = arith.select %1817, %1819, %1814 : vector<8x128xi1>, vector<8x128xi32>
    %1821 = vector.broadcast %37 : f32 to vector<8x128xf32>
    %1822 = arith.addf %1629, %1821 : vector<8x128xf32>
    %1823 = arith.cmpf ogt, %1822, %1818 : vector<8x128xf32>
    %1824 = arith.maximumf %1818, %1822 : vector<8x128xf32>
    %c4_i32_560 = arith.constant 4 : i32
    %1825 = vector.broadcast %c4_i32_560 : i32 to vector<8x128xi32>
    %1826 = arith.select %1823, %1825, %1820 : vector<8x128xi1>, vector<8x128xi32>
    %1827 = vector.broadcast %45 : f32 to vector<8x128xf32>
    %1828 = arith.addf %1681, %1827 : vector<8x128xf32>
    %1829 = arith.cmpf ogt, %1828, %1824 : vector<8x128xf32>
    %1830 = arith.maximumf %1824, %1828 : vector<8x128xf32>
    %c5_i32_561 = arith.constant 5 : i32
    %1831 = vector.broadcast %c5_i32_561 : i32 to vector<8x128xi32>
    %1832 = arith.select %1829, %1831, %1826 : vector<8x128xi1>, vector<8x128xi32>
    %1833 = vector.broadcast %53 : f32 to vector<8x128xf32>
    %1834 = arith.addf %1733, %1833 : vector<8x128xf32>
    %1835 = arith.cmpf ogt, %1834, %1830 : vector<8x128xf32>
    %1836 = arith.maximumf %1830, %1834 : vector<8x128xf32>
    %c6_i32_562 = arith.constant 6 : i32
    %1837 = vector.broadcast %c6_i32_562 : i32 to vector<8x128xi32>
    %1838 = arith.select %1835, %1837, %1832 : vector<8x128xi1>, vector<8x128xi32>
    %1839 = vector.broadcast %61 : f32 to vector<8x128xf32>
    %1840 = arith.addf %1785, %1839 : vector<8x128xf32>
    %1841 = arith.cmpf ogt, %1840, %1836 : vector<8x128xf32>
    %1842 = arith.maximumf %1836, %1840 : vector<8x128xf32>
    %c7_i32_563 = arith.constant 7 : i32
    %1843 = vector.broadcast %c7_i32_563 : i32 to vector<8x128xi32>
    %1844 = arith.select %1841, %1843, %1838 : vector<8x128xi1>, vector<8x128xi32>
    %c0_564 = arith.constant 0 : index
    %1845 = arith.index_cast %c5_i32_556 : i32 to index
    %c0_565 = arith.constant 0 : index
    %c0_566 = arith.constant 0 : index
    %c0_567 = arith.constant 0 : index
    %1846 = vector.load %arg2[%c0_564, %1845, %c0_565, %c0_566, %c0_567] : memref<1x8x8x8x128xf32, #tpu.memory_space<vmem>>, vector<1x1x1x8x128xf32>
    %1847 = vector.shape_cast %1846 : vector<1x1x1x8x128xf32> to vector<8x128xf32>
    %1848 = arith.addf %1842, %1847 : vector<8x128xf32>
    %1849 = arith.select %1800, %1848, %1425 : vector<8x128xi1>, vector<8x128xf32>
    %1850 = vector.broadcast %6 : f32 to vector<8x128xf32>
    %1851 = arith.addf %1424, %1850 : vector<8x128xf32>
    %1852 = vector.broadcast %14 : f32 to vector<8x128xf32>
    %1853 = arith.addf %1473, %1852 : vector<8x128xf32>
    %1854 = arith.cmpf ogt, %1853, %1851 : vector<8x128xf32>
    %1855 = arith.maximumf %1851, %1853 : vector<8x128xf32>
    %c1_i32_568 = arith.constant 1 : i32
    %1856 = vector.broadcast %c1_i32_568 : i32 to vector<8x128xi32>
    %1857 = arith.select %1854, %1856, %4 : vector<8x128xi1>, vector<8x128xi32>
    %1858 = vector.broadcast %22 : f32 to vector<8x128xf32>
    %1859 = arith.addf %1525, %1858 : vector<8x128xf32>
    %1860 = arith.cmpf ogt, %1859, %1855 : vector<8x128xf32>
    %1861 = arith.maximumf %1855, %1859 : vector<8x128xf32>
    %c2_i32_569 = arith.constant 2 : i32
    %1862 = vector.broadcast %c2_i32_569 : i32 to vector<8x128xi32>
    %1863 = arith.select %1860, %1862, %1857 : vector<8x128xi1>, vector<8x128xi32>
    %1864 = vector.broadcast %30 : f32 to vector<8x128xf32>
    %1865 = arith.addf %1577, %1864 : vector<8x128xf32>
    %1866 = arith.cmpf ogt, %1865, %1861 : vector<8x128xf32>
    %1867 = arith.maximumf %1861, %1865 : vector<8x128xf32>
    %c3_i32_570 = arith.constant 3 : i32
    %1868 = vector.broadcast %c3_i32_570 : i32 to vector<8x128xi32>
    %1869 = arith.select %1866, %1868, %1863 : vector<8x128xi1>, vector<8x128xi32>
    %1870 = vector.broadcast %38 : f32 to vector<8x128xf32>
    %1871 = arith.addf %1629, %1870 : vector<8x128xf32>
    %1872 = arith.cmpf ogt, %1871, %1867 : vector<8x128xf32>
    %1873 = arith.maximumf %1867, %1871 : vector<8x128xf32>
    %c4_i32_571 = arith.constant 4 : i32
    %1874 = vector.broadcast %c4_i32_571 : i32 to vector<8x128xi32>
    %1875 = arith.select %1872, %1874, %1869 : vector<8x128xi1>, vector<8x128xi32>
    %1876 = vector.broadcast %46 : f32 to vector<8x128xf32>
    %1877 = arith.addf %1681, %1876 : vector<8x128xf32>
    %1878 = arith.cmpf ogt, %1877, %1873 : vector<8x128xf32>
    %1879 = arith.maximumf %1873, %1877 : vector<8x128xf32>
    %c5_i32_572 = arith.constant 5 : i32
    %1880 = vector.broadcast %c5_i32_572 : i32 to vector<8x128xi32>
    %1881 = arith.select %1878, %1880, %1875 : vector<8x128xi1>, vector<8x128xi32>
    %1882 = vector.broadcast %54 : f32 to vector<8x128xf32>
    %1883 = arith.addf %1733, %1882 : vector<8x128xf32>
    %1884 = arith.cmpf ogt, %1883, %1879 : vector<8x128xf32>
    %1885 = arith.maximumf %1879, %1883 : vector<8x128xf32>
    %c6_i32_573 = arith.constant 6 : i32
    %1886 = vector.broadcast %c6_i32_573 : i32 to vector<8x128xi32>
    %1887 = arith.select %1884, %1886, %1881 : vector<8x128xi1>, vector<8x128xi32>
    %1888 = vector.broadcast %62 : f32 to vector<8x128xf32>
    %1889 = arith.addf %1785, %1888 : vector<8x128xf32>
    %1890 = arith.cmpf ogt, %1889, %1885 : vector<8x128xf32>
    %1891 = arith.maximumf %1885, %1889 : vector<8x128xf32>
    %c7_i32_574 = arith.constant 7 : i32
    %1892 = vector.broadcast %c7_i32_574 : i32 to vector<8x128xi32>
    %1893 = arith.select %1890, %1892, %1887 : vector<8x128xi1>, vector<8x128xi32>
    %c0_575 = arith.constant 0 : index
    %1894 = arith.index_cast %c5_i32_556 : i32 to index
    %c1_576 = arith.constant 1 : index
    %c0_577 = arith.constant 0 : index
    %c0_578 = arith.constant 0 : index
    %1895 = vector.load %arg2[%c0_575, %1894, %c1_576, %c0_577, %c0_578] : memref<1x8x8x8x128xf32, #tpu.memory_space<vmem>>, vector<1x1x1x8x128xf32>
    %1896 = vector.shape_cast %1895 : vector<1x1x1x8x128xf32> to vector<8x128xf32>
    %1897 = arith.addf %1891, %1896 : vector<8x128xf32>
    %c3_i32_579 = arith.constant 3 : i32
    %1898 = vector.broadcast %c3_i32_579 : i32 to vector<8x128xi32>
    %1899 = arith.shli %1893, %1898 : vector<8x128xi32>
    %1900 = arith.ori %1844, %1899 : vector<8x128xi32>
    %1901 = arith.select %1800, %1897, %1477 : vector<8x128xi1>, vector<8x128xf32>
    %1902 = vector.broadcast %7 : f32 to vector<8x128xf32>
    %1903 = arith.addf %1424, %1902 : vector<8x128xf32>
    %1904 = vector.broadcast %15 : f32 to vector<8x128xf32>
    %1905 = arith.addf %1473, %1904 : vector<8x128xf32>
    %1906 = arith.cmpf ogt, %1905, %1903 : vector<8x128xf32>
    %1907 = arith.maximumf %1903, %1905 : vector<8x128xf32>
    %c1_i32_580 = arith.constant 1 : i32
    %1908 = vector.broadcast %c1_i32_580 : i32 to vector<8x128xi32>
    %1909 = arith.select %1906, %1908, %4 : vector<8x128xi1>, vector<8x128xi32>
    %1910 = vector.broadcast %23 : f32 to vector<8x128xf32>
    %1911 = arith.addf %1525, %1910 : vector<8x128xf32>
    %1912 = arith.cmpf ogt, %1911, %1907 : vector<8x128xf32>
    %1913 = arith.maximumf %1907, %1911 : vector<8x128xf32>
    %c2_i32_581 = arith.constant 2 : i32
    %1914 = vector.broadcast %c2_i32_581 : i32 to vector<8x128xi32>
    %1915 = arith.select %1912, %1914, %1909 : vector<8x128xi1>, vector<8x128xi32>
    %1916 = vector.broadcast %31 : f32 to vector<8x128xf32>
    %1917 = arith.addf %1577, %1916 : vector<8x128xf32>
    %1918 = arith.cmpf ogt, %1917, %1913 : vector<8x128xf32>
    %1919 = arith.maximumf %1913, %1917 : vector<8x128xf32>
    %c3_i32_582 = arith.constant 3 : i32
    %1920 = vector.broadcast %c3_i32_582 : i32 to vector<8x128xi32>
    %1921 = arith.select %1918, %1920, %1915 : vector<8x128xi1>, vector<8x128xi32>
    %1922 = vector.broadcast %39 : f32 to vector<8x128xf32>
    %1923 = arith.addf %1629, %1922 : vector<8x128xf32>
    %1924 = arith.cmpf ogt, %1923, %1919 : vector<8x128xf32>
    %1925 = arith.maximumf %1919, %1923 : vector<8x128xf32>
    %c4_i32_583 = arith.constant 4 : i32
    %1926 = vector.broadcast %c4_i32_583 : i32 to vector<8x128xi32>
    %1927 = arith.select %1924, %1926, %1921 : vector<8x128xi1>, vector<8x128xi32>
    %1928 = vector.broadcast %47 : f32 to vector<8x128xf32>
    %1929 = arith.addf %1681, %1928 : vector<8x128xf32>
    %1930 = arith.cmpf ogt, %1929, %1925 : vector<8x128xf32>
    %1931 = arith.maximumf %1925, %1929 : vector<8x128xf32>
    %c5_i32_584 = arith.constant 5 : i32
    %1932 = vector.broadcast %c5_i32_584 : i32 to vector<8x128xi32>
    %1933 = arith.select %1930, %1932, %1927 : vector<8x128xi1>, vector<8x128xi32>
    %1934 = vector.broadcast %55 : f32 to vector<8x128xf32>
    %1935 = arith.addf %1733, %1934 : vector<8x128xf32>
    %1936 = arith.cmpf ogt, %1935, %1931 : vector<8x128xf32>
    %1937 = arith.maximumf %1931, %1935 : vector<8x128xf32>
    %c6_i32_585 = arith.constant 6 : i32
    %1938 = vector.broadcast %c6_i32_585 : i32 to vector<8x128xi32>
    %1939 = arith.select %1936, %1938, %1933 : vector<8x128xi1>, vector<8x128xi32>
    %1940 = vector.broadcast %63 : f32 to vector<8x128xf32>
    %1941 = arith.addf %1785, %1940 : vector<8x128xf32>
    %1942 = arith.cmpf ogt, %1941, %1937 : vector<8x128xf32>
    %1943 = arith.maximumf %1937, %1941 : vector<8x128xf32>
    %c7_i32_586 = arith.constant 7 : i32
    %1944 = vector.broadcast %c7_i32_586 : i32 to vector<8x128xi32>
    %1945 = arith.select %1942, %1944, %1939 : vector<8x128xi1>, vector<8x128xi32>
    %c0_587 = arith.constant 0 : index
    %1946 = arith.index_cast %c5_i32_556 : i32 to index
    %c2_588 = arith.constant 2 : index
    %c0_589 = arith.constant 0 : index
    %c0_590 = arith.constant 0 : index
    %1947 = vector.load %arg2[%c0_587, %1946, %c2_588, %c0_589, %c0_590] : memref<1x8x8x8x128xf32, #tpu.memory_space<vmem>>, vector<1x1x1x8x128xf32>
    %1948 = vector.shape_cast %1947 : vector<1x1x1x8x128xf32> to vector<8x128xf32>
    %1949 = arith.addf %1943, %1948 : vector<8x128xf32>
    %c6_i32_591 = arith.constant 6 : i32
    %1950 = vector.broadcast %c6_i32_591 : i32 to vector<8x128xi32>
    %1951 = arith.shli %1945, %1950 : vector<8x128xi32>
    %1952 = arith.ori %1900, %1951 : vector<8x128xi32>
    %1953 = arith.select %1800, %1949, %1529 : vector<8x128xi1>, vector<8x128xf32>
    %1954 = vector.broadcast %8 : f32 to vector<8x128xf32>
    %1955 = arith.addf %1424, %1954 : vector<8x128xf32>
    %1956 = vector.broadcast %16 : f32 to vector<8x128xf32>
    %1957 = arith.addf %1473, %1956 : vector<8x128xf32>
    %1958 = arith.cmpf ogt, %1957, %1955 : vector<8x128xf32>
    %1959 = arith.maximumf %1955, %1957 : vector<8x128xf32>
    %c1_i32_592 = arith.constant 1 : i32
    %1960 = vector.broadcast %c1_i32_592 : i32 to vector<8x128xi32>
    %1961 = arith.select %1958, %1960, %4 : vector<8x128xi1>, vector<8x128xi32>
    %1962 = vector.broadcast %24 : f32 to vector<8x128xf32>
    %1963 = arith.addf %1525, %1962 : vector<8x128xf32>
    %1964 = arith.cmpf ogt, %1963, %1959 : vector<8x128xf32>
    %1965 = arith.maximumf %1959, %1963 : vector<8x128xf32>
    %c2_i32_593 = arith.constant 2 : i32
    %1966 = vector.broadcast %c2_i32_593 : i32 to vector<8x128xi32>
    %1967 = arith.select %1964, %1966, %1961 : vector<8x128xi1>, vector<8x128xi32>
    %1968 = vector.broadcast %32 : f32 to vector<8x128xf32>
    %1969 = arith.addf %1577, %1968 : vector<8x128xf32>
    %1970 = arith.cmpf ogt, %1969, %1965 : vector<8x128xf32>
    %1971 = arith.maximumf %1965, %1969 : vector<8x128xf32>
    %c3_i32_594 = arith.constant 3 : i32
    %1972 = vector.broadcast %c3_i32_594 : i32 to vector<8x128xi32>
    %1973 = arith.select %1970, %1972, %1967 : vector<8x128xi1>, vector<8x128xi32>
    %1974 = vector.broadcast %40 : f32 to vector<8x128xf32>
    %1975 = arith.addf %1629, %1974 : vector<8x128xf32>
    %1976 = arith.cmpf ogt, %1975, %1971 : vector<8x128xf32>
    %1977 = arith.maximumf %1971, %1975 : vector<8x128xf32>
    %c4_i32_595 = arith.constant 4 : i32
    %1978 = vector.broadcast %c4_i32_595 : i32 to vector<8x128xi32>
    %1979 = arith.select %1976, %1978, %1973 : vector<8x128xi1>, vector<8x128xi32>
    %1980 = vector.broadcast %48 : f32 to vector<8x128xf32>
    %1981 = arith.addf %1681, %1980 : vector<8x128xf32>
    %1982 = arith.cmpf ogt, %1981, %1977 : vector<8x128xf32>
    %1983 = arith.maximumf %1977, %1981 : vector<8x128xf32>
    %c5_i32_596 = arith.constant 5 : i32
    %1984 = vector.broadcast %c5_i32_596 : i32 to vector<8x128xi32>
    %1985 = arith.select %1982, %1984, %1979 : vector<8x128xi1>, vector<8x128xi32>
    %1986 = vector.broadcast %56 : f32 to vector<8x128xf32>
    %1987 = arith.addf %1733, %1986 : vector<8x128xf32>
    %1988 = arith.cmpf ogt, %1987, %1983 : vector<8x128xf32>
    %1989 = arith.maximumf %1983, %1987 : vector<8x128xf32>
    %c6_i32_597 = arith.constant 6 : i32
    %1990 = vector.broadcast %c6_i32_597 : i32 to vector<8x128xi32>
    %1991 = arith.select %1988, %1990, %1985 : vector<8x128xi1>, vector<8x128xi32>
    %1992 = vector.broadcast %64 : f32 to vector<8x128xf32>
    %1993 = arith.addf %1785, %1992 : vector<8x128xf32>
    %1994 = arith.cmpf ogt, %1993, %1989 : vector<8x128xf32>
    %1995 = arith.maximumf %1989, %1993 : vector<8x128xf32>
    %c7_i32_598 = arith.constant 7 : i32
    %1996 = vector.broadcast %c7_i32_598 : i32 to vector<8x128xi32>
    %1997 = arith.select %1994, %1996, %1991 : vector<8x128xi1>, vector<8x128xi32>
    %c0_599 = arith.constant 0 : index
    %1998 = arith.index_cast %c5_i32_556 : i32 to index
    %c3_600 = arith.constant 3 : index
    %c0_601 = arith.constant 0 : index
    %c0_602 = arith.constant 0 : index
    %1999 = vector.load %arg2[%c0_599, %1998, %c3_600, %c0_601, %c0_602] : memref<1x8x8x8x128xf32, #tpu.memory_space<vmem>>, vector<1x1x1x8x128xf32>
    %2000 = vector.shape_cast %1999 : vector<1x1x1x8x128xf32> to vector<8x128xf32>
    %2001 = arith.addf %1995, %2000 : vector<8x128xf32>
    %c9_i32_603 = arith.constant 9 : i32
    %2002 = vector.broadcast %c9_i32_603 : i32 to vector<8x128xi32>
    %2003 = arith.shli %1997, %2002 : vector<8x128xi32>
    %2004 = arith.ori %1952, %2003 : vector<8x128xi32>
    %2005 = arith.select %1800, %2001, %1581 : vector<8x128xi1>, vector<8x128xf32>
    %2006 = vector.broadcast %9 : f32 to vector<8x128xf32>
    %2007 = arith.addf %1424, %2006 : vector<8x128xf32>
    %2008 = vector.broadcast %17 : f32 to vector<8x128xf32>
    %2009 = arith.addf %1473, %2008 : vector<8x128xf32>
    %2010 = arith.cmpf ogt, %2009, %2007 : vector<8x128xf32>
    %2011 = arith.maximumf %2007, %2009 : vector<8x128xf32>
    %c1_i32_604 = arith.constant 1 : i32
    %2012 = vector.broadcast %c1_i32_604 : i32 to vector<8x128xi32>
    %2013 = arith.select %2010, %2012, %4 : vector<8x128xi1>, vector<8x128xi32>
    %2014 = vector.broadcast %25 : f32 to vector<8x128xf32>
    %2015 = arith.addf %1525, %2014 : vector<8x128xf32>
    %2016 = arith.cmpf ogt, %2015, %2011 : vector<8x128xf32>
    %2017 = arith.maximumf %2011, %2015 : vector<8x128xf32>
    %c2_i32_605 = arith.constant 2 : i32
    %2018 = vector.broadcast %c2_i32_605 : i32 to vector<8x128xi32>
    %2019 = arith.select %2016, %2018, %2013 : vector<8x128xi1>, vector<8x128xi32>
    %2020 = vector.broadcast %33 : f32 to vector<8x128xf32>
    %2021 = arith.addf %1577, %2020 : vector<8x128xf32>
    %2022 = arith.cmpf ogt, %2021, %2017 : vector<8x128xf32>
    %2023 = arith.maximumf %2017, %2021 : vector<8x128xf32>
    %c3_i32_606 = arith.constant 3 : i32
    %2024 = vector.broadcast %c3_i32_606 : i32 to vector<8x128xi32>
    %2025 = arith.select %2022, %2024, %2019 : vector<8x128xi1>, vector<8x128xi32>
    %2026 = vector.broadcast %41 : f32 to vector<8x128xf32>
    %2027 = arith.addf %1629, %2026 : vector<8x128xf32>
    %2028 = arith.cmpf ogt, %2027, %2023 : vector<8x128xf32>
    %2029 = arith.maximumf %2023, %2027 : vector<8x128xf32>
    %c4_i32_607 = arith.constant 4 : i32
    %2030 = vector.broadcast %c4_i32_607 : i32 to vector<8x128xi32>
    %2031 = arith.select %2028, %2030, %2025 : vector<8x128xi1>, vector<8x128xi32>
    %2032 = vector.broadcast %49 : f32 to vector<8x128xf32>
    %2033 = arith.addf %1681, %2032 : vector<8x128xf32>
    %2034 = arith.cmpf ogt, %2033, %2029 : vector<8x128xf32>
    %2035 = arith.maximumf %2029, %2033 : vector<8x128xf32>
    %c5_i32_608 = arith.constant 5 : i32
    %2036 = vector.broadcast %c5_i32_608 : i32 to vector<8x128xi32>
    %2037 = arith.select %2034, %2036, %2031 : vector<8x128xi1>, vector<8x128xi32>
    %2038 = vector.broadcast %57 : f32 to vector<8x128xf32>
    %2039 = arith.addf %1733, %2038 : vector<8x128xf32>
    %2040 = arith.cmpf ogt, %2039, %2035 : vector<8x128xf32>
    %2041 = arith.maximumf %2035, %2039 : vector<8x128xf32>
    %c6_i32_609 = arith.constant 6 : i32
    %2042 = vector.broadcast %c6_i32_609 : i32 to vector<8x128xi32>
    %2043 = arith.select %2040, %2042, %2037 : vector<8x128xi1>, vector<8x128xi32>
    %2044 = vector.broadcast %65 : f32 to vector<8x128xf32>
    %2045 = arith.addf %1785, %2044 : vector<8x128xf32>
    %2046 = arith.cmpf ogt, %2045, %2041 : vector<8x128xf32>
    %2047 = arith.maximumf %2041, %2045 : vector<8x128xf32>
    %c7_i32_610 = arith.constant 7 : i32
    %2048 = vector.broadcast %c7_i32_610 : i32 to vector<8x128xi32>
    %2049 = arith.select %2046, %2048, %2043 : vector<8x128xi1>, vector<8x128xi32>
    %c0_611 = arith.constant 0 : index
    %2050 = arith.index_cast %c5_i32_556 : i32 to index
    %c4_612 = arith.constant 4 : index
    %c0_613 = arith.constant 0 : index
    %c0_614 = arith.constant 0 : index
    %2051 = vector.load %arg2[%c0_611, %2050, %c4_612, %c0_613, %c0_614] : memref<1x8x8x8x128xf32, #tpu.memory_space<vmem>>, vector<1x1x1x8x128xf32>
    %2052 = vector.shape_cast %2051 : vector<1x1x1x8x128xf32> to vector<8x128xf32>
    %2053 = arith.addf %2047, %2052 : vector<8x128xf32>
    %c12_i32_615 = arith.constant 12 : i32
    %2054 = vector.broadcast %c12_i32_615 : i32 to vector<8x128xi32>
    %2055 = arith.shli %2049, %2054 : vector<8x128xi32>
    %2056 = arith.ori %2004, %2055 : vector<8x128xi32>
    %2057 = arith.select %1800, %2053, %1633 : vector<8x128xi1>, vector<8x128xf32>
    %2058 = vector.broadcast %10 : f32 to vector<8x128xf32>
    %2059 = arith.addf %1424, %2058 : vector<8x128xf32>
    %2060 = vector.broadcast %18 : f32 to vector<8x128xf32>
    %2061 = arith.addf %1473, %2060 : vector<8x128xf32>
    %2062 = arith.cmpf ogt, %2061, %2059 : vector<8x128xf32>
    %2063 = arith.maximumf %2059, %2061 : vector<8x128xf32>
    %c1_i32_616 = arith.constant 1 : i32
    %2064 = vector.broadcast %c1_i32_616 : i32 to vector<8x128xi32>
    %2065 = arith.select %2062, %2064, %4 : vector<8x128xi1>, vector<8x128xi32>
    %2066 = vector.broadcast %26 : f32 to vector<8x128xf32>
    %2067 = arith.addf %1525, %2066 : vector<8x128xf32>
    %2068 = arith.cmpf ogt, %2067, %2063 : vector<8x128xf32>
    %2069 = arith.maximumf %2063, %2067 : vector<8x128xf32>
    %c2_i32_617 = arith.constant 2 : i32
    %2070 = vector.broadcast %c2_i32_617 : i32 to vector<8x128xi32>
    %2071 = arith.select %2068, %2070, %2065 : vector<8x128xi1>, vector<8x128xi32>
    %2072 = vector.broadcast %34 : f32 to vector<8x128xf32>
    %2073 = arith.addf %1577, %2072 : vector<8x128xf32>
    %2074 = arith.cmpf ogt, %2073, %2069 : vector<8x128xf32>
    %2075 = arith.maximumf %2069, %2073 : vector<8x128xf32>
    %c3_i32_618 = arith.constant 3 : i32
    %2076 = vector.broadcast %c3_i32_618 : i32 to vector<8x128xi32>
    %2077 = arith.select %2074, %2076, %2071 : vector<8x128xi1>, vector<8x128xi32>
    %2078 = vector.broadcast %42 : f32 to vector<8x128xf32>
    %2079 = arith.addf %1629, %2078 : vector<8x128xf32>
    %2080 = arith.cmpf ogt, %2079, %2075 : vector<8x128xf32>
    %2081 = arith.maximumf %2075, %2079 : vector<8x128xf32>
    %c4_i32_619 = arith.constant 4 : i32
    %2082 = vector.broadcast %c4_i32_619 : i32 to vector<8x128xi32>
    %2083 = arith.select %2080, %2082, %2077 : vector<8x128xi1>, vector<8x128xi32>
    %2084 = vector.broadcast %50 : f32 to vector<8x128xf32>
    %2085 = arith.addf %1681, %2084 : vector<8x128xf32>
    %2086 = arith.cmpf ogt, %2085, %2081 : vector<8x128xf32>
    %2087 = arith.maximumf %2081, %2085 : vector<8x128xf32>
    %c5_i32_620 = arith.constant 5 : i32
    %2088 = vector.broadcast %c5_i32_620 : i32 to vector<8x128xi32>
    %2089 = arith.select %2086, %2088, %2083 : vector<8x128xi1>, vector<8x128xi32>
    %2090 = vector.broadcast %58 : f32 to vector<8x128xf32>
    %2091 = arith.addf %1733, %2090 : vector<8x128xf32>
    %2092 = arith.cmpf ogt, %2091, %2087 : vector<8x128xf32>
    %2093 = arith.maximumf %2087, %2091 : vector<8x128xf32>
    %c6_i32_621 = arith.constant 6 : i32
    %2094 = vector.broadcast %c6_i32_621 : i32 to vector<8x128xi32>
    %2095 = arith.select %2092, %2094, %2089 : vector<8x128xi1>, vector<8x128xi32>
    %2096 = vector.broadcast %66 : f32 to vector<8x128xf32>
    %2097 = arith.addf %1785, %2096 : vector<8x128xf32>
    %2098 = arith.cmpf ogt, %2097, %2093 : vector<8x128xf32>
    %2099 = arith.maximumf %2093, %2097 : vector<8x128xf32>
    %c7_i32_622 = arith.constant 7 : i32
    %2100 = vector.broadcast %c7_i32_622 : i32 to vector<8x128xi32>
    %2101 = arith.select %2098, %2100, %2095 : vector<8x128xi1>, vector<8x128xi32>
    %c0_623 = arith.constant 0 : index
    %2102 = arith.index_cast %c5_i32_556 : i32 to index
    %c5_624 = arith.constant 5 : index
    %c0_625 = arith.constant 0 : index
    %c0_626 = arith.constant 0 : index
    %2103 = vector.load %arg2[%c0_623, %2102, %c5_624, %c0_625, %c0_626] : memref<1x8x8x8x128xf32, #tpu.memory_space<vmem>>, vector<1x1x1x8x128xf32>
    %2104 = vector.shape_cast %2103 : vector<1x1x1x8x128xf32> to vector<8x128xf32>
    %2105 = arith.addf %2099, %2104 : vector<8x128xf32>
    %c15_i32_627 = arith.constant 15 : i32
    %2106 = vector.broadcast %c15_i32_627 : i32 to vector<8x128xi32>
    %2107 = arith.shli %2101, %2106 : vector<8x128xi32>
    %2108 = arith.ori %2056, %2107 : vector<8x128xi32>
    %2109 = arith.select %1800, %2105, %1685 : vector<8x128xi1>, vector<8x128xf32>
    %2110 = vector.broadcast %11 : f32 to vector<8x128xf32>
    %2111 = arith.addf %1424, %2110 : vector<8x128xf32>
    %2112 = vector.broadcast %19 : f32 to vector<8x128xf32>
    %2113 = arith.addf %1473, %2112 : vector<8x128xf32>
    %2114 = arith.cmpf ogt, %2113, %2111 : vector<8x128xf32>
    %2115 = arith.maximumf %2111, %2113 : vector<8x128xf32>
    %c1_i32_628 = arith.constant 1 : i32
    %2116 = vector.broadcast %c1_i32_628 : i32 to vector<8x128xi32>
    %2117 = arith.select %2114, %2116, %4 : vector<8x128xi1>, vector<8x128xi32>
    %2118 = vector.broadcast %27 : f32 to vector<8x128xf32>
    %2119 = arith.addf %1525, %2118 : vector<8x128xf32>
    %2120 = arith.cmpf ogt, %2119, %2115 : vector<8x128xf32>
    %2121 = arith.maximumf %2115, %2119 : vector<8x128xf32>
    %c2_i32_629 = arith.constant 2 : i32
    %2122 = vector.broadcast %c2_i32_629 : i32 to vector<8x128xi32>
    %2123 = arith.select %2120, %2122, %2117 : vector<8x128xi1>, vector<8x128xi32>
    %2124 = vector.broadcast %35 : f32 to vector<8x128xf32>
    %2125 = arith.addf %1577, %2124 : vector<8x128xf32>
    %2126 = arith.cmpf ogt, %2125, %2121 : vector<8x128xf32>
    %2127 = arith.maximumf %2121, %2125 : vector<8x128xf32>
    %c3_i32_630 = arith.constant 3 : i32
    %2128 = vector.broadcast %c3_i32_630 : i32 to vector<8x128xi32>
    %2129 = arith.select %2126, %2128, %2123 : vector<8x128xi1>, vector<8x128xi32>
    %2130 = vector.broadcast %43 : f32 to vector<8x128xf32>
    %2131 = arith.addf %1629, %2130 : vector<8x128xf32>
    %2132 = arith.cmpf ogt, %2131, %2127 : vector<8x128xf32>
    %2133 = arith.maximumf %2127, %2131 : vector<8x128xf32>
    %c4_i32_631 = arith.constant 4 : i32
    %2134 = vector.broadcast %c4_i32_631 : i32 to vector<8x128xi32>
    %2135 = arith.select %2132, %2134, %2129 : vector<8x128xi1>, vector<8x128xi32>
    %2136 = vector.broadcast %51 : f32 to vector<8x128xf32>
    %2137 = arith.addf %1681, %2136 : vector<8x128xf32>
    %2138 = arith.cmpf ogt, %2137, %2133 : vector<8x128xf32>
    %2139 = arith.maximumf %2133, %2137 : vector<8x128xf32>
    %c5_i32_632 = arith.constant 5 : i32
    %2140 = vector.broadcast %c5_i32_632 : i32 to vector<8x128xi32>
    %2141 = arith.select %2138, %2140, %2135 : vector<8x128xi1>, vector<8x128xi32>
    %2142 = vector.broadcast %59 : f32 to vector<8x128xf32>
    %2143 = arith.addf %1733, %2142 : vector<8x128xf32>
    %2144 = arith.cmpf ogt, %2143, %2139 : vector<8x128xf32>
    %2145 = arith.maximumf %2139, %2143 : vector<8x128xf32>
    %c6_i32_633 = arith.constant 6 : i32
    %2146 = vector.broadcast %c6_i32_633 : i32 to vector<8x128xi32>
    %2147 = arith.select %2144, %2146, %2141 : vector<8x128xi1>, vector<8x128xi32>
    %2148 = vector.broadcast %67 : f32 to vector<8x128xf32>
    %2149 = arith.addf %1785, %2148 : vector<8x128xf32>
    %2150 = arith.cmpf ogt, %2149, %2145 : vector<8x128xf32>
    %2151 = arith.maximumf %2145, %2149 : vector<8x128xf32>
    %c7_i32_634 = arith.constant 7 : i32
    %2152 = vector.broadcast %c7_i32_634 : i32 to vector<8x128xi32>
    %2153 = arith.select %2150, %2152, %2147 : vector<8x128xi1>, vector<8x128xi32>
    %c0_635 = arith.constant 0 : index
    %2154 = arith.index_cast %c5_i32_556 : i32 to index
    %c6_636 = arith.constant 6 : index
    %c0_637 = arith.constant 0 : index
    %c0_638 = arith.constant 0 : index
    %2155 = vector.load %arg2[%c0_635, %2154, %c6_636, %c0_637, %c0_638] : memref<1x8x8x8x128xf32, #tpu.memory_space<vmem>>, vector<1x1x1x8x128xf32>
    %2156 = vector.shape_cast %2155 : vector<1x1x1x8x128xf32> to vector<8x128xf32>
    %2157 = arith.addf %2151, %2156 : vector<8x128xf32>
    %c18_i32_639 = arith.constant 18 : i32
    %2158 = vector.broadcast %c18_i32_639 : i32 to vector<8x128xi32>
    %2159 = arith.shli %2153, %2158 : vector<8x128xi32>
    %2160 = arith.ori %2108, %2159 : vector<8x128xi32>
    %2161 = arith.select %1800, %2157, %1737 : vector<8x128xi1>, vector<8x128xf32>
    %2162 = vector.broadcast %12 : f32 to vector<8x128xf32>
    %2163 = arith.addf %1424, %2162 : vector<8x128xf32>
    %2164 = vector.broadcast %20 : f32 to vector<8x128xf32>
    %2165 = arith.addf %1473, %2164 : vector<8x128xf32>
    %2166 = arith.cmpf ogt, %2165, %2163 : vector<8x128xf32>
    %2167 = arith.maximumf %2163, %2165 : vector<8x128xf32>
    %c1_i32_640 = arith.constant 1 : i32
    %2168 = vector.broadcast %c1_i32_640 : i32 to vector<8x128xi32>
    %2169 = arith.select %2166, %2168, %4 : vector<8x128xi1>, vector<8x128xi32>
    %2170 = vector.broadcast %28 : f32 to vector<8x128xf32>
    %2171 = arith.addf %1525, %2170 : vector<8x128xf32>
    %2172 = arith.cmpf ogt, %2171, %2167 : vector<8x128xf32>
    %2173 = arith.maximumf %2167, %2171 : vector<8x128xf32>
    %c2_i32_641 = arith.constant 2 : i32
    %2174 = vector.broadcast %c2_i32_641 : i32 to vector<8x128xi32>
    %2175 = arith.select %2172, %2174, %2169 : vector<8x128xi1>, vector<8x128xi32>
    %2176 = vector.broadcast %36 : f32 to vector<8x128xf32>
    %2177 = arith.addf %1577, %2176 : vector<8x128xf32>
    %2178 = arith.cmpf ogt, %2177, %2173 : vector<8x128xf32>
    %2179 = arith.maximumf %2173, %2177 : vector<8x128xf32>
    %c3_i32_642 = arith.constant 3 : i32
    %2180 = vector.broadcast %c3_i32_642 : i32 to vector<8x128xi32>
    %2181 = arith.select %2178, %2180, %2175 : vector<8x128xi1>, vector<8x128xi32>
    %2182 = vector.broadcast %44 : f32 to vector<8x128xf32>
    %2183 = arith.addf %1629, %2182 : vector<8x128xf32>
    %2184 = arith.cmpf ogt, %2183, %2179 : vector<8x128xf32>
    %2185 = arith.maximumf %2179, %2183 : vector<8x128xf32>
    %c4_i32_643 = arith.constant 4 : i32
    %2186 = vector.broadcast %c4_i32_643 : i32 to vector<8x128xi32>
    %2187 = arith.select %2184, %2186, %2181 : vector<8x128xi1>, vector<8x128xi32>
    %2188 = vector.broadcast %52 : f32 to vector<8x128xf32>
    %2189 = arith.addf %1681, %2188 : vector<8x128xf32>
    %2190 = arith.cmpf ogt, %2189, %2185 : vector<8x128xf32>
    %2191 = arith.maximumf %2185, %2189 : vector<8x128xf32>
    %c5_i32_644 = arith.constant 5 : i32
    %2192 = vector.broadcast %c5_i32_644 : i32 to vector<8x128xi32>
    %2193 = arith.select %2190, %2192, %2187 : vector<8x128xi1>, vector<8x128xi32>
    %2194 = vector.broadcast %60 : f32 to vector<8x128xf32>
    %2195 = arith.addf %1733, %2194 : vector<8x128xf32>
    %2196 = arith.cmpf ogt, %2195, %2191 : vector<8x128xf32>
    %2197 = arith.maximumf %2191, %2195 : vector<8x128xf32>
    %c6_i32_645 = arith.constant 6 : i32
    %2198 = vector.broadcast %c6_i32_645 : i32 to vector<8x128xi32>
    %2199 = arith.select %2196, %2198, %2193 : vector<8x128xi1>, vector<8x128xi32>
    %2200 = vector.broadcast %68 : f32 to vector<8x128xf32>
    %2201 = arith.addf %1785, %2200 : vector<8x128xf32>
    %2202 = arith.cmpf ogt, %2201, %2197 : vector<8x128xf32>
    %2203 = arith.maximumf %2197, %2201 : vector<8x128xf32>
    %c7_i32_646 = arith.constant 7 : i32
    %2204 = vector.broadcast %c7_i32_646 : i32 to vector<8x128xi32>
    %2205 = arith.select %2202, %2204, %2199 : vector<8x128xi1>, vector<8x128xi32>
    %c0_647 = arith.constant 0 : index
    %2206 = arith.index_cast %c5_i32_556 : i32 to index
    %c7_648 = arith.constant 7 : index
    %c0_649 = arith.constant 0 : index
    %c0_650 = arith.constant 0 : index
    %2207 = vector.load %arg2[%c0_647, %2206, %c7_648, %c0_649, %c0_650] : memref<1x8x8x8x128xf32, #tpu.memory_space<vmem>>, vector<1x1x1x8x128xf32>
    %2208 = vector.shape_cast %2207 : vector<1x1x1x8x128xf32> to vector<8x128xf32>
    %2209 = arith.addf %2203, %2208 : vector<8x128xf32>
    %c21_i32_651 = arith.constant 21 : i32
    %2210 = vector.broadcast %c21_i32_651 : i32 to vector<8x128xi32>
    %2211 = arith.shli %2205, %2210 : vector<8x128xi32>
    %2212 = arith.ori %2160, %2211 : vector<8x128xi32>
    %2213 = arith.select %1800, %2209, %1789 : vector<8x128xi1>, vector<8x128xf32>
    %c0_i32_652 = arith.constant 0 : i32
    %2214 = vector.broadcast %c0_i32_652 : i32 to vector<8x128xi32>
    %2215 = arith.select %1798, %2212, %2214 : vector<8x128xi1>, vector<8x128xi32>
    %c1_i32_653 = arith.constant 1 : i32
    %2216 = arith.subi %c5_i32_556, %c1_i32_653 : i32
    %2217 = arith.index_cast %2216 : i32 to index
    %c0_654 = arith.constant 0 : index
    %c0_655 = arith.constant 0 : index
    %c0_656 = arith.constant 0 : index
    %2218 = vector.load %arg5[%2217, %c0_654, %c0_655, %c0_656] : memref<8x1x8x128xi32, #tpu.memory_space<vmem>>, vector<1x1x8x128xi32>
    %2219 = vector.shape_cast %2218 : vector<1x1x8x128xi32> to vector<8x128xi32>
    %2220 = vector.shape_cast %2215 : vector<8x128xi32> to vector<1x1x8x128xi32>
    tpu.vector_store %arg5[%2217, %c0_654, %c0_655, %c0_656], %2220 {strides = array<i32>} : memref<8x1x8x128xi32, #tpu.memory_space<vmem>>, vector<1x1x8x128xi32>,
    %c6_i32_657 = arith.constant 6 : i32
    %2221 = vector.broadcast %c6_i32_657 : i32 to vector<8x128xi32>
    %2222 = arith.cmpi slt, %2221, %1 : vector<8x128xi32>
    %2223 = vector.broadcast %c6_i32_657 : i32 to vector<8x128xi32>
    %2224 = arith.cmpi eq, %2223, %3 : vector<8x128xi32>
    %2225 = vector.broadcast %5 : f32 to vector<8x128xf32>
    %2226 = arith.addf %1848, %2225 : vector<8x128xf32>
    %2227 = vector.broadcast %13 : f32 to vector<8x128xf32>
    %2228 = arith.addf %1897, %2227 : vector<8x128xf32>
    %2229 = arith.cmpf ogt, %2228, %2226 : vector<8x128xf32>
    %2230 = arith.maximumf %2226, %2228 : vector<8x128xf32>
    %c1_i32_658 = arith.constant 1 : i32
    %2231 = vector.broadcast %c1_i32_658 : i32 to vector<8x128xi32>
    %2232 = arith.select %2229, %2231, %4 : vector<8x128xi1>, vector<8x128xi32>
    %2233 = vector.broadcast %21 : f32 to vector<8x128xf32>
    %2234 = arith.addf %1949, %2233 : vector<8x128xf32>
    %2235 = arith.cmpf ogt, %2234, %2230 : vector<8x128xf32>
    %2236 = arith.maximumf %2230, %2234 : vector<8x128xf32>
    %c2_i32_659 = arith.constant 2 : i32
    %2237 = vector.broadcast %c2_i32_659 : i32 to vector<8x128xi32>
    %2238 = arith.select %2235, %2237, %2232 : vector<8x128xi1>, vector<8x128xi32>
    %2239 = vector.broadcast %29 : f32 to vector<8x128xf32>
    %2240 = arith.addf %2001, %2239 : vector<8x128xf32>
    %2241 = arith.cmpf ogt, %2240, %2236 : vector<8x128xf32>
    %2242 = arith.maximumf %2236, %2240 : vector<8x128xf32>
    %c3_i32_660 = arith.constant 3 : i32
    %2243 = vector.broadcast %c3_i32_660 : i32 to vector<8x128xi32>
    %2244 = arith.select %2241, %2243, %2238 : vector<8x128xi1>, vector<8x128xi32>
    %2245 = vector.broadcast %37 : f32 to vector<8x128xf32>
    %2246 = arith.addf %2053, %2245 : vector<8x128xf32>
    %2247 = arith.cmpf ogt, %2246, %2242 : vector<8x128xf32>
    %2248 = arith.maximumf %2242, %2246 : vector<8x128xf32>
    %c4_i32_661 = arith.constant 4 : i32
    %2249 = vector.broadcast %c4_i32_661 : i32 to vector<8x128xi32>
    %2250 = arith.select %2247, %2249, %2244 : vector<8x128xi1>, vector<8x128xi32>
    %2251 = vector.broadcast %45 : f32 to vector<8x128xf32>
    %2252 = arith.addf %2105, %2251 : vector<8x128xf32>
    %2253 = arith.cmpf ogt, %2252, %2248 : vector<8x128xf32>
    %2254 = arith.maximumf %2248, %2252 : vector<8x128xf32>
    %c5_i32_662 = arith.constant 5 : i32
    %2255 = vector.broadcast %c5_i32_662 : i32 to vector<8x128xi32>
    %2256 = arith.select %2253, %2255, %2250 : vector<8x128xi1>, vector<8x128xi32>
    %2257 = vector.broadcast %53 : f32 to vector<8x128xf32>
    %2258 = arith.addf %2157, %2257 : vector<8x128xf32>
    %2259 = arith.cmpf ogt, %2258, %2254 : vector<8x128xf32>
    %2260 = arith.maximumf %2254, %2258 : vector<8x128xf32>
    %c6_i32_663 = arith.constant 6 : i32
    %2261 = vector.broadcast %c6_i32_663 : i32 to vector<8x128xi32>
    %2262 = arith.select %2259, %2261, %2256 : vector<8x128xi1>, vector<8x128xi32>
    %2263 = vector.broadcast %61 : f32 to vector<8x128xf32>
    %2264 = arith.addf %2209, %2263 : vector<8x128xf32>
    %2265 = arith.cmpf ogt, %2264, %2260 : vector<8x128xf32>
    %2266 = arith.maximumf %2260, %2264 : vector<8x128xf32>
    %c7_i32_664 = arith.constant 7 : i32
    %2267 = vector.broadcast %c7_i32_664 : i32 to vector<8x128xi32>
    %2268 = arith.select %2265, %2267, %2262 : vector<8x128xi1>, vector<8x128xi32>
    %c0_665 = arith.constant 0 : index
    %2269 = arith.index_cast %c6_i32_657 : i32 to index
    %c0_666 = arith.constant 0 : index
    %c0_667 = arith.constant 0 : index
    %c0_668 = arith.constant 0 : index
    %2270 = vector.load %arg2[%c0_665, %2269, %c0_666, %c0_667, %c0_668] : memref<1x8x8x8x128xf32, #tpu.memory_space<vmem>>, vector<1x1x1x8x128xf32>
    %2271 = vector.shape_cast %2270 : vector<1x1x1x8x128xf32> to vector<8x128xf32>
    %2272 = arith.addf %2266, %2271 : vector<8x128xf32>
    %2273 = arith.select %2224, %2272, %1849 : vector<8x128xi1>, vector<8x128xf32>
    %2274 = vector.broadcast %6 : f32 to vector<8x128xf32>
    %2275 = arith.addf %1848, %2274 : vector<8x128xf32>
    %2276 = vector.broadcast %14 : f32 to vector<8x128xf32>
    %2277 = arith.addf %1897, %2276 : vector<8x128xf32>
    %2278 = arith.cmpf ogt, %2277, %2275 : vector<8x128xf32>
    %2279 = arith.maximumf %2275, %2277 : vector<8x128xf32>
    %c1_i32_669 = arith.constant 1 : i32
    %2280 = vector.broadcast %c1_i32_669 : i32 to vector<8x128xi32>
    %2281 = arith.select %2278, %2280, %4 : vector<8x128xi1>, vector<8x128xi32>
    %2282 = vector.broadcast %22 : f32 to vector<8x128xf32>
    %2283 = arith.addf %1949, %2282 : vector<8x128xf32>
    %2284 = arith.cmpf ogt, %2283, %2279 : vector<8x128xf32>
    %2285 = arith.maximumf %2279, %2283 : vector<8x128xf32>
    %c2_i32_670 = arith.constant 2 : i32
    %2286 = vector.broadcast %c2_i32_670 : i32 to vector<8x128xi32>
    %2287 = arith.select %2284, %2286, %2281 : vector<8x128xi1>, vector<8x128xi32>
    %2288 = vector.broadcast %30 : f32 to vector<8x128xf32>
    %2289 = arith.addf %2001, %2288 : vector<8x128xf32>
    %2290 = arith.cmpf ogt, %2289, %2285 : vector<8x128xf32>
    %2291 = arith.maximumf %2285, %2289 : vector<8x128xf32>
    %c3_i32_671 = arith.constant 3 : i32
    %2292 = vector.broadcast %c3_i32_671 : i32 to vector<8x128xi32>
    %2293 = arith.select %2290, %2292, %2287 : vector<8x128xi1>, vector<8x128xi32>
    %2294 = vector.broadcast %38 : f32 to vector<8x128xf32>
    %2295 = arith.addf %2053, %2294 : vector<8x128xf32>
    %2296 = arith.cmpf ogt, %2295, %2291 : vector<8x128xf32>
    %2297 = arith.maximumf %2291, %2295 : vector<8x128xf32>
    %c4_i32_672 = arith.constant 4 : i32
    %2298 = vector.broadcast %c4_i32_672 : i32 to vector<8x128xi32>
    %2299 = arith.select %2296, %2298, %2293 : vector<8x128xi1>, vector<8x128xi32>
    %2300 = vector.broadcast %46 : f32 to vector<8x128xf32>
    %2301 = arith.addf %2105, %2300 : vector<8x128xf32>
    %2302 = arith.cmpf ogt, %2301, %2297 : vector<8x128xf32>
    %2303 = arith.maximumf %2297, %2301 : vector<8x128xf32>
    %c5_i32_673 = arith.constant 5 : i32
    %2304 = vector.broadcast %c5_i32_673 : i32 to vector<8x128xi32>
    %2305 = arith.select %2302, %2304, %2299 : vector<8x128xi1>, vector<8x128xi32>
    %2306 = vector.broadcast %54 : f32 to vector<8x128xf32>
    %2307 = arith.addf %2157, %2306 : vector<8x128xf32>
    %2308 = arith.cmpf ogt, %2307, %2303 : vector<8x128xf32>
    %2309 = arith.maximumf %2303, %2307 : vector<8x128xf32>
    %c6_i32_674 = arith.constant 6 : i32
    %2310 = vector.broadcast %c6_i32_674 : i32 to vector<8x128xi32>
    %2311 = arith.select %2308, %2310, %2305 : vector<8x128xi1>, vector<8x128xi32>
    %2312 = vector.broadcast %62 : f32 to vector<8x128xf32>
    %2313 = arith.addf %2209, %2312 : vector<8x128xf32>
    %2314 = arith.cmpf ogt, %2313, %2309 : vector<8x128xf32>
    %2315 = arith.maximumf %2309, %2313 : vector<8x128xf32>
    %c7_i32_675 = arith.constant 7 : i32
    %2316 = vector.broadcast %c7_i32_675 : i32 to vector<8x128xi32>
    %2317 = arith.select %2314, %2316, %2311 : vector<8x128xi1>, vector<8x128xi32>
    %c0_676 = arith.constant 0 : index
    %2318 = arith.index_cast %c6_i32_657 : i32 to index
    %c1_677 = arith.constant 1 : index
    %c0_678 = arith.constant 0 : index
    %c0_679 = arith.constant 0 : index
    %2319 = vector.load %arg2[%c0_676, %2318, %c1_677, %c0_678, %c0_679] : memref<1x8x8x8x128xf32, #tpu.memory_space<vmem>>, vector<1x1x1x8x128xf32>
    %2320 = vector.shape_cast %2319 : vector<1x1x1x8x128xf32> to vector<8x128xf32>
    %2321 = arith.addf %2315, %2320 : vector<8x128xf32>
    %c3_i32_680 = arith.constant 3 : i32
    %2322 = vector.broadcast %c3_i32_680 : i32 to vector<8x128xi32>
    %2323 = arith.shli %2317, %2322 : vector<8x128xi32>
    %2324 = arith.ori %2268, %2323 : vector<8x128xi32>
    %2325 = arith.select %2224, %2321, %1901 : vector<8x128xi1>, vector<8x128xf32>
    %2326 = vector.broadcast %7 : f32 to vector<8x128xf32>
    %2327 = arith.addf %1848, %2326 : vector<8x128xf32>
    %2328 = vector.broadcast %15 : f32 to vector<8x128xf32>
    %2329 = arith.addf %1897, %2328 : vector<8x128xf32>
    %2330 = arith.cmpf ogt, %2329, %2327 : vector<8x128xf32>
    %2331 = arith.maximumf %2327, %2329 : vector<8x128xf32>
    %c1_i32_681 = arith.constant 1 : i32
    %2332 = vector.broadcast %c1_i32_681 : i32 to vector<8x128xi32>
    %2333 = arith.select %2330, %2332, %4 : vector<8x128xi1>, vector<8x128xi32>
    %2334 = vector.broadcast %23 : f32 to vector<8x128xf32>
    %2335 = arith.addf %1949, %2334 : vector<8x128xf32>
    %2336 = arith.cmpf ogt, %2335, %2331 : vector<8x128xf32>
    %2337 = arith.maximumf %2331, %2335 : vector<8x128xf32>
    %c2_i32_682 = arith.constant 2 : i32
    %2338 = vector.broadcast %c2_i32_682 : i32 to vector<8x128xi32>
    %2339 = arith.select %2336, %2338, %2333 : vector<8x128xi1>, vector<8x128xi32>
    %2340 = vector.broadcast %31 : f32 to vector<8x128xf32>
    %2341 = arith.addf %2001, %2340 : vector<8x128xf32>
    %2342 = arith.cmpf ogt, %2341, %2337 : vector<8x128xf32>
    %2343 = arith.maximumf %2337, %2341 : vector<8x128xf32>
    %c3_i32_683 = arith.constant 3 : i32
    %2344 = vector.broadcast %c3_i32_683 : i32 to vector<8x128xi32>
    %2345 = arith.select %2342, %2344, %2339 : vector<8x128xi1>, vector<8x128xi32>
    %2346 = vector.broadcast %39 : f32 to vector<8x128xf32>
    %2347 = arith.addf %2053, %2346 : vector<8x128xf32>
    %2348 = arith.cmpf ogt, %2347, %2343 : vector<8x128xf32>
    %2349 = arith.maximumf %2343, %2347 : vector<8x128xf32>
    %c4_i32_684 = arith.constant 4 : i32
    %2350 = vector.broadcast %c4_i32_684 : i32 to vector<8x128xi32>
    %2351 = arith.select %2348, %2350, %2345 : vector<8x128xi1>, vector<8x128xi32>
    %2352 = vector.broadcast %47 : f32 to vector<8x128xf32>
    %2353 = arith.addf %2105, %2352 : vector<8x128xf32>
    %2354 = arith.cmpf ogt, %2353, %2349 : vector<8x128xf32>
    %2355 = arith.maximumf %2349, %2353 : vector<8x128xf32>
    %c5_i32_685 = arith.constant 5 : i32
    %2356 = vector.broadcast %c5_i32_685 : i32 to vector<8x128xi32>
    %2357 = arith.select %2354, %2356, %2351 : vector<8x128xi1>, vector<8x128xi32>
    %2358 = vector.broadcast %55 : f32 to vector<8x128xf32>
    %2359 = arith.addf %2157, %2358 : vector<8x128xf32>
    %2360 = arith.cmpf ogt, %2359, %2355 : vector<8x128xf32>
    %2361 = arith.maximumf %2355, %2359 : vector<8x128xf32>
    %c6_i32_686 = arith.constant 6 : i32
    %2362 = vector.broadcast %c6_i32_686 : i32 to vector<8x128xi32>
    %2363 = arith.select %2360, %2362, %2357 : vector<8x128xi1>, vector<8x128xi32>
    %2364 = vector.broadcast %63 : f32 to vector<8x128xf32>
    %2365 = arith.addf %2209, %2364 : vector<8x128xf32>
    %2366 = arith.cmpf ogt, %2365, %2361 : vector<8x128xf32>
    %2367 = arith.maximumf %2361, %2365 : vector<8x128xf32>
    %c7_i32_687 = arith.constant 7 : i32
    %2368 = vector.broadcast %c7_i32_687 : i32 to vector<8x128xi32>
    %2369 = arith.select %2366, %2368, %2363 : vector<8x128xi1>, vector<8x128xi32>
    %c0_688 = arith.constant 0 : index
    %2370 = arith.index_cast %c6_i32_657 : i32 to index
    %c2_689 = arith.constant 2 : index
    %c0_690 = arith.constant 0 : index
    %c0_691 = arith.constant 0 : index
    %2371 = vector.load %arg2[%c0_688, %2370, %c2_689, %c0_690, %c0_691] : memref<1x8x8x8x128xf32, #tpu.memory_space<vmem>>, vector<1x1x1x8x128xf32>
    %2372 = vector.shape_cast %2371 : vector<1x1x1x8x128xf32> to vector<8x128xf32>
    %2373 = arith.addf %2367, %2372 : vector<8x128xf32>
    %c6_i32_692 = arith.constant 6 : i32
    %2374 = vector.broadcast %c6_i32_692 : i32 to vector<8x128xi32>
    %2375 = arith.shli %2369, %2374 : vector<8x128xi32>
    %2376 = arith.ori %2324, %2375 : vector<8x128xi32>
    %2377 = arith.select %2224, %2373, %1953 : vector<8x128xi1>, vector<8x128xf32>
    %2378 = vector.broadcast %8 : f32 to vector<8x128xf32>
    %2379 = arith.addf %1848, %2378 : vector<8x128xf32>
    %2380 = vector.broadcast %16 : f32 to vector<8x128xf32>
    %2381 = arith.addf %1897, %2380 : vector<8x128xf32>
    %2382 = arith.cmpf ogt, %2381, %2379 : vector<8x128xf32>
    %2383 = arith.maximumf %2379, %2381 : vector<8x128xf32>
    %c1_i32_693 = arith.constant 1 : i32
    %2384 = vector.broadcast %c1_i32_693 : i32 to vector<8x128xi32>
    %2385 = arith.select %2382, %2384, %4 : vector<8x128xi1>, vector<8x128xi32>
    %2386 = vector.broadcast %24 : f32 to vector<8x128xf32>
    %2387 = arith.addf %1949, %2386 : vector<8x128xf32>
    %2388 = arith.cmpf ogt, %2387, %2383 : vector<8x128xf32>
    %2389 = arith.maximumf %2383, %2387 : vector<8x128xf32>
    %c2_i32_694 = arith.constant 2 : i32
    %2390 = vector.broadcast %c2_i32_694 : i32 to vector<8x128xi32>
    %2391 = arith.select %2388, %2390, %2385 : vector<8x128xi1>, vector<8x128xi32>
    %2392 = vector.broadcast %32 : f32 to vector<8x128xf32>
    %2393 = arith.addf %2001, %2392 : vector<8x128xf32>
    %2394 = arith.cmpf ogt, %2393, %2389 : vector<8x128xf32>
    %2395 = arith.maximumf %2389, %2393 : vector<8x128xf32>
    %c3_i32_695 = arith.constant 3 : i32
    %2396 = vector.broadcast %c3_i32_695 : i32 to vector<8x128xi32>
    %2397 = arith.select %2394, %2396, %2391 : vector<8x128xi1>, vector<8x128xi32>
    %2398 = vector.broadcast %40 : f32 to vector<8x128xf32>
    %2399 = arith.addf %2053, %2398 : vector<8x128xf32>
    %2400 = arith.cmpf ogt, %2399, %2395 : vector<8x128xf32>
    %2401 = arith.maximumf %2395, %2399 : vector<8x128xf32>
    %c4_i32_696 = arith.constant 4 : i32
    %2402 = vector.broadcast %c4_i32_696 : i32 to vector<8x128xi32>
    %2403 = arith.select %2400, %2402, %2397 : vector<8x128xi1>, vector<8x128xi32>
    %2404 = vector.broadcast %48 : f32 to vector<8x128xf32>
    %2405 = arith.addf %2105, %2404 : vector<8x128xf32>
    %2406 = arith.cmpf ogt, %2405, %2401 : vector<8x128xf32>
    %2407 = arith.maximumf %2401, %2405 : vector<8x128xf32>
    %c5_i32_697 = arith.constant 5 : i32
    %2408 = vector.broadcast %c5_i32_697 : i32 to vector<8x128xi32>
    %2409 = arith.select %2406, %2408, %2403 : vector<8x128xi1>, vector<8x128xi32>
    %2410 = vector.broadcast %56 : f32 to vector<8x128xf32>
    %2411 = arith.addf %2157, %2410 : vector<8x128xf32>
    %2412 = arith.cmpf ogt, %2411, %2407 : vector<8x128xf32>
    %2413 = arith.maximumf %2407, %2411 : vector<8x128xf32>
    %c6_i32_698 = arith.constant 6 : i32
    %2414 = vector.broadcast %c6_i32_698 : i32 to vector<8x128xi32>
    %2415 = arith.select %2412, %2414, %2409 : vector<8x128xi1>, vector<8x128xi32>
    %2416 = vector.broadcast %64 : f32 to vector<8x128xf32>
    %2417 = arith.addf %2209, %2416 : vector<8x128xf32>
    %2418 = arith.cmpf ogt, %2417, %2413 : vector<8x128xf32>
    %2419 = arith.maximumf %2413, %2417 : vector<8x128xf32>
    %c7_i32_699 = arith.constant 7 : i32
    %2420 = vector.broadcast %c7_i32_699 : i32 to vector<8x128xi32>
    %2421 = arith.select %2418, %2420, %2415 : vector<8x128xi1>, vector<8x128xi32>
    %c0_700 = arith.constant 0 : index
    %2422 = arith.index_cast %c6_i32_657 : i32 to index
    %c3_701 = arith.constant 3 : index
    %c0_702 = arith.constant 0 : index
    %c0_703 = arith.constant 0 : index
    %2423 = vector.load %arg2[%c0_700, %2422, %c3_701, %c0_702, %c0_703] : memref<1x8x8x8x128xf32, #tpu.memory_space<vmem>>, vector<1x1x1x8x128xf32>
    %2424 = vector.shape_cast %2423 : vector<1x1x1x8x128xf32> to vector<8x128xf32>
    %2425 = arith.addf %2419, %2424 : vector<8x128xf32>
    %c9_i32_704 = arith.constant 9 : i32
    %2426 = vector.broadcast %c9_i32_704 : i32 to vector<8x128xi32>
    %2427 = arith.shli %2421, %2426 : vector<8x128xi32>
    %2428 = arith.ori %2376, %2427 : vector<8x128xi32>
    %2429 = arith.select %2224, %2425, %2005 : vector<8x128xi1>, vector<8x128xf32>
    %2430 = vector.broadcast %9 : f32 to vector<8x128xf32>
    %2431 = arith.addf %1848, %2430 : vector<8x128xf32>
    %2432 = vector.broadcast %17 : f32 to vector<8x128xf32>
    %2433 = arith.addf %1897, %2432 : vector<8x128xf32>
    %2434 = arith.cmpf ogt, %2433, %2431 : vector<8x128xf32>
    %2435 = arith.maximumf %2431, %2433 : vector<8x128xf32>
    %c1_i32_705 = arith.constant 1 : i32
    %2436 = vector.broadcast %c1_i32_705 : i32 to vector<8x128xi32>
    %2437 = arith.select %2434, %2436, %4 : vector<8x128xi1>, vector<8x128xi32>
    %2438 = vector.broadcast %25 : f32 to vector<8x128xf32>
    %2439 = arith.addf %1949, %2438 : vector<8x128xf32>
    %2440 = arith.cmpf ogt, %2439, %2435 : vector<8x128xf32>
    %2441 = arith.maximumf %2435, %2439 : vector<8x128xf32>
    %c2_i32_706 = arith.constant 2 : i32
    %2442 = vector.broadcast %c2_i32_706 : i32 to vector<8x128xi32>
    %2443 = arith.select %2440, %2442, %2437 : vector<8x128xi1>, vector<8x128xi32>
    %2444 = vector.broadcast %33 : f32 to vector<8x128xf32>
    %2445 = arith.addf %2001, %2444 : vector<8x128xf32>
    %2446 = arith.cmpf ogt, %2445, %2441 : vector<8x128xf32>
    %2447 = arith.maximumf %2441, %2445 : vector<8x128xf32>
    %c3_i32_707 = arith.constant 3 : i32
    %2448 = vector.broadcast %c3_i32_707 : i32 to vector<8x128xi32>
    %2449 = arith.select %2446, %2448, %2443 : vector<8x128xi1>, vector<8x128xi32>
    %2450 = vector.broadcast %41 : f32 to vector<8x128xf32>
    %2451 = arith.addf %2053, %2450 : vector<8x128xf32>
    %2452 = arith.cmpf ogt, %2451, %2447 : vector<8x128xf32>
    %2453 = arith.maximumf %2447, %2451 : vector<8x128xf32>
    %c4_i32_708 = arith.constant 4 : i32
    %2454 = vector.broadcast %c4_i32_708 : i32 to vector<8x128xi32>
    %2455 = arith.select %2452, %2454, %2449 : vector<8x128xi1>, vector<8x128xi32>
    %2456 = vector.broadcast %49 : f32 to vector<8x128xf32>
    %2457 = arith.addf %2105, %2456 : vector<8x128xf32>
    %2458 = arith.cmpf ogt, %2457, %2453 : vector<8x128xf32>
    %2459 = arith.maximumf %2453, %2457 : vector<8x128xf32>
    %c5_i32_709 = arith.constant 5 : i32
    %2460 = vector.broadcast %c5_i32_709 : i32 to vector<8x128xi32>
    %2461 = arith.select %2458, %2460, %2455 : vector<8x128xi1>, vector<8x128xi32>
    %2462 = vector.broadcast %57 : f32 to vector<8x128xf32>
    %2463 = arith.addf %2157, %2462 : vector<8x128xf32>
    %2464 = arith.cmpf ogt, %2463, %2459 : vector<8x128xf32>
    %2465 = arith.maximumf %2459, %2463 : vector<8x128xf32>
    %c6_i32_710 = arith.constant 6 : i32
    %2466 = vector.broadcast %c6_i32_710 : i32 to vector<8x128xi32>
    %2467 = arith.select %2464, %2466, %2461 : vector<8x128xi1>, vector<8x128xi32>
    %2468 = vector.broadcast %65 : f32 to vector<8x128xf32>
    %2469 = arith.addf %2209, %2468 : vector<8x128xf32>
    %2470 = arith.cmpf ogt, %2469, %2465 : vector<8x128xf32>
    %2471 = arith.maximumf %2465, %2469 : vector<8x128xf32>
    %c7_i32_711 = arith.constant 7 : i32
    %2472 = vector.broadcast %c7_i32_711 : i32 to vector<8x128xi32>
    %2473 = arith.select %2470, %2472, %2467 : vector<8x128xi1>, vector<8x128xi32>
    %c0_712 = arith.constant 0 : index
    %2474 = arith.index_cast %c6_i32_657 : i32 to index
    %c4_713 = arith.constant 4 : index
    %c0_714 = arith.constant 0 : index
    %c0_715 = arith.constant 0 : index
    %2475 = vector.load %arg2[%c0_712, %2474, %c4_713, %c0_714, %c0_715] : memref<1x8x8x8x128xf32, #tpu.memory_space<vmem>>, vector<1x1x1x8x128xf32>
    %2476 = vector.shape_cast %2475 : vector<1x1x1x8x128xf32> to vector<8x128xf32>
    %2477 = arith.addf %2471, %2476 : vector<8x128xf32>
    %c12_i32_716 = arith.constant 12 : i32
    %2478 = vector.broadcast %c12_i32_716 : i32 to vector<8x128xi32>
    %2479 = arith.shli %2473, %2478 : vector<8x128xi32>
    %2480 = arith.ori %2428, %2479 : vector<8x128xi32>
    %2481 = arith.select %2224, %2477, %2057 : vector<8x128xi1>, vector<8x128xf32>
    %2482 = vector.broadcast %10 : f32 to vector<8x128xf32>
    %2483 = arith.addf %1848, %2482 : vector<8x128xf32>
    %2484 = vector.broadcast %18 : f32 to vector<8x128xf32>
    %2485 = arith.addf %1897, %2484 : vector<8x128xf32>
    %2486 = arith.cmpf ogt, %2485, %2483 : vector<8x128xf32>
    %2487 = arith.maximumf %2483, %2485 : vector<8x128xf32>
    %c1_i32_717 = arith.constant 1 : i32
    %2488 = vector.broadcast %c1_i32_717 : i32 to vector<8x128xi32>
    %2489 = arith.select %2486, %2488, %4 : vector<8x128xi1>, vector<8x128xi32>
    %2490 = vector.broadcast %26 : f32 to vector<8x128xf32>
    %2491 = arith.addf %1949, %2490 : vector<8x128xf32>
    %2492 = arith.cmpf ogt, %2491, %2487 : vector<8x128xf32>
    %2493 = arith.maximumf %2487, %2491 : vector<8x128xf32>
    %c2_i32_718 = arith.constant 2 : i32
    %2494 = vector.broadcast %c2_i32_718 : i32 to vector<8x128xi32>
    %2495 = arith.select %2492, %2494, %2489 : vector<8x128xi1>, vector<8x128xi32>
    %2496 = vector.broadcast %34 : f32 to vector<8x128xf32>
    %2497 = arith.addf %2001, %2496 : vector<8x128xf32>
    %2498 = arith.cmpf ogt, %2497, %2493 : vector<8x128xf32>
    %2499 = arith.maximumf %2493, %2497 : vector<8x128xf32>
    %c3_i32_719 = arith.constant 3 : i32
    %2500 = vector.broadcast %c3_i32_719 : i32 to vector<8x128xi32>
    %2501 = arith.select %2498, %2500, %2495 : vector<8x128xi1>, vector<8x128xi32>
    %2502 = vector.broadcast %42 : f32 to vector<8x128xf32>
    %2503 = arith.addf %2053, %2502 : vector<8x128xf32>
    %2504 = arith.cmpf ogt, %2503, %2499 : vector<8x128xf32>
    %2505 = arith.maximumf %2499, %2503 : vector<8x128xf32>
    %c4_i32_720 = arith.constant 4 : i32
    %2506 = vector.broadcast %c4_i32_720 : i32 to vector<8x128xi32>
    %2507 = arith.select %2504, %2506, %2501 : vector<8x128xi1>, vector<8x128xi32>
    %2508 = vector.broadcast %50 : f32 to vector<8x128xf32>
    %2509 = arith.addf %2105, %2508 : vector<8x128xf32>
    %2510 = arith.cmpf ogt, %2509, %2505 : vector<8x128xf32>
    %2511 = arith.maximumf %2505, %2509 : vector<8x128xf32>
    %c5_i32_721 = arith.constant 5 : i32
    %2512 = vector.broadcast %c5_i32_721 : i32 to vector<8x128xi32>
    %2513 = arith.select %2510, %2512, %2507 : vector<8x128xi1>, vector<8x128xi32>
    %2514 = vector.broadcast %58 : f32 to vector<8x128xf32>
    %2515 = arith.addf %2157, %2514 : vector<8x128xf32>
    %2516 = arith.cmpf ogt, %2515, %2511 : vector<8x128xf32>
    %2517 = arith.maximumf %2511, %2515 : vector<8x128xf32>
    %c6_i32_722 = arith.constant 6 : i32
    %2518 = vector.broadcast %c6_i32_722 : i32 to vector<8x128xi32>
    %2519 = arith.select %2516, %2518, %2513 : vector<8x128xi1>, vector<8x128xi32>
    %2520 = vector.broadcast %66 : f32 to vector<8x128xf32>
    %2521 = arith.addf %2209, %2520 : vector<8x128xf32>
    %2522 = arith.cmpf ogt, %2521, %2517 : vector<8x128xf32>
    %2523 = arith.maximumf %2517, %2521 : vector<8x128xf32>
    %c7_i32_723 = arith.constant 7 : i32
    %2524 = vector.broadcast %c7_i32_723 : i32 to vector<8x128xi32>
    %2525 = arith.select %2522, %2524, %2519 : vector<8x128xi1>, vector<8x128xi32>
    %c0_724 = arith.constant 0 : index
    %2526 = arith.index_cast %c6_i32_657 : i32 to index
    %c5_725 = arith.constant 5 : index
    %c0_726 = arith.constant 0 : index
    %c0_727 = arith.constant 0 : index
    %2527 = vector.load %arg2[%c0_724, %2526, %c5_725, %c0_726, %c0_727] : memref<1x8x8x8x128xf32, #tpu.memory_space<vmem>>, vector<1x1x1x8x128xf32>
    %2528 = vector.shape_cast %2527 : vector<1x1x1x8x128xf32> to vector<8x128xf32>
    %2529 = arith.addf %2523, %2528 : vector<8x128xf32>
    %c15_i32_728 = arith.constant 15 : i32
    %2530 = vector.broadcast %c15_i32_728 : i32 to vector<8x128xi32>
    %2531 = arith.shli %2525, %2530 : vector<8x128xi32>
    %2532 = arith.ori %2480, %2531 : vector<8x128xi32>
    %2533 = arith.select %2224, %2529, %2109 : vector<8x128xi1>, vector<8x128xf32>
    %2534 = vector.broadcast %11 : f32 to vector<8x128xf32>
    %2535 = arith.addf %1848, %2534 : vector<8x128xf32>
    %2536 = vector.broadcast %19 : f32 to vector<8x128xf32>
    %2537 = arith.addf %1897, %2536 : vector<8x128xf32>
    %2538 = arith.cmpf ogt, %2537, %2535 : vector<8x128xf32>
    %2539 = arith.maximumf %2535, %2537 : vector<8x128xf32>
    %c1_i32_729 = arith.constant 1 : i32
    %2540 = vector.broadcast %c1_i32_729 : i32 to vector<8x128xi32>
    %2541 = arith.select %2538, %2540, %4 : vector<8x128xi1>, vector<8x128xi32>
    %2542 = vector.broadcast %27 : f32 to vector<8x128xf32>
    %2543 = arith.addf %1949, %2542 : vector<8x128xf32>
    %2544 = arith.cmpf ogt, %2543, %2539 : vector<8x128xf32>
    %2545 = arith.maximumf %2539, %2543 : vector<8x128xf32>
    %c2_i32_730 = arith.constant 2 : i32
    %2546 = vector.broadcast %c2_i32_730 : i32 to vector<8x128xi32>
    %2547 = arith.select %2544, %2546, %2541 : vector<8x128xi1>, vector<8x128xi32>
    %2548 = vector.broadcast %35 : f32 to vector<8x128xf32>
    %2549 = arith.addf %2001, %2548 : vector<8x128xf32>
    %2550 = arith.cmpf ogt, %2549, %2545 : vector<8x128xf32>
    %2551 = arith.maximumf %2545, %2549 : vector<8x128xf32>
    %c3_i32_731 = arith.constant 3 : i32
    %2552 = vector.broadcast %c3_i32_731 : i32 to vector<8x128xi32>
    %2553 = arith.select %2550, %2552, %2547 : vector<8x128xi1>, vector<8x128xi32>
    %2554 = vector.broadcast %43 : f32 to vector<8x128xf32>
    %2555 = arith.addf %2053, %2554 : vector<8x128xf32>
    %2556 = arith.cmpf ogt, %2555, %2551 : vector<8x128xf32>
    %2557 = arith.maximumf %2551, %2555 : vector<8x128xf32>
    %c4_i32_732 = arith.constant 4 : i32
    %2558 = vector.broadcast %c4_i32_732 : i32 to vector<8x128xi32>
    %2559 = arith.select %2556, %2558, %2553 : vector<8x128xi1>, vector<8x128xi32>
    %2560 = vector.broadcast %51 : f32 to vector<8x128xf32>
    %2561 = arith.addf %2105, %2560 : vector<8x128xf32>
    %2562 = arith.cmpf ogt, %2561, %2557 : vector<8x128xf32>
    %2563 = arith.maximumf %2557, %2561 : vector<8x128xf32>
    %c5_i32_733 = arith.constant 5 : i32
    %2564 = vector.broadcast %c5_i32_733 : i32 to vector<8x128xi32>
    %2565 = arith.select %2562, %2564, %2559 : vector<8x128xi1>, vector<8x128xi32>
    %2566 = vector.broadcast %59 : f32 to vector<8x128xf32>
    %2567 = arith.addf %2157, %2566 : vector<8x128xf32>
    %2568 = arith.cmpf ogt, %2567, %2563 : vector<8x128xf32>
    %2569 = arith.maximumf %2563, %2567 : vector<8x128xf32>
    %c6_i32_734 = arith.constant 6 : i32
    %2570 = vector.broadcast %c6_i32_734 : i32 to vector<8x128xi32>
    %2571 = arith.select %2568, %2570, %2565 : vector<8x128xi1>, vector<8x128xi32>
    %2572 = vector.broadcast %67 : f32 to vector<8x128xf32>
    %2573 = arith.addf %2209, %2572 : vector<8x128xf32>
    %2574 = arith.cmpf ogt, %2573, %2569 : vector<8x128xf32>
    %2575 = arith.maximumf %2569, %2573 : vector<8x128xf32>
    %c7_i32_735 = arith.constant 7 : i32
    %2576 = vector.broadcast %c7_i32_735 : i32 to vector<8x128xi32>
    %2577 = arith.select %2574, %2576, %2571 : vector<8x128xi1>, vector<8x128xi32>
    %c0_736 = arith.constant 0 : index
    %2578 = arith.index_cast %c6_i32_657 : i32 to index
    %c6_737 = arith.constant 6 : index
    %c0_738 = arith.constant 0 : index
    %c0_739 = arith.constant 0 : index
    %2579 = vector.load %arg2[%c0_736, %2578, %c6_737, %c0_738, %c0_739] : memref<1x8x8x8x128xf32, #tpu.memory_space<vmem>>, vector<1x1x1x8x128xf32>
    %2580 = vector.shape_cast %2579 : vector<1x1x1x8x128xf32> to vector<8x128xf32>
    %2581 = arith.addf %2575, %2580 : vector<8x128xf32>
    %c18_i32_740 = arith.constant 18 : i32
    %2582 = vector.broadcast %c18_i32_740 : i32 to vector<8x128xi32>
    %2583 = arith.shli %2577, %2582 : vector<8x128xi32>
    %2584 = arith.ori %2532, %2583 : vector<8x128xi32>
    %2585 = arith.select %2224, %2581, %2161 : vector<8x128xi1>, vector<8x128xf32>
    %2586 = vector.broadcast %12 : f32 to vector<8x128xf32>
    %2587 = arith.addf %1848, %2586 : vector<8x128xf32>
    %2588 = vector.broadcast %20 : f32 to vector<8x128xf32>
    %2589 = arith.addf %1897, %2588 : vector<8x128xf32>
    %2590 = arith.cmpf ogt, %2589, %2587 : vector<8x128xf32>
    %2591 = arith.maximumf %2587, %2589 : vector<8x128xf32>
    %c1_i32_741 = arith.constant 1 : i32
    %2592 = vector.broadcast %c1_i32_741 : i32 to vector<8x128xi32>
    %2593 = arith.select %2590, %2592, %4 : vector<8x128xi1>, vector<8x128xi32>
    %2594 = vector.broadcast %28 : f32 to vector<8x128xf32>
    %2595 = arith.addf %1949, %2594 : vector<8x128xf32>
    %2596 = arith.cmpf ogt, %2595, %2591 : vector<8x128xf32>
    %2597 = arith.maximumf %2591, %2595 : vector<8x128xf32>
    %c2_i32_742 = arith.constant 2 : i32
    %2598 = vector.broadcast %c2_i32_742 : i32 to vector<8x128xi32>
    %2599 = arith.select %2596, %2598, %2593 : vector<8x128xi1>, vector<8x128xi32>
    %2600 = vector.broadcast %36 : f32 to vector<8x128xf32>
    %2601 = arith.addf %2001, %2600 : vector<8x128xf32>
    %2602 = arith.cmpf ogt, %2601, %2597 : vector<8x128xf32>
    %2603 = arith.maximumf %2597, %2601 : vector<8x128xf32>
    %c3_i32_743 = arith.constant 3 : i32
    %2604 = vector.broadcast %c3_i32_743 : i32 to vector<8x128xi32>
    %2605 = arith.select %2602, %2604, %2599 : vector<8x128xi1>, vector<8x128xi32>
    %2606 = vector.broadcast %44 : f32 to vector<8x128xf32>
    %2607 = arith.addf %2053, %2606 : vector<8x128xf32>
    %2608 = arith.cmpf ogt, %2607, %2603 : vector<8x128xf32>
    %2609 = arith.maximumf %2603, %2607 : vector<8x128xf32>
    %c4_i32_744 = arith.constant 4 : i32
    %2610 = vector.broadcast %c4_i32_744 : i32 to vector<8x128xi32>
    %2611 = arith.select %2608, %2610, %2605 : vector<8x128xi1>, vector<8x128xi32>
    %2612 = vector.broadcast %52 : f32 to vector<8x128xf32>
    %2613 = arith.addf %2105, %2612 : vector<8x128xf32>
    %2614 = arith.cmpf ogt, %2613, %2609 : vector<8x128xf32>
    %2615 = arith.maximumf %2609, %2613 : vector<8x128xf32>
    %c5_i32_745 = arith.constant 5 : i32
    %2616 = vector.broadcast %c5_i32_745 : i32 to vector<8x128xi32>
    %2617 = arith.select %2614, %2616, %2611 : vector<8x128xi1>, vector<8x128xi32>
    %2618 = vector.broadcast %60 : f32 to vector<8x128xf32>
    %2619 = arith.addf %2157, %2618 : vector<8x128xf32>
    %2620 = arith.cmpf ogt, %2619, %2615 : vector<8x128xf32>
    %2621 = arith.maximumf %2615, %2619 : vector<8x128xf32>
    %c6_i32_746 = arith.constant 6 : i32
    %2622 = vector.broadcast %c6_i32_746 : i32 to vector<8x128xi32>
    %2623 = arith.select %2620, %2622, %2617 : vector<8x128xi1>, vector<8x128xi32>
    %2624 = vector.broadcast %68 : f32 to vector<8x128xf32>
    %2625 = arith.addf %2209, %2624 : vector<8x128xf32>
    %2626 = arith.cmpf ogt, %2625, %2621 : vector<8x128xf32>
    %2627 = arith.maximumf %2621, %2625 : vector<8x128xf32>
    %c7_i32_747 = arith.constant 7 : i32
    %2628 = vector.broadcast %c7_i32_747 : i32 to vector<8x128xi32>
    %2629 = arith.select %2626, %2628, %2623 : vector<8x128xi1>, vector<8x128xi32>
    %c0_748 = arith.constant 0 : index
    %2630 = arith.index_cast %c6_i32_657 : i32 to index
    %c7_749 = arith.constant 7 : index
    %c0_750 = arith.constant 0 : index
    %c0_751 = arith.constant 0 : index
    %2631 = vector.load %arg2[%c0_748, %2630, %c7_749, %c0_750, %c0_751] : memref<1x8x8x8x128xf32, #tpu.memory_space<vmem>>, vector<1x1x1x8x128xf32>
    %2632 = vector.shape_cast %2631 : vector<1x1x1x8x128xf32> to vector<8x128xf32>
    %2633 = arith.addf %2627, %2632 : vector<8x128xf32>
    %c21_i32_752 = arith.constant 21 : i32
    %2634 = vector.broadcast %c21_i32_752 : i32 to vector<8x128xi32>
    %2635 = arith.shli %2629, %2634 : vector<8x128xi32>
    %2636 = arith.ori %2584, %2635 : vector<8x128xi32>
    %2637 = arith.select %2224, %2633, %2213 : vector<8x128xi1>, vector<8x128xf32>
    %c0_i32_753 = arith.constant 0 : i32
    %2638 = vector.broadcast %c0_i32_753 : i32 to vector<8x128xi32>
    %2639 = arith.select %2222, %2636, %2638 : vector<8x128xi1>, vector<8x128xi32>
    %c1_i32_754 = arith.constant 1 : i32
    %2640 = arith.subi %c6_i32_657, %c1_i32_754 : i32
    %2641 = arith.index_cast %2640 : i32 to index
    %c0_755 = arith.constant 0 : index
    %c0_756 = arith.constant 0 : index
    %c0_757 = arith.constant 0 : index
    %2642 = vector.load %arg5[%2641, %c0_755, %c0_756, %c0_757] : memref<8x1x8x128xi32, #tpu.memory_space<vmem>>, vector<1x1x8x128xi32>
    %2643 = vector.shape_cast %2642 : vector<1x1x8x128xi32> to vector<8x128xi32>
    %2644 = vector.shape_cast %2639 : vector<8x128xi32> to vector<1x1x8x128xi32>
    tpu.vector_store %arg5[%2641, %c0_755, %c0_756, %c0_757], %2644 {strides = array<i32>} : memref<8x1x8x128xi32, #tpu.memory_space<vmem>>, vector<1x1x8x128xi32>,
    %c7_i32_758 = arith.constant 7 : i32
    %2645 = vector.broadcast %c7_i32_758 : i32 to vector<8x128xi32>
    %2646 = arith.cmpi slt, %2645, %1 : vector<8x128xi32>
    %2647 = vector.broadcast %c7_i32_758 : i32 to vector<8x128xi32>
    %2648 = arith.cmpi eq, %2647, %3 : vector<8x128xi32>
    %2649 = vector.broadcast %5 : f32 to vector<8x128xf32>
    %2650 = arith.addf %2272, %2649 : vector<8x128xf32>
    %2651 = vector.broadcast %13 : f32 to vector<8x128xf32>
    %2652 = arith.addf %2321, %2651 : vector<8x128xf32>
    %2653 = arith.cmpf ogt, %2652, %2650 : vector<8x128xf32>
    %2654 = arith.maximumf %2650, %2652 : vector<8x128xf32>
    %c1_i32_759 = arith.constant 1 : i32
    %2655 = vector.broadcast %c1_i32_759 : i32 to vector<8x128xi32>
    %2656 = arith.select %2653, %2655, %4 : vector<8x128xi1>, vector<8x128xi32>
    %2657 = vector.broadcast %21 : f32 to vector<8x128xf32>
    %2658 = arith.addf %2373, %2657 : vector<8x128xf32>
    %2659 = arith.cmpf ogt, %2658, %2654 : vector<8x128xf32>
    %2660 = arith.maximumf %2654, %2658 : vector<8x128xf32>
    %c2_i32_760 = arith.constant 2 : i32
    %2661 = vector.broadcast %c2_i32_760 : i32 to vector<8x128xi32>
    %2662 = arith.select %2659, %2661, %2656 : vector<8x128xi1>, vector<8x128xi32>
    %2663 = vector.broadcast %29 : f32 to vector<8x128xf32>
    %2664 = arith.addf %2425, %2663 : vector<8x128xf32>
    %2665 = arith.cmpf ogt, %2664, %2660 : vector<8x128xf32>
    %2666 = arith.maximumf %2660, %2664 : vector<8x128xf32>
    %c3_i32_761 = arith.constant 3 : i32
    %2667 = vector.broadcast %c3_i32_761 : i32 to vector<8x128xi32>
    %2668 = arith.select %2665, %2667, %2662 : vector<8x128xi1>, vector<8x128xi32>
    %2669 = vector.broadcast %37 : f32 to vector<8x128xf32>
    %2670 = arith.addf %2477, %2669 : vector<8x128xf32>
    %2671 = arith.cmpf ogt, %2670, %2666 : vector<8x128xf32>
    %2672 = arith.maximumf %2666, %2670 : vector<8x128xf32>
    %c4_i32_762 = arith.constant 4 : i32
    %2673 = vector.broadcast %c4_i32_762 : i32 to vector<8x128xi32>
    %2674 = arith.select %2671, %2673, %2668 : vector<8x128xi1>, vector<8x128xi32>
    %2675 = vector.broadcast %45 : f32 to vector<8x128xf32>
    %2676 = arith.addf %2529, %2675 : vector<8x128xf32>
    %2677 = arith.cmpf ogt, %2676, %2672 : vector<8x128xf32>
    %2678 = arith.maximumf %2672, %2676 : vector<8x128xf32>
    %c5_i32_763 = arith.constant 5 : i32
    %2679 = vector.broadcast %c5_i32_763 : i32 to vector<8x128xi32>
    %2680 = arith.select %2677, %2679, %2674 : vector<8x128xi1>, vector<8x128xi32>
    %2681 = vector.broadcast %53 : f32 to vector<8x128xf32>
    %2682 = arith.addf %2581, %2681 : vector<8x128xf32>
    %2683 = arith.cmpf ogt, %2682, %2678 : vector<8x128xf32>
    %2684 = arith.maximumf %2678, %2682 : vector<8x128xf32>
    %c6_i32_764 = arith.constant 6 : i32
    %2685 = vector.broadcast %c6_i32_764 : i32 to vector<8x128xi32>
    %2686 = arith.select %2683, %2685, %2680 : vector<8x128xi1>, vector<8x128xi32>
    %2687 = vector.broadcast %61 : f32 to vector<8x128xf32>
    %2688 = arith.addf %2633, %2687 : vector<8x128xf32>
    %2689 = arith.cmpf ogt, %2688, %2684 : vector<8x128xf32>
    %2690 = arith.maximumf %2684, %2688 : vector<8x128xf32>
    %c7_i32_765 = arith.constant 7 : i32
    %2691 = vector.broadcast %c7_i32_765 : i32 to vector<8x128xi32>
    %2692 = arith.select %2689, %2691, %2686 : vector<8x128xi1>, vector<8x128xi32>
    %c0_766 = arith.constant 0 : index
    %2693 = arith.index_cast %c7_i32_758 : i32 to index
    %c0_767 = arith.constant 0 : index
    %c0_768 = arith.constant 0 : index
    %c0_769 = arith.constant 0 : index
    %2694 = vector.load %arg2[%c0_766, %2693, %c0_767, %c0_768, %c0_769] : memref<1x8x8x8x128xf32, #tpu.memory_space<vmem>>, vector<1x1x1x8x128xf32>
    %2695 = vector.shape_cast %2694 : vector<1x1x1x8x128xf32> to vector<8x128xf32>
    %2696 = arith.addf %2690, %2695 : vector<8x128xf32>
    %2697 = arith.select %2648, %2696, %2273 : vector<8x128xi1>, vector<8x128xf32>
    %2698 = vector.broadcast %6 : f32 to vector<8x128xf32>
    %2699 = arith.addf %2272, %2698 : vector<8x128xf32>
    %2700 = vector.broadcast %14 : f32 to vector<8x128xf32>
    %2701 = arith.addf %2321, %2700 : vector<8x128xf32>
    %2702 = arith.cmpf ogt, %2701, %2699 : vector<8x128xf32>
    %2703 = arith.maximumf %2699, %2701 : vector<8x128xf32>
    %c1_i32_770 = arith.constant 1 : i32
    %2704 = vector.broadcast %c1_i32_770 : i32 to vector<8x128xi32>
    %2705 = arith.select %2702, %2704, %4 : vector<8x128xi1>, vector<8x128xi32>
    %2706 = vector.broadcast %22 : f32 to vector<8x128xf32>
    %2707 = arith.addf %2373, %2706 : vector<8x128xf32>
    %2708 = arith.cmpf ogt, %2707, %2703 : vector<8x128xf32>
    %2709 = arith.maximumf %2703, %2707 : vector<8x128xf32>
    %c2_i32_771 = arith.constant 2 : i32
    %2710 = vector.broadcast %c2_i32_771 : i32 to vector<8x128xi32>
    %2711 = arith.select %2708, %2710, %2705 : vector<8x128xi1>, vector<8x128xi32>
    %2712 = vector.broadcast %30 : f32 to vector<8x128xf32>
    %2713 = arith.addf %2425, %2712 : vector<8x128xf32>
    %2714 = arith.cmpf ogt, %2713, %2709 : vector<8x128xf32>
    %2715 = arith.maximumf %2709, %2713 : vector<8x128xf32>
    %c3_i32_772 = arith.constant 3 : i32
    %2716 = vector.broadcast %c3_i32_772 : i32 to vector<8x128xi32>
    %2717 = arith.select %2714, %2716, %2711 : vector<8x128xi1>, vector<8x128xi32>
    %2718 = vector.broadcast %38 : f32 to vector<8x128xf32>
    %2719 = arith.addf %2477, %2718 : vector<8x128xf32>
    %2720 = arith.cmpf ogt, %2719, %2715 : vector<8x128xf32>
    %2721 = arith.maximumf %2715, %2719 : vector<8x128xf32>
    %c4_i32_773 = arith.constant 4 : i32
    %2722 = vector.broadcast %c4_i32_773 : i32 to vector<8x128xi32>
    %2723 = arith.select %2720, %2722, %2717 : vector<8x128xi1>, vector<8x128xi32>
    %2724 = vector.broadcast %46 : f32 to vector<8x128xf32>
    %2725 = arith.addf %2529, %2724 : vector<8x128xf32>
    %2726 = arith.cmpf ogt, %2725, %2721 : vector<8x128xf32>
    %2727 = arith.maximumf %2721, %2725 : vector<8x128xf32>
    %c5_i32_774 = arith.constant 5 : i32
    %2728 = vector.broadcast %c5_i32_774 : i32 to vector<8x128xi32>
    %2729 = arith.select %2726, %2728, %2723 : vector<8x128xi1>, vector<8x128xi32>
    %2730 = vector.broadcast %54 : f32 to vector<8x128xf32>
    %2731 = arith.addf %2581, %2730 : vector<8x128xf32>
    %2732 = arith.cmpf ogt, %2731, %2727 : vector<8x128xf32>
    %2733 = arith.maximumf %2727, %2731 : vector<8x128xf32>
    %c6_i32_775 = arith.constant 6 : i32
    %2734 = vector.broadcast %c6_i32_775 : i32 to vector<8x128xi32>
    %2735 = arith.select %2732, %2734, %2729 : vector<8x128xi1>, vector<8x128xi32>
    %2736 = vector.broadcast %62 : f32 to vector<8x128xf32>
    %2737 = arith.addf %2633, %2736 : vector<8x128xf32>
    %2738 = arith.cmpf ogt, %2737, %2733 : vector<8x128xf32>
    %2739 = arith.maximumf %2733, %2737 : vector<8x128xf32>
    %c7_i32_776 = arith.constant 7 : i32
    %2740 = vector.broadcast %c7_i32_776 : i32 to vector<8x128xi32>
    %2741 = arith.select %2738, %2740, %2735 : vector<8x128xi1>, vector<8x128xi32>
    %c0_777 = arith.constant 0 : index
    %2742 = arith.index_cast %c7_i32_758 : i32 to index
    %c1_778 = arith.constant 1 : index
    %c0_779 = arith.constant 0 : index
    %c0_780 = arith.constant 0 : index
    %2743 = vector.load %arg2[%c0_777, %2742, %c1_778, %c0_779, %c0_780] : memref<1x8x8x8x128xf32, #tpu.memory_space<vmem>>, vector<1x1x1x8x128xf32>
    %2744 = vector.shape_cast %2743 : vector<1x1x1x8x128xf32> to vector<8x128xf32>
    %2745 = arith.addf %2739, %2744 : vector<8x128xf32>
    %c3_i32_781 = arith.constant 3 : i32
    %2746 = vector.broadcast %c3_i32_781 : i32 to vector<8x128xi32>
    %2747 = arith.shli %2741, %2746 : vector<8x128xi32>
    %2748 = arith.ori %2692, %2747 : vector<8x128xi32>
    %2749 = arith.select %2648, %2745, %2325 : vector<8x128xi1>, vector<8x128xf32>
    %2750 = vector.broadcast %7 : f32 to vector<8x128xf32>
    %2751 = arith.addf %2272, %2750 : vector<8x128xf32>
    %2752 = vector.broadcast %15 : f32 to vector<8x128xf32>
    %2753 = arith.addf %2321, %2752 : vector<8x128xf32>
    %2754 = arith.cmpf ogt, %2753, %2751 : vector<8x128xf32>
    %2755 = arith.maximumf %2751, %2753 : vector<8x128xf32>
    %c1_i32_782 = arith.constant 1 : i32
    %2756 = vector.broadcast %c1_i32_782 : i32 to vector<8x128xi32>
    %2757 = arith.select %2754, %2756, %4 : vector<8x128xi1>, vector<8x128xi32>
    %2758 = vector.broadcast %23 : f32 to vector<8x128xf32>
    %2759 = arith.addf %2373, %2758 : vector<8x128xf32>
    %2760 = arith.cmpf ogt, %2759, %2755 : vector<8x128xf32>
    %2761 = arith.maximumf %2755, %2759 : vector<8x128xf32>
    %c2_i32_783 = arith.constant 2 : i32
    %2762 = vector.broadcast %c2_i32_783 : i32 to vector<8x128xi32>
    %2763 = arith.select %2760, %2762, %2757 : vector<8x128xi1>, vector<8x128xi32>
    %2764 = vector.broadcast %31 : f32 to vector<8x128xf32>
    %2765 = arith.addf %2425, %2764 : vector<8x128xf32>
    %2766 = arith.cmpf ogt, %2765, %2761 : vector<8x128xf32>
    %2767 = arith.maximumf %2761, %2765 : vector<8x128xf32>
    %c3_i32_784 = arith.constant 3 : i32
    %2768 = vector.broadcast %c3_i32_784 : i32 to vector<8x128xi32>
    %2769 = arith.select %2766, %2768, %2763 : vector<8x128xi1>, vector<8x128xi32>
    %2770 = vector.broadcast %39 : f32 to vector<8x128xf32>
    %2771 = arith.addf %2477, %2770 : vector<8x128xf32>
    %2772 = arith.cmpf ogt, %2771, %2767 : vector<8x128xf32>
    %2773 = arith.maximumf %2767, %2771 : vector<8x128xf32>
    %c4_i32_785 = arith.constant 4 : i32
    %2774 = vector.broadcast %c4_i32_785 : i32 to vector<8x128xi32>
    %2775 = arith.select %2772, %2774, %2769 : vector<8x128xi1>, vector<8x128xi32>
    %2776 = vector.broadcast %47 : f32 to vector<8x128xf32>
    %2777 = arith.addf %2529, %2776 : vector<8x128xf32>
    %2778 = arith.cmpf ogt, %2777, %2773 : vector<8x128xf32>
    %2779 = arith.maximumf %2773, %2777 : vector<8x128xf32>
    %c5_i32_786 = arith.constant 5 : i32
    %2780 = vector.broadcast %c5_i32_786 : i32 to vector<8x128xi32>
    %2781 = arith.select %2778, %2780, %2775 : vector<8x128xi1>, vector<8x128xi32>
    %2782 = vector.broadcast %55 : f32 to vector<8x128xf32>
    %2783 = arith.addf %2581, %2782 : vector<8x128xf32>
    %2784 = arith.cmpf ogt, %2783, %2779 : vector<8x128xf32>
    %2785 = arith.maximumf %2779, %2783 : vector<8x128xf32>
    %c6_i32_787 = arith.constant 6 : i32
    %2786 = vector.broadcast %c6_i32_787 : i32 to vector<8x128xi32>
    %2787 = arith.select %2784, %2786, %2781 : vector<8x128xi1>, vector<8x128xi32>
    %2788 = vector.broadcast %63 : f32 to vector<8x128xf32>
    %2789 = arith.addf %2633, %2788 : vector<8x128xf32>
    %2790 = arith.cmpf ogt, %2789, %2785 : vector<8x128xf32>
    %2791 = arith.maximumf %2785, %2789 : vector<8x128xf32>
    %c7_i32_788 = arith.constant 7 : i32
    %2792 = vector.broadcast %c7_i32_788 : i32 to vector<8x128xi32>
    %2793 = arith.select %2790, %2792, %2787 : vector<8x128xi1>, vector<8x128xi32>
    %c0_789 = arith.constant 0 : index
    %2794 = arith.index_cast %c7_i32_758 : i32 to index
    %c2_790 = arith.constant 2 : index
    %c0_791 = arith.constant 0 : index
    %c0_792 = arith.constant 0 : index
    %2795 = vector.load %arg2[%c0_789, %2794, %c2_790, %c0_791, %c0_792] : memref<1x8x8x8x128xf32, #tpu.memory_space<vmem>>, vector<1x1x1x8x128xf32>
    %2796 = vector.shape_cast %2795 : vector<1x1x1x8x128xf32> to vector<8x128xf32>
    %2797 = arith.addf %2791, %2796 : vector<8x128xf32>
    %c6_i32_793 = arith.constant 6 : i32
    %2798 = vector.broadcast %c6_i32_793 : i32 to vector<8x128xi32>
    %2799 = arith.shli %2793, %2798 : vector<8x128xi32>
    %2800 = arith.ori %2748, %2799 : vector<8x128xi32>
    %2801 = arith.select %2648, %2797, %2377 : vector<8x128xi1>, vector<8x128xf32>
    %2802 = vector.broadcast %8 : f32 to vector<8x128xf32>
    %2803 = arith.addf %2272, %2802 : vector<8x128xf32>
    %2804 = vector.broadcast %16 : f32 to vector<8x128xf32>
    %2805 = arith.addf %2321, %2804 : vector<8x128xf32>
    %2806 = arith.cmpf ogt, %2805, %2803 : vector<8x128xf32>
    %2807 = arith.maximumf %2803, %2805 : vector<8x128xf32>
    %c1_i32_794 = arith.constant 1 : i32
    %2808 = vector.broadcast %c1_i32_794 : i32 to vector<8x128xi32>
    %2809 = arith.select %2806, %2808, %4 : vector<8x128xi1>, vector<8x128xi32>
    %2810 = vector.broadcast %24 : f32 to vector<8x128xf32>
    %2811 = arith.addf %2373, %2810 : vector<8x128xf32>
    %2812 = arith.cmpf ogt, %2811, %2807 : vector<8x128xf32>
    %2813 = arith.maximumf %2807, %2811 : vector<8x128xf32>
    %c2_i32_795 = arith.constant 2 : i32
    %2814 = vector.broadcast %c2_i32_795 : i32 to vector<8x128xi32>
    %2815 = arith.select %2812, %2814, %2809 : vector<8x128xi1>, vector<8x128xi32>
    %2816 = vector.broadcast %32 : f32 to vector<8x128xf32>
    %2817 = arith.addf %2425, %2816 : vector<8x128xf32>
    %2818 = arith.cmpf ogt, %2817, %2813 : vector<8x128xf32>
    %2819 = arith.maximumf %2813, %2817 : vector<8x128xf32>
    %c3_i32_796 = arith.constant 3 : i32
    %2820 = vector.broadcast %c3_i32_796 : i32 to vector<8x128xi32>
    %2821 = arith.select %2818, %2820, %2815 : vector<8x128xi1>, vector<8x128xi32>
    %2822 = vector.broadcast %40 : f32 to vector<8x128xf32>
    %2823 = arith.addf %2477, %2822 : vector<8x128xf32>
    %2824 = arith.cmpf ogt, %2823, %2819 : vector<8x128xf32>
    %2825 = arith.maximumf %2819, %2823 : vector<8x128xf32>
    %c4_i32_797 = arith.constant 4 : i32
    %2826 = vector.broadcast %c4_i32_797 : i32 to vector<8x128xi32>
    %2827 = arith.select %2824, %2826, %2821 : vector<8x128xi1>, vector<8x128xi32>
    %2828 = vector.broadcast %48 : f32 to vector<8x128xf32>
    %2829 = arith.addf %2529, %2828 : vector<8x128xf32>
    %2830 = arith.cmpf ogt, %2829, %2825 : vector<8x128xf32>
    %2831 = arith.maximumf %2825, %2829 : vector<8x128xf32>
    %c5_i32_798 = arith.constant 5 : i32
    %2832 = vector.broadcast %c5_i32_798 : i32 to vector<8x128xi32>
    %2833 = arith.select %2830, %2832, %2827 : vector<8x128xi1>, vector<8x128xi32>
    %2834 = vector.broadcast %56 : f32 to vector<8x128xf32>
    %2835 = arith.addf %2581, %2834 : vector<8x128xf32>
    %2836 = arith.cmpf ogt, %2835, %2831 : vector<8x128xf32>
    %2837 = arith.maximumf %2831, %2835 : vector<8x128xf32>
    %c6_i32_799 = arith.constant 6 : i32
    %2838 = vector.broadcast %c6_i32_799 : i32 to vector<8x128xi32>
    %2839 = arith.select %2836, %2838, %2833 : vector<8x128xi1>, vector<8x128xi32>
    %2840 = vector.broadcast %64 : f32 to vector<8x128xf32>
    %2841 = arith.addf %2633, %2840 : vector<8x128xf32>
    %2842 = arith.cmpf ogt, %2841, %2837 : vector<8x128xf32>
    %2843 = arith.maximumf %2837, %2841 : vector<8x128xf32>
    %c7_i32_800 = arith.constant 7 : i32
    %2844 = vector.broadcast %c7_i32_800 : i32 to vector<8x128xi32>
    %2845 = arith.select %2842, %2844, %2839 : vector<8x128xi1>, vector<8x128xi32>
    %c0_801 = arith.constant 0 : index
    %2846 = arith.index_cast %c7_i32_758 : i32 to index
    %c3_802 = arith.constant 3 : index
    %c0_803 = arith.constant 0 : index
    %c0_804 = arith.constant 0 : index
    %2847 = vector.load %arg2[%c0_801, %2846, %c3_802, %c0_803, %c0_804] : memref<1x8x8x8x128xf32, #tpu.memory_space<vmem>>, vector<1x1x1x8x128xf32>
    %2848 = vector.shape_cast %2847 : vector<1x1x1x8x128xf32> to vector<8x128xf32>
    %2849 = arith.addf %2843, %2848 : vector<8x128xf32>
    %c9_i32_805 = arith.constant 9 : i32
    %2850 = vector.broadcast %c9_i32_805 : i32 to vector<8x128xi32>
    %2851 = arith.shli %2845, %2850 : vector<8x128xi32>
    %2852 = arith.ori %2800, %2851 : vector<8x128xi32>
    %2853 = arith.select %2648, %2849, %2429 : vector<8x128xi1>, vector<8x128xf32>
    %2854 = vector.broadcast %9 : f32 to vector<8x128xf32>
    %2855 = arith.addf %2272, %2854 : vector<8x128xf32>
    %2856 = vector.broadcast %17 : f32 to vector<8x128xf32>
    %2857 = arith.addf %2321, %2856 : vector<8x128xf32>
    %2858 = arith.cmpf ogt, %2857, %2855 : vector<8x128xf32>
    %2859 = arith.maximumf %2855, %2857 : vector<8x128xf32>
    %c1_i32_806 = arith.constant 1 : i32
    %2860 = vector.broadcast %c1_i32_806 : i32 to vector<8x128xi32>
    %2861 = arith.select %2858, %2860, %4 : vector<8x128xi1>, vector<8x128xi32>
    %2862 = vector.broadcast %25 : f32 to vector<8x128xf32>
    %2863 = arith.addf %2373, %2862 : vector<8x128xf32>
    %2864 = arith.cmpf ogt, %2863, %2859 : vector<8x128xf32>
    %2865 = arith.maximumf %2859, %2863 : vector<8x128xf32>
    %c2_i32_807 = arith.constant 2 : i32
    %2866 = vector.broadcast %c2_i32_807 : i32 to vector<8x128xi32>
    %2867 = arith.select %2864, %2866, %2861 : vector<8x128xi1>, vector<8x128xi32>
    %2868 = vector.broadcast %33 : f32 to vector<8x128xf32>
    %2869 = arith.addf %2425, %2868 : vector<8x128xf32>
    %2870 = arith.cmpf ogt, %2869, %2865 : vector<8x128xf32>
    %2871 = arith.maximumf %2865, %2869 : vector<8x128xf32>
    %c3_i32_808 = arith.constant 3 : i32
    %2872 = vector.broadcast %c3_i32_808 : i32 to vector<8x128xi32>
    %2873 = arith.select %2870, %2872, %2867 : vector<8x128xi1>, vector<8x128xi32>
    %2874 = vector.broadcast %41 : f32 to vector<8x128xf32>
    %2875 = arith.addf %2477, %2874 : vector<8x128xf32>
    %2876 = arith.cmpf ogt, %2875, %2871 : vector<8x128xf32>
    %2877 = arith.maximumf %2871, %2875 : vector<8x128xf32>
    %c4_i32_809 = arith.constant 4 : i32
    %2878 = vector.broadcast %c4_i32_809 : i32 to vector<8x128xi32>
    %2879 = arith.select %2876, %2878, %2873 : vector<8x128xi1>, vector<8x128xi32>
    %2880 = vector.broadcast %49 : f32 to vector<8x128xf32>
    %2881 = arith.addf %2529, %2880 : vector<8x128xf32>
    %2882 = arith.cmpf ogt, %2881, %2877 : vector<8x128xf32>
    %2883 = arith.maximumf %2877, %2881 : vector<8x128xf32>
    %c5_i32_810 = arith.constant 5 : i32
    %2884 = vector.broadcast %c5_i32_810 : i32 to vector<8x128xi32>
    %2885 = arith.select %2882, %2884, %2879 : vector<8x128xi1>, vector<8x128xi32>
    %2886 = vector.broadcast %57 : f32 to vector<8x128xf32>
    %2887 = arith.addf %2581, %2886 : vector<8x128xf32>
    %2888 = arith.cmpf ogt, %2887, %2883 : vector<8x128xf32>
    %2889 = arith.maximumf %2883, %2887 : vector<8x128xf32>
    %c6_i32_811 = arith.constant 6 : i32
    %2890 = vector.broadcast %c6_i32_811 : i32 to vector<8x128xi32>
    %2891 = arith.select %2888, %2890, %2885 : vector<8x128xi1>, vector<8x128xi32>
    %2892 = vector.broadcast %65 : f32 to vector<8x128xf32>
    %2893 = arith.addf %2633, %2892 : vector<8x128xf32>
    %2894 = arith.cmpf ogt, %2893, %2889 : vector<8x128xf32>
    %2895 = arith.maximumf %2889, %2893 : vector<8x128xf32>
    %c7_i32_812 = arith.constant 7 : i32
    %2896 = vector.broadcast %c7_i32_812 : i32 to vector<8x128xi32>
    %2897 = arith.select %2894, %2896, %2891 : vector<8x128xi1>, vector<8x128xi32>
    %c0_813 = arith.constant 0 : index
    %2898 = arith.index_cast %c7_i32_758 : i32 to index
    %c4_814 = arith.constant 4 : index
    %c0_815 = arith.constant 0 : index
    %c0_816 = arith.constant 0 : index
    %2899 = vector.load %arg2[%c0_813, %2898, %c4_814, %c0_815, %c0_816] : memref<1x8x8x8x128xf32, #tpu.memory_space<vmem>>, vector<1x1x1x8x128xf32>
    %2900 = vector.shape_cast %2899 : vector<1x1x1x8x128xf32> to vector<8x128xf32>
    %2901 = arith.addf %2895, %2900 : vector<8x128xf32>
    %c12_i32_817 = arith.constant 12 : i32
    %2902 = vector.broadcast %c12_i32_817 : i32 to vector<8x128xi32>
    %2903 = arith.shli %2897, %2902 : vector<8x128xi32>
    %2904 = arith.ori %2852, %2903 : vector<8x128xi32>
    %2905 = arith.select %2648, %2901, %2481 : vector<8x128xi1>, vector<8x128xf32>
    %2906 = vector.broadcast %10 : f32 to vector<8x128xf32>
    %2907 = arith.addf %2272, %2906 : vector<8x128xf32>
    %2908 = vector.broadcast %18 : f32 to vector<8x128xf32>
    %2909 = arith.addf %2321, %2908 : vector<8x128xf32>
    %2910 = arith.cmpf ogt, %2909, %2907 : vector<8x128xf32>
    %2911 = arith.maximumf %2907, %2909 : vector<8x128xf32>
    %c1_i32_818 = arith.constant 1 : i32
    %2912 = vector.broadcast %c1_i32_818 : i32 to vector<8x128xi32>
    %2913 = arith.select %2910, %2912, %4 : vector<8x128xi1>, vector<8x128xi32>
    %2914 = vector.broadcast %26 : f32 to vector<8x128xf32>
    %2915 = arith.addf %2373, %2914 : vector<8x128xf32>
    %2916 = arith.cmpf ogt, %2915, %2911 : vector<8x128xf32>
    %2917 = arith.maximumf %2911, %2915 : vector<8x128xf32>
    %c2_i32_819 = arith.constant 2 : i32
    %2918 = vector.broadcast %c2_i32_819 : i32 to vector<8x128xi32>
    %2919 = arith.select %2916, %2918, %2913 : vector<8x128xi1>, vector<8x128xi32>
    %2920 = vector.broadcast %34 : f32 to vector<8x128xf32>
    %2921 = arith.addf %2425, %2920 : vector<8x128xf32>
    %2922 = arith.cmpf ogt, %2921, %2917 : vector<8x128xf32>
    %2923 = arith.maximumf %2917, %2921 : vector<8x128xf32>
    %c3_i32_820 = arith.constant 3 : i32
    %2924 = vector.broadcast %c3_i32_820 : i32 to vector<8x128xi32>
    %2925 = arith.select %2922, %2924, %2919 : vector<8x128xi1>, vector<8x128xi32>
    %2926 = vector.broadcast %42 : f32 to vector<8x128xf32>
    %2927 = arith.addf %2477, %2926 : vector<8x128xf32>
    %2928 = arith.cmpf ogt, %2927, %2923 : vector<8x128xf32>
    %2929 = arith.maximumf %2923, %2927 : vector<8x128xf32>
    %c4_i32_821 = arith.constant 4 : i32
    %2930 = vector.broadcast %c4_i32_821 : i32 to vector<8x128xi32>
    %2931 = arith.select %2928, %2930, %2925 : vector<8x128xi1>, vector<8x128xi32>
    %2932 = vector.broadcast %50 : f32 to vector<8x128xf32>
    %2933 = arith.addf %2529, %2932 : vector<8x128xf32>
    %2934 = arith.cmpf ogt, %2933, %2929 : vector<8x128xf32>
    %2935 = arith.maximumf %2929, %2933 : vector<8x128xf32>
    %c5_i32_822 = arith.constant 5 : i32
    %2936 = vector.broadcast %c5_i32_822 : i32 to vector<8x128xi32>
    %2937 = arith.select %2934, %2936, %2931 : vector<8x128xi1>, vector<8x128xi32>
    %2938 = vector.broadcast %58 : f32 to vector<8x128xf32>
    %2939 = arith.addf %2581, %2938 : vector<8x128xf32>
    %2940 = arith.cmpf ogt, %2939, %2935 : vector<8x128xf32>
    %2941 = arith.maximumf %2935, %2939 : vector<8x128xf32>
    %c6_i32_823 = arith.constant 6 : i32
    %2942 = vector.broadcast %c6_i32_823 : i32 to vector<8x128xi32>
    %2943 = arith.select %2940, %2942, %2937 : vector<8x128xi1>, vector<8x128xi32>
    %2944 = vector.broadcast %66 : f32 to vector<8x128xf32>
    %2945 = arith.addf %2633, %2944 : vector<8x128xf32>
    %2946 = arith.cmpf ogt, %2945, %2941 : vector<8x128xf32>
    %2947 = arith.maximumf %2941, %2945 : vector<8x128xf32>
    %c7_i32_824 = arith.constant 7 : i32
    %2948 = vector.broadcast %c7_i32_824 : i32 to vector<8x128xi32>
    %2949 = arith.select %2946, %2948, %2943 : vector<8x128xi1>, vector<8x128xi32>
    %c0_825 = arith.constant 0 : index
    %2950 = arith.index_cast %c7_i32_758 : i32 to index
    %c5_826 = arith.constant 5 : index
    %c0_827 = arith.constant 0 : index
    %c0_828 = arith.constant 0 : index
    %2951 = vector.load %arg2[%c0_825, %2950, %c5_826, %c0_827, %c0_828] : memref<1x8x8x8x128xf32, #tpu.memory_space<vmem>>, vector<1x1x1x8x128xf32>
    %2952 = vector.shape_cast %2951 : vector<1x1x1x8x128xf32> to vector<8x128xf32>
    %2953 = arith.addf %2947, %2952 : vector<8x128xf32>
    %c15_i32_829 = arith.constant 15 : i32
    %2954 = vector.broadcast %c15_i32_829 : i32 to vector<8x128xi32>
    %2955 = arith.shli %2949, %2954 : vector<8x128xi32>
    %2956 = arith.ori %2904, %2955 : vector<8x128xi32>
    %2957 = arith.select %2648, %2953, %2533 : vector<8x128xi1>, vector<8x128xf32>
    %2958 = vector.broadcast %11 : f32 to vector<8x128xf32>
    %2959 = arith.addf %2272, %2958 : vector<8x128xf32>
    %2960 = vector.broadcast %19 : f32 to vector<8x128xf32>
    %2961 = arith.addf %2321, %2960 : vector<8x128xf32>
    %2962 = arith.cmpf ogt, %2961, %2959 : vector<8x128xf32>
    %2963 = arith.maximumf %2959, %2961 : vector<8x128xf32>
    %c1_i32_830 = arith.constant 1 : i32
    %2964 = vector.broadcast %c1_i32_830 : i32 to vector<8x128xi32>
    %2965 = arith.select %2962, %2964, %4 : vector<8x128xi1>, vector<8x128xi32>
    %2966 = vector.broadcast %27 : f32 to vector<8x128xf32>
    %2967 = arith.addf %2373, %2966 : vector<8x128xf32>
    %2968 = arith.cmpf ogt, %2967, %2963 : vector<8x128xf32>
    %2969 = arith.maximumf %2963, %2967 : vector<8x128xf32>
    %c2_i32_831 = arith.constant 2 : i32
    %2970 = vector.broadcast %c2_i32_831 : i32 to vector<8x128xi32>
    %2971 = arith.select %2968, %2970, %2965 : vector<8x128xi1>, vector<8x128xi32>
    %2972 = vector.broadcast %35 : f32 to vector<8x128xf32>
    %2973 = arith.addf %2425, %2972 : vector<8x128xf32>
    %2974 = arith.cmpf ogt, %2973, %2969 : vector<8x128xf32>
    %2975 = arith.maximumf %2969, %2973 : vector<8x128xf32>
    %c3_i32_832 = arith.constant 3 : i32
    %2976 = vector.broadcast %c3_i32_832 : i32 to vector<8x128xi32>
    %2977 = arith.select %2974, %2976, %2971 : vector<8x128xi1>, vector<8x128xi32>
    %2978 = vector.broadcast %43 : f32 to vector<8x128xf32>
    %2979 = arith.addf %2477, %2978 : vector<8x128xf32>
    %2980 = arith.cmpf ogt, %2979, %2975 : vector<8x128xf32>
    %2981 = arith.maximumf %2975, %2979 : vector<8x128xf32>
    %c4_i32_833 = arith.constant 4 : i32
    %2982 = vector.broadcast %c4_i32_833 : i32 to vector<8x128xi32>
    %2983 = arith.select %2980, %2982, %2977 : vector<8x128xi1>, vector<8x128xi32>
    %2984 = vector.broadcast %51 : f32 to vector<8x128xf32>
    %2985 = arith.addf %2529, %2984 : vector<8x128xf32>
    %2986 = arith.cmpf ogt, %2985, %2981 : vector<8x128xf32>
    %2987 = arith.maximumf %2981, %2985 : vector<8x128xf32>
    %c5_i32_834 = arith.constant 5 : i32
    %2988 = vector.broadcast %c5_i32_834 : i32 to vector<8x128xi32>
    %2989 = arith.select %2986, %2988, %2983 : vector<8x128xi1>, vector<8x128xi32>
    %2990 = vector.broadcast %59 : f32 to vector<8x128xf32>
    %2991 = arith.addf %2581, %2990 : vector<8x128xf32>
    %2992 = arith.cmpf ogt, %2991, %2987 : vector<8x128xf32>
    %2993 = arith.maximumf %2987, %2991 : vector<8x128xf32>
    %c6_i32_835 = arith.constant 6 : i32
    %2994 = vector.broadcast %c6_i32_835 : i32 to vector<8x128xi32>
    %2995 = arith.select %2992, %2994, %2989 : vector<8x128xi1>, vector<8x128xi32>
    %2996 = vector.broadcast %67 : f32 to vector<8x128xf32>
    %2997 = arith.addf %2633, %2996 : vector<8x128xf32>
    %2998 = arith.cmpf ogt, %2997, %2993 : vector<8x128xf32>
    %2999 = arith.maximumf %2993, %2997 : vector<8x128xf32>
    %c7_i32_836 = arith.constant 7 : i32
    %3000 = vector.broadcast %c7_i32_836 : i32 to vector<8x128xi32>
    %3001 = arith.select %2998, %3000, %2995 : vector<8x128xi1>, vector<8x128xi32>
    %c0_837 = arith.constant 0 : index
    %3002 = arith.index_cast %c7_i32_758 : i32 to index
    %c6_838 = arith.constant 6 : index
    %c0_839 = arith.constant 0 : index
    %c0_840 = arith.constant 0 : index
    %3003 = vector.load %arg2[%c0_837, %3002, %c6_838, %c0_839, %c0_840] : memref<1x8x8x8x128xf32, #tpu.memory_space<vmem>>, vector<1x1x1x8x128xf32>
    %3004 = vector.shape_cast %3003 : vector<1x1x1x8x128xf32> to vector<8x128xf32>
    %3005 = arith.addf %2999, %3004 : vector<8x128xf32>
    %c18_i32_841 = arith.constant 18 : i32
    %3006 = vector.broadcast %c18_i32_841 : i32 to vector<8x128xi32>
    %3007 = arith.shli %3001, %3006 : vector<8x128xi32>
    %3008 = arith.ori %2956, %3007 : vector<8x128xi32>
    %3009 = arith.select %2648, %3005, %2585 : vector<8x128xi1>, vector<8x128xf32>
    %3010 = vector.broadcast %12 : f32 to vector<8x128xf32>
    %3011 = arith.addf %2272, %3010 : vector<8x128xf32>
    %3012 = vector.broadcast %20 : f32 to vector<8x128xf32>
    %3013 = arith.addf %2321, %3012 : vector<8x128xf32>
    %3014 = arith.cmpf ogt, %3013, %3011 : vector<8x128xf32>
    %3015 = arith.maximumf %3011, %3013 : vector<8x128xf32>
    %c1_i32_842 = arith.constant 1 : i32
    %3016 = vector.broadcast %c1_i32_842 : i32 to vector<8x128xi32>
    %3017 = arith.select %3014, %3016, %4 : vector<8x128xi1>, vector<8x128xi32>
    %3018 = vector.broadcast %28 : f32 to vector<8x128xf32>
    %3019 = arith.addf %2373, %3018 : vector<8x128xf32>
    %3020 = arith.cmpf ogt, %3019, %3015 : vector<8x128xf32>
    %3021 = arith.maximumf %3015, %3019 : vector<8x128xf32>
    %c2_i32_843 = arith.constant 2 : i32
    %3022 = vector.broadcast %c2_i32_843 : i32 to vector<8x128xi32>
    %3023 = arith.select %3020, %3022, %3017 : vector<8x128xi1>, vector<8x128xi32>
    %3024 = vector.broadcast %36 : f32 to vector<8x128xf32>
    %3025 = arith.addf %2425, %3024 : vector<8x128xf32>
    %3026 = arith.cmpf ogt, %3025, %3021 : vector<8x128xf32>
    %3027 = arith.maximumf %3021, %3025 : vector<8x128xf32>
    %c3_i32_844 = arith.constant 3 : i32
    %3028 = vector.broadcast %c3_i32_844 : i32 to vector<8x128xi32>
    %3029 = arith.select %3026, %3028, %3023 : vector<8x128xi1>, vector<8x128xi32>
    %3030 = vector.broadcast %44 : f32 to vector<8x128xf32>
    %3031 = arith.addf %2477, %3030 : vector<8x128xf32>
    %3032 = arith.cmpf ogt, %3031, %3027 : vector<8x128xf32>
    %3033 = arith.maximumf %3027, %3031 : vector<8x128xf32>
    %c4_i32_845 = arith.constant 4 : i32
    %3034 = vector.broadcast %c4_i32_845 : i32 to vector<8x128xi32>
    %3035 = arith.select %3032, %3034, %3029 : vector<8x128xi1>, vector<8x128xi32>
    %3036 = vector.broadcast %52 : f32 to vector<8x128xf32>
    %3037 = arith.addf %2529, %3036 : vector<8x128xf32>
    %3038 = arith.cmpf ogt, %3037, %3033 : vector<8x128xf32>
    %3039 = arith.maximumf %3033, %3037 : vector<8x128xf32>
    %c5_i32_846 = arith.constant 5 : i32
    %3040 = vector.broadcast %c5_i32_846 : i32 to vector<8x128xi32>
    %3041 = arith.select %3038, %3040, %3035 : vector<8x128xi1>, vector<8x128xi32>
    %3042 = vector.broadcast %60 : f32 to vector<8x128xf32>
    %3043 = arith.addf %2581, %3042 : vector<8x128xf32>
    %3044 = arith.cmpf ogt, %3043, %3039 : vector<8x128xf32>
    %3045 = arith.maximumf %3039, %3043 : vector<8x128xf32>
    %c6_i32_847 = arith.constant 6 : i32
    %3046 = vector.broadcast %c6_i32_847 : i32 to vector<8x128xi32>
    %3047 = arith.select %3044, %3046, %3041 : vector<8x128xi1>, vector<8x128xi32>
    %3048 = vector.broadcast %68 : f32 to vector<8x128xf32>
    %3049 = arith.addf %2633, %3048 : vector<8x128xf32>
    %3050 = arith.cmpf ogt, %3049, %3045 : vector<8x128xf32>
    %3051 = arith.maximumf %3045, %3049 : vector<8x128xf32>
    %c7_i32_848 = arith.constant 7 : i32
    %3052 = vector.broadcast %c7_i32_848 : i32 to vector<8x128xi32>
    %3053 = arith.select %3050, %3052, %3047 : vector<8x128xi1>, vector<8x128xi32>
    %c0_849 = arith.constant 0 : index
    %3054 = arith.index_cast %c7_i32_758 : i32 to index
    %c7_850 = arith.constant 7 : index
    %c0_851 = arith.constant 0 : index
    %c0_852 = arith.constant 0 : index
    %3055 = vector.load %arg2[%c0_849, %3054, %c7_850, %c0_851, %c0_852] : memref<1x8x8x8x128xf32, #tpu.memory_space<vmem>>, vector<1x1x1x8x128xf32>
    %3056 = vector.shape_cast %3055 : vector<1x1x1x8x128xf32> to vector<8x128xf32>
    %3057 = arith.addf %3051, %3056 : vector<8x128xf32>
    %c21_i32_853 = arith.constant 21 : i32
    %3058 = vector.broadcast %c21_i32_853 : i32 to vector<8x128xi32>
    %3059 = arith.shli %3053, %3058 : vector<8x128xi32>
    %3060 = arith.ori %3008, %3059 : vector<8x128xi32>
    %3061 = arith.select %2648, %3057, %2637 : vector<8x128xi1>, vector<8x128xf32>
    %c0_i32_854 = arith.constant 0 : i32
    %3062 = vector.broadcast %c0_i32_854 : i32 to vector<8x128xi32>
    %3063 = arith.select %2646, %3060, %3062 : vector<8x128xi1>, vector<8x128xi32>
    %c1_i32_855 = arith.constant 1 : i32
    %3064 = arith.subi %c7_i32_758, %c1_i32_855 : i32
    %3065 = arith.index_cast %3064 : i32 to index
    %c0_856 = arith.constant 0 : index
    %c0_857 = arith.constant 0 : index
    %c0_858 = arith.constant 0 : index
    %3066 = vector.load %arg5[%3065, %c0_856, %c0_857, %c0_858] : memref<8x1x8x128xi32, #tpu.memory_space<vmem>>, vector<1x1x8x128xi32>
    %3067 = vector.shape_cast %3066 : vector<1x1x8x128xi32> to vector<8x128xi32>
    %3068 = vector.shape_cast %3063 : vector<8x128xi32> to vector<1x1x8x128xi32>
    tpu.vector_store %arg5[%3065, %c0_856, %c0_857, %c0_858], %3068 {strides = array<i32>} : memref<8x1x8x128xi32, #tpu.memory_space<vmem>>, vector<1x1x8x128xi32>,
    %c7_i32_859 = arith.constant 7 : i32
    %3069 = vector.broadcast %12 : f32 to vector<8x128xf32>
    %3070 = arith.addf %2697, %3069 : vector<8x128xf32>
    %3071 = vector.broadcast %20 : f32 to vector<8x128xf32>
    %3072 = arith.addf %2749, %3071 : vector<8x128xf32>
    %3073 = arith.cmpf ogt, %3072, %3070 : vector<8x128xf32>
    %3074 = arith.maximumf %3070, %3072 : vector<8x128xf32>
    %c1_i32_860 = arith.constant 1 : i32
    %3075 = vector.broadcast %c1_i32_860 : i32 to vector<8x128xi32>
    %3076 = arith.select %3073, %3075, %4 : vector<8x128xi1>, vector<8x128xi32>
    %3077 = vector.broadcast %28 : f32 to vector<8x128xf32>
    %3078 = arith.addf %2801, %3077 : vector<8x128xf32>
    %3079 = arith.cmpf ogt, %3078, %3074 : vector<8x128xf32>
    %3080 = arith.maximumf %3074, %3078 : vector<8x128xf32>
    %c2_i32_861 = arith.constant 2 : i32
    %3081 = vector.broadcast %c2_i32_861 : i32 to vector<8x128xi32>
    %3082 = arith.select %3079, %3081, %3076 : vector<8x128xi1>, vector<8x128xi32>
    %3083 = vector.broadcast %36 : f32 to vector<8x128xf32>
    %3084 = arith.addf %2853, %3083 : vector<8x128xf32>
    %3085 = arith.cmpf ogt, %3084, %3080 : vector<8x128xf32>
    %3086 = arith.maximumf %3080, %3084 : vector<8x128xf32>
    %c3_i32_862 = arith.constant 3 : i32
    %3087 = vector.broadcast %c3_i32_862 : i32 to vector<8x128xi32>
    %3088 = arith.select %3085, %3087, %3082 : vector<8x128xi1>, vector<8x128xi32>
    %3089 = vector.broadcast %44 : f32 to vector<8x128xf32>
    %3090 = arith.addf %2905, %3089 : vector<8x128xf32>
    %3091 = arith.cmpf ogt, %3090, %3086 : vector<8x128xf32>
    %3092 = arith.maximumf %3086, %3090 : vector<8x128xf32>
    %c4_i32_863 = arith.constant 4 : i32
    %3093 = vector.broadcast %c4_i32_863 : i32 to vector<8x128xi32>
    %3094 = arith.select %3091, %3093, %3088 : vector<8x128xi1>, vector<8x128xi32>
    %3095 = vector.broadcast %52 : f32 to vector<8x128xf32>
    %3096 = arith.addf %2957, %3095 : vector<8x128xf32>
    %3097 = arith.cmpf ogt, %3096, %3092 : vector<8x128xf32>
    %3098 = arith.maximumf %3092, %3096 : vector<8x128xf32>
    %c5_i32_864 = arith.constant 5 : i32
    %3099 = vector.broadcast %c5_i32_864 : i32 to vector<8x128xi32>
    %3100 = arith.select %3097, %3099, %3094 : vector<8x128xi1>, vector<8x128xi32>
    %3101 = vector.broadcast %60 : f32 to vector<8x128xf32>
    %3102 = arith.addf %3009, %3101 : vector<8x128xf32>
    %3103 = arith.cmpf ogt, %3102, %3098 : vector<8x128xf32>
    %3104 = arith.maximumf %3098, %3102 : vector<8x128xf32>
    %c6_i32_865 = arith.constant 6 : i32
    %3105 = vector.broadcast %c6_i32_865 : i32 to vector<8x128xi32>
    %3106 = arith.select %3103, %3105, %3100 : vector<8x128xi1>, vector<8x128xi32>
    %3107 = vector.broadcast %68 : f32 to vector<8x128xf32>
    %3108 = arith.addf %3061, %3107 : vector<8x128xf32>
    %3109 = arith.cmpf ogt, %3108, %3104 : vector<8x128xf32>
    %c7_i32_866 = arith.constant 7 : i32
    %3110 = vector.broadcast %c7_i32_866 : i32 to vector<8x128xi32>
    %3111 = arith.select %3109, %3110, %3106 : vector<8x128xi1>, vector<8x128xi32>
    %c0_867 = arith.constant 0 : index
    %c7_868 = arith.constant 7 : index
    %c0_869 = arith.constant 0 : index
    %c0_870 = arith.constant 0 : index
    %3112 = vector.load %arg4[%c0_867, %c7_868, %c0_869, %c0_870] : memref<1x8x8x128xi32, #tpu.memory_space<vmem>>, vector<1x1x8x128xi32>
    %3113 = vector.shape_cast %3112 : vector<1x1x8x128xi32> to vector<8x128xi32>
    %3114 = vector.shape_cast %3111 : vector<8x128xi32> to vector<1x1x8x128xi32>
    tpu.vector_store %arg4[%c0_867, %c7_868, %c0_869, %c0_870], %3114 {strides = array<i32>} : memref<1x8x8x128xi32, #tpu.memory_space<vmem>>, vector<1x1x8x128xi32>,
    %c7_i32_871 = arith.constant 7 : i32
    %c0_i32_872 = arith.constant 0 : i32
    %c6_i32_873 = arith.constant 6 : i32
    %3115 = arith.subi %c6_i32_873, %c0_i32_872 : i32
    %3116 = arith.index_cast %3115 : i32 to index
    %c0_874 = arith.constant 0 : index
    %c0_875 = arith.constant 0 : index
    %c0_876 = arith.constant 0 : index
    %3117 = vector.load %arg5[%3116, %c0_874, %c0_875, %c0_876] : memref<8x1x8x128xi32, #tpu.memory_space<vmem>>, vector<1x1x8x128xi32>
    %3118 = vector.shape_cast %3117 : vector<1x1x8x128xi32> to vector<8x128xi32>
    %c3_i32_877 = arith.constant 3 : i32
    %3119 = vector.broadcast %c3_i32_877 : i32 to vector<8x128xi32>
    %3120 = arith.muli %3111, %3119 : vector<8x128xi32>
    %3121 = arith.shrui %3118, %3120 : vector<8x128xi32>
    %3122 = vector.broadcast %c7_i32_871 : i32 to vector<8x128xi32>
    %3123 = arith.andi %3121, %3122 : vector<8x128xi32>
    %3124 = vector.broadcast %3115 : i32 to vector<8x128xi32>
    %3125 = arith.cmpi eq, %3124, %3 : vector<8x128xi32>
    %3126 = arith.select %3125, %3111, %3123 : vector<8x128xi1>, vector<8x128xi32>
    %c0_878 = arith.constant 0 : index
    %3127 = arith.index_cast %3115 : i32 to index
    %c0_879 = arith.constant 0 : index
    %c0_880 = arith.constant 0 : index
    %3128 = vector.load %arg4[%c0_878, %3127, %c0_879, %c0_880] : memref<1x8x8x128xi32, #tpu.memory_space<vmem>>, vector<1x1x8x128xi32>
    %3129 = vector.shape_cast %3128 : vector<1x1x8x128xi32> to vector<8x128xi32>
    %3130 = vector.shape_cast %3126 : vector<8x128xi32> to vector<1x1x8x128xi32>
    tpu.vector_store %arg4[%c0_878, %3127, %c0_879, %c0_880], %3130 {strides = array<i32>} : memref<1x8x8x128xi32, #tpu.memory_space<vmem>>, vector<1x1x8x128xi32>,
    %c1_i32_881 = arith.constant 1 : i32
    %c6_i32_882 = arith.constant 6 : i32
    %3131 = arith.subi %c6_i32_882, %c1_i32_881 : i32
    %3132 = arith.index_cast %3131 : i32 to index
    %c0_883 = arith.constant 0 : index
    %c0_884 = arith.constant 0 : index
    %c0_885 = arith.constant 0 : index
    %3133 = vector.load %arg5[%3132, %c0_883, %c0_884, %c0_885] : memref<8x1x8x128xi32, #tpu.memory_space<vmem>>, vector<1x1x8x128xi32>
    %3134 = vector.shape_cast %3133 : vector<1x1x8x128xi32> to vector<8x128xi32>
    %c3_i32_886 = arith.constant 3 : i32
    %3135 = vector.broadcast %c3_i32_886 : i32 to vector<8x128xi32>
    %3136 = arith.muli %3126, %3135 : vector<8x128xi32>
    %3137 = arith.shrui %3134, %3136 : vector<8x128xi32>
    %3138 = vector.broadcast %c7_i32_871 : i32 to vector<8x128xi32>
    %3139 = arith.andi %3137, %3138 : vector<8x128xi32>
    %3140 = vector.broadcast %3131 : i32 to vector<8x128xi32>
    %3141 = arith.cmpi eq, %3140, %3 : vector<8x128xi32>
    %3142 = arith.select %3141, %3111, %3139 : vector<8x128xi1>, vector<8x128xi32>
    %c0_887 = arith.constant 0 : index
    %3143 = arith.index_cast %3131 : i32 to index
    %c0_888 = arith.constant 0 : index
    %c0_889 = arith.constant 0 : index
    %3144 = vector.load %arg4[%c0_887, %3143, %c0_888, %c0_889] : memref<1x8x8x128xi32, #tpu.memory_space<vmem>>, vector<1x1x8x128xi32>
    %3145 = vector.shape_cast %3144 : vector<1x1x8x128xi32> to vector<8x128xi32>
    %3146 = vector.shape_cast %3142 : vector<8x128xi32> to vector<1x1x8x128xi32>
    tpu.vector_store %arg4[%c0_887, %3143, %c0_888, %c0_889], %3146 {strides = array<i32>} : memref<1x8x8x128xi32, #tpu.memory_space<vmem>>, vector<1x1x8x128xi32>,
    %c2_i32_890 = arith.constant 2 : i32
    %c6_i32_891 = arith.constant 6 : i32
    %3147 = arith.subi %c6_i32_891, %c2_i32_890 : i32
    %3148 = arith.index_cast %3147 : i32 to index
    %c0_892 = arith.constant 0 : index
    %c0_893 = arith.constant 0 : index
    %c0_894 = arith.constant 0 : index
    %3149 = vector.load %arg5[%3148, %c0_892, %c0_893, %c0_894] : memref<8x1x8x128xi32, #tpu.memory_space<vmem>>, vector<1x1x8x128xi32>
    %3150 = vector.shape_cast %3149 : vector<1x1x8x128xi32> to vector<8x128xi32>
    %c3_i32_895 = arith.constant 3 : i32
    %3151 = vector.broadcast %c3_i32_895 : i32 to vector<8x128xi32>
    %3152 = arith.muli %3142, %3151 : vector<8x128xi32>
    %3153 = arith.shrui %3150, %3152 : vector<8x128xi32>
    %3154 = vector.broadcast %c7_i32_871 : i32 to vector<8x128xi32>
    %3155 = arith.andi %3153, %3154 : vector<8x128xi32>
    %3156 = vector.broadcast %3147 : i32 to vector<8x128xi32>
    %3157 = arith.cmpi eq, %3156, %3 : vector<8x128xi32>
    %3158 = arith.select %3157, %3111, %3155 : vector<8x128xi1>, vector<8x128xi32>
    %c0_896 = arith.constant 0 : index
    %3159 = arith.index_cast %3147 : i32 to index
    %c0_897 = arith.constant 0 : index
    %c0_898 = arith.constant 0 : index
    %3160 = vector.load %arg4[%c0_896, %3159, %c0_897, %c0_898] : memref<1x8x8x128xi32, #tpu.memory_space<vmem>>, vector<1x1x8x128xi32>
    %3161 = vector.shape_cast %3160 : vector<1x1x8x128xi32> to vector<8x128xi32>
    %3162 = vector.shape_cast %3158 : vector<8x128xi32> to vector<1x1x8x128xi32>
    tpu.vector_store %arg4[%c0_896, %3159, %c0_897, %c0_898], %3162 {strides = array<i32>} : memref<1x8x8x128xi32, #tpu.memory_space<vmem>>, vector<1x1x8x128xi32>,
    %c3_i32_899 = arith.constant 3 : i32
    %c6_i32_900 = arith.constant 6 : i32
    %3163 = arith.subi %c6_i32_900, %c3_i32_899 : i32
    %3164 = arith.index_cast %3163 : i32 to index
    %c0_901 = arith.constant 0 : index
    %c0_902 = arith.constant 0 : index
    %c0_903 = arith.constant 0 : index
    %3165 = vector.load %arg5[%3164, %c0_901, %c0_902, %c0_903] : memref<8x1x8x128xi32, #tpu.memory_space<vmem>>, vector<1x1x8x128xi32>
    %3166 = vector.shape_cast %3165 : vector<1x1x8x128xi32> to vector<8x128xi32>
    %c3_i32_904 = arith.constant 3 : i32
    %3167 = vector.broadcast %c3_i32_904 : i32 to vector<8x128xi32>
    %3168 = arith.muli %3158, %3167 : vector<8x128xi32>
    %3169 = arith.shrui %3166, %3168 : vector<8x128xi32>
    %3170 = vector.broadcast %c7_i32_871 : i32 to vector<8x128xi32>
    %3171 = arith.andi %3169, %3170 : vector<8x128xi32>
    %3172 = vector.broadcast %3163 : i32 to vector<8x128xi32>
    %3173 = arith.cmpi eq, %3172, %3 : vector<8x128xi32>
    %3174 = arith.select %3173, %3111, %3171 : vector<8x128xi1>, vector<8x128xi32>
    %c0_905 = arith.constant 0 : index
    %3175 = arith.index_cast %3163 : i32 to index
    %c0_906 = arith.constant 0 : index
    %c0_907 = arith.constant 0 : index
    %3176 = vector.load %arg4[%c0_905, %3175, %c0_906, %c0_907] : memref<1x8x8x128xi32, #tpu.memory_space<vmem>>, vector<1x1x8x128xi32>
    %3177 = vector.shape_cast %3176 : vector<1x1x8x128xi32> to vector<8x128xi32>
    %3178 = vector.shape_cast %3174 : vector<8x128xi32> to vector<1x1x8x128xi32>
    tpu.vector_store %arg4[%c0_905, %3175, %c0_906, %c0_907], %3178 {strides = array<i32>} : memref<1x8x8x128xi32, #tpu.memory_space<vmem>>, vector<1x1x8x128xi32>,
    %c4_i32_908 = arith.constant 4 : i32
    %c6_i32_909 = arith.constant 6 : i32
    %3179 = arith.subi %c6_i32_909, %c4_i32_908 : i32
    %3180 = arith.index_cast %3179 : i32 to index
    %c0_910 = arith.constant 0 : index
    %c0_911 = arith.constant 0 : index
    %c0_912 = arith.constant 0 : index
    %3181 = vector.load %arg5[%3180, %c0_910, %c0_911, %c0_912] : memref<8x1x8x128xi32, #tpu.memory_space<vmem>>, vector<1x1x8x128xi32>
    %3182 = vector.shape_cast %3181 : vector<1x1x8x128xi32> to vector<8x128xi32>
    %c3_i32_913 = arith.constant 3 : i32
    %3183 = vector.broadcast %c3_i32_913 : i32 to vector<8x128xi32>
    %3184 = arith.muli %3174, %3183 : vector<8x128xi32>
    %3185 = arith.shrui %3182, %3184 : vector<8x128xi32>
    %3186 = vector.broadcast %c7_i32_871 : i32 to vector<8x128xi32>
    %3187 = arith.andi %3185, %3186 : vector<8x128xi32>
    %3188 = vector.broadcast %3179 : i32 to vector<8x128xi32>
    %3189 = arith.cmpi eq, %3188, %3 : vector<8x128xi32>
    %3190 = arith.select %3189, %3111, %3187 : vector<8x128xi1>, vector<8x128xi32>
    %c0_914 = arith.constant 0 : index
    %3191 = arith.index_cast %3179 : i32 to index
    %c0_915 = arith.constant 0 : index
    %c0_916 = arith.constant 0 : index
    %3192 = vector.load %arg4[%c0_914, %3191, %c0_915, %c0_916] : memref<1x8x8x128xi32, #tpu.memory_space<vmem>>, vector<1x1x8x128xi32>
    %3193 = vector.shape_cast %3192 : vector<1x1x8x128xi32> to vector<8x128xi32>
    %3194 = vector.shape_cast %3190 : vector<8x128xi32> to vector<1x1x8x128xi32>
    tpu.vector_store %arg4[%c0_914, %3191, %c0_915, %c0_916], %3194 {strides = array<i32>} : memref<1x8x8x128xi32, #tpu.memory_space<vmem>>, vector<1x1x8x128xi32>,
    %c5_i32_917 = arith.constant 5 : i32
    %c6_i32_918 = arith.constant 6 : i32
    %3195 = arith.subi %c6_i32_918, %c5_i32_917 : i32
    %3196 = arith.index_cast %3195 : i32 to index
    %c0_919 = arith.constant 0 : index
    %c0_920 = arith.constant 0 : index
    %c0_921 = arith.constant 0 : index
    %3197 = vector.load %arg5[%3196, %c0_919, %c0_920, %c0_921] : memref<8x1x8x128xi32, #tpu.memory_space<vmem>>, vector<1x1x8x128xi32>
    %3198 = vector.shape_cast %3197 : vector<1x1x8x128xi32> to vector<8x128xi32>
    %c3_i32_922 = arith.constant 3 : i32
    %3199 = vector.broadcast %c3_i32_922 : i32 to vector<8x128xi32>
    %3200 = arith.muli %3190, %3199 : vector<8x128xi32>
    %3201 = arith.shrui %3198, %3200 : vector<8x128xi32>
    %3202 = vector.broadcast %c7_i32_871 : i32 to vector<8x128xi32>
    %3203 = arith.andi %3201, %3202 : vector<8x128xi32>
    %3204 = vector.broadcast %3195 : i32 to vector<8x128xi32>
    %3205 = arith.cmpi eq, %3204, %3 : vector<8x128xi32>
    %3206 = arith.select %3205, %3111, %3203 : vector<8x128xi1>, vector<8x128xi32>
    %c0_923 = arith.constant 0 : index
    %3207 = arith.index_cast %3195 : i32 to index
    %c0_924 = arith.constant 0 : index
    %c0_925 = arith.constant 0 : index
    %3208 = vector.load %arg4[%c0_923, %3207, %c0_924, %c0_925] : memref<1x8x8x128xi32, #tpu.memory_space<vmem>>, vector<1x1x8x128xi32>
    %3209 = vector.shape_cast %3208 : vector<1x1x8x128xi32> to vector<8x128xi32>
    %3210 = vector.shape_cast %3206 : vector<8x128xi32> to vector<1x1x8x128xi32>
    tpu.vector_store %arg4[%c0_923, %3207, %c0_924, %c0_925], %3210 {strides = array<i32>} : memref<1x8x8x128xi32, #tpu.memory_space<vmem>>, vector<1x1x8x128xi32>,
    %c6_i32_926 = arith.constant 6 : i32
    %c6_i32_927 = arith.constant 6 : i32
    %3211 = arith.subi %c6_i32_927, %c6_i32_926 : i32
    %3212 = arith.index_cast %3211 : i32 to index
    %c0_928 = arith.constant 0 : index
    %c0_929 = arith.constant 0 : index
    %c0_930 = arith.constant 0 : index
    %3213 = vector.load %arg5[%3212, %c0_928, %c0_929, %c0_930] : memref<8x1x8x128xi32, #tpu.memory_space<vmem>>, vector<1x1x8x128xi32>
    %3214 = vector.shape_cast %3213 : vector<1x1x8x128xi32> to vector<8x128xi32>
    %c3_i32_931 = arith.constant 3 : i32
    %3215 = vector.broadcast %c3_i32_931 : i32 to vector<8x128xi32>
    %3216 = arith.muli %3206, %3215 : vector<8x128xi32>
    %3217 = arith.shrui %3214, %3216 : vector<8x128xi32>
    %3218 = vector.broadcast %c7_i32_871 : i32 to vector<8x128xi32>
    %3219 = arith.andi %3217, %3218 : vector<8x128xi32>
    %3220 = vector.broadcast %3211 : i32 to vector<8x128xi32>
    %3221 = arith.cmpi eq, %3220, %3 : vector<8x128xi32>
    %3222 = arith.select %3221, %3111, %3219 : vector<8x128xi1>, vector<8x128xi32>
    %c0_932 = arith.constant 0 : index
    %3223 = arith.index_cast %3211 : i32 to index
    %c0_933 = arith.constant 0 : index
    %c0_934 = arith.constant 0 : index
    %3224 = vector.load %arg4[%c0_932, %3223, %c0_933, %c0_934] : memref<1x8x8x128xi32, #tpu.memory_space<vmem>>, vector<1x1x8x128xi32>
    %3225 = vector.shape_cast %3224 : vector<1x1x8x128xi32> to vector<8x128xi32>
    %3226 = vector.shape_cast %3222 : vector<8x128xi32> to vector<1x1x8x128xi32>
    tpu.vector_store %arg4[%c0_932, %3223, %c0_933, %c0_934], %3226 {strides = array<i32>} : memref<1x8x8x128xi32, #tpu.memory_space<vmem>>, vector<1x1x8x128xi32>,
    %c7_i32_935 = arith.constant 7 : i32
    return
  }
  func.func @transform_0(%arg0: i32) -> (i32, i32, i32) {
    %c0_i32 = arith.constant 0 : i32
    %c0_i32_0 = arith.constant 0 : i32
    %c0_i32_1 = arith.constant 0 : i32
    return %arg0, %c0_i32, %c0_i32_0 : i32, i32, i32
  }
  func.func @transform_1(%arg0: i32) -> (i32, i32, i32, i32, i32) {
    %c0_i32 = arith.constant 0 : i32
    %c0_i32_0 = arith.constant 0 : i32
    %c0_i32_1 = arith.constant 0 : i32
    %c0_i32_2 = arith.constant 0 : i32
    %c0_i32_3 = arith.constant 0 : i32
    return %arg0, %c0_i32, %c0_i32_0, %c0_i32_1, %c0_i32_2 : i32, i32, i32, i32, i32
  }
  func.func @transform_2(%arg0: i32) -> (i32, i32) {
    %c0_i32 = arith.constant 0 : i32
    %c0_i32_0 = arith.constant 0 : i32
    %c0_i32_1 = arith.constant 0 : i32
    return %c0_i32, %c0_i32_0 : i32, i32
  }
  func.func @transform_3(%arg0: i32) -> (i32, i32, i32, i32) {
    %c0_i32 = arith.constant 0 : i32
    %c0_i32_0 = arith.constant 0 : i32
    %c0_i32_1 = arith.constant 0 : i32
    %c0_i32_2 = arith.constant 0 : i32
    return %arg0, %c0_i32, %c0_i32_0, %c0_i32_1 : i32, i32, i32, i32
  }
}

</mosaic_0001>

<bundles_post_ra>
// kernel: tpu_custom_call.1
= control target key start
LH: loop header
LB: loop body
LE: loop exit
PB: predicated region body
PF: predicated region fallthrough
CT: control target
= control target key end

     0   :  { %s4568_s0 = inlined_call_operand.hbm [shape: s32[1,8,128], index: 0, kind: input, shape index: {}]   ;;  %s4569_s1 = inlined_call_operand.hbm [shape: f32[1,8,8,8,128], index: 1, kind: input, shape index: {}]   ;;  %s4570_s2 = inlined_call_operand.hbm [shape: f32[8,8], index: 2, kind: input, shape index: {}]   ;;  %s4571_s3 = inlined_call_operand.hbm [shape: s32[1,8,8,128], index: 3, kind: output, shape index: {}]  }
   0x1   :  { %4759 = sst [smem:[#allocation105_spill]] %s4571_s3 }
   0x2   :  { %8 = vsyncpa [#allocation4], 0 }
   0x3   :  { %9 = vsyncpa [#allocation8], 0 }
   0x4   :  { %10 = vsyncpa [#allocation6], 0 }
   0x5   :  { %11 = vsyncpa [#allocation5], 0  ;;  %s2439_s12 = smov [#allocation3]   ;;  %s2440_s14 = smov [#allocation7]  }
   0x6   :  { %s18_s13 = sshll.u32 %s2439_s12, 4  ;;  %s27_s15 = sshll.u32 %s2440_s14, 4  ;;  %s19_s13 = int_to_ptr.vmem [resolvable:$true] %s18_s13  ;;  %s2466_s15 = int_to_ptr.vmem [resolvable:$true] %s27_s15 }
   0x7   :  { %s2355_s18 = scalar_lea.hbm %s4568_s0, 128 }
   0x8   :  { %p2356_p0 = scmp.ne.s32.totalorder %s4568_s0, %s2355_s18  ;;  %p2359_p1 = scmp.lt.u32.totalorder %s2355_s18, %s4568_s0 }
   0xa   :  { %p2361_p2 = pnand %p2359_p1, %p2356_p0 }
   0xc   :  { %2364 = shalt.err (!%p2361_p2)
}
   0xd   :  { %s2365_s23 = scalar_lea.vmem %s19_s13, 128  ;;  %p2370_p4 = scmp.lt.s32.totalorder %s19_s13, %s19_s13 }
   0xe   :  { %p2366_p3 = scmp.ne.s32.totalorder %s19_s13, %s2365_s23  ;;  %p2371_p5 = scmp.lt.s32.totalorder %s2365_s23, %s2365_s23 }
  0x10   :  { %p2372_p6 = por %p2371_p5, %p2370_p4 }
  0x12   :  { %p2373_p7 = pnand %p2372_p6, %p2366_p3 }
  0x14   :  { %2376 = shalt.err (!%p2373_p7)
}
  0x15   :  { %21 = dma.hbm_to_vmem [thread:$0]  %s4568_s0, 128, %s19_s13, [#allocation4]  }
  0x16   :  { %s2377_s28 = scalar_lea.hbm %s4569_s1, 8192 }
  0x17   :  { %p2378_p8 = scmp.ne.s32.totalorder %s4569_s1, %s2377_s28  ;;  %p2381_p9 = scmp.lt.u32.totalorder %s2377_s28, %s4569_s1 }
  0x19   :  { %p2383_p10 = pnand %p2381_p9, %p2378_p8 }
  0x1b   :  { %2386 = shalt.err (!%p2383_p10)
}
  0x1c   :  { %s2387_s6 = scalar_lea.vmem %s2466_s15, 8192  ;;  %p2392_p12 = scmp.lt.s32.totalorder %s2466_s15, %s2466_s15 }
  0x1d   :  { %p2388_p11 = scmp.ne.s32.totalorder %s2466_s15, %s2387_s6  ;;  %p2393_p13 = scmp.lt.s32.totalorder %s2387_s6, %s2387_s6 }
  0x1f   :  { %p2394_p0 = por %p2393_p13, %p2392_p12 }
  0x21   :  { %p2395_p1 = pnand %p2394_p0, %p2388_p11 }
  0x23   :  { %2398 = shalt.err (!%p2395_p1)
}
  0x24   :  { %s4572_s0 = smov 128   ;;  %s4573_s7 = smov 8  }
  0x25   :  { %33 = dma.hbm_to_vmem [thread:$0]  %s4569_s1, 8192, %s2466_s15, [#allocation8], %s4572_s0, %s4572_s0, %s4573_s7  }
  0x26   :  { %s2399_s12 = scalar_lea.hbm %s4570_s2, 128 }
  0x27   :  { %p2400_p2 = scmp.ne.s32.totalorder %s4570_s2, %s2399_s12  ;;  %p2403_p3 = scmp.lt.u32.totalorder %s2399_s12, %s4570_s2 }
  0x29   :  { %p2405_p4 = pnand %p2403_p3, %p2400_p2 }
  0x2b   :  { %2408 = shalt.err (!%p2405_p4)
}
  0x2c   :  { %s2443_s18 = smov [#allocation9]  }
  0x2d   :  { %41 = dma.hbm_to_smem %s4570_s2, 128, %s2443_s18, [#allocation6]  }
  0x2e   :  { %2431 = dma.done.wait [#allocation4], 128  }
  0x2f   :  { %2432 = vsyncadd [#allocation4], 4294967168 }
  0x30   :  { %2433 = dma.done.wait [#allocation8], 8192  }
  0x31   :  { %2434 = vsyncadd [#allocation8], 4294959104 }
  0x32   :  { %2435 = dma.done.wait [#allocation6], 128  }
  0x33   :  { %2436 = vsyncadd [#allocation6], 4294967168 }
  0x34   :  { %51 = sfence }
  0x35   :  { %s2512_s1 = sld [smem:[#allocation9]]  ;;  %s2514_s15 = sld [smem:[#allocation9 + $0x1]]  ;;  %v52_v0 = vld [vmem:[#allocation3] sm:$0xff]  ;;  %v118_v34 = vld [vmem:[#allocation7] sm:$0xff]  ;;  %v122_v35 = vld [vmem:[#allocation7 + $0x8] sm:$0xff] }
  0x36   :  { %s2516_s21 = sld [smem:[#allocation9 + $0x2]]  ;;  %s2518_s22 = sld [smem:[#allocation9 + $0x3]]  ;;  %v2580_v1 = vadd.s32 4294967295, %v52_v0  ;;  %v126_v40 = vld [vmem:[#allocation7 + $0x10] sm:$0xff]  ;;  %v130_v41 = vld [vmem:[#allocation7 + $0x18] sm:$0xff]  ;;  %v134_v48 = vld [vmem:[#allocation7 + $0x20] sm:$0xff] }
  0x37   :  { %s2520_s23 = sld [smem:[#allocation9 + $0x4]]  ;;  %s2522_s24 = sld [smem:[#allocation9 + $0x5]]  ;;  %v138_v49 = vld [vmem:[#allocation7 + $0x28] sm:$0xff]  ;;  %v142_v56 = vld [vmem:[#allocation7 + $0x30] sm:$0xff]  ;;  %v146_v57 = vld [vmem:[#allocation7 + $0x38] sm:$0xff] }
  0x38   :  { %s2524_s2 = sld [smem:[#allocation9 + $0x6]]  ;;  %s2526_s25 = sld [smem:[#allocation9 + $0x7]]  ;;  %4767 = vst [vmem:[#allocation22_spill] sm:$0xff] %v2580_v1 }
  0x39   :  { %s2528_s26 = sld [smem:[#allocation9 + $0x80]]  ;;  %s2530_s27 = sld [smem:[#allocation9 + $0x81]] }
  0x3a   :  { %s2532_s28 = sld [smem:[#allocation9 + $0x82]]  ;;  %s2534_s29 = sld [smem:[#allocation9 + $0x83]] }
  0x3b   :  { %s2536_s30 = sld [smem:[#allocation9 + $0x84]]  ;;  %s2538_s4 = sld [smem:[#allocation9 + $0x85]]  ;;  %v2587_v2 = vstv %s2512_s1  ;;  %v2594_v3 = vstv %s2514_s15 }
  0x3c   :  { %s2540_s5 = sld [smem:[#allocation9 + $0x86]]  ;;  %s2542_s6 = sld [smem:[#allocation9 + $0x87]]  ;;  %4769 = vst [vmem:[#allocation24_spill] sm:$0xff] %v2587_v2  ;;  %4770 = vst [vmem:[#allocation25_spill] sm:$0xff] %v2594_v3  ;;  %v2597_v4 = vstv %s2516_s21  ;;  %v2600_v5 = vstv %s2518_s22 }
  0x3d   :  { %s2544_s8 = sld [smem:[#allocation9 + $0x100]]  ;;  %s2546_s9 = sld [smem:[#allocation9 + $0x101]]  ;;  %4771 = vst [vmem:[#allocation26_spill] sm:$0xff] %v2597_v4  ;;  %4772 = vst [vmem:[#allocation27_spill] sm:$0xff] %v2600_v5  ;;  %v2607_v6 = vstv %s2520_s23  ;;  %v2610_v7 = vstv %s2522_s24 }
  0x3e   :  { %s2548_s10 = sld [smem:[#allocation9 + $0x102]]  ;;  %s2550_s11 = sld [smem:[#allocation9 + $0x103]]  ;;  %4773 = vst [vmem:[#allocation28_spill] sm:$0xff] %v2607_v6  ;;  %4774 = vst [vmem:[#allocation29_spill] sm:$0xff] %v2610_v7  ;;  %v2613_v8 = vstv %s2524_s2  ;;  %v2616_v9 = vstv %s2526_s25 }
  0x3f   :  { %s2552_s12 = sld [smem:[#allocation9 + $0x104]]  ;;  %s2554_s13 = sld [smem:[#allocation9 + $0x105]]  ;;  %4775 = vst [vmem:[#allocation30_spill] sm:$0xff] %v2613_v8  ;;  %4776 = vst [vmem:[#allocation31_spill] sm:$0xff] %v2616_v9  ;;  %v2623_v10 = vstv %s2528_s26  ;;  %v2626_v11 = vstv %s2530_s27 }
  0x40   :  { %s2556_s14 = sld [smem:[#allocation9 + $0x106]]  ;;  %s2558_s16 = sld [smem:[#allocation9 + $0x107]]  ;;  %4777 = vst [vmem:[#allocation32_spill] sm:$0xff] %v2623_v10  ;;  %4778 = vst [vmem:[#allocation33_spill] sm:$0xff] %v2626_v11  ;;  %v2629_v12 = vstv %s2532_s28  ;;  %v2632_v13 = vstv %s2534_s29 }
  0x41   :  { %s2560_s17 = sld [smem:[#allocation9 + $0x180]]  ;;  %s2562_s18 = sld [smem:[#allocation9 + $0x181]]  ;;  %4779 = vst [vmem:[#allocation34_spill] sm:$0xff] %v2629_v12  ;;  %4780 = vst [vmem:[#allocation35_spill] sm:$0xff] %v2632_v13  ;;  %v2637_v14 = vstv %s2536_s30  ;;  %v2640_v15 = vstv %s2538_s4 }
  0x42   :  { %s2564_s19 = sld [smem:[#allocation9 + $0x182]]  ;;  %s2566_s20 = sld [smem:[#allocation9 + $0x183]]  ;;  %4782 = vst [vmem:[#allocation36_spill] sm:$0xff] %v2637_v14  ;;  %4783 = vst [vmem:[#allocation37_spill] sm:$0xff] %v2640_v15  ;;  %v2643_v16 = vstv %s2540_s5  ;;  %v2646_v17 = vstv %s2542_s6 }
  0x43   :  { %s2568_s0 = sld [smem:[#allocation9 + $0x184]]  ;;  %s2570_s7 = sld [smem:[#allocation9 + $0x185]]  ;;  %4784 = vst [vmem:[#allocation38_spill] sm:$0xff] %v2643_v16  ;;  %4785 = vst [vmem:[#allocation39_spill] sm:$0xff] %v2646_v17  ;;  %v2653_v18 = vstv %s2544_s8  ;;  %v2656_v19 = vstv %s2546_s9  ;;  %v4835_v17 = vmov 0  }
  0x44   :  { %s2572_s3 = sld [smem:[#allocation9 + $0x186]]  ;;  %s2604_s1 = sld [smem:[#allocation9 + $0x207]]  ;;  %4789 = vst [vmem:[#allocation40_spill] sm:$0xff] %v2653_v18  ;;  %4790 = vst [vmem:[#allocation41_spill] sm:$0xff] %v2656_v19  ;;  %v2659_v20 = vstv %s2548_s10  ;;  %v2662_v21 = vstv %s2550_s11 }
  0x45   :  { %s2618_s15 = sld [smem:[#allocation9 + $0x280]]  ;;  %s2620_s21 = sld [smem:[#allocation9 + $0x281]]  ;;  %4791 = vst [vmem:[#allocation42_spill] sm:$0xff] %v2659_v20  ;;  %4793 = vst [vmem:[#allocation43_spill] sm:$0xff] %v2662_v21  ;;  %v2669_v22 = vstv %s2552_s12  ;;  %v2672_v23 = vstv %s2554_s13 }
  0x46   :  { %4760 = sst [smem:[#allocation15_spill]] %s2558_s16  ;;  %s2574_s16 = sld [smem:[#allocation9 + $0x187]]  ;;  %4796 = vst [vmem:[#allocation44_spill] sm:$0xff] %v2669_v22  ;;  %4797 = vst [vmem:[#allocation45_spill] sm:$0xff] %v2672_v23  ;;  %v2675_v24 = vstv %s2556_s14 }
  0x47   :  { %4761 = sst [smem:[#allocation16_spill]] %s2562_s18  ;;  %s2576_s18 = sld [smem:[#allocation9 + $0x200]]  ;;  %4798 = vst [vmem:[#allocation46_spill] sm:$0xff] %v2675_v24  ;;  %v2685_v26 = vstv %s2560_s17 }
  0x48   :  { %4762 = sst [smem:[#allocation17_spill]] %s2564_s19  ;;  %s2578_s19 = sld [smem:[#allocation9 + $0x201]]  ;;  %4801 = vst [vmem:[#allocation48_spill] sm:$0xff] %v2685_v26 }
  0x49   :  { %4763 = sst [smem:[#allocation18_spill]] %s2566_s20  ;;  %s2582_s20 = sld [smem:[#allocation9 + $0x202]]  ;;  %v2704_v31 = vstv %s2570_s7 }
  0x4a   :  { %4764 = sst [smem:[#allocation19_spill]] %s2568_s0  ;;  %s2584_s0 = sld [smem:[#allocation9 + $0x203]]  ;;  %4806 = vst [vmem:[#allocation53_spill] sm:$0xff] %v2704_v31  ;;  %v2736_v45 = vstv %s2604_s1 }
  0x4b   :  { %4765 = sst [smem:[#allocation20_spill]] %s2572_s3  ;;  %s2589_s3 = sld [smem:[#allocation9 + $0x204]]  ;;  %4816 = vst [vmem:[#allocation63_spill] sm:$0xff] %v2736_v45  ;;  %v2745_v50 = vstv %s2618_s15  ;;  %v2748_v51 = vstv %s2620_s21 }
  0x4c   :  { %4766 = sst [smem:[#allocation21_spill]] %s2574_s16  ;;  %s2591_s16 = sld [smem:[#allocation9 + $0x205]]  ;;  %4819 = vst [vmem:[#allocation66_spill] sm:$0xff] %v2745_v50  ;;  %4820 = vst [vmem:[#allocation67_spill] sm:$0xff] %v2748_v51 }
  0x4d   :  { %s2634_s22 = sld [smem:[#allocation9 + $0x282]]  ;;  %s4781_s23 = sld [smem:[#allocation15_spill]]  ;;  %v2715_v36 = vstv %s2576_s18 }
  0x4e   :  { %s4786_s24 = sld [smem:[#allocation16_spill]]  ;;  %s2648_s2 = sld [smem:[#allocation9 + $0x300]]  ;;  %4809 = vst [vmem:[#allocation56_spill] sm:$0xff] %v2715_v36  ;;  %v2718_v37 = vstv %s2578_s19 }
  0x4f   :  { %4768 = sst [smem:[#allocation23_spill]] %s2582_s20  ;;  %s2602_s20 = sld [smem:[#allocation9 + $0x206]]  ;;  %4810 = vst [vmem:[#allocation57_spill] sm:$0xff] %v2718_v37 }
  0x50   :  { %s4787_s25 = sld [smem:[#allocation17_spill]]  ;;  %s2650_s26 = sld [smem:[#allocation9 + $0x301]]  ;;  %v2724_v39 = vstv %s2584_s0 }
  0x51   :  { %s4788_s27 = sld [smem:[#allocation18_spill]]  ;;  %s4792_s28 = sld [smem:[#allocation19_spill]]  ;;  %4812 = vst [vmem:[#allocation59_spill] sm:$0xff] %v2724_v39  ;;  %v2727_v42 = vstv %s2589_s3 }
  0x52   :  { %s2664_s29 = sld [smem:[#allocation9 + $0x302]]  ;;  %s4794_s30 = sld [smem:[#allocation20_spill]]  ;;  %4813 = vst [vmem:[#allocation60_spill] sm:$0xff] %v2727_v42  ;;  %v2730_v43 = vstv %s2591_s16 }
  0x53   :  { %s2666_s4 = sld [smem:[#allocation9 + $0x303]]  ;;  %s4795_s5 = sld [smem:[#allocation21_spill]]  ;;  %v2678_v25 = vstv %s4781_s23  ;;  %4814 = vst [vmem:[#allocation61_spill] sm:$0xff] %v2730_v43 }
  0x54   :  { %4799 = vst [vmem:[#allocation47_spill] sm:$0xff] %v2678_v25  ;;  %s2680_s6 = sld [smem:[#allocation9 + $0x304]]  ;;  %s2682_s8 = sld [smem:[#allocation9 + $0x305]]  ;;  %v2688_v27 = vstv %s4786_s24  ;;  %v2739_v46 = vstv %s2648_s2 }
  0x55   :  { %s4800_s9 = sld [smem:[#allocation23_spill]]  ;;  %4802 = vst [vmem:[#allocation49_spill] sm:$0xff] %v2688_v27  ;;  %s2696_s10 = sld [smem:[#allocation9 + $0x306]]  ;;  %v2733_v44 = vstv %s2602_s20  ;;  %4817 = vst [vmem:[#allocation64_spill] sm:$0xff] %v2739_v46  ;;  %v2751_v52 = vadd.f32 %v2739_v46, %v118_v34 }
  0x56   :  { %v2691_v28 = vstv %s4787_s25  ;;  %s2698_s11 = sld [smem:[#allocation9 + $0x307]]  ;;  %s2712_s12 = sld [smem:[#allocation9 + $0x380]]  ;;  %4815 = vst [vmem:[#allocation62_spill] sm:$0xff] %v2733_v44  ;;  %v2742_v47 = vstv %s2650_s26 }
  0x57   :  { %4803 = vst [vmem:[#allocation50_spill] sm:$0xff] %v2691_v28  ;;  %v2694_v29 = vstv %s4788_s27  ;;  %v2701_v30 = vstv %s4792_s28  ;;  %4818 = vst [vmem:[#allocation65_spill] sm:$0xff] %v2742_v47  ;;  %v2754_v53 = vadd.f32 %v2742_v47, %v122_v35  ;;  %s2796_s3 = sld [smem:[#allocation9 + $0x381]]  ;;  %s2832_s0 = sld [smem:[#allocation9 + $0x283]] }
  0x58   :  { %4804 = vst [vmem:[#allocation51_spill] sm:$0xff] %v2694_v29  ;;  %4805 = vst [vmem:[#allocation52_spill] sm:$0xff] %v2701_v30  ;;  %v2707_v32 = vstv %s4794_s30  ;;  %v2757_v54 = vstv %s2664_s29  ;;  %s2836_s7 = sld [smem:[#allocation9 + $0x284]]  ;;  %s2841_s13 = sld [smem:[#allocation9 + $0x285]] }
  0x59   :  { %4807 = vst [vmem:[#allocation54_spill] sm:$0xff] %v2707_v32  ;;  %v2710_v33 = vstv %s4795_s5  ;;  %4821 = vst [vmem:[#allocation68_spill] sm:$0xff] %v2751_v52  ;;  %v2760_v55 = vstv %s2666_s4  ;;  %v2763_v58 = vadd.f32 %v2757_v54, %v126_v40  ;;  %s2847_s14 = sld [smem:[#allocation9 + $0x286]]  ;;  %s2849_s16 = sld [smem:[#allocation9 + $0x287]] }
  0x5a   :  { %4808 = vst [vmem:[#allocation55_spill] sm:$0xff] %v2710_v33  ;;  %4822 = vst [vmem:[#allocation69_spill] sm:$0xff] %v2754_v53  ;;  %v2766_v59 = vadd.f32 %v2760_v55, %v130_v41  ;;  %v2769_v60 = vstv %s2680_s6  ;;  %v2772_v61 = vstv %s2682_s8  ;;  %v152_v41 = vadd.f32 %v2587_v2, %v2751_v52  ;;  %s2853_s17 = sld [smem:[#allocation9 + $0x382]]  ;;  %s2889_s18 = sld [smem:[#allocation9 + $0x383]] }
  0x5b   :  { %v2721_v38 = vstv %s4800_s9  ;;  %4823 = vst [vmem:[#allocation70_spill] sm:$0xff] %v2757_v54  ;;  %4824 = vst [vmem:[#allocation71_spill] sm:$0xff] %v2760_v55  ;;  %v2775_v62 = vadd.f32 %v2769_v60, %v134_v48  ;;  %v2778_v63 = vadd.f32 %v2772_v61, %v138_v49  ;;  %v2781_v0 = vstv %s2696_s10  ;;  %s2917_s19 = sld [smem:[#allocation9 + $0x384]]  ;;  %s2941_s20 = sld [smem:[#allocation9 + $0x385]] }
  0x5c   :  { %4811 = vst [vmem:[#allocation58_spill] sm:$0xff] %v2721_v38  ;;  %4825 = vst [vmem:[#allocation72_spill] sm:$0xff] %v2763_v58  ;;  %v2784_v34 = vstv %s2698_s11  ;;  %v2787_v35 = vadd.f32 %v2781_v0, %v142_v56  ;;  %v154_v48 = vadd.f32 %v2623_v10, %v2754_v53  ;;  %v159_v49 = vadd.f32 %v2653_v18, %v2763_v58  ;;  %s2963_s1 = sld [smem:[#allocation9 + $0x386]]  ;;  %s2990_s15 = sld [smem:[#allocation9 + $0x387]] }
  0x5d   :  { %4826 = vst [vmem:[#allocation73_spill] sm:$0xff] %v2766_v59  ;;  %4827 = vst [vmem:[#allocation74_spill] sm:$0xff] %v2769_v60  ;;  %v2790_v40 = vadd.f32 %v2784_v34, %v146_v57  ;;  %v164_v45 = vadd.f32 %v2685_v26, %v2766_v59  ;;  %v169_v56 = vadd.f32 %v2715_v36, %v2775_v62  ;;  %v2805_v33 = vstv %s2634_s22  ;;  %s2445_s21 = smov [#allocation10]  }
  0x5e   :  { %4828 = vst [vmem:[#allocation75_spill] sm:$0xff] %v2772_v61  ;;  %4829 = vst [vmem:[#allocation76_spill] sm:$0xff] %v2775_v62  ;;  %vm155_vm0 = vcmp.gt.f32.partialorder %v154_v48, %v152_v41  ;;  %v156_v57 = vmax.f32 %v152_v41, %v154_v48  ;;  %v174_v2 = vadd.f32 %v2745_v50, %v2778_v63  ;;  %v4593_v10 = vmov 0   ;;  %s2269_s22 = sshll.u32 %s2445_s21, 4  ;;  %s2270_s22 = int_to_ptr.vmem [resolvable:$true] %s2269_s22 }
  0x5f   :  { %4830 = vst [vmem:[#allocation77_spill] sm:$0xff] %v2778_v63  ;;  %4831 = vst [vmem:[#allocation78_spill] sm:$0xff] %v2781_v0  ;;  %v157_v25 = vsel %vm155_vm0, 1, %v4593_v10  ;;  %v178_v18 = vadd.f32 %v2787_v35, %v2739_v46  ;;  %v192_v26 = vadd.f32 %v2594_v3, %v2751_v52  ;;  %v194_v36 = vadd.f32 %v2626_v11, %v2754_v53  ;;  %s2409_s23 = scalar_lea.vmem %s2270_s22, 1024  ;;  %p2414_p6 = scmp.lt.s32.totalorder %s2270_s22, %s2270_s22 }
  0x60   :  { %4832 = vst [vmem:[#allocation79_spill] sm:$0xff] %v2784_v34  ;;  %4833 = vst [vmem:[#allocation80_spill] sm:$0xff] %v2805_v33  ;;  %v2810_v34 = vstv %s2712_s12  ;;  %vm160_vm1 = vcmp.gt.f32.partialorder %v159_v49, %v156_v57  ;;  %v161_v1 = vmax.f32 %v156_v57, %v159_v49  ;;  %v199_v48 = vadd.f32 %v2656_v19, %v2763_v58  ;;  %p2410_p5 = scmp.ne.s32.totalorder %s2270_s22, %s2409_s23  ;;  %p2415_p7 = scmp.lt.s32.totalorder %s2409_s23, %s2409_s23 }
  0x61   :  { %4834 = vst [vmem:[#allocation81_spill] sm:$0xff] %v2810_v34  ;;  %v2821_v41 = vadd.f32 %v2810_v34, %v2790_v40  ;;  %v162_v50 = vsel %vm160_vm1, 2, %v157_v25  ;;  %vm195_vm2 = vcmp.gt.f32.partialorder %v194_v36, %v192_v26  ;;  %v196_v10 = vmax.f32 %v192_v26, %v194_v36 }
  0x62   :  { %v204_v46 = vadd.f32 %v2688_v27, %v2766_v59  ;;  %vm165_vm3 = vcmp.gt.f32.partialorder %v164_v45, %v161_v1  ;;  %v166_v3 = vmax.f32 %v161_v1, %v164_v45  ;;  %v197_v11 = vsel %vm195_vm2, 1, %v4835_v17  ;;  %p2416_p8 = por %p2415_p7, %p2414_p6 }
  0x63   :  { %v209_v49 = vadd.f32 %v2718_v37, %v2775_v62  ;;  %v167_v57 = vsel %vm165_vm3, 3, %v162_v50  ;;  %vm200_vm4 = vcmp.gt.f32.partialorder %v199_v48, %v196_v10  ;;  %v201_v34 = vmax.f32 %v196_v10, %v199_v48 }
  0x64   :  { %v214_v19 = vadd.f32 %v2748_v51, %v2778_v63  ;;  %vm170_vm5 = vcmp.gt.f32.partialorder %v169_v56, %v166_v3  ;;  %v171_v25 = vmax.f32 %v166_v3, %v169_v56  ;;  %v202_v26 = vsel %vm200_vm4, 2, %v197_v11  ;;  %p2417_p9 = pnand %p2416_p8, %p2410_p5 }
  0x65   :  { %v218_v1 = vadd.f32 %v2787_v35, %v2742_v47  ;;  %v172_v36 = vsel %vm170_vm5, 4, %v167_v57  ;;  %vm205_vm6 = vcmp.gt.f32.partialorder %v204_v46, %v201_v34  ;;  %v206_v45 = vmax.f32 %v201_v34, %v204_v46 }
  0x66   :  { %v2839_v37 = vstv %s2796_s3  ;;  %vm175_vm7 = vcmp.gt.f32.partialorder %v174_v2, %v171_v25  ;;  %v176_v10 = vmax.f32 %v171_v25, %v174_v2  ;;  %v207_v50 = vsel %vm205_vm6, 3, %v202_v26 }
  0x67   :  { %4836 = vst [vmem:[#allocation82_spill] sm:$0xff] %v2839_v37  ;;  %v234_v48 = vadd.f32 %v2597_v4, %v2751_v52  ;;  %v177_v3 = vsel %vm175_vm7, 5, %v172_v36  ;;  %vm210_vm8 = vcmp.gt.f32.partialorder %v209_v49, %v206_v45  ;;  %v211_v11 = vmax.f32 %v206_v45, %v209_v49 }
  0x68   :  { %v236_v56 = vadd.f32 %v2629_v12, %v2754_v53  ;;  %vm179_vm9 = vcmp.gt.f32.partialorder %v178_v18, %v176_v10  ;;  %v180_v46 = vmax.f32 %v176_v10, %v178_v18  ;;  %v212_v34 = vsel %vm210_vm8, 4, %v207_v50 }
  0x69   :  { %v241_v2 = vadd.f32 %v2659_v20, %v2763_v58  ;;  %v181_v57 = vsel %vm179_vm9, 6, %v177_v3  ;;  %vm215_vm10 = vcmp.gt.f32.partialorder %v214_v19, %v211_v11  ;;  %v216_v25 = vmax.f32 %v211_v11, %v214_v19 }
  0x6a   :  { %vm237_vm11 = vcmp.gt.f32.partialorder %v236_v56, %v234_v48  ;;  %vm184_vm12 = vcmp.gt.f32.partialorder %v2821_v41, %v180_v46  ;;  %v217_v49 = vsel %vm215_vm10, 5, %v212_v34  ;;  %v2858_v26 = vadd.f32 %v2839_v37, %v2790_v40 }
  0x6b   :  { %v238_v18 = vmax.f32 %v234_v48, %v236_v56  ;;  %v186_v36 = vsel %vm184_vm12, 7, %v181_v57  ;;  %vm219_vm13 = vcmp.gt.f32.partialorder %v218_v1, %v216_v25  ;;  %v2860_v45 = vmax.f32 %v216_v25, %v218_v1 }
  0x6c   :  { %v239_v10 = vsel %vm237_vm11, 1, %v4835_v17  ;;  %v221_v19 = vsel %vm219_vm13, 6, %v217_v49  ;;  %v2864_v3 = vstv %s2832_s0  ;;  %v246_v48 = vadd.f32 %v2691_v28, %v2766_v59 }
  0x6d   :  { %vm242_vm14 = vcmp.gt.f32.partialorder %v241_v2, %v238_v18  ;;  %v243_v50 = vmax.f32 %v238_v18, %v241_v2  ;;  %4837 = vst [vmem:[#allocation83_spill] sm:$0xff] %v2864_v3  ;;  %vm224_vm15 = vcmp.gt.f32.partialorder %v2858_v26, %v2860_v45  ;;  %v2871_v56 = vstv %s2836_s7 }
  0x6e   :  { %v244_v11 = vsel %vm242_vm14, 2, %v239_v10  ;;  %4838 = vst [vmem:[#allocation84_spill] sm:$0xff] %v2871_v56  ;;  %v185_v1 = vmax.f32 %v180_v46, %v2821_v41  ;;  %v226_v34 = vsel %vm224_vm15, 7, %v221_v19  ;;  %v251_v57 = vadd.f32 %v2721_v38, %v2775_v62  ;;  %v188_v10 = vld [vmem:[#allocation7 + $0x40] sm:$0xff] }
  0x6f   :  { %v2877_v2 = vstv %s2841_s13  ;;  %v230_v25 = vshll.u32 %v226_v34, 3  ;;  %vm247_vm0 = vcmp.gt.f32.partialorder %v246_v48, %v243_v50  ;;  %v248_v49 = vmax.f32 %v243_v50, %v246_v48 }
  0x70   :  { %4839 = vst [vmem:[#allocation85_spill] sm:$0xff] %v2877_v2  ;;  %v256_v18 = vadd.f32 %v2805_v33, %v2778_v63  ;;  %v249_v37 = vsel %vm247_vm0, 3, %v244_v11  ;;  %v276_v28 = vadd.f32 %v2600_v5, %v2751_v52  ;;  %v2884_v20 = vstv %s2847_s14 }
  0x71   :  { %4840 = vst [vmem:[#allocation86_spill] sm:$0xff] %v2884_v20  ;;  %v2887_v41 = vstv %s2849_s16  ;;  %v231_v46 = vor.u32 %v230_v25, %v186_v36  ;;  %vm252_vm1 = vcmp.gt.f32.partialorder %v251_v57, %v248_v49  ;;  %v253_v19 = vmax.f32 %v248_v49, %v251_v57 }
  0x72   :  { %4841 = vst [vmem:[#allocation87_spill] sm:$0xff] %v2887_v41  ;;  %v260_v50 = vadd.f32 %v2787_v35, %v2757_v54  ;;  %v254_v48 = vsel %vm252_vm1, 4, %v249_v37  ;;  %v2894_v34 = vstv %s2853_s17  ;;  %v278_v11 = vadd.f32 %v2632_v13, %v2754_v53 }
  0x73   :  { %4842 = vst [vmem:[#allocation88_spill] sm:$0xff] %v2894_v34  ;;  %v283_v33 = vadd.f32 %v2662_v21, %v2763_v58  ;;  %v2900_v5 = vadd.f32 %v188_v10, %v185_v1  ;;  %v225_v38 = vmax.f32 %v2860_v45, %v2858_v26  ;;  %vm257_vm2 = vcmp.gt.f32.partialorder %v256_v18, %v253_v19 }
  0x74   :  { %v258_v36 = vmax.f32 %v253_v19, %v256_v18  ;;  %v259_v57 = vsel %vm257_vm2, 5, %v254_v48  ;;  %vm279_vm3 = vcmp.gt.f32.partialorder %v278_v11, %v276_v28  ;;  %v280_v25 = vmax.f32 %v276_v28, %v278_v11 }
  0x75   :  { %4843 = vst [vmem:[#allocation89_spill] sm:$0xff] %v2900_v5  ;;  %v288_v37 = vadd.f32 %v2694_v29, %v2766_v59  ;;  %v265_v54 = vadd.f32 %v2894_v34, %v2790_v40  ;;  %v281_v21 = vsel %vm279_vm3, 1, %v4835_v17  ;;  %v293_v26 = vadd.f32 %v2724_v39, %v2775_v62 }
  0x76   :  { %vm261_vm4 = vcmp.gt.f32.partialorder %v260_v50, %v258_v36  ;;  %v262_v49 = vmax.f32 %v258_v36, %v260_v50  ;;  %vm284_vm5 = vcmp.gt.f32.partialorder %v283_v33, %v280_v25  ;;  %v285_v10 = vmax.f32 %v280_v25, %v283_v33 }
  0x77   :  { %v263_v1 = vsel %vm261_vm4, 6, %v259_v57  ;;  %v286_v45 = vsel %vm284_vm5, 2, %v281_v21  ;;  %v298_v28 = vadd.f32 %v2864_v3, %v2778_v63  ;;  %v302_v18 = vadd.f32 %v2787_v35, %v2760_v55  ;;  %v228_v57 = vld [vmem:[#allocation7 + $0x48] sm:$0xff] }
  0x78   :  { %vm266_vm6 = vcmp.gt.f32.partialorder %v265_v54, %v262_v49  ;;  %vm289_vm7 = vcmp.gt.f32.partialorder %v288_v37, %v285_v10  ;;  %v290_v50 = vmax.f32 %v285_v10, %v288_v37  ;;  %v318_v48 = vadd.f32 %v2607_v6, %v2751_v52 }
  0x79   :  { %v268_v19 = vsel %vm266_vm6, 7, %v263_v1  ;;  %v291_v11 = vsel %vm289_vm7, 3, %v286_v45  ;;  %v2920_v36 = vstv %s2889_s18  ;;  %v320_v21 = vadd.f32 %v2637_v14, %v2754_v53 }
  0x7a   :  { %v272_v33 = vshll.u32 %v268_v19, 6  ;;  %4844 = vst [vmem:[#allocation90_spill] sm:$0xff] %v2920_v36  ;;  %v267_v25 = vmax.f32 %v262_v49, %v265_v54  ;;  %vm294_vm8 = vcmp.gt.f32.partialorder %v293_v26, %v290_v50  ;;  %v295_v3 = vmax.f32 %v290_v50, %v293_v26  ;;  %v270_v19 = vld [vmem:[#allocation7 + $0x50] sm:$0xff] }
  0x7b   :  { %v325_v1 = vadd.f32 %v2669_v22, %v2763_v58  ;;  %v296_v10 = vsel %vm294_vm8, 4, %v291_v11  ;;  %vm321_vm9 = vcmp.gt.f32.partialorder %v320_v21, %v318_v48  ;;  %v330_v6 = vadd.f32 %v2701_v30, %v2766_v59 }
  0x7c   :  { %v273_v37 = vor.u32 %v272_v33, %v231_v46  ;;  %vm299_vm10 = vcmp.gt.f32.partialorder %v298_v28, %v295_v3  ;;  %v300_v45 = vmax.f32 %v295_v3, %v298_v28  ;;  %v322_v55 = vmax.f32 %v318_v48, %v320_v21 }
  0x7d   :  { %v323_v39 = vsel %vm321_vm9, 1, %v4835_v17  ;;  %v2929_v14 = vadd.f32 %v228_v57, %v225_v38  ;;  %v301_v54 = vsel %vm299_vm10, 5, %v296_v10  ;;  %v307_v49 = vadd.f32 %v2920_v36, %v2790_v40 }
  0x7e   :  { %v335_v46 = vadd.f32 %v2727_v42, %v2775_v62  ;;  %vm303_vm11 = vcmp.gt.f32.partialorder %v302_v18, %v300_v45  ;;  %v304_v26 = vmax.f32 %v300_v45, %v302_v18  ;;  %vm326_vm12 = vcmp.gt.f32.partialorder %v325_v1, %v322_v55 }
  0x7f   :  { %4845 = vst [vmem:[#allocation91_spill] sm:$0xff] %v2929_v14  ;;  %v327_v50 = vmax.f32 %v322_v55, %v325_v1  ;;  %v2935_v33 = vadd.f32 %v270_v19, %v267_v25  ;;  %v305_v3 = vsel %vm303_vm11, 6, %v301_v54  ;;  %v328_v28 = vsel %vm326_vm12, 2, %v323_v39 }
  0x80   :  { %v360_v38 = vadd.f32 %v2610_v7, %v2751_v52  ;;  %vm308_vm13 = vcmp.gt.f32.partialorder %v307_v49, %v304_v26  ;;  %v340_v11 = vadd.f32 %v2871_v56, %v2778_v63  ;;  %v2944_v18 = vstv %s2917_s19 }
  0x81   :  { %4846 = vst [vmem:[#allocation92_spill] sm:$0xff] %v2935_v33  ;;  %vm331_vm14 = vcmp.gt.f32.partialorder %v330_v6, %v327_v50  ;;  %v332_v48 = vmax.f32 %v327_v50, %v330_v6  ;;  %v310_v21 = vsel %vm308_vm13, 7, %v305_v3  ;;  %4847 = vst [vmem:[#allocation93_spill] sm:$0xff] %v2944_v18  ;;  %v362_v55 = vadd.f32 %v2640_v15, %v2754_v53 }
  0x82   :  { %v333_v57 = vsel %vm331_vm14, 3, %v328_v28  ;;  %v314_v25 = vshll.u32 %v310_v21, 9  ;;  %v344_v1 = vadd.f32 %v2787_v35, %v2769_v60  ;;  %v367_v19 = vadd.f32 %v2672_v23, %v2763_v58 }
  0x83   :  { %vm336_vm15 = vcmp.gt.f32.partialorder %v335_v46, %v332_v48  ;;  %v337_v39 = vmax.f32 %v332_v48, %v335_v46  ;;  %vm363_vm0 = vcmp.gt.f32.partialorder %v362_v55, %v360_v38  ;;  %v364_v6 = vmax.f32 %v360_v38, %v362_v55 }
  0x84   :  { %v338_v10 = vsel %vm336_vm15, 4, %v333_v57  ;;  %v315_v45 = vor.u32 %v314_v25, %v273_v37  ;;  %v349_v50 = vadd.f32 %v2944_v18, %v2790_v40  ;;  %v365_v28 = vsel %vm363_vm0, 1, %v4835_v17  ;;  %v312_v25 = vld [vmem:[#allocation7 + $0x58] sm:$0xff] }
  0x85   :  { %vm341_vm1 = vcmp.gt.f32.partialorder %v340_v11, %v337_v39  ;;  %v342_v54 = vmax.f32 %v337_v39, %v340_v11  ;;  %vm368_vm2 = vcmp.gt.f32.partialorder %v367_v19, %v364_v6  ;;  %v369_v46 = vmax.f32 %v364_v6, %v367_v19 }
  0x86   :  { %v343_v3 = vsel %vm341_vm1, 5, %v338_v10  ;;  %v370_v21 = vsel %vm368_vm2, 2, %v365_v28  ;;  %v372_v38 = vadd.f32 %v2704_v31, %v2766_v59  ;;  %v309_v57 = vmax.f32 %v304_v26, %v307_v49 }
  0x87   :  { %vm345_vm3 = vcmp.gt.f32.partialorder %v344_v1, %v342_v54  ;;  %v346_v48 = vmax.f32 %v342_v54, %v344_v1  ;;  %v377_v37 = vadd.f32 %v2730_v43, %v2775_v62  ;;  %v382_v11 = vadd.f32 %v2877_v2, %v2778_v63  ;;  %v354_v2 = vld [vmem:[#allocation7 + $0x60] sm:$0xff] }
  0x88   :  { %v347_v55 = vsel %vm345_vm3, 6, %v343_v3  ;;  %vm373_vm5 = vcmp.gt.f32.partialorder %v372_v38, %v369_v46  ;;  %v374_v39 = vmax.f32 %v369_v46, %v372_v38  ;;  %v386_v10 = vadd.f32 %v2787_v35, %v2772_v61 }
  0x89   :  { %vm350_vm4 = vcmp.gt.f32.partialorder %v349_v50, %v346_v48  ;;  %v375_v6 = vsel %vm373_vm5, 3, %v370_v21  ;;  %v2966_v19 = vstv %s2941_s20  ;;  %v402_v49 = vadd.f32 %v2613_v8, %v2751_v52 }
  0x8a   :  { %v352_v1 = vsel %vm350_vm4, 7, %v347_v55  ;;  %4848 = vst [vmem:[#allocation94_spill] sm:$0xff] %v2966_v19  ;;  %v351_v26 = vmax.f32 %v346_v48, %v349_v50  ;;  %vm378_vm6 = vcmp.gt.f32.partialorder %v377_v37, %v374_v39  ;;  %v379_v3 = vmax.f32 %v374_v39, %v377_v37 }
  0x8b   :  { %v356_v54 = vshll.u32 %v352_v1, 12  ;;  %v2970_v28 = vadd.f32 %v312_v25, %v309_v57  ;;  %v380_v46 = vsel %vm378_vm6, 4, %v375_v6  ;;  %v404_v38 = vadd.f32 %v2643_v16, %v2754_v53 }
  0x8c   :  { %v409_v55 = vadd.f32 %v2675_v24, %v2763_v58  ;;  %vm383_vm7 = vcmp.gt.f32.partialorder %v382_v11, %v379_v3  ;;  %v384_v61 = vmax.f32 %v379_v3, %v382_v11  ;;  %v391_v8 = vadd.f32 %v2966_v19, %v2790_v40 }
  0x8d   :  { %4849 = vst [vmem:[#allocation95_spill] sm:$0xff] %v2970_v28  ;;  %v357_v21 = vor.u32 %v356_v54, %v315_v45  ;;  %v385_v50 = vsel %vm383_vm7, 5, %v380_v46  ;;  %vm405_vm8 = vcmp.gt.f32.partialorder %v404_v38, %v402_v49  ;;  %v406_v48 = vmax.f32 %v402_v49, %v404_v38  ;;  %v396_v45 = vld [vmem:[#allocation7 + $0x68] sm:$0xff] }
  0x8e   :  { %v414_v57 = vadd.f32 %v2707_v32, %v2766_v59  ;;  %v2980_v37 = vadd.f32 %v354_v2, %v351_v26  ;;  %vm387_vm9 = vcmp.gt.f32.partialorder %v386_v10, %v384_v61  ;;  %v388_v25 = vmax.f32 %v384_v61, %v386_v10 }
  0x8f   :  { %v407_v39 = vsel %vm405_vm8, 1, %v4835_v17  ;;  %v389_v1 = vsel %vm387_vm9, 6, %v385_v50  ;;  %vm410_vm10 = vcmp.gt.f32.partialorder %v409_v55, %v406_v48  ;;  %v411_v11 = vmax.f32 %v406_v48, %v409_v55  ;;  %v4853_v48 = vld [vmem:[#allocation39_spill] sm:$0xff] }
  0x90   :  { %4850 = vst [vmem:[#allocation96_spill] sm:$0xff] %v2980_v37  ;;  %v419_v6 = vadd.f32 %v2733_v44, %v2775_v62  ;;  %vm392_vm11 = vcmp.gt.f32.partialorder %v391_v8, %v388_v25  ;;  %v393_v54 = vmax.f32 %v388_v25, %v391_v8  ;;  %v412_v49 = vsel %vm410_vm10, 2, %v407_v39 }
  0x91   :  { %v424_v3 = vadd.f32 %v2884_v20, %v2778_v63  ;;  %v394_v2 = vsel %vm392_vm11, 7, %v389_v1  ;;  %vm415_vm12 = vcmp.gt.f32.partialorder %v414_v57, %v411_v11  ;;  %v416_v26 = vmax.f32 %v411_v11, %v414_v57  ;;  %v4854_v57 = vld [vmem:[#allocation22_spill] sm:$0xff] }
  0x92   :  { %v2988_v46 = vstv %s2963_s1  ;;  %v2992_v61 = vadd.f32 %v396_v45, %v393_v54  ;;  %v398_v10 = vshll.u32 %v394_v2, 15  ;;  %v417_v38 = vsel %vm415_vm12, 3, %v412_v49  ;;  %v4855_v11 = vld [vmem:[#allocation47_spill] sm:$0xff] }
  0x93   :  { %4851 = vst [vmem:[#allocation97_spill] sm:$0xff] %v2988_v46  ;;  %v428_v55 = vadd.f32 %v2787_v35, %v2781_v0  ;;  %vm420_vm13 = vcmp.gt.f32.partialorder %v419_v6, %v416_v26  ;;  %v421_v8 = vmax.f32 %v416_v26, %v419_v6  ;;  %v444_v50 = vadd.f32 %v2616_v9, %v2751_v52  ;;  %v4856_v52 = vld [vmem:[#allocation55_spill] sm:$0xff] }
  0x94   :  { %4852 = vst [vmem:[#allocation98_spill] sm:$0xff] %v2992_v61  ;;  %v446_v25 = vadd.f32 %v4853_v48, %v2754_v53  ;;  %vm150_vm14 = vcmp.eq.s32.totalorder %v4854_v57, 1  ;;  %v399_v39 = vor.u32 %v398_v10, %v357_v21  ;;  %v422_v1 = vsel %vm420_vm13, 4, %v417_v38  ;;  %v4857_v48 = vld [vmem:[#allocation63_spill] sm:$0xff] }
  0x95   :  { %v433_v45 = vadd.f32 %v2988_v46, %v2790_v40  ;;  %v451_v54 = vadd.f32 %v4855_v11, %v2763_v58  ;;  %vm425_vm15 = vcmp.gt.f32.partialorder %v424_v3, %v421_v8  ;;  %v426_v49 = vmax.f32 %v421_v8, %v424_v3  ;;  %v438_v58 = vld [vmem:[#allocation7 + $0x70] sm:$0xff]  ;;  %v4858_v8 = vld [vmem:[#allocation79_spill] sm:$0xff] }
  0x96   :  { %vm447_vm0 = vcmp.gt.f32.partialorder %v446_v25, %v444_v50  ;;  %v448_v6 = vmax.f32 %v444_v50, %v446_v25  ;;  %v427_v2 = vsel %vm425_vm15, 5, %v422_v1  ;;  %v456_v53 = vadd.f32 %v4856_v52, %v2766_v59 }
  0x97   :  { %v449_v26 = vsel %vm447_vm0, 1, %v4835_v17  ;;  %v461_v21 = vadd.f32 %v4857_v48, %v2775_v62  ;;  %vm429_vm1 = vcmp.gt.f32.partialorder %v428_v55, %v426_v49  ;;  %v430_v10 = vmax.f32 %v426_v49, %v428_v55  ;;  %v4860_v55 = vld [vmem:[#allocation24_spill] sm:$0xff] }
  0x98   :  { %vm452_vm2 = vcmp.gt.f32.partialorder %v451_v54, %v448_v6  ;;  %v453_v38 = vmax.f32 %v448_v6, %v451_v54  ;;  %v431_v46 = vsel %vm429_vm1, 6, %v427_v2  ;;  %v466_v3 = vadd.f32 %v2887_v41, %v2778_v63 }
  0x99   :  { %v454_v11 = vsel %vm452_vm2, 2, %v449_v26  ;;  %v470_v50 = vadd.f32 %v4858_v8, %v2787_v35  ;;  %vm434_vm3 = vcmp.gt.f32.partialorder %v433_v45, %v430_v10  ;;  %v435_v25 = vmax.f32 %v430_v10, %v433_v45  ;;  %v4861_v8 = vld [vmem:[#allocation32_spill] sm:$0xff] }
  0x9a   :  { %vm457_vm4 = vcmp.gt.f32.partialorder %v456_v53, %v453_v38  ;;  %v458_v1 = vmax.f32 %v453_v38, %v456_v53  ;;  %v436_v59 = vsel %vm434_vm3, 7, %v431_v46  ;;  %v3015_v48 = vstv %s2990_s15  ;;  %v4862_v53 = vld [vmem:[#allocation40_spill] sm:$0xff] }
  0x9b   :  { %v459_v62 = vsel %vm457_vm4, 3, %v454_v11  ;;  %4859 = vst [vmem:[#allocation22_spill] sm:$0xff] %v3015_v48  ;;  %v489_v54 = vadd.f32 %v2900_v5, %v4860_v55  ;;  %v3019_v49 = vadd.f32 %v438_v58, %v435_v25  ;;  %v440_v6 = vshll.u32 %v436_v59, 18  ;;  %v4864_v10 = vld [vmem:[#allocation48_spill] sm:$0xff] }
  0x9c   :  { %vm462_vm5 = vcmp.gt.f32.partialorder %v461_v21, %v458_v1  ;;  %v463_v2 = vmax.f32 %v458_v1, %v461_v21  ;;  %v475_v63 = vadd.f32 %v3015_v48, %v2790_v40  ;;  %v490_v45 = vadd.f32 %v2929_v14, %v4861_v8  ;;  %v4865_v8 = vld [vmem:[#allocation56_spill] sm:$0xff] }
  0x9d   :  { %v464_v26 = vsel %vm462_vm5, 4, %v459_v62  ;;  %v494_v46 = vadd.f32 %v2935_v33, %v4862_v53  ;;  %v441_v11 = vor.u32 %v440_v6, %v399_v39  ;;  %v3031_v58 = vsel %vm150_vm14, %v3019_v49, %v2787_v35  ;;  %v480_v39 = vld [vmem:[#allocation7 + $0x78] sm:$0xff] }
  0x9e   :  { %4863 = vst [vmem:[#allocation99_spill] sm:$0xff] %v3031_v58  ;;  %vm467_vm6 = vcmp.gt.f32.partialorder %v466_v3, %v463_v2  ;;  %v468_v59 = vmax.f32 %v463_v2, %v466_v3  ;;  %vm491_vm7 = vcmp.gt.f32.partialorder %v490_v45, %v489_v54  ;;  %v492_v62 = vmax.f32 %v489_v54, %v490_v45  ;;  %v4866_v2 = vld [vmem:[#allocation66_spill] sm:$0xff] }
  0x9f   :  { %v469_v21 = vsel %vm467_vm6, 5, %v464_v26  ;;  %v498_v38 = vadd.f32 %v2970_v28, %v4864_v10  ;;  %v493_v1 = vsel %vm491_vm7, 1, %v4835_v17  ;;  %v502_v35 = vadd.f32 %v2980_v37, %v4865_v8 }
  0xa0   :  { %vm471_vm8 = vcmp.gt.f32.partialorder %v470_v50, %v468_v59  ;;  %v472_v25 = vmax.f32 %v468_v59, %v470_v50  ;;  %vm495_vm9 = vcmp.gt.f32.partialorder %v494_v46, %v492_v62  ;;  %v496_v6 = vmax.f32 %v492_v62, %v494_v46  ;;  %v4867_v50 = vld [vmem:[#allocation25_spill] sm:$0xff] }
  0xa1   :  { %v473_v53 = vsel %vm471_vm8, 6, %v469_v21  ;;  %v497_v3 = vsel %vm495_vm9, 2, %v493_v1  ;;  %v506_v54 = vadd.f32 %v2992_v61, %v4866_v2  ;;  %v522_v59 = vadd.f32 %v4867_v50, %v2900_v5  ;;  %v4868_v46 = vld [vmem:[#allocation33_spill] sm:$0xff] }
  0xa2   :  { %vm476_vm10 = vcmp.gt.f32.partialorder %v475_v63, %v472_v25  ;;  %v477_v58 = vmax.f32 %v472_v25, %v475_v63  ;;  %vm499_vm11 = vcmp.gt.f32.partialorder %v498_v38, %v496_v6  ;;  %v500_v45 = vmax.f32 %v496_v6, %v498_v38  ;;  %v4869_v63 = vld [vmem:[#allocation64_spill] sm:$0xff]  ;;  %v4870_v1 = vld [vmem:[#allocation41_spill] sm:$0xff] }
  0xa3   :  { %v478_v26 = vsel %vm476_vm10, 7, %v473_v53  ;;  %v501_v55 = vsel %vm499_vm11, 3, %v497_v3  ;;  %v523_v62 = vadd.f32 %v2929_v14, %v4868_v46  ;;  %v510_v25 = vadd.f32 %v3019_v49, %v4869_v63  ;;  %v4873_v46 = vld [vmem:[#allocation57_spill] sm:$0xff] }
  0xa4   :  { %v3042_v10 = vadd.f32 %v480_v39, %v477_v58  ;;  %v482_v21 = vshll.u32 %v478_v26, 21  ;;  %vm503_vm12 = vcmp.gt.f32.partialorder %v502_v35, %v500_v45  ;;  %v504_v8 = vmax.f32 %v500_v45, %v502_v35  ;;  %v4872_v26 = vld [vmem:[#allocation81_spill] sm:$0xff] }
  0xa5   :  { %v527_v53 = vadd.f32 %v2935_v33, %v4870_v1  ;;  %v505_v38 = vsel %vm503_vm12, 4, %v501_v55  ;;  %v531_v58 = vadd.f32 %v2970_v28, %v2688_v27  ;;  %vm524_vm15 = vcmp.gt.f32.partialorder %v523_v62, %v522_v59 }
  0xa6   :  { %v3050_v2 = vor.u32 %v482_v21, %v441_v11  ;;  %vm507_vm13 = vcmp.gt.f32.partialorder %v506_v54, %v504_v8  ;;  %v508_v39 = vmax.f32 %v504_v8, %v506_v54  ;;  %v525_v6 = vmax.f32 %v522_v59, %v523_v62 }
  0xa7   :  { %v509_v3 = vsel %vm507_vm13, 5, %v505_v38  ;;  %v3056_v35 = vadd.f32 %v3042_v10, %v4872_v26  ;;  %v526_v45 = vsel %vm524_vm15, 1, %v4835_v17  ;;  %v535_v1 = vadd.f32 %v2980_v37, %v4873_v46  ;;  %v4881_v26 = vld [vmem:[#allocation70_spill] sm:$0xff] }
  0xa8   :  { %4871 = vst [vmem:[#allocation100_spill] sm:$0xff] %v3050_v2  ;;  %vm511_vm0 = vcmp.gt.f32.partialorder %v510_v25, %v508_v39  ;;  %v3061_v11 = vmax.f32 %v508_v39, %v510_v25  ;;  %vm528_vm1 = vcmp.gt.f32.partialorder %v527_v53, %v525_v6  ;;  %v529_v55 = vmax.f32 %v525_v6, %v527_v53 }
  0xa9   :  { %v513_v21 = vsel %vm511_vm0, 6, %v509_v3  ;;  %v530_v2 = vsel %vm528_vm1, 2, %v526_v45  ;;  %v539_v54 = vadd.f32 %v2992_v61, %v2748_v51  ;;  %v557_v38 = vadd.f32 %v2597_v4, %v2900_v5  ;;  %v4874_v3 = vld [vmem:[#allocation42_spill] sm:$0xff] }
  0xaa   :  { %vm515_vm2 = vcmp.gt.f32.partialorder %v3056_v35, %v3061_v11  ;;  %vm532_vm3 = vcmp.gt.f32.partialorder %v531_v58, %v529_v55  ;;  %v533_v8 = vmax.f32 %v529_v55, %v531_v58  ;;  %v543_v53 = vadd.f32 %v3019_v49, %v2742_v47  ;;  %v4875_v4 = vld [vmem:[#allocation50_spill] sm:$0xff] }
  0xab   :  { %v517_v59 = vsel %vm515_vm2, 7, %v513_v21  ;;  %v534_v62 = vsel %vm532_vm3, 3, %v530_v2  ;;  %v558_v39 = vadd.f32 %v2629_v12, %v2929_v14  ;;  %v562_v58 = vadd.f32 %v2935_v33, %v4874_v3  ;;  %v4876_v47 = vld [vmem:[#allocation82_spill] sm:$0xff] }
  0xac   :  { %vm536_vm4 = vcmp.gt.f32.partialorder %v535_v1, %v533_v8  ;;  %v537_v25 = vmax.f32 %v533_v8, %v535_v1  ;;  %v566_v1 = vadd.f32 %v2970_v28, %v4875_v4  ;;  %v3082_v12 = vadd.f32 %v3042_v10, %v4876_v47 }
  0xad   :  { %v538_v6 = vsel %vm536_vm4, 4, %v534_v62  ;;  %vm559_vm6 = vcmp.gt.f32.partialorder %v558_v39, %v557_v38  ;;  %v560_v2 = vmax.f32 %v557_v38, %v558_v39  ;;  %v4877_v62 = vld [vmem:[#allocation58_spill] sm:$0xff]  ;;  %v4878_v38 = vld [vmem:[#allocation27_spill] sm:$0xff] }
  0xae   :  { %vm540_vm5 = vcmp.gt.f32.partialorder %v539_v54, %v537_v25  ;;  %v541_v45 = vmax.f32 %v537_v25, %v539_v54  ;;  %v561_v21 = vsel %vm559_vm6, 1, %v4835_v17  ;;  %v570_v3 = vadd.f32 %v2980_v37, %v4877_v62 }
  0xaf   :  { %v542_v55 = vsel %vm540_vm5, 5, %v538_v6  ;;  %vm563_vm8 = vcmp.gt.f32.partialorder %v562_v58, %v560_v2  ;;  %v564_v54 = vmax.f32 %v560_v2, %v562_v58  ;;  %v592_v25 = vadd.f32 %v4878_v38, %v2900_v5  ;;  %v4879_v6 = vld [vmem:[#allocation80_spill] sm:$0xff] }
  0xb0   :  { %vm544_vm7 = vcmp.gt.f32.partialorder %v543_v53, %v541_v45  ;;  %v3078_v8 = vmax.f32 %v541_v45, %v543_v53  ;;  %v565_v39 = vsel %vm563_vm8, 2, %v561_v21  ;;  %v574_v53 = vadd.f32 %v2992_v61, %v4879_v6 }
  0xb1   :  { %v546_v51 = vsel %vm544_vm7, 6, %v542_v55  ;;  %v593_v45 = vadd.f32 %v2632_v13, %v2929_v14  ;;  %vm567_vm10 = vcmp.gt.f32.partialorder %v566_v1, %v564_v54  ;;  %v568_v4 = vmax.f32 %v564_v54, %v566_v1  ;;  %v4880_v55 = vld [vmem:[#allocation43_spill] sm:$0xff] }
  0xb2   :  { %vm548_vm9 = vcmp.gt.f32.partialorder %v3082_v12, %v3078_v8  ;;  %v597_v62 = vadd.f32 %v4880_v55, %v2935_v33  ;;  %v569_v2 = vsel %vm567_vm10, 3, %v565_v39  ;;  %v578_v38 = vadd.f32 %v3019_v49, %v4881_v26  ;;  %v4882_v13 = vld [vmem:[#allocation59_spill] sm:$0xff] }
  0xb3   :  { %v550_v47 = vsel %vm548_vm9, 7, %v546_v51  ;;  %vm594_vm11 = vcmp.gt.f32.partialorder %v593_v45, %v592_v25  ;;  %vm571_vm12 = vcmp.gt.f32.partialorder %v570_v3, %v568_v4  ;;  %v572_v21 = vmax.f32 %v568_v4, %v570_v3  ;;  %v4883_v3 = vld [vmem:[#allocation83_spill] sm:$0xff] }
  0xb4   :  { %v554_v58 = vshll.u32 %v550_v47, 3  ;;  %v595_v46 = vmax.f32 %v592_v25, %v593_v45  ;;  %v596_v6 = vsel %vm594_vm11, 1, %v4835_v17  ;;  %v573_v50 = vsel %vm571_vm12, 4, %v569_v2 }
  0xb5   :  { %v3101_v51 = vadd.f32 %v3042_v10, %v2894_v34  ;;  %v601_v1 = vadd.f32 %v2970_v28, %v2694_v29  ;;  %vm575_vm13 = vcmp.gt.f32.partialorder %v574_v53, %v572_v21  ;;  %v576_v47 = vmax.f32 %v572_v21, %v574_v53 }
  0xb6   :  { %v555_v27 = vor.u32 %v554_v58, %v517_v59  ;;  %vm598_vm15 = vcmp.gt.f32.partialorder %v597_v62, %v595_v46  ;;  %v599_v54 = vmax.f32 %v595_v46, %v597_v62  ;;  %v577_v39 = vsel %vm575_vm13, 5, %v573_v50  ;;  %v4884_v46 = vld [vmem:[#allocation71_spill] sm:$0xff] }
  0xb7   :  { %v600_v55 = vsel %vm598_vm15, 2, %v596_v6  ;;  %v605_v4 = vadd.f32 %v2980_v37, %v4882_v13  ;;  %v609_v59 = vadd.f32 %v2992_v61, %v4883_v3  ;;  %vm579_vm0 = vcmp.gt.f32.partialorder %v578_v38, %v576_v47 }
  0xb8   :  { %v3109_v25 = vmax.f32 %v576_v47, %v578_v38  ;;  %vm602_vm1 = vcmp.gt.f32.partialorder %v601_v1, %v599_v54  ;;  %v603_v45 = vmax.f32 %v599_v54, %v601_v1  ;;  %v516_v58 = vmax.f32 %v3061_v11, %v3056_v35  ;;  %v4885_v38 = vld [vmem:[#allocation28_spill] sm:$0xff] }
  0xb9   :  { %v581_v2 = vsel %vm579_vm0, 6, %v577_v39  ;;  %v604_v53 = vsel %vm602_vm1, 3, %v600_v55  ;;  %v613_v62 = vadd.f32 %v3019_v49, %v4884_v46  ;;  %v627_v47 = vadd.f32 %v4885_v38, %v2900_v5  ;;  %v4886_v1 = vld [vmem:[#allocation36_spill] sm:$0xff] }
  0xba   :  { %vm583_vm2 = vcmp.gt.f32.partialorder %v3101_v51, %v3109_v25  ;;  %vm606_vm3 = vcmp.gt.f32.partialorder %v605_v4, %v603_v45  ;;  %v607_v50 = vmax.f32 %v603_v45, %v605_v4  ;;  %v628_v54 = vadd.f32 %v4886_v1, %v2929_v14 }
  0xbb   :  { %v585_v6 = vsel %vm583_vm2, 7, %v581_v2  ;;  %v608_v21 = vsel %vm606_vm3, 4, %v604_v53  ;;  %v549_v35 = vmax.f32 %v3078_v8, %v3082_v12  ;;  %v632_v45 = vadd.f32 %v2669_v22, %v2935_v33  ;;  %v519_v2 = vld [vmem:[#allocation7 + $0x80] sm:$0xff]  ;;  %v552_v53 = vld [vmem:[#allocation7 + $0x88] sm:$0xff] }
  0xbc   :  { %v589_v11 = vshll.u32 %v585_v6, 6  ;;  %vm610_vm4 = vcmp.gt.f32.partialorder %v609_v59, %v607_v50  ;;  %v611_v55 = vmax.f32 %v607_v50, %v609_v59  ;;  %vm629_vm5 = vcmp.gt.f32.partialorder %v628_v54, %v627_v47 }
  0xbd   :  { %v612_v39 = vsel %vm610_vm4, 5, %v608_v21  ;;  %v630_v4 = vmax.f32 %v627_v47, %v628_v54  ;;  %v3129_v1 = vadd.f32 %v3042_v10, %v2920_v36  ;;  %v631_v8 = vsel %vm629_vm5, 1, %v4835_v17 }
  0xbe   :  { %v590_v46 = vor.u32 %v589_v11, %v555_v27  ;;  %vm614_vm6 = vcmp.gt.f32.partialorder %v613_v62, %v611_v55  ;;  %v3125_v38 = vmax.f32 %v611_v55, %v613_v62  ;;  %v3136_v50 = vsel %vm150_vm14, %v3042_v10, %v2790_v40 }
  0xbf   :  { %v616_v12 = vsel %vm614_vm6, 6, %v612_v39  ;;  %vm633_vm7 = vcmp.gt.f32.partialorder %v632_v45, %v630_v4  ;;  %v634_v59 = vmax.f32 %v630_v4, %v632_v45  ;;  %v636_v62 = vadd.f32 %v2701_v30, %v2970_v28 }
  0xc0   :  { %vm618_vm8 = vcmp.gt.f32.partialorder %v3129_v1, %v3125_v38  ;;  %v635_v27 = vsel %vm633_vm7, 2, %v631_v8  ;;  %v3142_v6 = vadd.f32 %v519_v2, %v516_v58  ;;  %v3144_v21 = vadd.f32 %v552_v53, %v549_v35 }
  0xc1   :  { %v620_v47 = vsel %vm618_vm8, 7, %v616_v12  ;;  %v640_v54 = vadd.f32 %v2980_v37, %v2727_v42  ;;  %vm637_vm9 = vcmp.gt.f32.partialorder %v636_v62, %v634_v59  ;;  %v638_v55 = vmax.f32 %v634_v59, %v636_v62 }
  0xc2   :  { %4887 = vst [vmem:[#allocation101_spill] sm:$0xff] %v3144_v21  ;;  %v624_v11 = vshll.u32 %v620_v47, 9  ;;  %v644_v40 = vadd.f32 %v2992_v61, %v2871_v56  ;;  %v584_v39 = vmax.f32 %v3109_v25, %v3101_v51  ;;  %v639_v4 = vsel %vm637_vm9, 3, %v635_v27 }
  0xc3   :  { %v662_v58 = vadd.f32 %v2610_v7, %v2900_v5  ;;  %v663_v35 = vadd.f32 %v2640_v15, %v2929_v14  ;;  %vm641_vm10 = vcmp.gt.f32.partialorder %v640_v54, %v638_v55  ;;  %v642_v2 = vmax.f32 %v638_v55, %v640_v54 }
  0xc4   :  { %v625_v45 = vor.u32 %v624_v11, %v590_v46  ;;  %v648_v53 = vadd.f32 %v3019_v49, %v2769_v60  ;;  %v643_v12 = vsel %vm641_vm10, 4, %v639_v4  ;;  %v667_v59 = vadd.f32 %v2672_v23, %v2935_v33 }
  0xc5   :  { %vm664_vm11 = vcmp.gt.f32.partialorder %v663_v35, %v662_v58  ;;  %v665_v8 = vmax.f32 %v662_v58, %v663_v35  ;;  %vm645_vm12 = vcmp.gt.f32.partialorder %v644_v40, %v642_v2  ;;  %v646_v51 = vmax.f32 %v642_v2, %v644_v40  ;;  %v4888_v58 = vld [vmem:[#allocation85_spill] sm:$0xff] }
  0xc6   :  { %v666_v25 = vsel %vm664_vm11, 1, %v4835_v17  ;;  %v671_v27 = vadd.f32 %v2704_v31, %v2970_v28  ;;  %v647_v62 = vsel %vm645_vm12, 5, %v643_v12  ;;  %v675_v47 = vadd.f32 %v2730_v43, %v2980_v37  ;;  %v622_v31 = vld [vmem:[#allocation7 + $0x98] sm:$0xff] }
  0xc7   :  { %vm668_vm13 = vcmp.gt.f32.partialorder %v667_v59, %v665_v8  ;;  %v669_v46 = vmax.f32 %v665_v8, %v667_v59  ;;  %vm649_vm15 = vcmp.gt.f32.partialorder %v648_v53, %v646_v51  ;;  %v650_v54 = vmax.f32 %v646_v51, %v648_v53  ;;  %v4889_v8 = vld [vmem:[#allocation75_spill] sm:$0xff]  ;;  %v4890_v51 = vld [vmem:[#allocation30_spill] sm:$0xff] }
  0xc8   :  { %v652_v11 = vadd.f32 %v3042_v10, %v2944_v18  ;;  %v670_v55 = vsel %vm668_vm13, 2, %v666_v25  ;;  %v651_v4 = vsel %vm649_vm15, 6, %v647_v62  ;;  %v679_v35 = vadd.f32 %v2992_v61, %v4888_v58  ;;  %v587_v58 = vld [vmem:[#allocation7 + $0x90] sm:$0xff] }
  0xc9   :  { %vm672_vm0 = vcmp.gt.f32.partialorder %v671_v27, %v669_v46  ;;  %v673_v40 = vmax.f32 %v669_v46, %v671_v27  ;;  %v619_v2 = vmax.f32 %v3125_v38, %v3129_v1  ;;  %v683_v59 = vadd.f32 %v3019_v49, %v4889_v8  ;;  %v657_v38 = vld [vmem:[#allocation7 + $0xa0] sm:$0xff] }
  0xca   :  { %vm653_vm1 = vcmp.gt.f32.partialorder %v652_v11, %v650_v54  ;;  %v674_v12 = vsel %vm672_vm0, 3, %v670_v55  ;;  %v697_v25 = vadd.f32 %v4890_v51, %v2900_v5  ;;  %v654_v62 = vmax.f32 %v650_v54, %v652_v11 }
  0xcb   :  { %v655_v43 = vsel %vm653_vm1, 7, %v651_v4  ;;  %vm676_vm2 = vcmp.gt.f32.partialorder %v675_v47, %v673_v40  ;;  %v677_v53 = vmax.f32 %v673_v40, %v675_v47  ;;  %v698_v46 = vadd.f32 %v2643_v16, %v2929_v14 }
  0xcc   :  { %v659_v18 = vshll.u32 %v655_v43, 12  ;;  %v678_v27 = vsel %vm676_vm2, 4, %v674_v12  ;;  %v687_v55 = vadd.f32 %v3042_v10, %v2966_v19  ;;  %v702_v47 = vadd.f32 %v2675_v24, %v2935_v33 }
  0xcd   :  { %vm680_vm3 = vcmp.gt.f32.partialorder %v679_v35, %v677_v53  ;;  %v681_v1 = vmax.f32 %v677_v53, %v679_v35  ;;  %vm699_vm4 = vcmp.gt.f32.partialorder %v698_v46, %v697_v25  ;;  %v706_v43 = vadd.f32 %v2707_v32, %v2970_v28 }
  0xce   :  { %v660_v4 = vor.u32 %v659_v18, %v625_v45  ;;  %v682_v40 = vsel %vm680_vm3, 5, %v678_v27  ;;  %v700_v11 = vmax.f32 %v697_v25, %v698_v46  ;;  %v701_v12 = vsel %vm699_vm4, 1, %v4835_v17  ;;  %v692_v25 = vld [vmem:[#allocation7 + $0xa8] sm:$0xff] }
  0xcf   :  { %vm684_vm5 = vcmp.gt.f32.partialorder %v683_v59, %v681_v1  ;;  %v685_v54 = vmax.f32 %v681_v1, %v683_v59  ;;  %v3184_v16 = vadd.f32 %v587_v58, %v584_v39  ;;  %v3186_v35 = vadd.f32 %v622_v31, %v619_v2 }
  0xd0   :  { %v3188_v53 = vadd.f32 %v657_v38, %v654_v62  ;;  %v686_v19 = vsel %vm684_vm5, 6, %v682_v40  ;;  %vm703_vm7 = vcmp.gt.f32.partialorder %v702_v47, %v700_v11  ;;  %v704_v18 = vmax.f32 %v700_v11, %v702_v47  ;;  %v4894_v38 = vld [vmem:[#allocation39_spill] sm:$0xff] }
  0xd1   :  { %4891 = vst [vmem:[#allocation102_spill] sm:$0xff] %v3184_v16  ;;  %4892 = vst [vmem:[#allocation103_spill] sm:$0xff] %v3186_v35  ;;  %vm688_vm6 = vcmp.gt.f32.partialorder %v687_v55, %v685_v54  ;;  %v710_v45 = vadd.f32 %v2733_v44, %v2980_v37  ;;  %v705_v32 = vsel %vm703_vm7, 2, %v701_v12  ;;  %v714_v59 = vadd.f32 %v2884_v20, %v2992_v61  ;;  %v4896_v12 = vld [vmem:[#allocation97_spill] sm:$0xff] }
  0xd2   :  { %4893 = vst [vmem:[#allocation104_spill] sm:$0xff] %v3188_v53  ;;  %v690_v27 = vsel %vm688_vm6, 7, %v686_v19  ;;  %v732_v39 = vadd.f32 %v2616_v9, %v2900_v5  ;;  %v689_v58 = vmax.f32 %v685_v54, %v687_v55  ;;  %vm707_vm8 = vcmp.gt.f32.partialorder %v706_v43, %v704_v18  ;;  %v4895_v19 = vld [vmem:[#allocation47_spill] sm:$0xff]  ;;  %v4906_v5 = vld [vmem:[#allocation56_spill] sm:$0xff] }
  0xd3   :  { %v694_v31 = vshll.u32 %v690_v27, 15  ;;  %v708_v2 = vmax.f32 %v704_v18, %v706_v43  ;;  %v709_v62 = vsel %vm707_vm8, 3, %v705_v32  ;;  %v718_v46 = vadd.f32 %v3019_v49, %v2781_v0 }
  0xd4   :  { %v733_v1 = vadd.f32 %v4894_v38, %v2929_v14  ;;  %v737_v47 = vadd.f32 %v4895_v19, %v2935_v33  ;;  %v722_v55 = vadd.f32 %v3042_v10, %v4896_v12  ;;  %vm488_vm10 = vcmp.eq.s32.totalorder %v4854_v57, 2 }
  0xd5   :  { %v695_v40 = vor.u32 %v694_v31, %v660_v4  ;;  %vm711_vm9 = vcmp.gt.f32.partialorder %v710_v45, %v708_v2  ;;  %v712_v11 = vmax.f32 %v708_v2, %v710_v45  ;;  %v741_v54 = vadd.f32 %v4856_v52, %v2970_v28  ;;  %v4898_v31 = vld [vmem:[#allocation63_spill] sm:$0xff]  ;;  %v727_v28 = vld [vmem:[#allocation7 + $0xb0] sm:$0xff] }
  0xd6   :  { %v713_v43 = vsel %vm711_vm9, 4, %v709_v62  ;;  %vm734_vm11 = vcmp.gt.f32.partialorder %v733_v1, %v732_v39  ;;  %v735_v32 = vmax.f32 %v732_v39, %v733_v1  ;;  %v3207_v18 = vadd.f32 %v692_v25, %v689_v58  ;;  %v4899_v25 = vld [vmem:[#allocation79_spill] sm:$0xff] }
  0xd7   :  { %vm715_vm12 = vcmp.gt.f32.partialorder %v714_v59, %v712_v11  ;;  %v716_v27 = vmax.f32 %v712_v11, %v714_v59  ;;  %v736_v33 = vsel %vm734_vm11, 1, %v4835_v17  ;;  %v745_v2 = vadd.f32 %v4898_v31, %v2980_v37 }
  0xd8   :  { %4897 = vst [vmem:[#allocation97_spill] sm:$0xff] %v3207_v18  ;;  %v717_v4 = vsel %vm715_vm12, 5, %v713_v43  ;;  %vm738_vm13 = vcmp.gt.f32.partialorder %v737_v47, %v735_v32  ;;  %v739_v45 = vmax.f32 %v735_v32, %v737_v47  ;;  %v749_v39 = vadd.f32 %v2887_v41, %v2992_v61 }
  0xd9   :  { %vm719_vm15 = vcmp.gt.f32.partialorder %v718_v46, %v716_v27  ;;  %v720_v14 = vmax.f32 %v716_v27, %v718_v46  ;;  %v740_v62 = vsel %vm738_vm13, 2, %v736_v33  ;;  %v753_v59 = vadd.f32 %v3019_v49, %v4899_v25  ;;  %v4900_v33 = vld [vmem:[#allocation24_spill] sm:$0xff] }
  0xda   :  { %v721_v1 = vsel %vm719_vm15, 6, %v717_v4  ;;  %vm742_vm0 = vcmp.gt.f32.partialorder %v741_v54, %v739_v45  ;;  %v743_v58 = vmax.f32 %v739_v45, %v741_v54  ;;  %v757_v47 = vadd.f32 %v3042_v10, %v3015_v48  ;;  %v4901_v54 = vld [vmem:[#allocation32_spill] sm:$0xff]  ;;  %v4910_v48 = vld [vmem:[#allocation41_spill] sm:$0xff] }
  0xdb   :  { %vm723_vm1 = vcmp.gt.f32.partialorder %v722_v55, %v720_v14  ;;  %v724_v11 = vmax.f32 %v720_v14, %v722_v55  ;;  %v744_v43 = vsel %vm742_vm0, 3, %v740_v62  ;;  %v772_v27 = vadd.f32 %v3142_v6, %v4900_v33  ;;  %v4902_v14 = vld [vmem:[#allocation40_spill] sm:$0xff] }
  0xdc   :  { %v725_v32 = vsel %vm723_vm1, 7, %v721_v1  ;;  %vm746_vm2 = vcmp.gt.f32.partialorder %v745_v2, %v743_v58  ;;  %v747_v46 = vmax.f32 %v743_v58, %v745_v2  ;;  %v773_v45 = vadd.f32 %v3144_v21, %v4901_v54  ;;  %v4903_v62 = vld [vmem:[#allocation48_spill] sm:$0xff]  ;;  %v4904_v2 = vld [vmem:[#allocation99_spill] sm:$0xff] }
  0xdd   :  { %v3220_v61 = vadd.f32 %v727_v28, %v724_v11  ;;  %v729_v4 = vshll.u32 %v725_v32, 18  ;;  %v748_v37 = vsel %vm746_vm2, 4, %v744_v43  ;;  %v777_v55 = vadd.f32 %v3184_v16, %v4902_v14 }
  0xde   :  { %vm750_vm3 = vcmp.gt.f32.partialorder %v749_v39, %v747_v46  ;;  %v751_v49 = vmax.f32 %v747_v46, %v749_v39  ;;  %v781_v10 = vadd.f32 %v3186_v35, %v4903_v62  ;;  %vm774_vm4 = vcmp.gt.f32.partialorder %v773_v45, %v772_v27  ;;  %v762_v46 = vld [vmem:[#allocation7 + $0xb8] sm:$0xff] }
  0xdf   :  { %v730_v1 = vor.u32 %v729_v4, %v695_v40  ;;  %v3232_v28 = vsel %vm488_vm10, %v3220_v61, %v4904_v2  ;;  %v752_v58 = vsel %vm750_vm3, 5, %v748_v37  ;;  %v775_v43 = vmax.f32 %v772_v27, %v773_v45  ;;  %v4907_v62 = vld [vmem:[#allocation66_spill] sm:$0xff]  ;;  %v4908_v27 = vld [vmem:[#allocation25_spill] sm:$0xff] }
  0xe0   :  { %4905 = vst [vmem:[#allocation63_spill] sm:$0xff] %v3232_v28  ;;  %vm754_vm5 = vcmp.gt.f32.partialorder %v753_v59, %v751_v49  ;;  %v755_v11 = vmax.f32 %v751_v49, %v753_v59  ;;  %v776_v39 = vsel %vm774_vm4, 1, %v4835_v17  ;;  %v785_v14 = vadd.f32 %v3188_v53, %v4906_v5  ;;  %v4909_v49 = vld [vmem:[#allocation33_spill] sm:$0xff] }
  0xe1   :  { %v756_v32 = vsel %vm754_vm5, 6, %v752_v58  ;;  %v789_v40 = vadd.f32 %v3207_v18, %v4907_v62  ;;  %v793_v4 = vadd.f32 %v3220_v61, %v4869_v63  ;;  %vm778_vm7 = vcmp.gt.f32.partialorder %v777_v55, %v775_v43 }
  0xe2   :  { %vm758_vm6 = vcmp.gt.f32.partialorder %v757_v47, %v755_v11  ;;  %v759_v2 = vmax.f32 %v755_v11, %v757_v47  ;;  %v779_v37 = vmax.f32 %v775_v43, %v777_v55  ;;  %v780_v59 = vsel %vm778_vm7, 2, %v776_v39 }
  0xe3   :  { %v760_v28 = vsel %vm758_vm6, 7, %v756_v32  ;;  %v805_v45 = vadd.f32 %v3142_v6, %v4908_v27  ;;  %v806_v58 = vadd.f32 %v3144_v21, %v4909_v49  ;;  %v810_v47 = vadd.f32 %v3184_v16, %v4910_v48 }
  0xe4   :  { %v3245_v54 = vadd.f32 %v762_v46, %v759_v2  ;;  %v764_v5 = vshll.u32 %v760_v28, 21  ;;  %vm782_vm8 = vcmp.gt.f32.partialorder %v781_v10, %v779_v37  ;;  %v783_v62 = vmax.f32 %v779_v37, %v781_v10  ;;  %v4913_v37 = vld [vmem:[#allocation49_spill] sm:$0xff] }
  0xe5   :  { %v784_v33 = vsel %vm782_vm8, 3, %v780_v59  ;;  %vm807_vm9 = vcmp.gt.f32.partialorder %v806_v58, %v805_v45  ;;  %v808_v63 = vmax.f32 %v805_v45, %v806_v58  ;;  %v4915_v45 = vld [vmem:[#allocation81_spill] sm:$0xff] }
  0xe6   :  { %v3249_v55 = vor.u32 %v764_v5, %v730_v1  ;;  %v3255_v11 = vsel %vm488_vm10, %v3245_v54, %v3136_v50  ;;  %vm786_vm11 = vcmp.gt.f32.partialorder %v785_v14, %v783_v62  ;;  %v787_v43 = vmax.f32 %v783_v62, %v785_v14  ;;  %v4914_v1 = vld [vmem:[#allocation57_spill] sm:$0xff] }
  0xe7   :  { %4912 = vst [vmem:[#allocation99_spill] sm:$0xff] %v3255_v11  ;;  %v788_v39 = vsel %vm786_vm11, 4, %v784_v33  ;;  %v809_v28 = vsel %vm807_vm9, 1, %v4835_v17  ;;  %vm811_vm12 = vcmp.gt.f32.partialorder %v810_v47, %v808_v63  ;;  %v812_v32 = vmax.f32 %v808_v63, %v810_v47  ;;  %v4917_v47 = vld [vmem:[#allocation65_spill] sm:$0xff]  ;;  %v4922_v11 = vld [vmem:[#allocation82_spill] sm:$0xff] }
  0xe8   :  { %4911 = vst [vmem:[#allocation79_spill] sm:$0xff] %v3249_v55  ;;  %vm790_vm13 = vcmp.gt.f32.partialorder %v789_v40, %v787_v43  ;;  %v791_v10 = vmax.f32 %v787_v43, %v789_v40  ;;  %v813_v2 = vsel %vm811_vm12, 2, %v809_v28  ;;  %v814_v5 = vadd.f32 %v3186_v35, %v4913_v37  ;;  %v4916_v40 = vld [vmem:[#allocation67_spill] sm:$0xff]  ;;  %v4919_v55 = vld [vmem:[#allocation34_spill] sm:$0xff] }
  0xe9   :  { %v792_v46 = vsel %vm790_vm13, 5, %v788_v39  ;;  %v818_v59 = vadd.f32 %v3188_v53, %v4914_v1  ;;  %v3266_v33 = vadd.f32 %v3245_v54, %v4915_v45  ;;  %v822_v63 = vadd.f32 %v3207_v18, %v4916_v40  ;;  %v4918_v39 = vld [vmem:[#allocation26_spill] sm:$0xff] }
  0xea   :  { %vm794_vm15 = vcmp.gt.f32.partialorder %v793_v4, %v791_v10  ;;  %v3262_v50 = vmax.f32 %v791_v10, %v793_v4  ;;  %vm815_vm0 = vcmp.gt.f32.partialorder %v814_v5, %v812_v32  ;;  %v816_v62 = vmax.f32 %v812_v32, %v814_v5  ;;  %v4920_v5 = vld [vmem:[#allocation42_spill] sm:$0xff] }
  0xeb   :  { %v796_v14 = vsel %vm794_vm15, 6, %v792_v46  ;;  %v817_v58 = vsel %vm815_vm0, 3, %v813_v2  ;;  %v826_v43 = vadd.f32 %v3220_v61, %v4917_v47  ;;  %v840_v4 = vadd.f32 %v3142_v6, %v4918_v39  ;;  %v4921_v45 = vld [vmem:[#allocation50_spill] sm:$0xff] }
  0xec   :  { %vm798_vm1 = vcmp.gt.f32.partialorder %v3266_v33, %v3262_v50  ;;  %vm819_vm2 = vcmp.gt.f32.partialorder %v818_v59, %v816_v62  ;;  %v820_v10 = vmax.f32 %v816_v62, %v818_v59  ;;  %v841_v46 = vadd.f32 %v3144_v21, %v4919_v55  ;;  %v4923_v62 = vld [vmem:[#allocation58_spill] sm:$0xff] }
  0xed   :  { %v800_v28 = vsel %vm798_vm1, 7, %v796_v14  ;;  %v821_v32 = vsel %vm819_vm2, 4, %v817_v58  ;;  %v845_v40 = vadd.f32 %v3184_v16, %v4920_v5  ;;  %v849_v1 = vadd.f32 %v3186_v35, %v4921_v45 }
  0xee   :  { %vm823_vm3 = vcmp.gt.f32.partialorder %v822_v63, %v820_v10  ;;  %v824_v2 = vmax.f32 %v820_v10, %v822_v63  ;;  %vm842_vm4 = vcmp.gt.f32.partialorder %v841_v46, %v840_v4  ;;  %v843_v47 = vmax.f32 %v840_v4, %v841_v46  ;;  %v4924_v4 = vld [vmem:[#allocation80_spill] sm:$0xff] }
  0xef   :  { %v825_v37 = vsel %vm823_vm3, 5, %v821_v32  ;;  %v3284_v14 = vadd.f32 %v3245_v54, %v4922_v11  ;;  %v844_v59 = vsel %vm842_vm4, 1, %v4835_v17  ;;  %v853_v58 = vadd.f32 %v3188_v53, %v4923_v62  ;;  %v4925_v11 = vld [vmem:[#allocation27_spill] sm:$0xff] }
  0xf0   :  { %vm827_vm5 = vcmp.gt.f32.partialorder %v826_v43, %v824_v2  ;;  %v3289_v55 = vmax.f32 %v824_v2, %v826_v43  ;;  %vm846_vm6 = vcmp.gt.f32.partialorder %v845_v40, %v843_v47  ;;  %v847_v5 = vmax.f32 %v843_v47, %v845_v40  ;;  %v4926_v47 = vld [vmem:[#allocation35_spill] sm:$0xff] }
  0xf1   :  { %v829_v45 = vsel %vm827_vm5, 6, %v825_v37  ;;  %v848_v39 = vsel %vm846_vm6, 2, %v844_v59  ;;  %v857_v10 = vadd.f32 %v3207_v18, %v4924_v4  ;;  %v875_v62 = vadd.f32 %v3142_v6, %v4925_v11  ;;  %v4927_v59 = vld [vmem:[#allocation43_spill] sm:$0xff] }
  0xf2   :  { %vm831_vm7 = vcmp.gt.f32.partialorder %v3284_v14, %v3289_v55  ;;  %vm850_vm8 = vcmp.gt.f32.partialorder %v849_v1, %v847_v5  ;;  %v851_v63 = vmax.f32 %v847_v5, %v849_v1  ;;  %v861_v37 = vadd.f32 %v3220_v61, %v4881_v26 }
  0xf3   :  { %v833_v46 = vsel %vm831_vm7, 7, %v829_v45  ;;  %v852_v32 = vsel %vm850_vm8, 3, %v848_v39  ;;  %v876_v2 = vadd.f32 %v3144_v21, %v4926_v47  ;;  %v880_v1 = vadd.f32 %v3184_v16, %v4927_v59 }
  0xf4   :  { %v837_v48 = vshll.u32 %v833_v46, 3  ;;  %vm854_vm9 = vcmp.gt.f32.partialorder %v853_v58, %v851_v63  ;;  %v855_v43 = vmax.f32 %v851_v63, %v853_v58  ;;  %v884_v46 = vadd.f32 %v3186_v35, %v2694_v29 }
  0xf5   :  { %v856_v40 = vsel %vm854_vm9, 4, %v852_v32  ;;  %vm877_vm12 = vcmp.gt.f32.partialorder %v876_v2, %v875_v62  ;;  %v878_v4 = vmax.f32 %v875_v62, %v876_v2  ;;  %v3309_v63 = vadd.f32 %v3245_v54, %v2894_v34  ;;  %v4928_v2 = vld [vmem:[#allocation28_spill] sm:$0xff]  ;;  %v4930_v34 = vld [vmem:[#allocation71_spill] sm:$0xff] }
  0xf6   :  { %v838_v5 = vor.u32 %v837_v48, %v800_v28  ;;  %vm858_vm11 = vcmp.gt.f32.partialorder %v857_v10, %v855_v43  ;;  %v859_v45 = vmax.f32 %v855_v43, %v857_v10  ;;  %v879_v32 = vsel %vm877_vm12, 1, %v4835_v17 }
  0xf7   :  { %v860_v39 = vsel %vm858_vm11, 5, %v856_v40  ;;  %vm881_vm15 = vcmp.gt.f32.partialorder %v880_v1, %v878_v4  ;;  %v882_v48 = vmax.f32 %v878_v4, %v880_v1  ;;  %v888_v28 = vadd.f32 %v3188_v53, %v4882_v13  ;;  %v4929_v13 = vld [vmem:[#allocation36_spill] sm:$0xff] }
  0xf8   :  { %vm862_vm13 = vcmp.gt.f32.partialorder %v861_v37, %v859_v45  ;;  %v3305_v58 = vmax.f32 %v859_v45, %v861_v37  ;;  %v799_v62 = vmax.f32 %v3262_v50, %v3266_v33  ;;  %v883_v10 = vsel %vm881_vm15, 2, %v879_v32  ;;  %v802_v33 = vld [vmem:[#allocation7 + $0xc0] sm:$0xff] }
  0xf9   :  { %v864_v26 = vsel %vm862_vm13, 6, %v860_v39  ;;  %v892_v43 = vadd.f32 %v3207_v18, %v4883_v3  ;;  %vm885_vm1 = vcmp.gt.f32.partialorder %v884_v46, %v882_v48  ;;  %v886_v40 = vmax.f32 %v882_v48, %v884_v46 }
  0xfa   :  { %vm866_vm0 = vcmp.gt.f32.partialorder %v3309_v63, %v3305_v58  ;;  %v910_v45 = vadd.f32 %v3142_v6, %v4928_v2  ;;  %v832_v4 = vmax.f32 %v3289_v55, %v3284_v14  ;;  %v887_v39 = vsel %vm885_vm1, 3, %v883_v10  ;;  %v835_v14 = vld [vmem:[#allocation7 + $0xc8] sm:$0xff] }
  0xfb   :  { %v868_v37 = vsel %vm866_vm0, 7, %v864_v26  ;;  %v911_v50 = vadd.f32 %v3144_v21, %v4929_v13  ;;  %vm889_vm2 = vcmp.gt.f32.partialorder %v888_v28, %v886_v40  ;;  %v890_v32 = vmax.f32 %v886_v40, %v888_v28 }
  0xfc   :  { %v872_v1 = vshll.u32 %v868_v37, 6  ;;  %v896_v3 = vadd.f32 %v3220_v61, %v4930_v34  ;;  %v915_v26 = vadd.f32 %v3184_v16, %v2669_v22  ;;  %v891_v48 = vsel %vm889_vm2, 4, %v887_v39 }
  0xfd   :  { %vm912_vm3 = vcmp.gt.f32.partialorder %v911_v50, %v910_v45  ;;  %v919_v55 = vadd.f32 %v3186_v35, %v2701_v30  ;;  %vm893_vm4 = vcmp.gt.f32.partialorder %v892_v43, %v890_v32  ;;  %v894_v10 = vmax.f32 %v890_v32, %v892_v43 }
  0xfe   :  { %v873_v46 = vor.u32 %v872_v1, %v838_v5  ;;  %v913_v37 = vmax.f32 %v910_v45, %v911_v50  ;;  %v914_v13 = vsel %vm912_vm3, 1, %v4835_v17  ;;  %v3333_v2 = vadd.f32 %v802_v33, %v799_v62 }
  0xff   :  { %v895_v28 = vsel %vm893_vm4, 5, %v891_v48  ;;  %v3337_v40 = vadd.f32 %v3245_v54, %v2920_v36  ;;  %v923_v5 = vadd.f32 %v3188_v53, %v2727_v42  ;;  %vm897_vm5 = vcmp.gt.f32.partialorder %v896_v3, %v894_v10 }
 0x100   :  { %v3341_v1 = vmax.f32 %v894_v10, %v896_v3  ;;  %vm916_vm6 = vcmp.gt.f32.partialorder %v915_v26, %v913_v37  ;;  %v917_v39 = vmax.f32 %v913_v37, %v915_v26  ;;  %v3343_v30 = vadd.f32 %v835_v14, %v832_v4  ;;  %v4931_v37 = vld [vmem:[#allocation53_spill] sm:$0xff] }
 0x101   :  { %v899_v43 = vsel %vm897_vm5, 6, %v895_v28  ;;  %v918_v45 = vsel %vm916_vm6, 2, %v914_v13  ;;  %v945_v62 = vadd.f32 %v3142_v6, %v2610_v7  ;;  %v927_v33 = vadd.f32 %v3207_v18, %v2871_v56 }
 0x102   :  { %vm901_vm7 = vcmp.gt.f32.partialorder %v3337_v40, %v3341_v1  ;;  %vm920_vm8 = vcmp.gt.f32.partialorder %v919_v55, %v917_v39  ;;  %v921_v50 = vmax.f32 %v917_v39, %v919_v55  ;;  %v946_v26 = vadd.f32 %v3144_v21, %v2640_v15 }
 0x103   :  { %v903_v32 = vsel %vm901_vm7, 7, %v899_v43  ;;  %v922_v3 = vsel %vm920_vm8, 3, %v918_v45  ;;  %v950_v4 = vadd.f32 %v3184_v16, %v2672_v23  ;;  %v931_v14 = vadd.f32 %v3220_v61, %v2769_v60  ;;  %v4932_v45 = vld [vmem:[#allocation93_spill] sm:$0xff] }
 0x104   :  { %v907_v13 = vshll.u32 %v903_v32, 9  ;;  %vm924_vm9 = vcmp.gt.f32.partialorder %v923_v5, %v921_v50  ;;  %v925_v48 = vmax.f32 %v921_v50, %v923_v5  ;;  %vm947_vm11 = vcmp.gt.f32.partialorder %v946_v26, %v945_v62 }
 0x105   :  { %v926_v10 = vsel %vm924_vm9, 4, %v922_v3  ;;  %v948_v55 = vmax.f32 %v945_v62, %v946_v26  ;;  %v954_v28 = vadd.f32 %v3186_v35, %v4931_v37  ;;  %v935_v15 = vadd.f32 %v3245_v54, %v4932_v45  ;;  %v4933_v3 = vld [vmem:[#allocation61_spill] sm:$0xff] }
 0x106   :  { %v908_v39 = vor.u32 %v907_v13, %v873_v46  ;;  %vm928_vm12 = vcmp.gt.f32.partialorder %v927_v33, %v925_v48  ;;  %v929_v43 = vmax.f32 %v925_v48, %v927_v33  ;;  %v949_v32 = vsel %vm947_vm11, 1, %v4835_v17  ;;  %v4934_v46 = vld [vmem:[#allocation85_spill] sm:$0xff] }
 0x107   :  { %v930_v7 = vsel %vm928_vm12, 5, %v926_v10  ;;  %vm951_vm13 = vcmp.gt.f32.partialorder %v950_v4, %v948_v55  ;;  %v952_v5 = vmax.f32 %v948_v55, %v950_v4  ;;  %v958_v62 = vadd.f32 %v3188_v53, %v4933_v3 }
 0x108   :  { %vm932_vm15 = vcmp.gt.f32.partialorder %v931_v14, %v929_v43  ;;  %v933_v50 = vmax.f32 %v929_v43, %v931_v14  ;;  %v953_v23 = vsel %vm951_vm13, 2, %v949_v32  ;;  %v962_v33 = vadd.f32 %v3207_v18, %v4934_v46  ;;  %v905_v46 = vld [vmem:[#allocation7 + $0xd8] sm:$0xff] }
 0x109   :  { %v934_v26 = vsel %vm932_vm15, 6, %v930_v7  ;;  %vm955_vm0 = vcmp.gt.f32.partialorder %v954_v28, %v952_v5  ;;  %v956_v37 = vmax.f32 %v952_v5, %v954_v28  ;;  %v867_v13 = vmax.f32 %v3305_v58, %v3309_v63  ;;  %v870_v5 = vld [vmem:[#allocation7 + $0xd0] sm:$0xff]  ;;  %v4935_v63 = vld [vmem:[#allocation38_spill] sm:$0xff] }
 0x10a   :  { %v902_v48 = vmax.f32 %v3341_v1, %v3337_v40  ;;  %vm936_vm1 = vcmp.gt.f32.partialorder %v935_v15, %v933_v50  ;;  %v957_v4 = vsel %vm955_vm0, 3, %v953_v23  ;;  %v966_v55 = vadd.f32 %v3220_v61, %v4889_v8 }
 0x10b   :  { %v938_v10 = vsel %vm936_vm1, 7, %v934_v26  ;;  %vm959_vm2 = vcmp.gt.f32.partialorder %v958_v62, %v956_v37  ;;  %v960_v14 = vmax.f32 %v956_v37, %v958_v62  ;;  %v937_v7 = vmax.f32 %v933_v50, %v935_v15  ;;  %v4936_v62 = vld [vmem:[#allocation94_spill] sm:$0xff] }
 0x10c   :  { %v942_v43 = vshll.u32 %v938_v10, 12  ;;  %v961_v28 = vsel %vm959_vm2, 4, %v957_v4  ;;  %v980_v32 = vadd.f32 %v3142_v6, %v4890_v51  ;;  %v981_v40 = vadd.f32 %v3144_v21, %v4935_v63  ;;  %v4937_v50 = vld [vmem:[#allocation54_spill] sm:$0xff]  ;;  %v940_v4 = vld [vmem:[#allocation7 + $0xe0] sm:$0xff] }
 0x10d   :  { %vm963_vm3 = vcmp.gt.f32.partialorder %v962_v33, %v960_v14  ;;  %v964_v58 = vmax.f32 %v960_v14, %v962_v33  ;;  %v985_v23 = vadd.f32 %v3184_v16, %v2675_v24  ;;  %v970_v15 = vadd.f32 %v3245_v54, %v4936_v62 }
 0x10e   :  { %v943_v1 = vor.u32 %v942_v43, %v908_v39  ;;  %v965_v37 = vsel %vm963_vm3, 5, %v961_v28  ;;  %v989_v26 = vadd.f32 %v3186_v35, %v4937_v50  ;;  %vm982_vm5 = vcmp.gt.f32.partialorder %v981_v40, %v980_v32 }
 0x10f   :  { %vm967_vm4 = vcmp.gt.f32.partialorder %v966_v55, %v964_v58  ;;  %v968_v10 = vmax.f32 %v964_v58, %v966_v55  ;;  %v983_v8 = vmax.f32 %v980_v32, %v981_v40  ;;  %v3382_v33 = vadd.f32 %v870_v5, %v867_v13  ;;  %v975_v40 = vld [vmem:[#allocation7 + $0xe8] sm:$0xff] }
 0x110   :  { %v3384_v14 = vadd.f32 %v905_v46, %v902_v48  ;;  %v969_v63 = vsel %vm967_vm4, 6, %v965_v37  ;;  %v984_v24 = vsel %vm982_vm5, 1, %v4835_v17  ;;  %v993_v43 = vadd.f32 %v3188_v53, %v2733_v44 }
 0x111   :  { %vm971_vm6 = vcmp.gt.f32.partialorder %v970_v15, %v968_v10  ;;  %vm986_vm7 = vcmp.gt.f32.partialorder %v985_v23, %v983_v8  ;;  %v987_v39 = vmax.f32 %v983_v8, %v985_v23  ;;  %v3389_v28 = vadd.f32 %v940_v4, %v937_v7 }
 0x112   :  { %v973_v62 = vsel %vm971_vm6, 7, %v969_v63  ;;  %v988_v50 = vsel %vm986_vm7, 2, %v984_v24  ;;  %v997_v55 = vadd.f32 %v3207_v18, %v2884_v20  ;;  %v972_v13 = vmax.f32 %v968_v10, %v970_v15 }
 0x113   :  { %v977_v32 = vshll.u32 %v973_v62, 15  ;;  %vm990_vm8 = vcmp.gt.f32.partialorder %v989_v26, %v987_v39  ;;  %v991_v46 = vmax.f32 %v987_v39, %v989_v26  ;;  %v1015_v5 = vadd.f32 %v3142_v6, %v2616_v9 }
 0x114   :  { %v992_v48 = vsel %vm990_vm8, 3, %v988_v50  ;;  %v1016_v8 = vadd.f32 %v3144_v21, %v4894_v38  ;;  %v1020_v7 = vadd.f32 %v3184_v16, %v4895_v19  ;;  %v1001_v63 = vadd.f32 %v3220_v61, %v2781_v0  ;;  %v4947_v21 = vld [vmem:[#allocation64_spill] sm:$0xff] }
 0x115   :  { %v978_v58 = vor.u32 %v977_v32, %v943_v1  ;;  %vm994_vm9 = vcmp.gt.f32.partialorder %v993_v43, %v991_v46  ;;  %v995_v24 = vmax.f32 %v991_v46, %v993_v43  ;;  %vm771_vm11 = vcmp.eq.s32.totalorder %v4854_v57, 3 }
 0x116   :  { %v996_v23 = vsel %vm994_vm9, 4, %v992_v48  ;;  %vm1017_vm12 = vcmp.gt.f32.partialorder %v1016_v8, %v1015_v5  ;;  %v1018_v37 = vmax.f32 %v1015_v5, %v1016_v8  ;;  %v1024_v62 = vadd.f32 %v3186_v35, %v4856_v52  ;;  %v1010_v48 = vld [vmem:[#allocation7 + $0xf0] sm:$0xff]  ;;  %v4946_v35 = vld [vmem:[#allocation66_spill] sm:$0xff] }
 0x117   :  { %vm998_vm13 = vcmp.gt.f32.partialorder %v997_v55, %v995_v24  ;;  %v999_v15 = vmax.f32 %v995_v24, %v997_v55  ;;  %v1005_v50 = vadd.f32 %v3245_v54, %v4896_v12  ;;  %v1019_v1 = vsel %vm1017_vm12, 1, %v4835_v17 }
 0x118   :  { %v1000_v26 = vsel %vm998_vm13, 5, %v996_v23  ;;  %vm1021_vm15 = vcmp.gt.f32.partialorder %v1020_v7, %v1018_v37  ;;  %v1022_v4 = vmax.f32 %v1018_v37, %v1020_v7  ;;  %v1028_v10 = vadd.f32 %v3188_v53, %v4898_v31  ;;  %v4945_v53 = vld [vmem:[#allocation56_spill] sm:$0xff] }
 0x119   :  { %v3409_v39 = vadd.f32 %v975_v40, %v972_v13  ;;  %vm1002_vm0 = vcmp.gt.f32.partialorder %v1001_v63, %v999_v15  ;;  %v1003_v43 = vmax.f32 %v999_v15, %v1001_v63  ;;  %v1023_v32 = vsel %vm1021_vm15, 2, %v1019_v1  ;;  %v4938_v40 = vld [vmem:[#allocation22_spill] sm:$0xff] }
 0x11a   :  { %v1004_v46 = vsel %vm1002_vm0, 6, %v1000_v26  ;;  %vm1025_vm1 = vcmp.gt.f32.partialorder %v1024_v62, %v1022_v4  ;;  %v1026_v55 = vmax.f32 %v1022_v4, %v1024_v62  ;;  %v1032_v5 = vadd.f32 %v3207_v18, %v2887_v41  ;;  %v4939_v62 = vld [vmem:[#allocation24_spill] sm:$0xff] }
 0x11b   :  { %vm1006_vm2 = vcmp.gt.f32.partialorder %v1005_v50, %v1003_v43  ;;  %v1007_v8 = vmax.f32 %v1003_v43, %v1005_v50  ;;  %v1027_v24 = vsel %vm1025_vm1, 3, %v1023_v32  ;;  %v1036_v7 = vadd.f32 %v3220_v61, %v4899_v25  ;;  %v4940_v50 = vld [vmem:[#allocation32_spill] sm:$0xff] }
 0x11c   :  { %v1008_v23 = vsel %vm1006_vm2, 7, %v1004_v46  ;;  %vm1029_vm3 = vcmp.gt.f32.partialorder %v1028_v10, %v1026_v55  ;;  %v1030_v13 = vmax.f32 %v1026_v55, %v1028_v10  ;;  %v1040_v63 = vadd.f32 %v3245_v54, %v4938_v40  ;;  %v4941_v32 = vld [vmem:[#allocation40_spill] sm:$0xff]  ;;  %v4942_v10 = vld [vmem:[#allocation63_spill] sm:$0xff] }
 0x11d   :  { %v3417_v37 = vadd.f32 %v1010_v48, %v1007_v8  ;;  %v1012_v15 = vshll.u32 %v1008_v23, 18  ;;  %v1031_v1 = vsel %vm1029_vm3, 4, %v1027_v24  ;;  %v1055_v26 = vadd.f32 %v3333_v2, %v4939_v62  ;;  %v4944_v55 = vld [vmem:[#allocation48_spill] sm:$0xff] }
 0x11e   :  { %vm1033_vm4 = vcmp.gt.f32.partialorder %v1032_v5, %v1030_v13  ;;  %v1034_v4 = vmax.f32 %v1030_v13, %v1032_v5  ;;  %v1056_v43 = vadd.f32 %v3343_v30, %v4940_v50  ;;  %v1060_v61 = vadd.f32 %v3382_v33, %v4941_v32  ;;  %v1045_v13 = vld [vmem:[#allocation7 + $0xf8] sm:$0xff] }
 0x11f   :  { %v1013_v46 = vor.u32 %v1012_v15, %v978_v58  ;;  %v3429_v54 = vsel %vm771_vm11, %v3417_v37, %v4942_v10  ;;  %v1035_v48 = vsel %vm1033_vm4, 5, %v1031_v1  ;;  %v1064_v8 = vadd.f32 %v3384_v14, %v4944_v55 }
 0x120   :  { %4943 = vst [vmem:[#allocation22_spill] sm:$0xff] %v3429_v54  ;;  %vm1037_vm5 = vcmp.gt.f32.partialorder %v1036_v7, %v1034_v4  ;;  %v1038_v24 = vmax.f32 %v1034_v4, %v1036_v7  ;;  %vm1057_vm6 = vcmp.gt.f32.partialorder %v1056_v43, %v1055_v26  ;;  %v1058_v5 = vmax.f32 %v1055_v26, %v1056_v43 }
 0x121   :  { %v1039_v23 = vsel %vm1037_vm5, 6, %v1035_v48  ;;  %v1059_v18 = vsel %vm1057_vm6, 1, %v4835_v17  ;;  %v1068_v58 = vadd.f32 %v3389_v28, %v4945_v53  ;;  %v1072_v16 = vadd.f32 %v3409_v39, %v4946_v35 }
 0x122   :  { %vm1041_vm7 = vcmp.gt.f32.partialorder %v1040_v63, %v1038_v24  ;;  %v1042_v15 = vmax.f32 %v1038_v24, %v1040_v63  ;;  %vm1061_vm8 = vcmp.gt.f32.partialorder %v1060_v61, %v1058_v5  ;;  %v1062_v10 = vmax.f32 %v1058_v5, %v1060_v61  ;;  %v4948_v61 = vld [vmem:[#allocation41_spill] sm:$0xff]  ;;  %v4950_v5 = vld [vmem:[#allocation99_spill] sm:$0xff] }
 0x123   :  { %v1043_v54 = vsel %vm1041_vm7, 7, %v1039_v23  ;;  %v1063_v1 = vsel %vm1061_vm8, 2, %v1059_v18  ;;  %v1088_v7 = vadd.f32 %v3333_v2, %v4908_v27  ;;  %v1076_v53 = vadd.f32 %v3417_v37, %v4947_v21 }
 0x124   :  { %v3440_v26 = vadd.f32 %v1045_v13, %v1042_v15  ;;  %v1047_v4 = vshll.u32 %v1043_v54, 21  ;;  %vm1065_vm9 = vcmp.gt.f32.partialorder %v1064_v8, %v1062_v10  ;;  %v1066_v43 = vmax.f32 %v1062_v10, %v1064_v8  ;;  %v4952_v15 = vld [vmem:[#allocation49_spill] sm:$0xff] }
 0x125   :  { %v1067_v48 = vsel %vm1065_vm9, 3, %v1063_v1  ;;  %v1089_v63 = vadd.f32 %v3343_v30, %v4909_v49  ;;  %v1093_v18 = vadd.f32 %v3382_v33, %v4948_v61  ;;  %v1097_v10 = vadd.f32 %v3384_v14, %v4952_v15  ;;  %v4960_v61 = vld [vmem:[#allocation50_spill] sm:$0xff] }
 0x126   :  { %v3448_v24 = vor.u32 %v1047_v4, %v1013_v46  ;;  %v3454_v23 = vsel %vm771_vm11, %v3440_v26, %v4950_v5  ;;  %vm1069_vm12 = vcmp.gt.f32.partialorder %v1068_v58, %v1066_v43  ;;  %v1070_v54 = vmax.f32 %v1066_v43, %v1068_v58  ;;  %v4954_v58 = vld [vmem:[#allocation81_spill] sm:$0xff] }
 0x127   :  { %4951 = vst [vmem:[#allocation32_spill] sm:$0xff] %v3454_v23  ;;  %v1071_v8 = vsel %vm1069_vm12, 4, %v1067_v48  ;;  %vm1090_vm13 = vcmp.gt.f32.partialorder %v1089_v63, %v1088_v7  ;;  %v1091_v13 = vmax.f32 %v1088_v7, %v1089_v63  ;;  %v3465_v43 = vadd.f32 %v3440_v26, %v4954_v58  ;;  %v4957_v23 = vld [vmem:[#allocation26_spill] sm:$0xff] }
 0x128   :  { %4949 = vst [vmem:[#allocation24_spill] sm:$0xff] %v3448_v24  ;;  %vm1073_vm15 = vcmp.gt.f32.partialorder %v1072_v16, %v1070_v54  ;;  %v1074_v1 = vmax.f32 %v1070_v54, %v1072_v16  ;;  %v1092_v21 = vsel %vm1090_vm13, 1, %v4835_v17  ;;  %v4953_v24 = vld [vmem:[#allocation57_spill] sm:$0xff]  ;;  %v4955_v16 = vld [vmem:[#allocation67_spill] sm:$0xff]  ;;  %v1123_v58 = vadd.f32 %v3333_v2, %v4957_v23  ;;  %v4962_v23 = vld [vmem:[#allocation58_spill] sm:$0xff] }
 0x129   :  { %v1075_v46 = vsel %vm1073_vm15, 5, %v1071_v8  ;;  %vm1094_vm0 = vcmp.gt.f32.partialorder %v1093_v18, %v1091_v13  ;;  %v1095_v4 = vmax.f32 %v1091_v13, %v1093_v18  ;;  %v1101_v35 = vadd.f32 %v3389_v28, %v4953_v24  ;;  %v4956_v8 = vld [vmem:[#allocation65_spill] sm:$0xff] }
 0x12a   :  { %vm1077_vm1 = vcmp.gt.f32.partialorder %v1076_v53, %v1074_v1  ;;  %v3461_v5 = vmax.f32 %v1074_v1, %v1076_v53  ;;  %v1096_v7 = vsel %vm1094_vm0, 2, %v1092_v21  ;;  %v1105_v54 = vadd.f32 %v3409_v39, %v4955_v16 }
 0x12b   :  { %v1079_v48 = vsel %vm1077_vm1, 6, %v1075_v46  ;;  %vm1098_vm2 = vcmp.gt.f32.partialorder %v1097_v10, %v1095_v4  ;;  %v1099_v63 = vmax.f32 %v1095_v4, %v1097_v10  ;;  %v1109_v13 = vadd.f32 %v3417_v37, %v4956_v8  ;;  %v4958_v46 = vld [vmem:[#allocation34_spill] sm:$0xff] }
 0x12c   :  { %vm1081_vm3 = vcmp.gt.f32.partialorder %v3465_v43, %v3461_v5  ;;  %v1100_v18 = vsel %vm1098_vm2, 3, %v1096_v7  ;;  %v1124_v10 = vadd.f32 %v3343_v30, %v4958_v46  ;;  %v4959_v4 = vld [vmem:[#allocation42_spill] sm:$0xff] }
 0x12d   :  { %v1083_v53 = vsel %vm1081_vm3, 7, %v1079_v48  ;;  %vm1102_vm4 = vcmp.gt.f32.partialorder %v1101_v35, %v1099_v63  ;;  %v1103_v1 = vmax.f32 %v1099_v63, %v1101_v35  ;;  %v1128_v16 = vadd.f32 %v3382_v33, %v4959_v4  ;;  %v4961_v63 = vld [vmem:[#allocation82_spill] sm:$0xff] }
 0x12e   :  { %v1104_v21 = vsel %vm1102_vm4, 4, %v1100_v18  ;;  %vm1125_vm6 = vcmp.gt.f32.partialorder %v1124_v10, %v1123_v58  ;;  %v1126_v7 = vmax.f32 %v1123_v58, %v1124_v10  ;;  %v1132_v48 = vadd.f32 %v3384_v14, %v4960_v61 }
 0x12f   :  { %vm1106_vm5 = vcmp.gt.f32.partialorder %v1105_v54, %v1103_v1  ;;  %v1107_v24 = vmax.f32 %v1103_v1, %v1105_v54  ;;  %v3485_v18 = vadd.f32 %v3440_v26, %v4961_v63  ;;  %v1127_v8 = vsel %vm1125_vm6, 1, %v4835_v17  ;;  %v4963_v1 = vld [vmem:[#allocation80_spill] sm:$0xff] }
 0x130   :  { %v1108_v15 = vsel %vm1106_vm5, 5, %v1104_v21  ;;  %vm1129_vm8 = vcmp.gt.f32.partialorder %v1128_v16, %v1126_v7  ;;  %v1130_v4 = vmax.f32 %v1126_v7, %v1128_v16  ;;  %v1136_v54 = vadd.f32 %v3389_v28, %v4962_v23  ;;  %v4964_v23 = vld [vmem:[#allocation70_spill] sm:$0xff] }
 0x131   :  { %vm1110_vm7 = vcmp.gt.f32.partialorder %v1109_v13, %v1107_v24  ;;  %v3481_v35 = vmax.f32 %v1107_v24, %v1109_v13  ;;  %v1131_v58 = vsel %vm1129_vm8, 2, %v1127_v8  ;;  %v1140_v24 = vadd.f32 %v3409_v39, %v4963_v1 }
 0x132   :  { %v1112_v46 = vsel %vm1110_vm7, 6, %v1108_v15  ;;  %vm1133_vm12 = vcmp.gt.f32.partialorder %v1132_v48, %v1130_v4  ;;  %v1134_v21 = vmax.f32 %v1130_v4, %v1132_v48  ;;  %v1158_v10 = vadd.f32 %v3333_v2, %v4925_v11  ;;  %v4965_v11 = vld [vmem:[#allocation88_spill] sm:$0xff] }
 0x133   :  { %vm1114_vm9 = vcmp.gt.f32.partialorder %v3485_v18, %v3481_v35  ;;  %v1135_v15 = vsel %vm1133_vm12, 3, %v1131_v58  ;;  %v1159_v16 = vadd.f32 %v3343_v30, %v4926_v47  ;;  %v1144_v63 = vadd.f32 %v3417_v37, %v4964_v23 }
 0x134   :  { %v1116_v13 = vsel %vm1114_vm9, 7, %v1112_v46  ;;  %vm1137_vm13 = vcmp.gt.f32.partialorder %v1136_v54, %v1134_v21  ;;  %v1138_v7 = vmax.f32 %v1134_v21, %v1136_v54  ;;  %v1163_v8 = vadd.f32 %v3382_v33, %v4927_v59  ;;  %v4966_v21 = vld [vmem:[#allocation59_spill] sm:$0xff]  ;;  %v4967_v59 = vld [vmem:[#allocation28_spill] sm:$0xff] }
 0x135   :  { %v1120_v61 = vshll.u32 %v1116_v13, 3  ;;  %v1139_v46 = vsel %vm1137_vm13, 4, %v1135_v15  ;;  %vm1160_vm15 = vcmp.gt.f32.partialorder %v1159_v16, %v1158_v10  ;;  %v1167_v4 = vadd.f32 %v3384_v14, %v2694_v29 }
 0x136   :  { %vm1141_vm0 = vcmp.gt.f32.partialorder %v1140_v24, %v1138_v7  ;;  %v1142_v48 = vmax.f32 %v1138_v7, %v1140_v24  ;;  %v1161_v58 = vmax.f32 %v1158_v10, %v1159_v16  ;;  %v1162_v13 = vsel %vm1160_vm15, 1, %v4835_v17  ;;  %v4968_v16 = vld [vmem:[#allocation83_spill] sm:$0xff] }
 0x137   :  { %v1121_v1 = vor.u32 %v1120_v61, %v1083_v53  ;;  %v1143_v47 = vsel %vm1141_vm0, 5, %v1139_v46  ;;  %v3507_v54 = vadd.f32 %v3440_v26, %v4965_v11  ;;  %v1171_v23 = vadd.f32 %v3389_v28, %v4966_v21  ;;  %v4969_v21 = vld [vmem:[#allocation36_spill] sm:$0xff] }
 0x138   :  { %vm1145_vm1 = vcmp.gt.f32.partialorder %v1144_v63, %v1142_v48  ;;  %v3511_v61 = vmax.f32 %v1142_v48, %v1144_v63  ;;  %vm1164_vm2 = vcmp.gt.f32.partialorder %v1163_v8, %v1161_v58  ;;  %v1165_v53 = vmax.f32 %v1161_v58, %v1163_v8 }
 0x139   :  { %v1147_v15 = vsel %vm1145_vm1, 6, %v1143_v47  ;;  %v1166_v29 = vsel %vm1164_vm2, 2, %v1162_v13  ;;  %v1193_v24 = vadd.f32 %v3333_v2, %v4967_v59  ;;  %v1175_v7 = vadd.f32 %v3409_v39, %v4968_v16 }
 0x13a   :  { %vm1149_vm3 = vcmp.gt.f32.partialorder %v3507_v54, %v3511_v61  ;;  %vm1168_vm4 = vcmp.gt.f32.partialorder %v1167_v4, %v1165_v53  ;;  %v1169_v10 = vmax.f32 %v1165_v53, %v1167_v4  ;;  %v1194_v63 = vadd.f32 %v3343_v30, %v4969_v21  ;;  %v4970_v53 = vld [vmem:[#allocation52_spill] sm:$0xff] }
 0x13b   :  { %v1151_v46 = vsel %vm1149_vm3, 7, %v1147_v15  ;;  %v1170_v11 = vsel %vm1168_vm4, 3, %v1166_v29  ;;  %v1198_v47 = vadd.f32 %v3382_v33, %v2669_v22  ;;  %v1179_v58 = vadd.f32 %v3417_v37, %v4930_v34 }
 0x13c   :  { %v1155_v8 = vshll.u32 %v1151_v46, 6  ;;  %vm1172_vm5 = vcmp.gt.f32.partialorder %v1171_v23, %v1169_v10  ;;  %v1173_v48 = vmax.f32 %v1169_v10, %v1171_v23  ;;  %vm1195_vm6 = vcmp.gt.f32.partialorder %v1194_v63, %v1193_v24 }
 0x13d   :  { %v1174_v13 = vsel %vm1172_vm5, 4, %v1170_v11  ;;  %v1196_v4 = vmax.f32 %v1193_v24, %v1194_v63  ;;  %v1202_v16 = vadd.f32 %v3384_v14, %v4970_v53  ;;  %v3529_v21 = vadd.f32 %v3440_v26, %v2920_v36 }
 0x13e   :  { %v1156_v15 = vor.u32 %v1155_v8, %v1121_v1  ;;  %vm1176_vm7 = vcmp.gt.f32.partialorder %v1175_v7, %v1173_v48  ;;  %v1177_v29 = vmax.f32 %v1173_v48, %v1175_v7  ;;  %v1197_v46 = vsel %vm1195_vm6, 1, %v4835_v17 }
 0x13f   :  { %v1178_v22 = vsel %vm1176_vm7, 5, %v1174_v13  ;;  %vm1199_vm8 = vcmp.gt.f32.partialorder %v1198_v47, %v1196_v4  ;;  %v1200_v23 = vmax.f32 %v1196_v4, %v1198_v47  ;;  %v1206_v24 = vadd.f32 %v3389_v28, %v2727_v42 }
 0x140   :  { %vm1180_vm9 = vcmp.gt.f32.partialorder %v1179_v58, %v1177_v29  ;;  %v3532_v10 = vmax.f32 %v1177_v29, %v1179_v58  ;;  %v1201_v11 = vsel %vm1199_vm8, 2, %v1197_v46  ;;  %v1210_v7 = vadd.f32 %v3409_v39, %v2871_v56  ;;  %v4971_v29 = vld [vmem:[#allocation29_spill] sm:$0xff] }
 0x141   :  { %v1182_v63 = vsel %vm1180_vm9, 6, %v1178_v22  ;;  %vm1203_vm12 = vcmp.gt.f32.partialorder %v1202_v16, %v1200_v23  ;;  %v1204_v1 = vmax.f32 %v1200_v23, %v1202_v16  ;;  %v1214_v58 = vadd.f32 %v3417_v37, %v2769_v60  ;;  %v4972_v23 = vld [vmem:[#allocation37_spill] sm:$0xff] }
 0x142   :  { %vm1184_vm13 = vcmp.gt.f32.partialorder %v3529_v21, %v3532_v10  ;;  %v1205_v8 = vsel %vm1203_vm12, 3, %v1201_v11  ;;  %v1082_v13 = vmax.f32 %v3461_v5, %v3465_v43  ;;  %v1228_v16 = vadd.f32 %v3333_v2, %v4971_v29  ;;  %v4973_v11 = vld [vmem:[#allocation45_spill] sm:$0xff] }
 0x143   :  { %v1186_v48 = vsel %vm1184_vm13, 7, %v1182_v63  ;;  %vm1207_vm15 = vcmp.gt.f32.partialorder %v1206_v24, %v1204_v1  ;;  %v1208_v47 = vmax.f32 %v1204_v1, %v1206_v24  ;;  %v1229_v36 = vadd.f32 %v3343_v30, %v4972_v23  ;;  %v4974_v5 = vld [vmem:[#allocation53_spill] sm:$0xff] }
 0x144   :  { %v1190_v4 = vshll.u32 %v1186_v48, 9  ;;  %v1209_v22 = vsel %vm1207_vm15, 4, %v1205_v8  ;;  %v1233_v63 = vadd.f32 %v3382_v33, %v4973_v11  ;;  %v3552_v60 = vadd.f32 %v3440_v26, %v4932_v45  ;;  %v1085_v8 = vld [vmem:[#allocation7 + $0x100] sm:$0xff]  ;;  %v4976_v11 = vld [vmem:[#allocation38_spill] sm:$0xff] }
 0x145   :  { %vm1211_vm0 = vcmp.gt.f32.partialorder %v1210_v7, %v1208_v47  ;;  %v1212_v46 = vmax.f32 %v1208_v47, %v1210_v7  ;;  %v1237_v43 = vadd.f32 %v3384_v14, %v4974_v5  ;;  %vm1230_vm2 = vcmp.gt.f32.partialorder %v1229_v36, %v1228_v16 }
 0x146   :  { %v1191_v24 = vor.u32 %v1190_v4, %v1156_v15  ;;  %v1213_v1 = vsel %vm1211_vm0, 5, %v1209_v22  ;;  %v1231_v7 = vmax.f32 %v1228_v16, %v1229_v36  ;;  %v1232_v56 = vsel %vm1230_vm2, 1, %v4835_v17 }
 0x147   :  { %vm1215_vm1 = vcmp.gt.f32.partialorder %v1214_v58, %v1212_v46  ;;  %v3556_v48 = vmax.f32 %v1212_v46, %v1214_v58  ;;  %v1241_v4 = vadd.f32 %v3389_v28, %v4933_v3  ;;  %v3563_v22 = vadd.f32 %v1085_v8, %v1082_v13  ;;  %v4975_v46 = vld [vmem:[#allocation85_spill] sm:$0xff] }
 0x148   :  { %v1217_v47 = vsel %vm1215_vm1, 6, %v1213_v1  ;;  %vm1234_vm4 = vcmp.gt.f32.partialorder %v1233_v63, %v1231_v7  ;;  %v1235_v15 = vmax.f32 %v1231_v7, %v1233_v63  ;;  %v1245_v36 = vadd.f32 %v3409_v39, %v4975_v46  ;;  %v4977_v7 = vld [vmem:[#allocation46_spill] sm:$0xff] }
 0x149   :  { %vm1219_vm3 = vcmp.gt.f32.partialorder %v3552_v60, %v3556_v48  ;;  %v1236_v5 = vsel %vm1234_vm4, 2, %v1232_v56  ;;  %v1263_v1 = vadd.f32 %v3333_v2, %v4890_v51  ;;  %v1264_v63 = vadd.f32 %v3343_v30, %v4976_v11  ;;  %v4978_v56 = vld [vmem:[#allocation75_spill] sm:$0xff] }
 0x14a   :  { %v1221_v45 = vsel %vm1219_vm3, 7, %v1217_v47  ;;  %vm1238_vm5 = vcmp.gt.f32.partialorder %v1237_v43, %v1235_v15  ;;  %v1239_v58 = vmax.f32 %v1235_v15, %v1237_v43  ;;  %v1268_v3 = vadd.f32 %v3382_v33, %v4977_v7  ;;  %v4979_v15 = vld [vmem:[#allocation54_spill] sm:$0xff] }
 0x14b   :  { %v1225_v34 = vshll.u32 %v1221_v45, 12  ;;  %v1240_v16 = vsel %vm1238_vm5, 3, %v1236_v5  ;;  %v1249_v45 = vadd.f32 %v3417_v37, %v4978_v56  ;;  %vm1265_vm7 = vcmp.gt.f32.partialorder %v1264_v63, %v1263_v1 }
 0x14c   :  { %vm1242_vm6 = vcmp.gt.f32.partialorder %v1241_v4, %v1239_v58  ;;  %v1243_v8 = vmax.f32 %v1239_v58, %v1241_v4  ;;  %v1266_v47 = vmax.f32 %v1263_v1, %v1264_v63  ;;  %v1272_v5 = vadd.f32 %v3384_v14, %v4979_v15  ;;  %v4980_v58 = vld [vmem:[#allocation94_spill] sm:$0xff] }
 0x14d   :  { %v1226_v13 = vor.u32 %v1225_v34, %v1191_v24  ;;  %v1244_v43 = vsel %vm1242_vm6, 4, %v1240_v16  ;;  %v1115_v46 = vmax.f32 %v3481_v35, %v3485_v18  ;;  %v1267_v51 = vsel %vm1265_vm7, 1, %v4835_v17 }
 0x14e   :  { %vm1246_vm8 = vcmp.gt.f32.partialorder %v1245_v36, %v1243_v8  ;;  %v1247_v11 = vmax.f32 %v1243_v8, %v1245_v36  ;;  %vm1269_vm9 = vcmp.gt.f32.partialorder %v1268_v3, %v1266_v47  ;;  %v1270_v34 = vmax.f32 %v1266_v47, %v1268_v3 }
 0x14f   :  { %v1248_v7 = vsel %vm1246_vm8, 5, %v1244_v43  ;;  %v1276_v24 = vadd.f32 %v3389_v28, %v2733_v44  ;;  %v3586_v16 = vadd.f32 %v3440_v26, %v4980_v58  ;;  %v1271_v1 = vsel %vm1269_vm9, 2, %v1267_v51  ;;  %v1118_v58 = vld [vmem:[#allocation7 + $0x108] sm:$0xff] }
 0x150   :  { %vm1250_vm12 = vcmp.gt.f32.partialorder %v1249_v45, %v1247_v11  ;;  %v3582_v4 = vmax.f32 %v1247_v11, %v1249_v45  ;;  %vm1273_vm13 = vcmp.gt.f32.partialorder %v1272_v5, %v1270_v34  ;;  %v1274_v35 = vmax.f32 %v1270_v34, %v1272_v5 }
 0x151   :  { %v1252_v63 = vsel %vm1250_vm12, 6, %v1248_v7  ;;  %v1280_v18 = vadd.f32 %v3409_v39, %v2884_v20  ;;  %v1275_v3 = vsel %vm1273_vm13, 3, %v1271_v1  ;;  %v1284_v36 = vadd.f32 %v3417_v37, %v2781_v0 }
 0x152   :  { %vm1254_vm15 = vcmp.gt.f32.partialorder %v3586_v16, %v3582_v4  ;;  %v1298_v11 = vadd.f32 %v3333_v2, %v2616_v9  ;;  %vm1277_vm0 = vcmp.gt.f32.partialorder %v1276_v24, %v1274_v35  ;;  %v1278_v45 = vmax.f32 %v1274_v35, %v1276_v24 }
 0x153   :  { %v1256_v8 = vsel %vm1254_vm15, 7, %v1252_v63  ;;  %v1299_v51 = vadd.f32 %v3343_v30, %v4894_v38  ;;  %v1150_v7 = vmax.f32 %v3511_v61, %v3507_v54  ;;  %v1279_v47 = vsel %vm1277_vm0, 4, %v1275_v3  ;;  %v1153_v3 = vld [vmem:[#allocation7 + $0x110] sm:$0xff] }
 0x154   :  { %v1260_v43 = vshll.u32 %v1256_v8, 15  ;;  %v1303_v5 = vadd.f32 %v3382_v33, %v4895_v19  ;;  %vm1281_vm1 = vcmp.gt.f32.partialorder %v1280_v18, %v1278_v45  ;;  %v1282_v34 = vmax.f32 %v1278_v45, %v1280_v18  ;;  %v4982_v45 = vld [vmem:[#allocation89_spill] sm:$0xff] }
 0x155   :  { %vm1300_vm2 = vcmp.gt.f32.partialorder %v1299_v51, %v1298_v11  ;;  %v1301_v1 = vmax.f32 %v1298_v11, %v1299_v51  ;;  %v1283_v63 = vsel %vm1281_vm1, 5, %v1279_v47  ;;  %v3604_v24 = vadd.f32 %v3440_v26, %v4896_v12  ;;  %v4981_v11 = vld [vmem:[#allocation68_spill] sm:$0xff] }
 0x156   :  { %v1261_v0 = vor.u32 %v1260_v43, %v1226_v13  ;;  %v1302_v35 = vsel %vm1300_vm2, 1, %v4835_v17  ;;  %vm1285_vm3 = vcmp.gt.f32.partialorder %v1284_v36, %v1282_v34  ;;  %v3607_v54 = vmax.f32 %v1282_v34, %v1284_v36 }
 0x157   :  { %vm1304_vm4 = vcmp.gt.f32.partialorder %v1303_v5, %v1301_v1  ;;  %v1305_v61 = vmax.f32 %v1301_v1, %v1303_v5  ;;  %v1287_v8 = vsel %vm1285_vm3, 6, %v1283_v63  ;;  %v1307_v18 = vadd.f32 %v3384_v14, %v4856_v52  ;;  %v4983_v1 = vld [vmem:[#allocation69_spill] sm:$0xff]  ;;  %v4984_v63 = vld [vmem:[#allocation91_spill] sm:$0xff] }
 0x158   :  { %v1306_v19 = vsel %vm1304_vm4, 2, %v1302_v35  ;;  %v1311_v13 = vadd.f32 %v3389_v28, %v4898_v31  ;;  %v190_v51 = vsel %vm150_vm14, %v4982_v45, %v4981_v11  ;;  %v3617_v43 = vadd.f32 %v1118_v58, %v1115_v46  ;;  %v1188_v46 = vld [vmem:[#allocation7 + $0x118] sm:$0xff] }
 0x159   :  { %v1185_v36 = vmax.f32 %v3532_v10, %v3529_v21  ;;  %vm1289_vm5 = vcmp.gt.f32.partialorder %v3604_v24, %v3607_v54  ;;  %vm1308_vm6 = vcmp.gt.f32.partialorder %v1307_v18, %v1305_v61  ;;  %v1309_v5 = vmax.f32 %v1305_v61, %v1307_v18 }
 0x15a   :  { %v1291_v47 = vsel %vm1289_vm5, 7, %v1287_v8  ;;  %v1315_v34 = vadd.f32 %v3409_v39, %v2887_v41  ;;  %v232_v35 = vsel %vm150_vm14, %v4984_v63, %v4983_v1  ;;  %v3629_v11 = vadd.f32 %v1153_v3, %v1150_v7  ;;  %v4985_v3 = vld [vmem:[#allocation72_spill] sm:$0xff] }
 0x15b   :  { %v1295_v58 = vshll.u32 %v1291_v47, 18  ;;  %v1310_v45 = vsel %vm1308_vm6, 3, %v1306_v19  ;;  %vm1312_vm7 = vcmp.gt.f32.partialorder %v1311_v13, %v1309_v5  ;;  %v1313_v21 = vmax.f32 %v1309_v5, %v1311_v13  ;;  %v4986_v1 = vld [vmem:[#allocation92_spill] sm:$0xff]  ;;  %v1223_v47 = vld [vmem:[#allocation7 + $0x120] sm:$0xff] }
 0x15c   :  { %v1319_v10 = vadd.f32 %v3417_v37, %v4899_v25  ;;  %v1338_v61 = vadd.f32 %v3563_v22, %v4939_v62  ;;  %v1220_v8 = vmax.f32 %v3556_v48, %v3552_v60  ;;  %v1314_v41 = vsel %vm1312_vm7, 4, %v1310_v45  ;;  %v4988_v48 = vld [vmem:[#allocation95_spill] sm:$0xff] }
 0x15d   :  { %v1296_v18 = vor.u32 %v1295_v58, %v1261_v0  ;;  %v1339_v7 = vadd.f32 %v3617_v43, %v4940_v50  ;;  %v274_v19 = vsel %vm150_vm14, %v4986_v1, %v4985_v3  ;;  %v3643_v13 = vadd.f32 %v1188_v46, %v1185_v36  ;;  %v4987_v0 = vld [vmem:[#allocation73_spill] sm:$0xff]  ;;  %v4989_v46 = vld [vmem:[#allocation76_spill] sm:$0xff] }
 0x15e   :  { %vm1316_vm8 = vcmp.gt.f32.partialorder %v1315_v34, %v1313_v21  ;;  %v1317_v37 = vmax.f32 %v1313_v21, %v1315_v34  ;;  %v1343_v60 = vadd.f32 %v3629_v11, %v4941_v32  ;;  %v316_v58 = vsel %vm150_vm14, %v4988_v48, %v4987_v0  ;;  %v4990_v3 = vld [vmem:[#allocation96_spill] sm:$0xff] }
 0x15f   :  { %v1318_v5 = vsel %vm1316_vm8, 5, %v1314_v41  ;;  %vm1340_vm9 = vcmp.gt.f32.partialorder %v1339_v7, %v1338_v61  ;;  %v1341_v63 = vmax.f32 %v1338_v61, %v1339_v7  ;;  %v1323_v36 = vadd.f32 %v3440_v26, %v4938_v40  ;;  %v1258_v7 = vld [vmem:[#allocation7 + $0x128] sm:$0xff] }
 0x160   :  { %vm1320_vm12 = vcmp.gt.f32.partialorder %v1319_v10, %v1317_v37  ;;  %v3651_v45 = vmax.f32 %v1317_v37, %v1319_v10  ;;  %v358_v41 = vsel %vm150_vm14, %v4990_v3, %v4989_v46  ;;  %v3659_v34 = vadd.f32 %v1223_v47, %v1220_v8  ;;  %v4991_v47 = vld [vmem:[#allocation77_spill] sm:$0xff] }
 0x161   :  { %v1255_v21 = vmax.f32 %v3582_v4, %v3586_v16  ;;  %v1322_v61 = vsel %vm1320_vm12, 6, %v1318_v5  ;;  %v1342_v10 = vsel %vm1340_vm9, 1, %v4835_v17  ;;  %v1347_v1 = vadd.f32 %v3643_v13, %v4944_v55  ;;  %v4992_v4 = vld [vmem:[#allocation98_spill] sm:$0xff]  ;;  %v4993_v46 = vld [vmem:[#allocation41_spill] sm:$0xff] }
 0x162   :  { %vm1324_vm13 = vcmp.gt.f32.partialorder %v1323_v36, %v3651_v45  ;;  %v1371_v26 = vadd.f32 %v3563_v22, %v4908_v27  ;;  %vm1344_vm15 = vcmp.gt.f32.partialorder %v1343_v60, %v1341_v63  ;;  %v1345_v0 = vmax.f32 %v1341_v63, %v1343_v60 }
 0x163   :  { %v1326_v37 = vsel %vm1324_vm13, 7, %v1322_v61  ;;  %v1372_v8 = vadd.f32 %v3617_v43, %v4909_v49  ;;  %v400_v16 = vsel %vm150_vm14, %v4992_v4, %v4991_v47  ;;  %v521_v5 = vsel %vm488_vm10, %v3142_v6, %v190_v51  ;;  %v4994_v61 = vld [vmem:[#allocation101_spill] sm:$0xff]  ;;  %v4996_v6 = vld [vmem:[#allocation56_spill] sm:$0xff] }
 0x164   :  { %v1330_v48 = vshll.u32 %v1326_v37, 21  ;;  %v1376_v3 = vadd.f32 %v3629_v11, %v4993_v46  ;;  %v3680_v27 = vadd.f32 %v1258_v7, %v1255_v21  ;;  %v1290_v63 = vmax.f32 %v3607_v54, %v3604_v24  ;;  %v1293_v47 = vld [vmem:[#allocation7 + $0x130] sm:$0xff]  ;;  %v4997_v7 = vld [vmem:[#allocation102_spill] sm:$0xff]  ;;  %v4998_v54 = vld [vmem:[#allocation103_spill] sm:$0xff] }
 0x165   :  { %vm1373_vm0 = vcmp.gt.f32.partialorder %v1372_v8, %v1371_v26  ;;  %v1374_v60 = vmax.f32 %v1371_v26, %v1372_v8  ;;  %v556_v49 = vsel %vm488_vm10, %v4994_v61, %v232_v35  ;;  %v1346_v55 = vsel %vm1344_vm15, 2, %v1342_v10  ;;  %v4999_v26 = vld [vmem:[#allocation104_spill] sm:$0xff]  ;;  %v5000_v8 = vld [vmem:[#allocation97_spill] sm:$0xff] }
 0x166   :  { %v3687_v4 = vor.u32 %v1330_v48, %v1296_v18  ;;  %v1351_v51 = vadd.f32 %v3659_v34, %v4996_v6  ;;  %vm1348_vm1 = vcmp.gt.f32.partialorder %v1347_v1, %v1345_v0  ;;  %v1349_v37 = vmax.f32 %v1345_v0, %v1347_v1  ;;  %v5001_v48 = vld [vmem:[#allocation66_spill] sm:$0xff] }
 0x167   :  { %v1375_v21 = vsel %vm1373_vm0, 1, %v4835_v17  ;;  %vm1377_vm2 = vcmp.gt.f32.partialorder %v1376_v3, %v1374_v60  ;;  %v591_v24 = vsel %vm488_vm10, %v4997_v7, %v274_v19  ;;  %v626_v35 = vsel %vm488_vm10, %v4998_v54, %v316_v58  ;;  %v5003_v54 = vld [vmem:[#allocation57_spill] sm:$0xff] }
 0x168   :  { %4995 = vst [vmem:[#allocation40_spill] sm:$0xff] %v3687_v4  ;;  %v661_v18 = vsel %vm488_vm10, %v4999_v26, %v358_v41  ;;  %v1378_v10 = vmax.f32 %v1374_v60, %v1376_v3  ;;  %v696_v1 = vsel %vm488_vm10, %v5000_v8, %v400_v16  ;;  %v3704_v0 = vadd.f32 %v1293_v47, %v1290_v63  ;;  %v5002_v4 = vld [vmem:[#allocation49_spill] sm:$0xff]  ;;  %v1328_v47 = vld [vmem:[#allocation7 + $0x138] sm:$0xff] }
 0x169   :  { %v1355_v61 = vadd.f32 %v3680_v27, %v5001_v48  ;;  %v1380_v19 = vadd.f32 %v3643_v13, %v5002_v4  ;;  %v1350_v7 = vsel %vm1348_vm1, 3, %v1346_v55  ;;  %vm1352_vm3 = vcmp.gt.f32.partialorder %v1351_v51, %v1349_v37  ;;  %v5006_v26 = vld [vmem:[#allocation34_spill] sm:$0xff]  ;;  %v1368_v4 = vld [vmem:[#allocation7 + $0x140] sm:$0xff] }
 0x16a   :  { %v1379_v58 = vsel %vm1377_vm2, 2, %v1375_v21  ;;  %v1384_v46 = vadd.f32 %v3659_v34, %v5003_v54  ;;  %v1325_v41 = vmax.f32 %v3651_v45, %v1323_v36  ;;  %v1353_v3 = vmax.f32 %v1349_v37, %v1351_v51  ;;  %v5004_v36 = vld [vmem:[#allocation67_spill] sm:$0xff] }
 0x16b   :  { %vm1381_vm4 = vcmp.gt.f32.partialorder %v1380_v19, %v1378_v10  ;;  %v1382_v60 = vmax.f32 %v1378_v10, %v1380_v19  ;;  %v804_v16 = vsel %vm771_vm11, %v3333_v2, %v521_v5  ;;  %v839_v63 = vsel %vm771_vm11, %v3343_v30, %v556_v49  ;;  %v5005_v2 = vld [vmem:[#allocation26_spill] sm:$0xff]  ;;  %v5007_v10 = vld [vmem:[#allocation64_spill] sm:$0xff] }
 0x16c   :  { %v874_v55 = vsel %vm771_vm11, %v3382_v33, %v591_v24  ;;  %vm1054_vm5 = vcmp.eq.s32.totalorder %v4854_v57, 4  ;;  %v1354_v21 = vsel %vm1352_vm3, 4, %v1350_v7  ;;  %vm1356_vm6 = vcmp.gt.f32.partialorder %v1355_v61, %v1353_v3 }
 0x16d   :  { %v1383_v45 = vsel %vm1381_vm4, 3, %v1379_v58  ;;  %v1388_v51 = vadd.f32 %v3680_v27, %v5004_v36  ;;  %vm1385_vm7 = vcmp.gt.f32.partialorder %v1384_v46, %v1382_v60  ;;  %v1386_v37 = vmax.f32 %v1382_v60, %v1384_v46  ;;  %v5008_v58 = vld [vmem:[#allocation65_spill] sm:$0xff]  ;;  %v5009_v60 = vld [vmem:[#allocation42_spill] sm:$0xff] }
 0x16e   :  { %v1406_v5 = vadd.f32 %v3563_v22, %v5005_v2  ;;  %v1407_v30 = vadd.f32 %v3617_v43, %v5006_v26  ;;  %v909_v49 = vsel %vm771_vm11, %v3384_v14, %v626_v35  ;;  %v3732_v33 = vadd.f32 %v1328_v47, %v1325_v41  ;;  %v5014_v36 = vld [vmem:[#allocation50_spill] sm:$0xff] }
 0x16f   :  { %v1357_v24 = vmax.f32 %v1353_v3, %v1355_v61  ;;  %v1359_v8 = vadd.f32 %v3704_v0, %v5007_v10  ;;  %v944_v46 = vsel %vm771_vm11, %v3389_v28, %v661_v18  ;;  %v979_v19 = vsel %vm771_vm11, %v3409_v39, %v696_v1  ;;  %v5010_v1 = vld [vmem:[#allocation81_spill] sm:$0xff] }
 0x170   :  { %v1087_v7 = vsel %vm1054_vm5, %v3563_v22, %v804_v16  ;;  %vm1408_vm8 = vcmp.gt.f32.partialorder %v1407_v30, %v1406_v5  ;;  %v1358_v14 = vsel %vm1356_vm6, 5, %v1354_v21  ;;  %v1387_v35 = vsel %vm1385_vm7, 4, %v1383_v45  ;;  %v5011_v45 = vld [vmem:[#allocation27_spill] sm:$0xff] }
 0x171   :  { %vm1360_vm9 = vcmp.gt.f32.partialorder %v1359_v8, %v1357_v24  ;;  %vm1389_vm12 = vcmp.gt.f32.partialorder %v1388_v51, %v1386_v37  ;;  %v1390_v61 = vmax.f32 %v1386_v37, %v1388_v51  ;;  %v1392_v41 = vadd.f32 %v3704_v0, %v5008_v58 }
 0x172   :  { %v1409_v3 = vmax.f32 %v1406_v5, %v1407_v30  ;;  %v1411_v28 = vadd.f32 %v3629_v11, %v5009_v60  ;;  %v3752_v39 = vsel %vm1054_vm5, %v3617_v43, %v839_v63  ;;  %v1361_v18 = vmax.f32 %v1357_v24, %v1359_v8  ;;  %v5012_v30 = vld [vmem:[#allocation35_spill] sm:$0xff]  ;;  %v5013_v60 = vld [vmem:[#allocation82_spill] sm:$0xff] }
 0x173   :  { %v1363_v16 = vadd.f32 %v3732_v33, %v5010_v1  ;;  %v1410_v47 = vsel %vm1408_vm8, 1, %v4835_v17  ;;  %v1391_v21 = vsel %vm1389_vm12, 5, %v1387_v35  ;;  %vm1393_vm13 = vcmp.gt.f32.partialorder %v1392_v41, %v1390_v61  ;;  %v5015_v24 = vld [vmem:[#allocation43_spill] sm:$0xff] }
 0x174   :  { %vm1412_vm15 = vcmp.gt.f32.partialorder %v1411_v28, %v1409_v3  ;;  %v1441_v51 = vadd.f32 %v3563_v22, %v5011_v45  ;;  %v3762_v37 = vsel %vm1054_vm5, %v3629_v11, %v874_v55  ;;  %v3767_v63 = vsel %vm1054_vm5, %v3643_v13, %v909_v49 }
 0x175   :  { %v1362_v5 = vsel %vm1360_vm9, 6, %v1358_v14  ;;  %v1442_v35 = vadd.f32 %v3617_v43, %v5012_v30  ;;  %v1394_v58 = vmax.f32 %v1390_v61, %v1392_v41  ;;  %v1396_v26 = vadd.f32 %v3732_v33, %v5013_v60  ;;  %v5016_v41 = vld [vmem:[#allocation22_spill] sm:$0xff] }
 0x176   :  { %v1413_v45 = vmax.f32 %v1409_v3, %v1411_v28  ;;  %v1415_v2 = vadd.f32 %v3643_v13, %v5014_v36  ;;  %vm1364_vm0 = vcmp.gt.f32.partialorder %v1363_v16, %v1361_v18  ;;  %v1365_v55 = vmax.f32 %v1361_v18, %v1363_v16  ;;  %v5018_v28 = vld [vmem:[#allocation32_spill] sm:$0xff]  ;;  %v5021_v36 = vld [vmem:[#allocation51_spill] sm:$0xff] }
 0x177   :  { %v1395_v1 = vsel %vm1393_vm13, 6, %v1391_v21  ;;  %v1414_v54 = vsel %vm1412_vm15, 2, %v1410_v47  ;;  %vm1397_vm1 = vcmp.gt.f32.partialorder %v1396_v26, %v1394_v58  ;;  %v1444_v49 = vmax.f32 %v1441_v51, %v1442_v35  ;;  %v5020_v47 = vld [vmem:[#allocation58_spill] sm:$0xff] }
 0x178   :  { %vm1416_vm2 = vcmp.gt.f32.partialorder %v1415_v2, %v1413_v45  ;;  %v1446_v8 = vadd.f32 %v3629_v11, %v5015_v24  ;;  %v3781_v14 = vsel %vm1054_vm5, %v3659_v34, %v944_v46  ;;  %v3786_v61 = vsel %vm1054_vm5, %v3680_v27, %v979_v19 }
 0x179   :  { %v3792_v3 = vsel %vm1054_vm5, %v3704_v0, %v5016_v41  ;;  %vm1337_vm3 = vcmp.eq.s32.totalorder %v4854_v57, 5  ;;  %v3799_v18 = vsel %vm1054_vm5, %v3732_v33, %v5018_v28  ;;  %v1366_v46 = vsel %vm1364_vm0, 7, %v1362_v5  ;;  %v5023_v5 = vld [vmem:[#allocation36_spill] sm:$0xff] }
 0x17a   :  { %5017 = vst [vmem:[#allocation63_spill] sm:$0xff] %v3792_v3  ;;  %5019 = vst [vmem:[#allocation99_spill] sm:$0xff] %v3799_v18  ;;  %v1417_v16 = vmax.f32 %v1413_v45, %v1415_v2  ;;  %v1419_v19 = vadd.f32 %v3659_v34, %v5020_v47  ;;  %v3803_v21 = vadd.f32 %v1368_v4, %v1365_v55  ;;  %v1399_v24 = vsel %vm1397_vm1, 7, %v1395_v1  ;;  %v5024_v1 = vld [vmem:[#allocation44_spill] sm:$0xff]  ;;  %v5026_v18 = vld [vmem:[#allocation70_spill] sm:$0xff] }
 0x17b   :  { %v1418_v30 = vsel %vm1416_vm2, 3, %v1414_v54  ;;  %v1476_v41 = vadd.f32 %v3563_v22, %v4967_v59  ;;  %vm1443_vm6 = vcmp.gt.f32.partialorder %v1442_v35, %v1441_v51  ;;  %v1448_v60 = vmax.f32 %v1444_v49, %v1446_v8  ;;  %v1401_v55 = vld [vmem:[#allocation7 + $0x148] sm:$0xff] }
 0x17c   :  { %vm1420_vm4 = vcmp.gt.f32.partialorder %v1419_v19, %v1417_v16  ;;  %v1450_v3 = vadd.f32 %v3643_v13, %v5021_v36  ;;  %v3812_v2 = vsel %vm1337_vm3, %v3803_v21, %v1087_v7  ;;  %v1398_v45 = vmax.f32 %v1394_v58, %v1396_v26  ;;  %v5025_v51 = vld [vmem:[#allocation80_spill] sm:$0xff] }
 0x17d   :  { %5022 = vst [vmem:[#allocation68_spill] sm:$0xff] %v3812_v2  ;;  %v1477_v4 = vadd.f32 %v3617_v43, %v5023_v5  ;;  %v1481_v54 = vadd.f32 %v3629_v11, %v5024_v1  ;;  %v1403_v28 = vshll.u32 %v1399_v24, 3  ;;  %v1421_v59 = vmax.f32 %v1417_v16, %v1419_v19  ;;  %v5027_v2 = vld [vmem:[#allocation59_spill] sm:$0xff]  ;;  %v5028_v24 = vld [vmem:[#allocation88_spill] sm:$0xff] }
 0x17e   :  { %v1423_v35 = vadd.f32 %v3680_v27, %v5025_v51  ;;  %v1427_v36 = vadd.f32 %v3704_v0, %v5026_v18  ;;  %v1422_v47 = vsel %vm1420_vm4, 4, %v1418_v30  ;;  %v1445_v7 = vsel %vm1443_vm6, 1, %v4835_v17 }
 0x17f   :  { %vm1447_vm7 = vcmp.gt.f32.partialorder %v1446_v8, %v1444_v49  ;;  %v1479_v26 = vmax.f32 %v1476_v41, %v1477_v4  ;;  %v1452_v58 = vmax.f32 %v1448_v60, %v1450_v3  ;;  %v1454_v5 = vadd.f32 %v3659_v34, %v5027_v2 }
 0x180   :  { %vm1424_vm8 = vcmp.gt.f32.partialorder %v1423_v35, %v1421_v59  ;;  %vm1478_vm9 = vcmp.gt.f32.partialorder %v1477_v4, %v1476_v41  ;;  %v3825_v1 = vadd.f32 %v1401_v55, %v1398_v45  ;;  %v3829_v16 = vadd.f32 %v3732_v33, %v5028_v24  ;;  %v5029_v4 = vld [vmem:[#allocation83_spill] sm:$0xff] }
 0x181   :  { %v1483_v19 = vmax.f32 %v1479_v26, %v1481_v54  ;;  %v1485_v30 = vadd.f32 %v3643_v13, %v4970_v53  ;;  %v3833_v18 = vor.u32 %v1403_v28, %v1366_v46  ;;  %v1425_v49 = vmax.f32 %v1421_v59, %v1423_v35 }
 0x182   :  { %v1449_v8 = vsel %vm1447_vm7, 2, %v1445_v7  ;;  %vm1451_vm12 = vcmp.gt.f32.partialorder %v1450_v3, %v1448_v60  ;;  %v1426_v51 = vsel %vm1424_vm8, 5, %v1422_v47  ;;  %v1480_v10 = vsel %vm1478_vm9, 1, %v4835_v17  ;;  %v5031_v7 = vld [vmem:[#allocation71_spill] sm:$0xff] }
 0x183   :  { %vm1482_vm13 = vcmp.gt.f32.partialorder %v1481_v54, %v1479_v26  ;;  %v1511_v41 = vadd.f32 %v3563_v22, %v4971_v29  ;;  %vm1428_vm15 = vcmp.gt.f32.partialorder %v1427_v36, %v1425_v49  ;;  %v1456_v45 = vmax.f32 %v1452_v58, %v1454_v5  ;;  %v5030_v54 = vld [vmem:[#allocation45_spill] sm:$0xff] }
 0x184   :  { %v1458_v55 = vadd.f32 %v3680_v27, %v5029_v4  ;;  %v1512_v53 = vadd.f32 %v3617_v43, %v4972_v23  ;;  %v1453_v46 = vsel %vm1451_vm12, 3, %v1449_v8  ;;  %vm1455_vm0 = vcmp.gt.f32.partialorder %v1454_v5, %v1452_v58 }
 0x185   :  { %v1487_v59 = vmax.f32 %v1483_v19, %v1485_v30  ;;  %v1489_v60 = vadd.f32 %v3659_v34, %v2727_v42  ;;  %v1429_v3 = vmax.f32 %v1425_v49, %v1427_v36  ;;  %v1484_v47 = vsel %vm1482_vm13, 2, %v1480_v10  ;;  %v5032_v36 = vld [vmem:[#allocation84_spill] sm:$0xff]  ;;  %v5038_v42 = vld [vmem:[#allocation38_spill] sm:$0xff] }
 0x186   :  { %vm1486_vm1 = vcmp.gt.f32.partialorder %v1485_v30, %v1483_v19  ;;  %v1516_v28 = vadd.f32 %v3629_v11, %v5030_v54  ;;  %v1430_v35 = vsel %vm1428_vm15, 6, %v1426_v51  ;;  %v1462_v26 = vadd.f32 %v3704_v0, %v5031_v7  ;;  %v5033_v30 = vld [vmem:[#allocation53_spill] sm:$0xff]  ;;  %v5039_v7 = vld [vmem:[#allocation46_spill] sm:$0xff] }
 0x187   :  { %vm1513_vm2 = vcmp.gt.f32.partialorder %v1512_v53, %v1511_v41  ;;  %v1514_v29 = vmax.f32 %v1511_v41, %v1512_v53  ;;  %vm1432_vm4 = vcmp.gt.f32.partialorder %v3829_v16, %v1429_v3  ;;  %v1457_v8 = vsel %vm1455_vm0, 4, %v1453_v46  ;;  %v5034_v41 = vld [vmem:[#allocation90_spill] sm:$0xff] }
 0x188   :  { %vm1459_vm6 = vcmp.gt.f32.partialorder %v1458_v55, %v1456_v45  ;;  %v1460_v5 = vmax.f32 %v1456_v45, %v1458_v55  ;;  %v1488_v58 = vsel %vm1486_vm1, 3, %v1484_v47  ;;  %vm1490_vm7 = vcmp.gt.f32.partialorder %v1489_v60, %v1487_v59  ;;  %v5035_v45 = vld [vmem:[#allocation74_spill] sm:$0xff] }
 0x189   :  { %v1491_v23 = vmax.f32 %v1487_v59, %v1489_v60  ;;  %v1493_v10 = vadd.f32 %v3680_v27, %v5032_v36  ;;  %v1515_v19 = vsel %vm1513_vm2, 1, %v4835_v17  ;;  %vm1517_vm8 = vcmp.gt.f32.partialorder %v1516_v28, %v1514_v29 }
 0x18a   :  { %v1518_v51 = vmax.f32 %v1514_v29, %v1516_v28  ;;  %v1520_v49 = vadd.f32 %v3643_v13, %v5033_v30  ;;  %v1434_v54 = vsel %vm1432_vm4, 7, %v1430_v35  ;;  %v1461_v53 = vsel %vm1459_vm6, 5, %v1457_v8  ;;  %v5036_v29 = vld [vmem:[#allocation61_spill] sm:$0xff]  ;;  %v5037_v8 = vld [vmem:[#allocation30_spill] sm:$0xff] }
 0x18b   :  { %v3856_v46 = vadd.f32 %v3732_v33, %v5034_v41  ;;  %v1497_v55 = vadd.f32 %v3704_v0, %v5035_v45  ;;  %vm1463_vm9 = vcmp.gt.f32.partialorder %v1462_v26, %v1460_v5  ;;  %v3860_v59 = vmax.f32 %v1460_v5, %v1462_v26 }
 0x18c   :  { %v1492_v60 = vsel %vm1490_vm7, 4, %v1488_v58  ;;  %vm1494_vm12 = vcmp.gt.f32.partialorder %v1493_v10, %v1491_v23  ;;  %v1495_v47 = vmax.f32 %v1491_v23, %v1493_v10  ;;  %v1519_v36 = vsel %vm1517_vm8, 2, %v1515_v19  ;;  %v5040_v58 = vld [vmem:[#allocation93_spill] sm:$0xff] }
 0x18d   :  { %vm1521_vm13 = vcmp.gt.f32.partialorder %v1520_v49, %v1518_v51  ;;  %v1524_v28 = vadd.f32 %v3659_v34, %v5036_v29  ;;  %v1522_v35 = vmax.f32 %v1518_v51, %v1520_v49  ;;  %v1546_v30 = vadd.f32 %v3563_v22, %v5037_v8  ;;  %v1436_v19 = vld [vmem:[#allocation7 + $0x150] sm:$0xff] }
 0x18e   :  { %v1547_v41 = vadd.f32 %v3617_v43, %v5038_v42  ;;  %v3870_v45 = vadd.f32 %v3629_v11, %v5039_v7  ;;  %v1433_v26 = vmax.f32 %v1429_v3, %v3829_v16  ;;  %v1438_v5 = vshll.u32 %v1434_v54, 6  ;;  %v5041_v16 = vld [vmem:[#allocation85_spill] sm:$0xff] }
 0x18f   :  { %v1465_v23 = vsel %vm1463_vm9, 6, %v1461_v53  ;;  %v1501_v10 = vadd.f32 %v3732_v33, %v5040_v58  ;;  %vm1467_vm15 = vcmp.gt.f32.partialorder %v3856_v46, %v3860_v59  ;;  %v1496_v29 = vsel %vm1494_vm12, 5, %v1492_v60 }
 0x190   :  { %v1549_v8 = vmax.f32 %v1546_v30, %v1547_v41  ;;  %v3879_v42 = vadd.f32 %v3643_v13, %v4979_v15  ;;  %vm1498_vm0 = vcmp.gt.f32.partialorder %v1497_v55, %v1495_v47  ;;  %v1499_v7 = vmax.f32 %v1495_v47, %v1497_v55 }
 0x191   :  { %v1523_v4 = vsel %vm1521_vm13, 3, %v1519_v36  ;;  %v1528_v3 = vadd.f32 %v3680_v27, %v5041_v16  ;;  %vm1525_vm1 = vcmp.gt.f32.partialorder %v1524_v28, %v1522_v35  ;;  %v1526_v54 = vmax.f32 %v1522_v35, %v1524_v28  ;;  %v1506_v16 = vld [vmem:[#allocation7 + $0x160] sm:$0xff] }
 0x192   :  { %v3885_v53 = vmax.f32 %v1549_v8, %v3870_v45  ;;  %v3889_v60 = vadd.f32 %v3659_v34, %v2733_v44  ;;  %v3895_v15 = vsel %vm1337_vm3, %v3825_v1, %v3752_v39  ;;  %v3897_v51 = vadd.f32 %v1436_v19, %v1433_v26 }
 0x193   :  { %v1439_v36 = vor.u32 %v1438_v5, %v3833_v18  ;;  %v1469_v49 = vsel %vm1467_vm15, 7, %v1465_v23  ;;  %v1500_v55 = vsel %vm1498_vm0, 6, %v1496_v29  ;;  %vm1502_vm2 = vcmp.gt.f32.partialorder %v1501_v10, %v1499_v7  ;;  %v5042_v23 = vld [vmem:[#allocation47_spill] sm:$0xff] }
 0x194   :  { %v3902_v47 = vmax.f32 %v3885_v53, %v3879_v42  ;;  %v3906_v28 = vadd.f32 %v3680_v27, %v2884_v20  ;;  %v1527_v35 = vsel %vm1525_vm1, 4, %v1523_v4  ;;  %vm1529_vm4 = vcmp.gt.f32.partialorder %v1528_v3, %v1526_v54 }
 0x195   :  { %v1532_v39 = vadd.f32 %v3704_v0, %v4978_v56  ;;  %v3912_v26 = vadd.f32 %v3563_v22, %v2616_v9  ;;  %v1530_v18 = vmax.f32 %v1526_v54, %v1528_v3  ;;  %v1582_v5 = vadd.f32 %v3617_v43, %v4894_v38  ;;  %v1471_v9 = vld [vmem:[#allocation7 + $0x158] sm:$0xff] }
 0x196   :  { %v3916_v29 = vmax.f32 %v3902_v47, %v3889_v60  ;;  %v3922_v19 = vadd.f32 %v3629_v11, %v5042_v23  ;;  %v3928_v4 = vsel %vm1337_vm3, %v3897_v51, %v3762_v37  ;;  %v1468_v22 = vmax.f32 %v3860_v59, %v3856_v46  ;;  %v5044_v43 = vld [vmem:[#allocation78_spill] sm:$0xff] }
 0x197   :  { %5043 = vst [vmem:[#allocation89_spill] sm:$0xff] %v3928_v4  ;;  %v1473_v20 = vshll.u32 %v1469_v49, 9  ;;  %vm1548_vm6 = vcmp.gt.f32.partialorder %v1547_v41, %v1546_v30  ;;  %v3938_v11 = vadd.f32 %v3704_v0, %v5044_v43  ;;  %v3941_v23 = vmax.f32 %v3912_v26, %v1582_v5  ;;  %v5046_v49 = vld [vmem:[#allocation94_spill] sm:$0xff] }
 0x198   :  { %v3934_v44 = vmax.f32 %v3916_v29, %v3906_v28  ;;  %v3945_v37 = vadd.f32 %v3643_v13, %v4856_v52  ;;  %v1503_v38 = vmax.f32 %v1499_v7, %v1501_v10  ;;  %v3948_v46 = vsel %vm1502_vm2, 7, %v1500_v55 }
 0x199   :  { %5045 = vst [vmem:[#allocation69_spill] sm:$0xff] %v3948_v46  ;;  %v1531_v59 = vsel %vm1529_vm4, 5, %v1527_v35  ;;  %v1536_v56 = vadd.f32 %v3732_v33, %v5046_v49  ;;  %vm1533_vm7 = vcmp.gt.f32.partialorder %v1532_v39, %v1530_v18  ;;  %v1534_v43 = vmax.f32 %v1530_v18, %v1532_v39  ;;  %v1541_v35 = vld [vmem:[#allocation7 + $0x168] sm:$0xff] }
 0x19a   :  { %v3955_v4 = vmax.f32 %v3941_v23, %v3922_v19  ;;  %v3959_v13 = vadd.f32 %v3659_v34, %v4898_v31  ;;  %v3961_v52 = vadd.f32 %v1471_v9, %v1468_v22  ;;  %v3963_v7 = vor.u32 %v1473_v20, %v1439_v36  ;;  %v5050_v9 = vld [vmem:[#allocation87_spill] sm:$0xff]  ;;  %v1576_v22 = vld [vmem:[#allocation7 + $0x170] sm:$0xff] }
 0x19b   :  { %v1550_v10 = vsel %vm1548_vm6, 1, %v4835_v17  ;;  %vm1552_vm8 = vcmp.gt.f32.partialorder %v3870_v45, %v1549_v8  ;;  %v3970_v3 = vmax.f32 %v3934_v44, %v3938_v11  ;;  %v3974_v54 = vadd.f32 %v3732_v33, %v4896_v12  ;;  %v5056_v45 = vld [vmem:[#allocation48_spill] sm:$0xff] }
 0x19c   :  { %5047 = vst [vmem:[#allocation91_spill] sm:$0xff] %v3963_v7  ;;  %v3978_v34 = vmax.f32 %v3955_v4, %v3945_v37  ;;  %v3982_v20 = vadd.f32 %v3680_v27, %v5050_v9  ;;  %v3988_v30 = vsel %vm1337_vm3, %v3961_v52, %v3767_v63  ;;  %v3990_v41 = vadd.f32 %v1506_v16, %v1503_v38 }
 0x19d   :  { %5048 = vst [vmem:[#allocation72_spill] sm:$0xff] %v3970_v3  ;;  %5049 = vst [vmem:[#allocation92_spill] sm:$0xff] %v3974_v54  ;;  %v1535_v8 = vsel %vm1533_vm7, 6, %v1531_v59  ;;  %vm1537_vm9 = vcmp.gt.f32.partialorder %v1536_v56, %v1534_v43  ;;  %v1538_v36 = vmax.f32 %v1534_v43, %v1536_v56  ;;  %v3999_v27 = vadd.f32 %v3704_v0, %v4899_v25 }
 0x19e   :  { %5051 = vst [vmem:[#allocation73_spill] sm:$0xff] %v3982_v20  ;;  %v3995_v55 = vmax.f32 %v3978_v34, %v3959_v13  ;;  %v1554_v39 = vsel %vm1552_vm8, 2, %v1550_v10  ;;  %v1621_v63 = vadd.f32 %v3803_v21, %v4939_v62  ;;  %v1622_v38 = vadd.f32 %v3825_v1, %v4940_v50 }
 0x19f   :  { %5053 = vst [vmem:[#allocation76_spill] sm:$0xff] %v3999_v27  ;;  %v1626_v16 = vadd.f32 %v3897_v51, %v4941_v32  ;;  %vm1556_vm12 = vcmp.gt.f32.partialorder %v3879_v42, %v3885_v53  ;;  %v1573_v18 = vmax.f32 %v3970_v3, %v3974_v54  ;;  %vm1583_vm13 = vcmp.gt.f32.partialorder %v1582_v5, %v3912_v26  ;;  %v1611_v5 = vld [vmem:[#allocation7 + $0x178] sm:$0xff] }
 0x1a0   :  { %5052 = vst [vmem:[#allocation95_spill] sm:$0xff] %v3995_v55  ;;  %v4014_v0 = vmax.f32 %v3995_v55, %v3982_v20  ;;  %v4018_v59 = vadd.f32 %v3732_v33, %v4938_v40  ;;  %vm1623_vm15 = vcmp.gt.f32.partialorder %v1622_v38, %v1621_v63  ;;  %v1624_v10 = vmax.f32 %v1621_v63, %v1622_v38  ;;  %v5077_v55 = vld [vmem:[#allocation58_spill] sm:$0xff] }
 0x1a1   :  { %v1630_v46 = vadd.f32 %v3961_v52, %v5056_v45  ;;  %v4026_v42 = vsel %vm1337_vm3, %v3990_v41, %v3781_v14  ;;  %v4029_v53 = vsel %vm1537_vm9, 7, %v1535_v8  ;;  %v4031_v7 = vadd.f32 %v1541_v35, %v1538_v36 }
 0x1a2   :  { %5054 = vst [vmem:[#allocation96_spill] sm:$0xff] %v4014_v0  ;;  %5055 = vst [vmem:[#allocation77_spill] sm:$0xff] %v4018_v59  ;;  %v4035_v33 = vmax.f32 %v4014_v0, %v3999_v27  ;;  %v1558_v54 = vsel %vm1556_vm12, 3, %v1554_v39  ;;  %vm1560_vm0 = vcmp.gt.f32.partialorder %v3889_v60, %v3902_v47  ;;  %v1628_v63 = vmax.f32 %v1624_v10, %v1626_v16  ;;  %v5059_v47 = vld [vmem:[#allocation25_spill] sm:$0xff]  ;;  %v5067_v27 = vld [vmem:[#allocation67_spill] sm:$0xff] }
 0x1a3   :  { %5057 = vst [vmem:[#allocation98_spill] sm:$0xff] %v4029_v53  ;;  %v1634_v38 = vadd.f32 %v3990_v41, %v4996_v6  ;;  %v4041_v3 = vadd.f32 %v1576_v22, %v1573_v18  ;;  %v1585_v56 = vsel %vm1583_vm13, 1, %v4835_v17  ;;  %v1625_v14 = vsel %vm1623_vm15, 1, %v4835_v17  ;;  %v5060_v39 = vld [vmem:[#allocation33_spill] sm:$0xff] }
 0x1a4   :  { %5058 = vst [vmem:[#allocation101_spill] sm:$0xff] %v4035_v33  ;;  %vm1627_vm1 = vcmp.gt.f32.partialorder %v1626_v16, %v1624_v10  ;;  %vm1587_vm2 = vcmp.gt.f32.partialorder %v3922_v19, %v3941_v23  ;;  %v1608_v43 = vmax.f32 %v4035_v33, %v4018_v59  ;;  %v1632_v60 = vmax.f32 %v1628_v63, %v1630_v46  ;;  %v5061_v18 = vld [vmem:[#allocation41_spill] sm:$0xff] }
 0x1a5   :  { %v1654_v8 = vadd.f32 %v3803_v21, %v5059_v47  ;;  %v4057_v36 = vsel %vm1337_vm3, %v4031_v7, %v3786_v61  ;;  %v1562_v26 = vsel %vm1560_vm0, 4, %v1558_v54  ;;  %v1638_v35 = vadd.f32 %v4031_v7, %v5001_v48  ;;  %v5062_v61 = vld [vmem:[#allocation64_spill] sm:$0xff] }
 0x1a6   :  { %v1655_v23 = vadd.f32 %v3825_v1, %v5060_v39  ;;  %v1629_v19 = vsel %vm1627_vm1, 2, %v1625_v14  ;;  %vm1631_vm4 = vcmp.gt.f32.partialorder %v1630_v46, %v1628_v63  ;;  %v1636_v16 = vmax.f32 %v1632_v60, %v1634_v38  ;;  %v5063_v46 = vld [vmem:[#allocation49_spill] sm:$0xff] }
 0x1a7   :  { %v1659_v22 = vadd.f32 %v3897_v51, %v5061_v18  ;;  %vm1564_vm6 = vcmp.gt.f32.partialorder %v3906_v28, %v3916_v29  ;;  %v1589_v10 = vsel %vm1587_vm2, 2, %v1585_v56  ;;  %vm1591_vm7 = vcmp.gt.f32.partialorder %v3945_v37, %v3955_v4  ;;  %v5064_v37 = vld [vmem:[#allocation57_spill] sm:$0xff] }
 0x1a8   :  { %v4071_v54 = vadd.f32 %v4041_v3, %v5062_v61  ;;  %v4073_v59 = vadd.f32 %v1611_v5, %v1608_v43  ;;  %vm1656_vm8 = vcmp.gt.f32.partialorder %v1655_v23, %v1654_v8  ;;  %v1657_v14 = vmax.f32 %v1654_v8, %v1655_v23 }
 0x1a9   :  { %v1663_v63 = vadd.f32 %v3961_v52, %v5063_v46  ;;  %v1633_v33 = vsel %vm1631_vm4, 3, %v1629_v19  ;;  %vm1635_vm9 = vcmp.gt.f32.partialorder %v1634_v38, %v1632_v60  ;;  %v4077_v53 = vmax.f32 %v1636_v16, %v1638_v35  ;;  %v5065_v38 = vld [vmem:[#allocation81_spill] sm:$0xff] }
 0x1aa   :  { %v1658_v28 = vsel %vm1656_vm8, 1, %v4835_v17  ;;  %v1566_v29 = vsel %vm1564_vm6, 5, %v1562_v26  ;;  %vm1660_vm12 = vcmp.gt.f32.partialorder %v1659_v22, %v1657_v14  ;;  %v1661_v4 = vmax.f32 %v1657_v14, %v1659_v22  ;;  %v5066_v22 = vld [vmem:[#allocation26_spill] sm:$0xff] }
 0x1ab   :  { %v1667_v56 = vadd.f32 %v3990_v41, %v5064_v37  ;;  %vm1568_vm13 = vcmp.gt.f32.partialorder %v3938_v11, %v3934_v44  ;;  %v1593_v43 = vsel %vm1591_vm7, 3, %v1589_v10  ;;  %vm1595_vm15 = vcmp.gt.f32.partialorder %v3959_v13, %v3978_v34  ;;  %v1651_v37 = vld [vmem:[#allocation7 + $0x180] sm:$0xff] }
 0x1ac   :  { %v1662_v8 = vsel %vm1660_vm12, 2, %v1658_v28  ;;  %v1637_v5 = vsel %vm1635_vm9, 4, %v1633_v33  ;;  %v4088_v60 = vadd.f32 %v4073_v59, %v5065_v38  ;;  %vm1664_vm0 = vcmp.gt.f32.partialorder %v1663_v63, %v1661_v4  ;;  %v5068_v28 = vld [vmem:[#allocation34_spill] sm:$0xff] }
 0x1ad   :  { %v1665_v26 = vmax.f32 %v1661_v4, %v1663_v63  ;;  %vm1639_vm1 = vcmp.gt.f32.partialorder %v1638_v35, %v1636_v16  ;;  %v4092_v23 = vmax.f32 %v4077_v53, %v4071_v54  ;;  %v1666_v19 = vsel %vm1664_vm0, 3, %v1662_v8  ;;  %v5070_v16 = vld [vmem:[#allocation63_spill] sm:$0xff]  ;;  %v5082_v38 = vld [vmem:[#allocation70_spill] sm:$0xff] }
 0x1ae   :  { %v1689_v10 = vadd.f32 %v3803_v21, %v5066_v22  ;;  %v1671_v33 = vadd.f32 %v4031_v7, %v5067_v27  ;;  %v1690_v0 = vadd.f32 %v3825_v1, %v5068_v28  ;;  %v4103_v35 = vsel %vm1568_vm13, 6, %v1566_v29  ;;  %v5079_v22 = vld [vmem:[#allocation80_spill] sm:$0xff] }
 0x1af   :  { %vm1668_vm2 = vcmp.gt.f32.partialorder %v1667_v56, %v1665_v26  ;;  %v1669_v14 = vmax.f32 %v1665_v26, %v1667_v56  ;;  %5069 = vst [vmem:[#allocation56_spill] sm:$0xff] %v4103_v35  ;;  %v4109_v63 = vsel %vm1337_vm3, %v4041_v3, %v5070_v16  ;;  %v4114_v4 = vsel %vm1595_vm15, 4, %v1593_v43  ;;  %v5073_v56 = vld [vmem:[#allocation42_spill] sm:$0xff]  ;;  %v5075_v43 = vld [vmem:[#allocation65_spill] sm:$0xff] }
 0x1b0   :  { %5071 = vst [vmem:[#allocation102_spill] sm:$0xff] %v4109_v63  ;;  %5072 = vst [vmem:[#allocation103_spill] sm:$0xff] %v4114_v4  ;;  %v1694_v8 = vadd.f32 %v3897_v51, %v5073_v56  ;;  %v1641_v26 = vsel %vm1639_vm1, 5, %v1637_v5  ;;  %vm1643_vm4 = vcmp.gt.f32.partialorder %v4071_v54, %v4077_v53  ;;  %v1670_v44 = vsel %vm1668_vm2, 4, %v1666_v19  ;;  %v5074_v16 = vld [vmem:[#allocation50_spill] sm:$0xff]  ;;  %v5083_v63 = vld [vmem:[#allocation51_spill] sm:$0xff] }
 0x1b1   :  { %vm1691_vm6 = vcmp.gt.f32.partialorder %v1690_v0, %v1689_v10  ;;  %vm1672_vm7 = vcmp.gt.f32.partialorder %v1671_v33, %v1669_v14  ;;  %v1692_v11 = vmax.f32 %v1689_v10, %v1690_v0  ;;  %v1698_v35 = vadd.f32 %v3961_v52, %v5074_v16  ;;  %v5076_v5 = vld [vmem:[#allocation82_spill] sm:$0xff]  ;;  %v5078_v10 = vld [vmem:[#allocation27_spill] sm:$0xff] }
 0x1b2   :  { %v1693_v29 = vsel %vm1691_vm6, 1, %v4835_v17  ;;  %v1648_v13 = vmax.f32 %v4092_v23, %v4088_v60  ;;  %v1673_v34 = vmax.f32 %v1669_v14, %v1671_v33  ;;  %v1675_v4 = vadd.f32 %v4041_v3, %v5075_v43  ;;  %v5080_v33 = vld [vmem:[#allocation35_spill] sm:$0xff] }
 0x1b3   :  { %v1679_v20 = vadd.f32 %v4073_v59, %v5076_v5  ;;  %vm1695_vm8 = vcmp.gt.f32.partialorder %v1694_v8, %v1692_v11  ;;  %v1696_v19 = vmax.f32 %v1692_v11, %v1694_v8  ;;  %v1702_v0 = vadd.f32 %v3990_v41, %v5077_v55  ;;  %v5081_v8 = vld [vmem:[#allocation43_spill] sm:$0xff] }
 0x1b4   :  { %v1724_v56 = vadd.f32 %v3803_v21, %v5078_v10  ;;  %vm1620_vm9 = vcmp.eq.s32.totalorder %v4854_v57, 6  ;;  %v1674_v16 = vsel %vm1672_vm7, 5, %v1670_v44  ;;  %v1697_v28 = vsel %vm1695_vm8, 2, %v1693_v29 }
 0x1b5   :  { %v1706_v14 = vadd.f32 %v4031_v7, %v5079_v22  ;;  %v1725_v43 = vadd.f32 %v3825_v1, %v5080_v33  ;;  %vm1676_vm12 = vcmp.gt.f32.partialorder %v1675_v4, %v1673_v34  ;;  %vm1699_vm13 = vcmp.gt.f32.partialorder %v1698_v35, %v1696_v19 }
 0x1b6   :  { %v1700_v5 = vmax.f32 %v1696_v19, %v1698_v35  ;;  %v1729_v11 = vadd.f32 %v3897_v51, %v5081_v8  ;;  %v1677_v55 = vmax.f32 %v1673_v34, %v1675_v4  ;;  %v1701_v27 = vsel %vm1699_vm13, 3, %v1697_v28  ;;  %v5084_v4 = vld [vmem:[#allocation99_spill] sm:$0xff] }
 0x1b7   :  { %v1710_v10 = vadd.f32 %v4041_v3, %v5082_v38  ;;  %vm1726_vm15 = vcmp.gt.f32.partialorder %v1725_v43, %v1724_v56  ;;  %v1727_v29 = vmax.f32 %v1724_v56, %v1725_v43  ;;  %v1678_v46 = vsel %vm1676_vm12, 6, %v1674_v16 }
 0x1b8   :  { %vm1703_vm0 = vcmp.gt.f32.partialorder %v1702_v0, %v1700_v5  ;;  %v1704_v44 = vmax.f32 %v1700_v5, %v1702_v0  ;;  %v1728_v22 = vsel %vm1726_vm15, 1, %v4835_v17  ;;  %vm1680_vm1 = vcmp.gt.f32.partialorder %v1679_v20, %v1677_v55 }
 0x1b9   :  { %v1705_v33 = vsel %vm1703_vm0, 4, %v1701_v27  ;;  %v1733_v35 = vadd.f32 %v3961_v52, %v5083_v63  ;;  %vm1730_vm6 = vcmp.gt.f32.partialorder %v1729_v11, %v1727_v29  ;;  %v1731_v28 = vmax.f32 %v1727_v29, %v1729_v11  ;;  %v1684_v29 = vld [vmem:[#allocation7 + $0x188] sm:$0xff]  ;;  %v1719_v63 = vld [vmem:[#allocation7 + $0x190] sm:$0xff] }
 0x1ba   :  { %vm1707_vm2 = vcmp.gt.f32.partialorder %v1706_v14, %v1704_v44  ;;  %v1708_v19 = vmax.f32 %v1704_v44, %v1706_v14  ;;  %v4149_v34 = vsel %vm1337_vm3, %v4073_v59, %v5084_v4  ;;  %v1645_v56 = vsel %vm1643_vm4, 6, %v1641_v26 }
 0x1bb   :  { %5085 = vst [vmem:[#allocation104_spill] sm:$0xff] %v4149_v34  ;;  %v1732_v16 = vsel %vm1730_vm6, 2, %v1728_v22  ;;  %v1737_v27 = vadd.f32 %v3990_v41, %v5027_v2  ;;  %vm1647_vm7 = vcmp.gt.f32.partialorder %v4088_v60, %v4092_v23  ;;  %v4158_v43 = vadd.f32 %v1651_v37, %v1648_v13  ;;  %v5086_v22 = vld [vmem:[#allocation83_spill] sm:$0xff]  ;;  %v5087_v34 = vld [vmem:[#allocation28_spill] sm:$0xff] }
 0x1bc   :  { %vm1734_vm8 = vcmp.gt.f32.partialorder %v1733_v35, %v1731_v28  ;;  %v1735_v5 = vmax.f32 %v1731_v28, %v1733_v35  ;;  %v1682_v0 = vsel %vm1680_vm1, 7, %v1678_v46  ;;  %v1709_v14 = vsel %vm1707_vm2, 5, %v1705_v33  ;;  %v5088_v13 = vld [vmem:[#allocation36_spill] sm:$0xff]  ;;  %v5091_v60 = vld [vmem:[#allocation71_spill] sm:$0xff] }
 0x1bd   :  { %vm1711_vm12 = vcmp.gt.f32.partialorder %v1710_v10, %v1708_v19  ;;  %v1714_v11 = vadd.f32 %v4073_v59, %v5028_v24  ;;  %v1681_v44 = vmax.f32 %v1677_v55, %v1679_v20  ;;  %v1712_v53 = vmax.f32 %v1708_v19, %v1710_v10  ;;  %v5089_v35 = vld [vmem:[#allocation68_spill] sm:$0xff] }
 0x1be   :  { %v1736_v54 = vsel %vm1734_vm8, 3, %v1732_v16  ;;  %v1741_v26 = vadd.f32 %v4031_v7, %v5086_v22  ;;  %vm1738_vm4 = vcmp.gt.f32.partialorder %v1737_v27, %v1735_v5  ;;  %v1739_v4 = vmax.f32 %v1735_v5, %v1737_v27  ;;  %v5090_v28 = vld [vmem:[#allocation44_spill] sm:$0xff] }
 0x1bf   :  { %v1759_v37 = vadd.f32 %v3803_v21, %v5087_v34  ;;  %v1760_v46 = vadd.f32 %v3825_v1, %v5088_v13  ;;  %v1649_v33 = vsel %vm1647_vm7, 7, %v1645_v56  ;;  %v4175_v20 = vsel %vm1620_vm9, %v4158_v43, %v5089_v35  ;;  %v5092_v34 = vld [vmem:[#allocation90_spill] sm:$0xff] }
 0x1c0   :  { %v1686_v55 = vshll.u32 %v1682_v0, 3  ;;  %v1713_v10 = vsel %vm1711_vm12, 6, %v1709_v14  ;;  %vm1715_vm13 = vcmp.gt.f32.partialorder %v1714_v11, %v1712_v53  ;;  %v1764_v16 = vadd.f32 %v3897_v51, %v5090_v28 }
 0x1c1   :  { %vm1761_vm15 = vcmp.gt.f32.partialorder %v1760_v46, %v1759_v37  ;;  %v1762_v19 = vmax.f32 %v1759_v37, %v1760_v46  ;;  %v4179_v27 = vadd.f32 %v1684_v29, %v1681_v44  ;;  %v1740_v5 = vsel %vm1738_vm4, 4, %v1736_v54  ;;  %v5093_v46 = vld [vmem:[#allocation52_spill] sm:$0xff] }
 0x1c2   :  { %vm1742_vm0 = vcmp.gt.f32.partialorder %v1741_v26, %v1739_v4  ;;  %v1745_v23 = vadd.f32 %v4041_v3, %v5091_v60  ;;  %v1743_v56 = vmax.f32 %v1739_v4, %v1741_v26  ;;  %v1763_v13 = vsel %vm1761_vm15, 1, %v4835_v17  ;;  %v5094_v29 = vld [vmem:[#allocation60_spill] sm:$0xff] }
 0x1c3   :  { %vm1765_vm1 = vcmp.gt.f32.partialorder %v1764_v16, %v1762_v19  ;;  %v1766_v35 = vmax.f32 %v1762_v19, %v1764_v16  ;;  %v1687_v0 = vor.u32 %v1686_v55, %v1649_v33  ;;  %v1717_v14 = vsel %vm1715_vm13, 7, %v1713_v10  ;;  %v5095_v4 = vld [vmem:[#allocation84_spill] sm:$0xff]  ;;  %v5096_v10 = vld [vmem:[#allocation29_spill] sm:$0xff] }
 0x1c4   :  { %v1749_v37 = vadd.f32 %v4073_v59, %v5092_v34  ;;  %v1768_v28 = vadd.f32 %v3961_v52, %v5093_v46  ;;  %v1744_v44 = vsel %vm1742_vm0, 5, %v1740_v5  ;;  %vm1746_vm2 = vcmp.gt.f32.partialorder %v1745_v23, %v1743_v56  ;;  %v5097_v34 = vld [vmem:[#allocation37_spill] sm:$0xff] }
 0x1c5   :  { %v1767_v54 = vsel %vm1765_vm1, 2, %v1763_v13  ;;  %v1772_v22 = vadd.f32 %v3990_v41, %v5094_v29  ;;  %v1716_v60 = vmax.f32 %v1712_v53, %v1714_v11  ;;  %v1776_v19 = vadd.f32 %v4031_v7, %v5095_v4  ;;  %v5098_v53 = vld [vmem:[#allocation45_spill] sm:$0xff] }
 0x1c6   :  { %vm1769_vm6 = vcmp.gt.f32.partialorder %v1768_v28, %v1766_v35  ;;  %v1770_v26 = vmax.f32 %v1766_v35, %v1768_v28  ;;  %v1721_v33 = vshll.u32 %v1717_v14, 6  ;;  %v1747_v55 = vmax.f32 %v1743_v56, %v1745_v23  ;;  %v5099_v14 = vld [vmem:[#allocation74_spill] sm:$0xff]  ;;  %v5101_v4 = vld [vmem:[#allocation61_spill] sm:$0xff] }
 0x1c7   :  { %v1794_v16 = vadd.f32 %v3803_v21, %v5096_v10  ;;  %v1795_v46 = vadd.f32 %v3825_v1, %v5097_v34  ;;  %v1748_v5 = vsel %vm1746_vm2, 6, %v1744_v44  ;;  %v1771_v2 = vsel %vm1769_vm6, 3, %v1767_v54  ;;  %v5100_v10 = vld [vmem:[#allocation53_spill] sm:$0xff] }
 0x1c8   :  { %vm1773_vm7 = vcmp.gt.f32.partialorder %v1772_v22, %v1770_v26  ;;  %v1774_v13 = vmax.f32 %v1770_v26, %v1772_v22  ;;  %vm1750_vm8 = vcmp.gt.f32.partialorder %v1749_v37, %v1747_v55  ;;  %v1799_v28 = vadd.f32 %v3897_v51, %v5098_v53 }
 0x1c9   :  { %vm1796_vm12 = vcmp.gt.f32.partialorder %v1795_v46, %v1794_v16  ;;  %v1797_v11 = vmax.f32 %v1794_v16, %v1795_v46  ;;  %v1780_v23 = vadd.f32 %v4041_v3, %v5099_v14  ;;  %v1803_v34 = vadd.f32 %v3961_v52, %v5100_v10 }
 0x1ca   :  { %v1778_v35 = vmax.f32 %v1774_v13, %v1776_v19  ;;  %v1798_v56 = vsel %vm1796_vm12, 1, %v4835_v17  ;;  %v1775_v44 = vsel %vm1773_vm7, 4, %v1771_v2  ;;  %vm1777_vm4 = vcmp.gt.f32.partialorder %v1776_v19, %v1774_v13 }
 0x1cb   :  { %vm1800_vm13 = vcmp.gt.f32.partialorder %v1799_v28, %v1797_v11  ;;  %v1801_v22 = vmax.f32 %v1797_v11, %v1799_v28  ;;  %v4207_v46 = vsel %vm1620_vm9, %v4179_v27, %v3895_v15  ;;  %v4209_v54 = vadd.f32 %v1719_v63, %v1716_v60  ;;  %v1754_v15 = vld [vmem:[#allocation7 + $0x198] sm:$0xff] }
 0x1cc   :  { %v1751_v26 = vmax.f32 %v1747_v55, %v1749_v37  ;;  %v1802_v16 = vsel %vm1800_vm13, 2, %v1798_v56  ;;  %v1752_v14 = vsel %vm1750_vm8, 7, %v1748_v5  ;;  %v1807_v2 = vadd.f32 %v3990_v41, %v5101_v4  ;;  %v5102_v63 = vld [vmem:[#allocation30_spill] sm:$0xff]  ;;  %v5103_v37 = vld [vmem:[#allocation89_spill] sm:$0xff] }
 0x1cd   :  { %vm1804_vm15 = vcmp.gt.f32.partialorder %v1803_v34, %v1801_v22  ;;  %v1805_v53 = vmax.f32 %v1801_v22, %v1803_v34  ;;  %v1779_v19 = vsel %vm1777_vm4, 5, %v1775_v44  ;;  %vm1781_vm0 = vcmp.gt.f32.partialorder %v1780_v23, %v1778_v35  ;;  %v5105_v5 = vld [vmem:[#allocation85_spill] sm:$0xff]  ;;  %v5107_v44 = vld [vmem:[#allocation46_spill] sm:$0xff] }
 0x1ce   :  { %v1782_v13 = vmax.f32 %v1778_v35, %v1780_v23  ;;  %v1784_v11 = vadd.f32 %v4073_v59, %v5040_v58  ;;  %v1722_v28 = vor.u32 %v1721_v33, %v1687_v0  ;;  %v1806_v10 = vsel %vm1804_vm15, 3, %v1802_v16  ;;  %v5106_v23 = vld [vmem:[#allocation38_spill] sm:$0xff] }
 0x1cf   :  { %vm1808_vm1 = vcmp.gt.f32.partialorder %v1807_v2, %v1805_v53  ;;  %v1829_v60 = vadd.f32 %v3803_v21, %v5102_v63  ;;  %v4222_v34 = vsel %vm1620_vm9, %v4209_v54, %v5103_v37  ;;  %v1756_v55 = vshll.u32 %v1752_v14, 9  ;;  %v1789_v37 = vld [vmem:[#allocation7 + $0x1a0] sm:$0xff] }
 0x1d0   :  { %5104 = vst [vmem:[#allocation97_spill] sm:$0xff] %v4222_v34  ;;  %v1811_v35 = vadd.f32 %v4031_v7, %v5105_v5  ;;  %v1830_v56 = vadd.f32 %v3825_v1, %v5106_v23  ;;  %v1783_v0 = vsel %vm1781_vm0, 6, %v1779_v19  ;;  %vm1785_vm2 = vcmp.gt.f32.partialorder %v1784_v11, %v1782_v13  ;;  %v5108_v5 = vld [vmem:[#allocation54_spill] sm:$0xff]  ;;  %v5109_v34 = vld [vmem:[#allocation75_spill] sm:$0xff] }
 0x1d1   :  { %v1809_v33 = vmax.f32 %v1805_v53, %v1807_v2  ;;  %v1834_v22 = vadd.f32 %v3897_v51, %v5107_v44  ;;  %v4230_v16 = vadd.f32 %v1754_v15, %v1751_v26  ;;  %v1786_v63 = vmax.f32 %v1782_v13, %v1784_v11  ;;  %v5110_v13 = vld [vmem:[#allocation62_spill] sm:$0xff]  ;;  %v5111_v44 = vld [vmem:[#allocation31_spill] sm:$0xff] }
 0x1d2   :  { %v1810_v4 = vsel %vm1808_vm1, 4, %v1806_v10  ;;  %vm1831_vm6 = vcmp.gt.f32.partialorder %v1830_v56, %v1829_v60  ;;  %v1832_v14 = vmax.f32 %v1829_v60, %v1830_v56  ;;  %v1838_v29 = vadd.f32 %v3961_v52, %v5108_v5 }
 0x1d3   :  { %vm1812_vm7 = vcmp.gt.f32.partialorder %v1811_v35, %v1809_v33  ;;  %v1833_v58 = vsel %vm1831_vm6, 1, %v4835_v17  ;;  %v1757_v23 = vor.u32 %v1756_v55, %v1722_v28  ;;  %v1787_v19 = vsel %vm1785_vm2, 7, %v1783_v0  ;;  %v5112_v0 = vld [vmem:[#allocation86_spill] sm:$0xff] }
 0x1d4   :  { %v1815_v53 = vadd.f32 %v4041_v3, %v5109_v34  ;;  %v1819_v26 = vadd.f32 %v4073_v59, %v5046_v49  ;;  %v1813_v2 = vmax.f32 %v1809_v33, %v1811_v35  ;;  %vm1835_vm8 = vcmp.gt.f32.partialorder %v1834_v22, %v1832_v14  ;;  %v5113_v33 = vld [vmem:[#allocation39_spill] sm:$0xff] }
 0x1d5   :  { %v1836_v10 = vmax.f32 %v1832_v14, %v1834_v22  ;;  %v1842_v11 = vadd.f32 %v3990_v41, %v5110_v13  ;;  %v4241_v15 = vadd.f32 %v1789_v37, %v1786_v63  ;;  %v1814_v60 = vsel %vm1812_vm7, 5, %v1810_v4  ;;  %v5114_v14 = vld [vmem:[#allocation47_spill] sm:$0xff]  ;;  %v5115_v4 = vld [vmem:[#allocation78_spill] sm:$0xff] }
 0x1d6   :  { %v1837_v56 = vsel %vm1835_vm8, 2, %v1833_v58  ;;  %v1864_v28 = vadd.f32 %v3803_v21, %v5111_v44  ;;  %vm1816_vm12 = vcmp.gt.f32.partialorder %v1815_v53, %v1813_v2  ;;  %v1846_v5 = vadd.f32 %v4031_v7, %v5112_v0 }
 0x1d7   :  { %vm1839_vm4 = vcmp.gt.f32.partialorder %v1838_v29, %v1836_v10  ;;  %v1840_v55 = vmax.f32 %v1836_v10, %v1838_v29  ;;  %v1791_v49 = vshll.u32 %v1787_v19, 12  ;;  %v1865_v22 = vadd.f32 %v3825_v1, %v5113_v33  ;;  %v5116_v10 = vld [vmem:[#allocation55_spill] sm:$0xff] }
 0x1d8   :  { %v1841_v35 = vsel %vm1839_vm4, 3, %v1837_v56  ;;  %v1869_v63 = vadd.f32 %v3897_v51, %v5114_v14  ;;  %v1817_v37 = vmax.f32 %v1813_v2, %v1815_v53  ;;  %v1850_v21 = vadd.f32 %v4041_v3, %v5115_v4 }
 0x1d9   :  { %vm1843_vm13 = vcmp.gt.f32.partialorder %v1842_v11, %v1840_v55  ;;  %v1844_v58 = vmax.f32 %v1840_v55, %v1842_v11  ;;  %v1818_v44 = vsel %vm1816_vm12, 6, %v1814_v60  ;;  %vm1866_vm15 = vcmp.gt.f32.partialorder %v1865_v22, %v1864_v28 }
 0x1da   :  { %v1867_v29 = vmax.f32 %v1864_v28, %v1865_v22  ;;  %v1873_v0 = vadd.f32 %v3961_v52, %v5116_v10  ;;  %vm1820_vm0 = vcmp.gt.f32.partialorder %v1819_v26, %v1817_v37  ;;  %v1845_v19 = vsel %vm1843_vm13, 4, %v1841_v35 }
 0x1db   :  { %v1848_v56 = vmax.f32 %v1844_v58, %v1846_v5  ;;  %v1877_v1 = vadd.f32 %v3990_v41, %v4898_v31  ;;  %vm1847_vm1 = vcmp.gt.f32.partialorder %v1846_v5, %v1844_v58  ;;  %v1868_v51 = vsel %vm1866_vm15, 1, %v4835_v17  ;;  %v1824_v5 = vld [vmem:[#allocation7 + $0x1a8] sm:$0xff] }
 0x1dc   :  { %vm1870_vm2 = vcmp.gt.f32.partialorder %v1869_v63, %v1867_v29  ;;  %v1871_v53 = vmax.f32 %v1867_v29, %v1869_v63  ;;  %v4262_v2 = vsel %vm1620_vm9, %v4230_v16, %v3988_v30  ;;  %v1821_v11 = vmax.f32 %v1817_v37, %v1819_v26  ;;  %v1859_v26 = vld [vmem:[#allocation7 + $0x1b0] sm:$0xff] }
 0x1dd   :  { %v1852_v60 = vmax.f32 %v1848_v56, %v1850_v21  ;;  %v1854_v52 = vadd.f32 %v4073_v59, %v4896_v12  ;;  %v4266_v28 = vor.u32 %v1791_v49, %v1757_v23  ;;  %v4272_v41 = vsel %vm1620_vm9, %v4241_v15, %v4026_v42 }
 0x1de   :  { %v1875_v55 = vmax.f32 %v1871_v53, %v1873_v0  ;;  %v1881_v35 = vadd.f32 %v4031_v7, %v5050_v9  ;;  %v4277_v30 = vsel %vm1820_vm0, 7, %v1818_v44  ;;  %v1849_v22 = vsel %vm1847_vm1, 5, %v1845_v19 }
 0x1df   :  { %v1872_v63 = vsel %vm1870_vm2, 2, %v1868_v51  ;;  %vm1874_vm6 = vcmp.gt.f32.partialorder %v1873_v0, %v1871_v53  ;;  %vm1851_vm7 = vcmp.gt.f32.partialorder %v1850_v21, %v1848_v56  ;;  %v1885_v23 = vadd.f32 %v4041_v3, %v4899_v25 }
 0x1e0   :  { %v1879_v49 = vmax.f32 %v1875_v55, %v1877_v1  ;;  %v1904_v42 = vadd.f32 %v4158_v43, %v4939_v62  ;;  %v4283_v58 = vadd.f32 %v1824_v5, %v1821_v11  ;;  %v1856_v29 = vmax.f32 %v1852_v60, %v1854_v52 }
 0x1e1   :  { %v4287_v7 = vadd.f32 %v4073_v59, %v4938_v40  ;;  %v1905_v44 = vadd.f32 %v4179_v27, %v4940_v50  ;;  %v1876_v0 = vsel %vm1874_vm6, 3, %v1872_v63  ;;  %vm1878_vm8 = vcmp.gt.f32.partialorder %v1877_v1, %v1875_v55 }
 0x1e2   :  { %v1883_v37 = vmax.f32 %v1879_v49, %v1881_v35  ;;  %v1909_v3 = vadd.f32 %v4209_v54, %v4941_v32  ;;  %v1826_v21 = vshll.u32 %v4277_v30, 15  ;;  %v1853_v62 = vsel %vm1851_vm7, 6, %v1849_v22 }
 0x1e3   :  { %vm1855_vm12 = vcmp.gt.f32.partialorder %v1854_v52, %v1852_v60  ;;  %vm1906_vm4 = vcmp.gt.f32.partialorder %v1905_v44, %v1904_v42  ;;  %v1907_v56 = vmax.f32 %v1904_v42, %v1905_v44  ;;  %v1913_v50 = vadd.f32 %v4230_v16, %v5056_v45  ;;  %v1894_v45 = vld [vmem:[#allocation7 + $0x1b8] sm:$0xff] }
 0x1e4   :  { %v4294_v19 = vmax.f32 %v1883_v37, %v1885_v23  ;;  %v1908_v59 = vsel %vm1906_vm4, 1, %v4835_v17  ;;  %v4303_v1 = vsel %vm1620_vm9, %v4283_v58, %v4057_v36  ;;  %v4305_v32 = vadd.f32 %v1859_v26, %v1856_v29 }
 0x1e5   :  { %v1880_v51 = vsel %vm1878_vm8, 4, %v1876_v0  ;;  %vm1882_vm13 = vcmp.gt.f32.partialorder %v1881_v35, %v1879_v49  ;;  %vm1910_vm15 = vcmp.gt.f32.partialorder %v1909_v3, %v1907_v56  ;;  %v1911_v11 = vmax.f32 %v1907_v56, %v1909_v3  ;;  %v5117_v0 = vld [vmem:[#allocation102_spill] sm:$0xff] }
 0x1e6   :  { %v1891_v53 = vmax.f32 %v4294_v19, %v4287_v7  ;;  %v1917_v60 = vadd.f32 %v4241_v15, %v4996_v6  ;;  %v4311_v52 = vsel %vm1855_vm12, 7, %v1853_v62  ;;  %v1912_v5 = vsel %vm1910_vm15, 2, %v1908_v59  ;;  %v5118_v59 = vld [vmem:[#allocation49_spill] sm:$0xff] }
 0x1e7   :  { %v1937_v36 = vadd.f32 %v4158_v43, %v5059_v47  ;;  %v1938_v55 = vadd.f32 %v4179_v27, %v5060_v39  ;;  %v1884_v22 = vsel %vm1882_vm13, 5, %v1880_v51  ;;  %vm1914_vm0 = vcmp.gt.f32.partialorder %v1913_v50, %v1911_v11 }
 0x1e8   :  { %v1915_v35 = vmax.f32 %v1911_v11, %v1913_v50  ;;  %v1921_v63 = vadd.f32 %v4283_v58, %v5001_v48  ;;  %v1916_v49 = vsel %vm1914_vm0, 3, %v1912_v5  ;;  %v1942_v6 = vadd.f32 %v4209_v54, %v5061_v18 }
 0x1e9   :  { %vm1939_vm1 = vcmp.gt.f32.partialorder %v1938_v55, %v1937_v36  ;;  %v1940_v42 = vmax.f32 %v1937_v36, %v1938_v55  ;;  %v4321_v29 = vadd.f32 %v1894_v45, %v1891_v53  ;;  %v1925_v47 = vadd.f32 %v4305_v32, %v5062_v61  ;;  %v5119_v61 = vld [vmem:[#allocation57_spill] sm:$0xff]  ;;  %v5121_v45 = vld [vmem:[#allocation67_spill] sm:$0xff] }
 0x1ea   :  { %vm1918_vm2 = vcmp.gt.f32.partialorder %v1917_v60, %v1915_v35  ;;  %v1919_v44 = vmax.f32 %v1915_v35, %v1917_v60  ;;  %vm1886_vm6 = vcmp.gt.f32.partialorder %v1885_v23, %v1883_v37  ;;  %v1941_v26 = vsel %vm1939_vm1, 1, %v4835_v17  ;;  %v5120_v53 = vld [vmem:[#allocation81_spill] sm:$0xff] }
 0x1eb   :  { %v1920_v39 = vsel %vm1918_vm2, 4, %v1916_v49  ;;  %vm1943_vm7 = vcmp.gt.f32.partialorder %v1942_v6, %v1940_v42  ;;  %v4330_v48 = vsel %vm1620_vm9, %v4305_v32, %v5117_v0  ;;  %v1944_v3 = vmax.f32 %v1940_v42, %v1942_v6  ;;  %v5122_v36 = vld [vmem:[#allocation65_spill] sm:$0xff]  ;;  %v5123_v49 = vld [vmem:[#allocation82_spill] sm:$0xff] }
 0x1ec   :  { %vm1922_vm8 = vcmp.gt.f32.partialorder %v1921_v63, %v1919_v44  ;;  %v1923_v18 = vmax.f32 %v1919_v44, %v1921_v63  ;;  %v1945_v56 = vsel %vm1943_vm7, 2, %v1941_v26  ;;  %v1946_v50 = vadd.f32 %v4230_v16, %v5118_v59  ;;  %v5124_v42 = vld [vmem:[#allocation26_spill] sm:$0xff] }
 0x1ed   :  { %v1924_v62 = vsel %vm1922_vm8, 5, %v1920_v39  ;;  %v1950_v23 = vadd.f32 %v4241_v15, %v5119_v61  ;;  %v4336_v37 = vsel %vm1886_vm6, 6, %v1884_v22  ;;  %v1929_v11 = vadd.f32 %v4321_v29, %v5120_v53  ;;  %v5127_v59 = vld [vmem:[#allocation50_spill] sm:$0xff] }
 0x1ee   :  { %vm1926_vm12 = vcmp.gt.f32.partialorder %v1925_v47, %v1923_v18  ;;  %v1927_v51 = vmax.f32 %v1923_v18, %v1925_v47  ;;  %vm1903_vm4 = vcmp.eq.s32.totalorder %v4854_v57, 7  ;;  %vm1947_vm13 = vcmp.gt.f32.partialorder %v1946_v50, %v1944_v3  ;;  %v5125_v47 = vld [vmem:[#allocation34_spill] sm:$0xff] }
 0x1ef   :  { %v1948_v60 = vmax.f32 %v1944_v3, %v1946_v50  ;;  %v1954_v5 = vadd.f32 %v4283_v58, %v5121_v45  ;;  %v1958_v55 = vadd.f32 %v4305_v32, %v5122_v36  ;;  %v1928_v35 = vsel %vm1926_vm12, 6, %v1924_v62  ;;  %v5126_v18 = vld [vmem:[#allocation42_spill] sm:$0xff] }
 0x1f0   :  { %v1949_v63 = vsel %vm1947_vm13, 3, %v1945_v56  ;;  %v1962_v22 = vadd.f32 %v4321_v29, %v5123_v49  ;;  %v1972_v6 = vadd.f32 %v4158_v43, %v5124_v42  ;;  %vm1930_vm15 = vcmp.gt.f32.partialorder %v1929_v11, %v1927_v51  ;;  %v1934_v56 = vld [vmem:[#allocation7 + $0x1c0] sm:$0xff]  ;;  %v1967_v42 = vld [vmem:[#allocation7 + $0x1c8] sm:$0xff] }
 0x1f1   :  { %vm1951_vm0 = vcmp.gt.f32.partialorder %v1950_v23, %v1948_v60  ;;  %v1952_v44 = vmax.f32 %v1948_v60, %v1950_v23  ;;  %v1973_v39 = vadd.f32 %v4179_v27, %v5125_v47  ;;  %v1931_v26 = vmax.f32 %v1927_v51, %v1929_v11  ;;  %v5128_v60 = vld [vmem:[#allocation58_spill] sm:$0xff] }
 0x1f2   :  { %v1953_v0 = vsel %vm1951_vm0, 4, %v1949_v63  ;;  %v1977_v3 = vadd.f32 %v4209_v54, %v5126_v18  ;;  %v1981_v62 = vadd.f32 %v4230_v16, %v5127_v59  ;;  %v1932_v53 = vsel %vm1930_vm15, 7, %v1928_v35  ;;  %v5129_v18 = vld [vmem:[#allocation80_spill] sm:$0xff]  ;;  %v5130_v59 = vld [vmem:[#allocation27_spill] sm:$0xff] }
 0x1f3   :  { %vm1955_vm1 = vcmp.gt.f32.partialorder %v1954_v5, %v1952_v44  ;;  %v1956_v50 = vmax.f32 %v1952_v44, %v1954_v5  ;;  %vm1974_vm2 = vcmp.gt.f32.partialorder %v1973_v39, %v1972_v6  ;;  %v1975_v61 = vmax.f32 %v1972_v6, %v1973_v39 }
 0x1f4   :  { %v1957_v45 = vsel %vm1955_vm1, 5, %v1953_v0  ;;  %v1976_v23 = vsel %vm1974_vm2, 1, %v4835_v17  ;;  %v1985_v36 = vadd.f32 %v4241_v15, %v5128_v60  ;;  %v1935_v63 = vadd.f32 %v1934_v56, %v1931_v26  ;;  %v5132_v60 = vld [vmem:[#allocation51_spill] sm:$0xff] }
 0x1f5   :  { %vm1959_vm6 = vcmp.gt.f32.partialorder %v1958_v55, %v1956_v50  ;;  %v1960_v51 = vmax.f32 %v1956_v50, %v1958_v55  ;;  %vm1978_vm7 = vcmp.gt.f32.partialorder %v1977_v3, %v1975_v61  ;;  %v1979_v11 = vmax.f32 %v1975_v61, %v1977_v3  ;;  %v5131_v61 = vld [vmem:[#allocation35_spill] sm:$0xff] }
 0x1f6   :  { %v1961_v49 = vsel %vm1959_vm6, 6, %v1957_v45  ;;  %v1980_v47 = vsel %vm1978_vm7, 2, %v1976_v23  ;;  %v1989_v5 = vadd.f32 %v4283_v58, %v5129_v18  ;;  %v1993_v0 = vadd.f32 %v4305_v32, %v5082_v38  ;;  %v5133_v18 = vld [vmem:[#allocation59_spill] sm:$0xff] }
 0x1f7   :  { %vm1963_vm8 = vcmp.gt.f32.partialorder %v1962_v22, %v1960_v51  ;;  %v1964_v6 = vmax.f32 %v1960_v51, %v1962_v22  ;;  %vm1982_vm12 = vcmp.gt.f32.partialorder %v1981_v62, %v1979_v11  ;;  %v1983_v35 = vmax.f32 %v1979_v11, %v1981_v62 }
 0x1f8   :  { %v1965_v44 = vsel %vm1963_vm8, 7, %v1961_v49  ;;  %v1984_v39 = vsel %vm1982_vm12, 3, %v1980_v47  ;;  %v2007_v55 = vadd.f32 %v4158_v43, %v5130_v59  ;;  %v4367_v50 = vsel %vm1903_vm4, %v1935_v63, %v4175_v20  ;;  %v2002_v47 = vld [vmem:[#allocation7 + $0x1d0] sm:$0xff]  ;;  %v5135_v59 = vld [vmem:[#allocation28_spill] sm:$0xff] }
 0x1f9   :  { %v1968_v3 = vadd.f32 %v1967_v42, %v1964_v6  ;;  %v1969_v26 = vshll.u32 %v1965_v44, 3  ;;  %vm1986_vm13 = vcmp.gt.f32.partialorder %v1985_v36, %v1983_v35  ;;  %v1987_v56 = vmax.f32 %v1983_v35, %v1985_v36  ;;  %v5134_v35 = vld [vmem:[#allocation83_spill] sm:$0xff] }
 0x1fa   :  { %v1988_v22 = vsel %vm1986_vm13, 4, %v1984_v39  ;;  %v2008_v62 = vadd.f32 %v4179_v27, %v5131_v61  ;;  %v2012_v45 = vadd.f32 %v4209_v54, %v5081_v8  ;;  %v1997_v23 = vadd.f32 %v4321_v29, %v5028_v24 }
 0x1fb   :  { %vm1990_vm15 = vcmp.gt.f32.partialorder %v1989_v5, %v1987_v56  ;;  %v1991_v38 = vmax.f32 %v1987_v56, %v1989_v5  ;;  %v2016_v36 = vadd.f32 %v4230_v16, %v5132_v60  ;;  %v1970_v51 = vor.u32 %v1969_v26, %v1932_v53  ;;  %v5136_v56 = vld [vmem:[#allocation36_spill] sm:$0xff] }
 0x1fc   :  { %v1992_v11 = vsel %vm1990_vm15, 5, %v1988_v22  ;;  %vm2009_vm0 = vcmp.gt.f32.partialorder %v2008_v62, %v2007_v55  ;;  %v2010_v20 = vmax.f32 %v2007_v55, %v2008_v62  ;;  %v4380_v63 = vsel %vm1903_vm4, %v1968_v3, %v4207_v46  ;;  %v5137_v62 = vld [vmem:[#allocation71_spill] sm:$0xff] }
 0x1fd   :  { %vm1994_vm1 = vcmp.gt.f32.partialorder %v1993_v0, %v1991_v38  ;;  %v1995_v49 = vmax.f32 %v1991_v38, %v1993_v0  ;;  %v2011_v8 = vsel %vm2009_vm0, 1, %v4835_v17  ;;  %v2020_v5 = vadd.f32 %v4241_v15, %v5133_v18  ;;  %v5138_v38 = vld [vmem:[#allocation44_spill] sm:$0xff]  ;;  %v5141_v18 = vld [vmem:[#allocation97_spill] sm:$0xff] }
 0x1fe   :  { %v1996_v42 = vsel %vm1994_vm1, 6, %v1992_v11  ;;  %vm2013_vm2 = vcmp.gt.f32.partialorder %v2012_v45, %v2010_v20  ;;  %v2014_v24 = vmax.f32 %v2010_v20, %v2012_v45  ;;  %v2024_v44 = vadd.f32 %v4283_v58, %v5134_v35  ;;  %v5139_v11 = vld [vmem:[#allocation90_spill] sm:$0xff]  ;;  %v5140_v20 = vld [vmem:[#allocation52_spill] sm:$0xff] }
 0x1ff   :  { %vm1998_vm6 = vcmp.gt.f32.partialorder %v1997_v23, %v1995_v49  ;;  %v1999_v53 = vmax.f32 %v1995_v49, %v1997_v23  ;;  %v2015_v6 = vsel %vm2013_vm2, 2, %v2011_v8  ;;  %v2042_v0 = vadd.f32 %v4158_v43, %v5135_v59 }
 0x200   :  { %v2000_v39 = vsel %vm1998_vm6, 7, %v1996_v42  ;;  %vm2017_vm7 = vcmp.gt.f32.partialorder %v2016_v36, %v2014_v24  ;;  %v2018_v46 = vmax.f32 %v2014_v24, %v2016_v36  ;;  %v2043_v22 = vadd.f32 %v4179_v27, %v5136_v56  ;;  %v5144_v56 = vld [vmem:[#allocation29_spill] sm:$0xff] }
 0x201   :  { %v2003_v55 = vadd.f32 %v2002_v47, %v1999_v53  ;;  %v2004_v3 = vshll.u32 %v2000_v39, 6  ;;  %v2019_v26 = vsel %vm2017_vm7, 3, %v2015_v6  ;;  %v2028_v45 = vadd.f32 %v4305_v32, %v5137_v62  ;;  %v5142_v6 = vld [vmem:[#allocation60_spill] sm:$0xff] }
 0x202   :  { %vm2021_vm8 = vcmp.gt.f32.partialorder %v2020_v5, %v2018_v46  ;;  %v2022_v61 = vmax.f32 %v2018_v46, %v2020_v5  ;;  %v2047_v23 = vadd.f32 %v4209_v54, %v5138_v38  ;;  %v2032_v36 = vadd.f32 %v4321_v29, %v5139_v11  ;;  %v5145_v38 = vld [vmem:[#allocation37_spill] sm:$0xff] }
 0x203   :  { %v2023_v60 = vsel %vm2021_vm8, 4, %v2019_v26  ;;  %vm2044_vm12 = vcmp.gt.f32.partialorder %v2043_v22, %v2042_v0  ;;  %v2051_v49 = vadd.f32 %v4230_v16, %v5140_v20  ;;  %v2045_v42 = vmax.f32 %v2042_v0, %v2043_v22  ;;  %v5147_v20 = vld [vmem:[#allocation74_spill] sm:$0xff] }
 0x204   :  { %vm2025_vm13 = vcmp.gt.f32.partialorder %v2024_v44, %v2022_v61  ;;  %v2026_v8 = vmax.f32 %v2022_v61, %v2024_v44  ;;  %v2046_v47 = vsel %vm2044_vm12, 1, %v4835_v17  ;;  %v2005_v24 = vor.u32 %v2004_v3, %v1970_v51  ;;  %v5143_v44 = vld [vmem:[#allocation84_spill] sm:$0xff]  ;;  %v2037_v61 = vld [vmem:[#allocation7 + $0x1d8] sm:$0xff] }
 0x205   :  { %v4403_v5 = vsel %vm1903_vm4, %v2003_v55, %v5141_v18  ;;  %v2027_v53 = vsel %vm2025_vm13, 5, %v2023_v60  ;;  %v2055_v35 = vadd.f32 %v4241_v15, %v5142_v6  ;;  %vm2048_vm0 = vcmp.gt.f32.partialorder %v2047_v23, %v2045_v42  ;;  %v5146_v60 = vld [vmem:[#allocation45_spill] sm:$0xff] }
 0x206   :  { %vm2029_vm15 = vcmp.gt.f32.partialorder %v2028_v45, %v2026_v8  ;;  %v2030_v39 = vmax.f32 %v2026_v8, %v2028_v45  ;;  %v2049_v46 = vmax.f32 %v2045_v42, %v2047_v23  ;;  %v2050_v26 = vsel %vm2048_vm0, 2, %v2046_v47  ;;  %v5148_v42 = vld [vmem:[#allocation93_spill] sm:$0xff] }
 0x207   :  { %v2031_v59 = vsel %vm2029_vm15, 6, %v2027_v53  ;;  %v2059_v0 = vadd.f32 %v4283_v58, %v5143_v44  ;;  %v2077_v51 = vadd.f32 %v4158_v43, %v5144_v56  ;;  %v2078_v45 = vadd.f32 %v4179_v27, %v5145_v38  ;;  %v5149_v18 = vld [vmem:[#allocation53_spill] sm:$0xff] }
 0x208   :  { %vm2033_vm1 = vcmp.gt.f32.partialorder %v2032_v36, %v2030_v39  ;;  %v2034_v3 = vmax.f32 %v2030_v39, %v2032_v36  ;;  %vm2052_vm2 = vcmp.gt.f32.partialorder %v2051_v49, %v2049_v46  ;;  %v2053_v55 = vmax.f32 %v2049_v46, %v2051_v49 }
 0x209   :  { %v2035_v22 = vsel %vm2033_vm1, 7, %v2031_v59  ;;  %v2054_v62 = vsel %vm2052_vm2, 3, %v2050_v26  ;;  %v2082_v23 = vadd.f32 %v4209_v54, %v5146_v60  ;;  %v2063_v8 = vadd.f32 %v4305_v32, %v5147_v20 }
 0x20a   :  { %vm2056_vm6 = vcmp.gt.f32.partialorder %v2055_v35, %v2053_v55  ;;  %v2057_v11 = vmax.f32 %v2053_v55, %v2055_v35  ;;  %v2067_v47 = vadd.f32 %v4321_v29, %v5148_v42  ;;  %vm2079_vm7 = vcmp.gt.f32.partialorder %v2078_v45, %v2077_v51  ;;  %v5150_v55 = vld [vmem:[#allocation61_spill] sm:$0xff] }
 0x20b   :  { %v2058_v36 = vsel %vm2056_vm6, 4, %v2054_v62  ;;  %v2080_v49 = vmax.f32 %v2077_v51, %v2078_v45  ;;  %v2086_v53 = vadd.f32 %v4230_v16, %v5149_v18  ;;  %v2038_v6 = vadd.f32 %v2037_v61, %v2034_v3  ;;  %v5151_v45 = vld [vmem:[#allocation85_spill] sm:$0xff]  ;;  %v5153_v18 = vld [vmem:[#allocation30_spill] sm:$0xff] }
 0x20c   :  { %v2039_v39 = vshll.u32 %v2035_v22, 9  ;;  %vm2060_vm8 = vcmp.gt.f32.partialorder %v2059_v0, %v2057_v11  ;;  %v2061_v46 = vmax.f32 %v2057_v11, %v2059_v0  ;;  %v2081_v26 = vsel %vm2079_vm7, 1, %v4835_v17  ;;  %v2072_v11 = vld [vmem:[#allocation7 + $0x1e0] sm:$0xff] }
 0x20d   :  { %v2062_v59 = vsel %vm2060_vm8, 5, %v2058_v36  ;;  %vm2083_vm12 = vcmp.gt.f32.partialorder %v2082_v23, %v2080_v49  ;;  %v2084_v35 = vmax.f32 %v2080_v49, %v2082_v23  ;;  %v2090_v62 = vadd.f32 %v4241_v15, %v5150_v55  ;;  %v5152_v36 = vld [vmem:[#allocation94_spill] sm:$0xff] }
 0x20e   :  { %vm2064_vm13 = vcmp.gt.f32.partialorder %v2063_v8, %v2061_v46  ;;  %v2065_v44 = vmax.f32 %v2061_v46, %v2063_v8  ;;  %v2085_v56 = vsel %vm2083_vm12, 2, %v2081_v26  ;;  %v2094_v3 = vadd.f32 %v4283_v58, %v5151_v45  ;;  %v5155_v46 = vld [vmem:[#allocation46_spill] sm:$0xff] }
 0x20f   :  { %v2066_v38 = vsel %vm2064_vm13, 6, %v2062_v59  ;;  %vm2087_vm15 = vcmp.gt.f32.partialorder %v2086_v53, %v2084_v35  ;;  %v2088_v51 = vmax.f32 %v2084_v35, %v2086_v53  ;;  %v2040_v22 = vor.u32 %v2039_v39, %v2005_v24  ;;  %v5154_v39 = vld [vmem:[#allocation38_spill] sm:$0xff] }
 0x210   :  { %vm2068_vm0 = vcmp.gt.f32.partialorder %v2067_v47, %v2065_v44  ;;  %v2069_v0 = vmax.f32 %v2065_v44, %v2067_v47  ;;  %v2089_v61 = vsel %vm2087_vm15, 3, %v2085_v56  ;;  %v2098_v20 = vadd.f32 %v4305_v32, %v5109_v34  ;;  %v5156_v44 = vld [vmem:[#allocation54_spill] sm:$0xff] }
 0x211   :  { %v2070_v60 = vsel %vm2068_vm0, 7, %v2066_v38  ;;  %vm2091_vm1 = vcmp.gt.f32.partialorder %v2090_v62, %v2088_v51  ;;  %v2092_v23 = vmax.f32 %v2088_v51, %v2090_v62  ;;  %v2102_v49 = vadd.f32 %v4321_v29, %v5152_v36  ;;  %v5158_v36 = vld [vmem:[#allocation31_spill] sm:$0xff] }
 0x212   :  { %v2074_v8 = vshll.u32 %v2070_v60, 12  ;;  %v2093_v42 = vsel %vm2091_vm1, 4, %v2089_v61  ;;  %v2112_v53 = vadd.f32 %v4158_v43, %v5153_v18  ;;  %v2113_v47 = vadd.f32 %v4179_v27, %v5154_v39  ;;  %v2107_v60 = vld [vmem:[#allocation7 + $0x1e8] sm:$0xff] }
 0x213   :  { %vm2095_vm2 = vcmp.gt.f32.partialorder %v2094_v3, %v2092_v23  ;;  %v2096_v24 = vmax.f32 %v2092_v23, %v2094_v3  ;;  %v2117_v59 = vadd.f32 %v4209_v54, %v5155_v46  ;;  %v4439_v34 = vsel %vm1903_vm4, %v2038_v6, %v4262_v2  ;;  %v5157_v23 = vld [vmem:[#allocation86_spill] sm:$0xff] }
 0x214   :  { %v2073_v26 = vadd.f32 %v2072_v11, %v2069_v0  ;;  %v2097_v35 = vsel %vm2095_vm2, 5, %v2093_v42  ;;  %v2121_v56 = vadd.f32 %v4230_v16, %v5156_v44  ;;  %vm2114_vm7 = vcmp.gt.f32.partialorder %v2113_v47, %v2112_v53 }
 0x215   :  { %vm2099_vm6 = vcmp.gt.f32.partialorder %v2098_v20, %v2096_v24  ;;  %v2100_v55 = vmax.f32 %v2096_v24, %v2098_v20  ;;  %v2115_v62 = vmax.f32 %v2112_v53, %v2113_v47  ;;  %v2075_v38 = vor.u32 %v2074_v8, %v2040_v22 }
 0x216   :  { %v2101_v51 = vsel %vm2099_vm6, 6, %v2097_v35  ;;  %v2116_v45 = vsel %vm2114_vm7, 1, %v4835_v17  ;;  %v2125_v3 = vadd.f32 %v4241_v15, %v5110_v13  ;;  %v4449_v6 = vsel %vm1903_vm4, %v2073_v26, %v4272_v41 }
 0x217   :  { %vm2103_vm8 = vcmp.gt.f32.partialorder %v2102_v49, %v2100_v55  ;;  %v2104_v61 = vmax.f32 %v2100_v55, %v2102_v49  ;;  %vm2118_vm12 = vcmp.gt.f32.partialorder %v2117_v59, %v2115_v62  ;;  %v2119_v2 = vmax.f32 %v2115_v62, %v2117_v59  ;;  %v2142_v62 = vld [vmem:[#allocation7 + $0x1f0] sm:$0xff] }
 0x218   :  { %v2105_v0 = vsel %vm2103_vm8, 7, %v2101_v51  ;;  %v2120_v11 = vsel %vm2118_vm12, 2, %v2116_v45  ;;  %v2129_v22 = vadd.f32 %v4283_v58, %v5157_v23  ;;  %v2133_v13 = vadd.f32 %v4305_v32, %v5115_v4 }
 0x219   :  { %v2109_v20 = vshll.u32 %v2105_v0, 15  ;;  %vm2122_vm13 = vcmp.gt.f32.partialorder %v2121_v56, %v2119_v2  ;;  %v2123_v8 = vmax.f32 %v2119_v2, %v2121_v56  ;;  %v2147_v49 = vadd.f32 %v4158_v43, %v5158_v36  ;;  %v5160_v0 = vld [vmem:[#allocation73_spill] sm:$0xff] }
 0x21a   :  { %v2124_v42 = vsel %vm2122_vm13, 3, %v2120_v11  ;;  %v2148_v41 = vadd.f32 %v4179_v27, %v5113_v33  ;;  %v2152_v18 = vadd.f32 %v4209_v54, %v5114_v14  ;;  %v2108_v53 = vadd.f32 %v2107_v60, %v2104_v61 }
 0x21b   :  { %vm2126_vm15 = vcmp.gt.f32.partialorder %v2125_v3, %v2123_v8  ;;  %v2127_v24 = vmax.f32 %v2123_v8, %v2125_v3  ;;  %v2137_v39 = vadd.f32 %v4321_v29, %v4896_v12  ;;  %v2156_v4 = vadd.f32 %v4230_v16, %v5116_v10 }
 0x21c   :  { %v2128_v47 = vsel %vm2126_vm15, 4, %v2124_v42  ;;  %vm2149_vm0 = vcmp.gt.f32.partialorder %v2148_v41, %v2147_v49  ;;  %v2150_v46 = vmax.f32 %v2147_v49, %v2148_v41  ;;  %v2110_v59 = vor.u32 %v2109_v20, %v2075_v38  ;;  %v2177_v49 = vld [vmem:[#allocation7 + $0x1f8] sm:$0xff] }
 0x21d   :  { %vm2130_vm1 = vcmp.gt.f32.partialorder %v2129_v22, %v2127_v24  ;;  %v2131_v43 = vmax.f32 %v2127_v24, %v2129_v22  ;;  %v2151_v27 = vsel %vm2149_vm0, 1, %v4835_v17  ;;  %v2160_v35 = vadd.f32 %v4241_v15, %v4898_v31 }
 0x21e   :  { %v2132_v26 = vsel %vm2130_vm1, 5, %v2128_v47  ;;  %vm2153_vm2 = vcmp.gt.f32.partialorder %v2152_v18, %v2150_v46  ;;  %v2154_v54 = vmax.f32 %v2150_v46, %v2152_v18  ;;  %v2164_v56 = vadd.f32 %v4283_v58, %v5050_v9  ;;  %v5159_v58 = vld [vmem:[#allocation95_spill] sm:$0xff]  ;;  %v5161_v18 = vld [vmem:[#allocation104_spill] sm:$0xff] }
 0x21f   :  { %vm2134_vm6 = vcmp.gt.f32.partialorder %v2133_v13, %v2131_v43  ;;  %v2135_v44 = vmax.f32 %v2131_v43, %v2133_v13  ;;  %v2155_v12 = vsel %vm2153_vm2, 2, %v2151_v27  ;;  %v2168_v38 = vadd.f32 %v4305_v32, %v4899_v25 }
 0x220   :  { %v2136_v55 = vsel %vm2134_vm6, 6, %v2132_v26  ;;  %vm2157_vm7 = vcmp.gt.f32.partialorder %v2156_v4, %v2154_v54  ;;  %v2158_v16 = vmax.f32 %v2154_v54, %v2156_v4  ;;  %v2185_v3 = vadd.f32 %v4367_v50, %v5158_v36  ;;  %v5162_v4 = vld [vmem:[#allocation72_spill] sm:$0xff] }
 0x221   :  { %vm2138_vm8 = vcmp.gt.f32.partialorder %v2137_v39, %v2135_v44  ;;  %v2139_v51 = vmax.f32 %v2135_v44, %v2137_v39  ;;  %v2159_v45 = vsel %vm2157_vm7, 3, %v2155_v12  ;;  %v2186_v2 = vadd.f32 %v4380_v63, %v5113_v33  ;;  %v4517_v44 = vld [vmem:[#allocation3] sm:$0xff]  ;;  %v5167_v12 = vld [vmem:[#allocation91_spill] sm:$0xff] }
 0x222   :  { %v2140_v15 = vsel %vm2138_vm8, 7, %v2136_v55  ;;  %vm2161_vm12 = vcmp.gt.f32.partialorder %v2160_v35, %v2158_v16  ;;  %v2162_v61 = vmax.f32 %v2158_v16, %v2160_v35  ;;  %vm1599_vm13 = vcmp.gt.f32.partialorder %v5160_v0, %v5159_v58 }
 0x223   :  { %v2143_v60 = vadd.f32 %v2142_v62, %v2139_v51  ;;  %v2163_v11 = vsel %vm2161_vm12, 4, %v2159_v45  ;;  %v2172_v32 = vadd.f32 %v4321_v29, %v4938_v40  ;;  %v2190_v23 = vadd.f32 %v4403_v5, %v5114_v14  ;;  %v5170_v62 = vld [vmem:[#allocation98_spill] sm:$0xff]  ;;  %v5171_v51 = vld [vmem:[#allocation56_spill] sm:$0xff] }
 0x224   :  { %vm2165_vm15 = vcmp.gt.f32.partialorder %v2164_v56, %v2162_v61  ;;  %v2166_v22 = vmax.f32 %v2162_v61, %v2164_v56  ;;  %vm2187_vm0 = vcmp.gt.f32.partialorder %v2186_v2, %v2185_v3  ;;  %v2188_v50 = vmax.f32 %v2185_v3, %v2186_v2  ;;  %v5172_v61 = vld [vmem:[#allocation101_spill] sm:$0xff] }
 0x225   :  { %v2111_v20 = vsel %vm1903_vm4, %v2108_v53, %v4303_v1  ;;  %v2144_v33 = vshll.u32 %v2140_v15, 18  ;;  %v2167_v63 = vsel %vm2165_vm15, 5, %v2163_v11  ;;  %v2189_v8 = vsel %vm2187_vm0, 1, %v4835_v17  ;;  %v5173_v2 = vld [vmem:[#allocation77_spill] sm:$0xff] }
 0x226   :  { %vm2169_vm1 = vcmp.gt.f32.partialorder %v2168_v38, %v2166_v22  ;;  %v2170_v13 = vmax.f32 %v2166_v22, %v2168_v38  ;;  %vm2191_vm2 = vcmp.gt.f32.partialorder %v2190_v23, %v2188_v50  ;;  %v2192_v42 = vmax.f32 %v2188_v50, %v2190_v23 }
 0x227   :  { %v2171_v36 = vsel %vm2169_vm1, 6, %v2167_v63  ;;  %v2193_v41 = vsel %vm2191_vm2, 2, %v2189_v8  ;;  %v2194_v14 = vadd.f32 %v4439_v34, %v5116_v10  ;;  %v2198_v5 = vadd.f32 %v4449_v6, %v4898_v31 }
 0x228   :  { %v1898_v1 = vsel %vm1620_vm9, %v4321_v29, %v5161_v18  ;;  %v2146_v17 = vsel %vm1903_vm4, %v2143_v60, %v4330_v48  ;;  %vm2173_vm6 = vcmp.gt.f32.partialorder %v2172_v32, %v2170_v13  ;;  %v2174_v53 = vmax.f32 %v2170_v13, %v2172_v32  ;;  %v5163_v48 = vld [vmem:[#allocation92_spill] sm:$0xff] }
 0x229   :  { %v2175_v24 = vsel %vm2173_vm6, 7, %v2171_v36  ;;  %vm2195_vm7 = vcmp.gt.f32.partialorder %v2194_v14, %v2192_v42  ;;  %v2196_v39 = vmax.f32 %v2192_v42, %v2194_v14  ;;  %v2202_v47 = vadd.f32 %v2111_v20, %v5050_v9 }
 0x22a   :  { %v2145_v10 = vor.u32 %v2144_v33, %v2110_v59  ;;  %v2178_v34 = vadd.f32 %v2177_v49, %v2174_v53  ;;  %v2179_v46 = vshll.u32 %v2175_v24, 21  ;;  %v2197_v31 = vsel %vm2195_vm7, 3, %v2193_v41  ;;  %v5174_v53 = vld [vmem:[#allocation40_spill] sm:$0xff] }
 0x22b   :  { %vm1890_vm8 = vcmp.gt.f32.partialorder %v4287_v7, %v4294_v19  ;;  %vm2199_vm12 = vcmp.gt.f32.partialorder %v2198_v5, %v2196_v39  ;;  %v2200_v29 = vmax.f32 %v2196_v39, %v2198_v5  ;;  %v2206_v6 = vadd.f32 %v2146_v17, %v4899_v25  ;;  %v5164_v19 = vld [vmem:[#allocation103_spill] sm:$0xff] }
 0x22c   :  { %vm1572_vm15 = vcmp.gt.f32.partialorder %v5163_v48, %v5162_v4  ;;  %v1827_v43 = vor.u32 %v1826_v21, %v4266_v28  ;;  %v2181_v9 = vsel %vm1903_vm4, %v2178_v34, %v1898_v1  ;;  %v2201_v59 = vsel %vm2199_vm12, 4, %v2197_v31  ;;  %v5165_v28 = vld [vmem:[#allocation96_spill] sm:$0xff] }
 0x22d   :  { %v1861_v27 = vshll.u32 %v4311_v52, 18  ;;  %vm2203_vm0 = vcmp.gt.f32.partialorder %v2202_v47, %v2200_v29  ;;  %v2204_v26 = vmax.f32 %v2200_v29, %v2202_v47  ;;  %v2210_v7 = vadd.f32 %v2181_v9, %v4938_v40  ;;  %v5166_v21 = vld [vmem:[#allocation76_spill] sm:$0xff]  ;;  %v5168_v40 = vld [vmem:[#allocation69_spill] sm:$0xff] }
 0x22e   :  { %v1601_v25 = vsel %vm1599_vm13, 5, %v5164_v19  ;;  %v1892_v54 = vsel %vm1890_vm8, 7, %v4336_v37  ;;  %v2180_v35 = vor.u32 %v2179_v46, %v2145_v10  ;;  %v2205_v30 = vsel %vm2203_vm0, 5, %v2201_v59  ;;  %v5175_v46 = vld [vmem:[#allocation24_spill] sm:$0xff] }
 0x22f   :  { %vm1603_vm1 = vcmp.gt.f32.partialorder %v5166_v21, %v5165_v28  ;;  %vm1902_vm4 = vcmp.gt.s32.totalorder %v4517_v44, 7  ;;  %vm2207_vm2 = vcmp.gt.f32.partialorder %v2206_v6, %v2204_v26  ;;  %v2208_v52 = vmax.f32 %v2204_v26, %v2206_v6  ;;  %v5177_v19 = vld [vmem:[#allocation100_spill] sm:$0xff] }
 0x230   :  { %v5169_v56 = vshll.u32 %v5168_v40, 12  ;;  %v1543_v16 = vshll.u32 %v5170_v62, 15  ;;  %v2209_v38 = vsel %vm2207_vm2, 6, %v2205_v30  ;;  %v1574_v37 = vsel %vm1572_vm15, 7, %v5171_v51 }
 0x231   :  { %v1862_v45 = vor.u32 %v1861_v27, %v1827_v43  ;;  %v1896_v3 = vshll.u32 %v1892_v54, 21  ;;  %vm2211_vm13 = vcmp.gt.f32.partialorder %v2210_v7, %v2208_v52  ;;  %v1605_v15 = vsel %vm1603_vm1, 6, %v1601_v25  ;;  %v5176_v43 = vld [vmem:[#allocation79_spill] sm:$0xff] }
 0x232   :  { %v1509_v55 = vor.u32 %v5169_v56, %v5167_v12  ;;  %vm1607_vm6 = vcmp.gt.f32.partialorder %v5173_v2, %v5172_v61  ;;  %v2182_v58 = vsel %vm1902_vm4, %v2180_v35, 0  ;;  %v2212_v0 = vsel %vm2211_vm13, 7, %v2209_v38 }
 0x233   :  { %2214 = vst [vmem:[#allocation10 + $0x38] sm:$0xff] %v2212_v0  ;;  %v2216_v60 = vmul.u32 3, %v2212_v0  ;;  %v1578_v32 = vshll.u32 %v1574_v37, 18  ;;  %v1609_v23 = vsel %vm1607_vm6, 7, %v1605_v15  ;;  %v1897_v22 = vor.u32 %v1896_v3, %v1862_v45 }
 0x234   :  { %v1544_v11 = vor.u32 %v1543_v16, %v1509_v55  ;;  %vm1619_vm7 = vcmp.gt.s32.totalorder %v4517_v44, 6  ;;  %v1613_v63 = vshll.u32 %v1609_v23, 21  ;;  %vm1336_vm8 = vcmp.gt.s32.totalorder %v4517_v44, 5 }
 0x235   :  { %v2217_v50 = vshrl.u32 %v2182_v58, %v2216_v60  ;;  %v1899_v8 = vsel %vm1619_vm7, %v1897_v22, 0  ;;  %vm1053_vm12 = vcmp.gt.s32.totalorder %v4517_v44, 4 }
 0x236   :  { %v1579_v33 = vor.u32 %v1578_v32, %v1544_v11  ;;  %v1333_v24 = vsel %vm1053_vm12, %v5174_v53, 0 }
 0x237   :  { %v2218_v20 = vand.u32 7, %v2217_v50 }
 0x238   :  { %v1614_v36 = vor.u32 %v1613_v63, %v1579_v33 }
 0x239   :  { %v2219_v13 = vsel %vm1620_vm9, %v2212_v0, %v2218_v20  ;;  %vm770_vm9 = vcmp.gt.s32.totalorder %v4517_v44, 3 }
 0x23a   :  { %2221 = vst [vmem:[#allocation10 + $0x30] sm:$0xff] %v2219_v13  ;;  %v2223_v42 = vmul.u32 3, %v2219_v13  ;;  %v1616_v14 = vsel %vm1336_vm8, %v1614_v36, 0  ;;  %v1050_v31 = vsel %vm770_vm9, %v5175_v46, 0 }
 0x23c   :  { %v2224_v49 = vshrl.u32 %v1899_v8, %v2223_v42 }
 0x23e   :  { %v2225_v41 = vand.u32 7, %v2224_v49 }
 0x240   :  { %v2226_v5 = vsel %vm1337_vm3, %v2212_v0, %v2225_v41  ;;  %vm487_vm3 = vcmp.gt.s32.totalorder %v4517_v44, 2 }
 0x241   :  { %2228 = vst [vmem:[#allocation10 + $0x28] sm:$0xff] %v2226_v5  ;;  %v2230_v18 = vmul.u32 3, %v2226_v5  ;;  %v767_v9 = vsel %vm487_vm3, %v5176_v43, 0 }
 0x243   :  { %v2231_v1 = vshrl.u32 %v1616_v14, %v2230_v18 }
 0x245   :  { %v2232_v17 = vand.u32 7, %v2231_v1 }
 0x247   :  { %v2233_v39 = vsel %vm1054_vm5, %v2212_v0, %v2232_v17  ;;  %vm149_vm5 = vcmp.gt.s32.totalorder %v4517_v44, 1 }
 0x248   :  { %2235 = vst [vmem:[#allocation10 + $0x20] sm:$0xff] %v2233_v39  ;;  %v2237_v47 = vmul.u32 3, %v2233_v39  ;;  %v485_v25 = vsel %vm149_vm5, %v5177_v19, 0 }
 0x24a   :  { %v2238_v10 = vshrl.u32 %v1333_v24, %v2237_v47 }
 0x24c   :  { %v2239_v34 = vand.u32 7, %v2238_v10 }
 0x24e   :  { %v2240_v29 = vsel %vm771_vm11, %v2212_v0, %v2239_v34  ;;  %vm2261_vm11 = vcmp.eq.s32.totalorder %v4854_v57, 0 }
 0x24f   :  { %2242 = vst [vmem:[#allocation10 + $0x18] sm:$0xff] %v2240_v29  ;;  %v2244_v6 = vmul.u32 3, %v2240_v29 }
 0x251   :  { %v2245_v4 = vshrl.u32 %v1050_v31, %v2244_v6 }
 0x253   :  { %v2246_v48 = vand.u32 7, %v2245_v4 }
 0x255   :  { %v2247_v59 = vsel %vm488_vm10, %v2212_v0, %v2246_v48 }
 0x256   :  { %2249 = vst [vmem:[#allocation10 + $0x10] sm:$0xff] %v2247_v59  ;;  %v2251_v27 = vmul.u32 3, %v2247_v59 }
 0x258   :  { %v2252_v26 = vshrl.u32 %v767_v9, %v2251_v27 }
 0x25a   :  { %v2253_v7 = vand.u32 7, %v2252_v26 }
 0x25c   :  { %v2254_v54 = vsel %vm150_vm14, %v2212_v0, %v2253_v7 }
 0x25d   :  { %2256 = vst [vmem:[#allocation10 + $0x8] sm:$0xff] %v2254_v54  ;;  %v2258_v35 = vmul.u32 3, %v2254_v54 }
 0x25f   :  { %v2259_v30 = vshrl.u32 %v485_v25, %v2258_v35 }
 0x261   :  { %v2260_v28 = vand.u32 7, %v2259_v30 }
 0x263   :  { %v2262_v21 = vsel %vm2261_vm11, %v2212_v0, %v2260_v28 }
 0x264   :  { %2263 = vst [vmem:[#allocation10] sm:$0xff] %v2262_v21 }
 0x265   :  { %2420 = shalt.err (!%p2417_p9)
}
 0x266   :  { %s5178_s25 = sld [smem:[#allocation105_spill]] }
 0x26c   :  { %s2421_s26 = scalar_lea.hbm %s5178_s25, 1024 }
 0x26d   :  { %p2422_p10 = scmp.ne.s32.totalorder %s5178_s25, %s2421_s26  ;;  %p2425_p11 = scmp.lt.u32.totalorder %s2421_s26, %s5178_s25 }
 0x26f   :  { %p2427_p12 = pnand %p2425_p11, %p2422_p10 }
 0x271   :  { %2430 = shalt.err (!%p2427_p12)
}
 0x272   :  { %s5179_s4 = smov 8   ;;  %s5180_s5 = smov 128  }
 0x273   :  { %2275 = dma.vmem_to_hbm [thread:$0]  %s2270_s22, 1024, %s5178_s25, [#allocation5], %s5180_s5, %s5180_s5, %s5179_s4  }
 0x274   :  { %2437 = dma.done.wait [#allocation5], 1024  }
 0x275   :  { %2438 = vsyncadd [#allocation5], 4294966272 }
 0x276   :  { %2279 = vsyncpa [#allocation4], 1 }
 0x277   :  { %2280 = vsyncpa [#allocation8], 1 }
 0x278   :  { %2281 = vsyncpa [#allocation5], 1 }
 0x279   :  { %2282 = vsyncpa [#allocation6], 1 }

</bundles_post_ra>
